<compile_context>
chip_gen: v6e
topology: v6e:2x2x1
jax: 0.10.0
libtpu: 0.0.40
codegen_flags: <defaults>
</compile_context>

<pallas_src>
import jax
import jax.numpy as jnp
from jax.experimental import pallas as pl
from jax.experimental.pallas import tpu as pltpu

BN_EPS = 1e-5                         # PyTorch BatchNorm2d default
LANE = 128                            # TPU lane width
VMEM_LIMIT = 32 * 1024 * 1024         # explicit scoped-VMEM budget (safe on v5e/v6e/v7x)
TILE_BYTES_BUDGET = 4 * 1024 * 1024   # target bytes per patch-tile buffer


def _round_up(x, m):
    return (x + m - 1) // m * m


def _pick_tile_m(M, K, itemsize):
    """Largest row tile that divides M, is a multiple of 8, and fits the byte budget."""
    cap = max(8, TILE_BYTES_BUDGET // max(K * itemsize, 1))
    for t in (1024, 512, 256, 128, 64, 32, 16, 8):
        if t <= cap and M % t == 0:
            return t
    return M                          # tiny / odd M: single full block (allowed)


# ----------------------------- Pallas kernels ------------------------------ #

def _gemm_stats_kernel(p_ref, w_ref, y_ref, stats_ref):
    # Pass 1: y = patches @ w (bf16 x bf16 -> f32 accumulate on the MXU), plus
    # per-channel sum / sum-of-squares accumulated across the grid (for BatchNorm).
    y = jnp.dot(p_ref[...], w_ref[...], preferred_element_type=jnp.float32)
    y_ref[...] = y

    @pl.when(pl.program_id(0) == 0)
    def _init():
        stats_ref[...] = jnp.zeros_like(stats_ref)

    s = jnp.sum(y, axis=0, keepdims=True)
    ss = jnp.sum(y * y, axis=0, keepdims=True)
    stats_ref[...] += jnp.concatenate([s, ss], axis=0)


def _bn_relu_kernel(y_ref, coef_ref, o_ref):
    # Pass 2: y * scale + shift -> ReLU -> bf16 (scale/shift pre-folded in wrapper).
    scale = coef_ref[0:1, :]
    shift = coef_ref[1:2, :]
    o_ref[...] = jnp.maximum(y_ref[...] * scale + shift, 0.0).astype(o_ref.dtype)


def _gemm_tanh_kernel(p_ref, w_ref, o_ref):
    y = jnp.dot(p_ref[...], w_ref[...], preferred_element_type=jnp.float32)
    o_ref[...] = jnp.tanh(y)


# --------------------------- pallas_call wrappers --------------------------- #

def _gemm_stats(patches, w2d):
    M, K = patches.shape
    Cp = w2d.shape[1]
    tm = _pick_tile_m(M, K, patches.dtype.itemsize)
    return pl.pallas_call(
        _gemm_stats_kernel,
        out_shape=(jax.ShapeDtypeStruct((M, Cp), jnp.float32),
                   jax.ShapeDtypeStruct((2, Cp), jnp.float32)),
        grid=(M // tm,),
        in_specs=[pl.BlockSpec((tm, K), lambda i: (i, 0)),
                  pl.BlockSpec((K, Cp), lambda i: (0, 0))],
        out_specs=(pl.BlockSpec((tm, Cp), lambda i: (i, 0)),
                   pl.BlockSpec((2, Cp), lambda i: (0, 0))),
        compiler_params=pltpu.CompilerParams(
            dimension_semantics=("arbitrary",),   # stats output is a revisited accumulator
            vmem_limit_bytes=VMEM_LIMIT),
    )(patches, w2d)


def _bn_relu_apply(y, coef):
    M, Cp = y.shape
    tm = _pick_tile_m(M, Cp, y.dtype.itemsize)
    return pl.pallas_call(
        _bn_relu_kernel,
        out_shape=jax.ShapeDtypeStruct((M, Cp), jnp.bfloat16),
        grid=(M // tm,),
        in_specs=[pl.BlockSpec((tm, Cp), lambda i: (i, 0)),
                  pl.BlockSpec((2, Cp), lambda i: (0, 0))],
        out_specs=pl.BlockSpec((tm, Cp), lambda i: (i, 0)),
        compiler_params=pltpu.CompilerParams(
            dimension_semantics=("parallel",),
            vmem_limit_bytes=VMEM_LIMIT),
    )(y, coef)


def _gemm_tanh(patches, w2d):
    M, K = patches.shape
    Cp = w2d.shape[1]
    tm = _pick_tile_m(M, K, patches.dtype.itemsize)
    return pl.pallas_call(
        _gemm_tanh_kernel,
        out_shape=jax.ShapeDtypeStruct((M, Cp), jnp.float32),
        grid=(M // tm,),
        in_specs=[pl.BlockSpec((tm, K), lambda i: (i, 0)),
                  pl.BlockSpec((K, Cp), lambda i: (0, 0))],
        out_specs=pl.BlockSpec((tm, Cp), lambda i: (i, 0)),
        compiler_params=pltpu.CompilerParams(
            dimension_semantics=("parallel",),
            vmem_limit_bytes=VMEM_LIMIT),
    )(patches, w2d)


# ------------------------------ JAX-side glue ------------------------------ #

def _im2col_nhwc(x, k, stride, padding):
    """x: (N, H, W, C) -> im2col patches (N*Ho*Wo, k*k*C) for the stride-1 conv
    that is equivalent to the transposed conv (zero-dilate + pad + flipped kernel)."""
    N, H, W, C = x.shape
    if stride > 1:
        Hd, Wd = H * stride - (stride - 1), W * stride - (stride - 1)
        xd = jnp.zeros((N, Hd, Wd, C), x.dtype).at[:, ::stride, ::stride, :].set(x)
    else:
        xd = x
    q = k - 1 - padding
    xp = jnp.pad(xd, ((0, 0), (q, q), (q, q), (0, 0)))
    Ho, Wo = xp.shape[1] - k + 1, xp.shape[2] - k + 1
    cols = [xp[:, kh:kh + Ho, kw:kw + Wo, :] for kh in range(k) for kw in range(k)]
    pat = jnp.stack(cols, axis=3)                       # (N, Ho, Wo, k*k, C)
    return pat.reshape(N * Ho * Wo, k * k * C), Ho, Wo


def _convt_weight_to_gemm(w, c_pad):
    """PyTorch ConvTranspose2d weight (Cin, Cout, k, k) -> bf16 GEMM matrix
    (k*k*Cin, Cout padded to lane width), rows ordered (kh, kw, ci) like the patches."""
    Cin, Cout, k, _ = w.shape
    wf = w[:, :, ::-1, ::-1]                            # spatial flip
    w2d = wf.transpose(2, 3, 0, 1).reshape(k * k * Cin, Cout)
    w2d = jnp.pad(w2d, ((0, 0), (0, c_pad - Cout)))     # lane-dense output columns
    return w2d.astype(jnp.bfloat16)


def convt_bn_relu_nhwc(x, w, gamma, beta, stride, padding):
    """ConvTranspose2d(no bias) + train-mode BatchNorm2d + ReLU.  NHWC in, NHWC bf16 out."""
    N = x.shape[0]
    Cout, k = w.shape[1], w.shape[2]
    Cp = _round_up(Cout, LANE)

    pat, Ho, Wo = _im2col_nhwc(x.astype(jnp.bfloat16), k, stride, padding)
    w2d = _convt_weight_to_gemm(w, Cp)

    y, stats = _gemm_stats(pat, w2d)                    # y: (M, Cp) f32, stats: (2, Cp) f32
    M = y.shape[0]
    mean = stats[0] / M
    var = jnp.maximum(stats[1] / M - mean * mean, 0.0)  # biased, like PyTorch train-mode BN
    gamma_p = jnp.pad(gamma.astype(jnp.float32), (0, Cp - Cout))
    beta_p = jnp.pad(beta.astype(jnp.float32), (0, Cp - Cout))
    scale = gamma_p * jax.lax.rsqrt(var + BN_EPS)
    shift = beta_p - mean * scale
    coef = jnp.stack([scale, shift], axis=0)            # (2, Cp)

    a = _bn_relu_apply(y, coef)                         # (M, Cp) bf16
    return a.reshape(N, Ho, Wo, Cp)[:, :, :, :Cout]     # drop channel padding, stay NHWC


def convt_tanh_nhwc(x, w, stride, padding):
    N = x.shape[0]
    Cout, k = w.shape[1], w.shape[2]
    Cp = _round_up(Cout, LANE)
    pat, Ho, Wo = _im2col_nhwc(x.astype(jnp.bfloat16), k, stride, padding)
    w2d = _convt_weight_to_gemm(w, Cp)
    y = _gemm_tanh(pat, w2d)                            # (M, Cp) f32
    return y.reshape(N, Ho, Wo, Cp)[:, :, :, :Cout]     # NHWC f32


# ----------------------------- Generator model ----------------------------- #

def init_generator_params(key, z_size, n_features, n_channel):
    dims = [(z_size, n_features * 8),
            (n_features * 8, n_features * 4),
            (n_features * 4, n_features * 2),
            (n_features * 2, n_features),
            (n_features, n_channel)]
    params = {}
    keys = jax.random.split(key, len(dims))
    for i, ((cin, cout), k) in enumerate(zip(dims, keys)):
        params[f"w{i}"] = 0.02 * jax.random.normal(k, (cin, cout, 4, 4), jnp.float32)
        if i < 4:
            params[f"gamma{i}"] = jnp.ones((cout,), jnp.float32)   # PyTorch BN defaults
            params[f"beta{i}"] = jnp.zeros((cout,), jnp.float32)
    return params


def generator_forward(params, z):
    # z: (N, z_size, 1, 1) NCHW, same as the PyTorch module input.
    x = z.transpose(0, 2, 3, 1)                                     # NCHW -> NHWC once
    x = convt_bn_relu_nhwc(x, params["w0"], params["gamma0"], params["beta0"], 1, 0)
    x = convt_bn_relu_nhwc(x, params["w1"], params["gamma1"], params["beta1"], 2, 1)
    x = convt_bn_relu_nhwc(x, params["w2"], params["gamma2"], params["beta2"], 2, 1)
    x = convt_bn_relu_nhwc(x, params["w3"], params["gamma3"], params["beta3"], 2, 1)
    x = convt_tanh_nhwc(x, params["w4"], 2, 1)
    return x.transpose(0, 3, 1, 2)                                  # NHWC -> NCHW once


# ------------------------- pure-JAX reference check ------------------------ #

def _ref_convt(x, w, stride, padding):
    k = w.shape[2]
    w_conv = jnp.transpose(w[:, :, ::-1, ::-1], (1, 0, 2, 3))       # (Cout, Cin, k, k)
    q = k - 1 - padding
    return jax.lax.conv_general_dilated(
        x, w_conv, window_strides=(1, 1), padding=[(q, q), (q, q)],
        lhs_dilation=(stride, stride),
        dimension_numbers=("NCHW", "OIHW", "NCHW"))


def _ref_bn_relu(x, gamma, beta):
    mean = jnp.mean(x, axis=(0, 2, 3), keepdims=True)
    var = jnp.mean(jnp.square(x - mean), axis=(0, 2, 3), keepdims=True)
    xh = (x - mean) * jax.lax.rsqrt(var + BN_EPS)
    return jnp.maximum(xh * gamma.reshape(1, -1, 1, 1) + beta.reshape(1, -1, 1, 1), 0.0)


def generator_reference(params, z):
    x = _ref_bn_relu(_ref_convt(z, params["w0"], 1, 0), params["gamma0"], params["beta0"])
    x = _ref_bn_relu(_ref_convt(x, params["w1"], 2, 1), params["gamma1"], params["beta1"])
    x = _ref_bn_relu(_ref_convt(x, params["w2"], 2, 1), params["gamma2"], params["beta2"])
    x = _ref_bn_relu(_ref_convt(x, params["w3"], 2, 1), params["gamma3"], params["beta3"])
    return jnp.tanh(_ref_convt(x, params["w4"], 2, 1))


# ---------------------------------- main ----------------------------------- #

if __name__ == "__main__":
    N, Z, NF, NC = 2, 16, 8, 3           # batch=2, z_size=16, n_features=8, n_channel=3
    key = jax.random.PRNGKey(0)
    kp, kz = jax.random.split(key)
    params = init_generator_params(kp, Z, NF, NC)
    z = jax.random.normal(kz, (N, Z, 1, 1), jnp.float32)

    out = jax.jit(generator_forward)(params, z)
    out = jax.block_until_ready(out)

    assert out.shape == (N, NC, 64, 64), out.shape
    assert bool(jnp.all(jnp.isfinite(out)))

    ref = generator_reference(params, z)
    max_err = float(jnp.max(jnp.abs(out - ref)))
    assert max_err < 5e-2, f"mismatch vs reference: {max_err}"

    print("KERNEL_OK")
</pallas_src>

<mosaic_0001>
module attributes {stable_mosaic.version = 11 : i64} {
  func.func @_gemm_stats_kernel(%arg0: i32, %arg1: memref<32x256xbf16, #tpu.memory_space<vmem>>, %arg2: memref<256x128xbf16, #tpu.memory_space<vmem>>, %arg3: memref<32x128xf32, #tpu.memory_space<vmem>>, %arg4: memref<2x128xf32, #tpu.memory_space<vmem>>) attributes {dimension_semantics = [#tpu.dimension_semantics<arbitrary>], iteration_bounds = array<i64: 1>, scalar_prefetch = 0 : i64, scratch_operands = 0 : i64, tpu.core_type = #tpu.core_type<tc>, window_params = [{transform_indices = @transform_0, window_bounds = array<i64: 32, 256>}, {pipeline_mode = #tpu.pipeline_mode<synchronous>, transform_indices = @transform_1, window_bounds = array<i64: 256, 128>}, {transform_indices = @transform_2, window_bounds = array<i64: 32, 128>}, {pipeline_mode = #tpu.pipeline_mode<synchronous>, transform_indices = @transform_3, window_bounds = array<i64: 2, 128>}]} {
    %c0 = arith.constant 0 : index
    %c0_0 = arith.constant 0 : index
    %0 = vector.load %arg1[%c0, %c0_0] : memref<32x256xbf16, #tpu.memory_space<vmem>>, vector<32x256xbf16>
    %c0_1 = arith.constant 0 : index
    %c0_2 = arith.constant 0 : index
    %1 = vector.load %arg2[%c0_1, %c0_2] : memref<256x128xbf16, #tpu.memory_space<vmem>>, vector<256x128xbf16>
    %cst = arith.constant dense<0.000000e+00> : vector<32x128xf32>
    %2 = tpu.matmul %0, %1, %cst {dimension_numbers = #tpu.dot_dimension_numbers<[1], [0], [0], [1], [0, 0, 1, 1], [], []>} : vector<32x256xbf16>, vector<256x128xbf16>, vector<32x128xf32> -> vector<32x128xf32>
    %c0_3 = arith.constant 0 : index
    %c0_4 = arith.constant 0 : index
    %3 = vector.load %arg3[%c0_3, %c0_4] : memref<32x128xf32, #tpu.memory_space<vmem>>, vector<32x128xf32>
    tpu.vector_store %arg3[%c0_3, %c0_4], %2 {strides = array<i32>} : memref<32x128xf32, #tpu.memory_space<vmem>>, vector<32x128xf32>,
    %c0_i32 = arith.constant 0 : i32
    %4 = arith.cmpi eq, %arg0, %c0_i32 : i32
    %5 = arith.extui %4 : i1 to i32
    %c0_i32_5 = arith.constant 0 : i32
    %6 = arith.cmpi ne, %5, %c0_i32_5 : i32
    scf.if %6 {
      %cst_12 = arith.constant 0.000000e+00 : f32
      %16 = vector.broadcast %cst_12 : f32 to vector<2x128xf32>
      %c0_13 = arith.constant 0 : index
      %c0_14 = arith.constant 0 : index
      %17 = vector.load %arg4[%c0_13, %c0_14] : memref<2x128xf32, #tpu.memory_space<vmem>>, vector<2x128xf32>
      tpu.vector_store %arg4[%c0_13, %c0_14], %16 {strides = array<i32>} : memref<2x128xf32, #tpu.memory_space<vmem>>, vector<2x128xf32>,
    } else {
    }
    %cst_6 = arith.constant dense<0.000000e+00> : vector<128xf32>
    %7 = vector.multi_reduction <add>, %2, %cst_6 [0] : vector<32x128xf32> to vector<128xf32>
    %8 = vector.shape_cast %7 : vector<128xf32> to vector<1x128xf32>
    %9 = arith.mulf %2, %2 : vector<32x128xf32>
    %cst_7 = arith.constant dense<0.000000e+00> : vector<128xf32>
    %10 = vector.multi_reduction <add>, %9, %cst_7 [0] : vector<32x128xf32> to vector<128xf32>
    %11 = vector.shape_cast %10 : vector<128xf32> to vector<1x128xf32>
    %c0_8 = arith.constant 0 : index
    %c0_9 = arith.constant 0 : index
    %12 = vector.load %arg4[%c0_8, %c0_9] : memref<2x128xf32, #tpu.memory_space<vmem>>, vector<2x128xf32>
    %13 = tpu.concatenate %8, %11 in 0 : vector<1x128xf32>, vector<1x128xf32> -> vector<2x128xf32>
    %14 = arith.addf %12, %13 : vector<2x128xf32>
    %c0_10 = arith.constant 0 : index
    %c0_11 = arith.constant 0 : index
    %15 = vector.load %arg4[%c0_10, %c0_11] : memref<2x128xf32, #tpu.memory_space<vmem>>, vector<2x128xf32>
    tpu.vector_store %arg4[%c0_10, %c0_11], %14 {strides = array<i32>} : memref<2x128xf32, #tpu.memory_space<vmem>>, vector<2x128xf32>,
    return
  }
  func.func @transform_0(%arg0: i32) -> (i32, i32) {
    %c0_i32 = arith.constant 0 : i32
    %c0_i32_0 = arith.constant 0 : i32
    return %arg0, %c0_i32 : i32, i32
  }
  func.func @transform_1(%arg0: i32) -> (i32, i32) {
    %c0_i32 = arith.constant 0 : i32
    %c0_i32_0 = arith.constant 0 : i32
    %c0_i32_1 = arith.constant 0 : i32
    return %c0_i32, %c0_i32_0 : i32, i32
  }
  func.func @transform_2(%arg0: i32) -> (i32, i32) {
    %c0_i32 = arith.constant 0 : i32
    %c0_i32_0 = arith.constant 0 : i32
    return %arg0, %c0_i32 : i32, i32
  }
  func.func @transform_3(%arg0: i32) -> (i32, i32) {
    %c0_i32 = arith.constant 0 : i32
    %c0_i32_0 = arith.constant 0 : i32
    %c0_i32_1 = arith.constant 0 : i32
    return %c0_i32, %c0_i32_0 : i32, i32
  }
}

module attributes {stable_mosaic.version = 11 : i64} {
  func.func @_bn_relu_kernel(%arg0: i32, %arg1: memref<32x128xf32, #tpu.memory_space<vmem>>, %arg2: memref<2x128xf32, #tpu.memory_space<vmem>>, %arg3: memref<32x128xbf16, #tpu.memory_space<vmem>>) attributes {dimension_semantics = [#tpu.dimension_semantics<parallel>], iteration_bounds = array<i64: 1>, scalar_prefetch = 0 : i64, scratch_operands = 0 : i64, tpu.core_type = #tpu.core_type<tc>, window_params = [{transform_indices = @transform_0, window_bounds = array<i64: 32, 128>}, {pipeline_mode = #tpu.pipeline_mode<synchronous>, transform_indices = @transform_1, window_bounds = array<i64: 2, 128>}, {transform_indices = @transform_2, window_bounds = array<i64: 32, 128>}]} {
    %c0 = arith.constant 0 : index
    %c0_0 = arith.constant 0 : index
    %0 = vector.load %arg2[%c0, %c0_0] : memref<2x128xf32, #tpu.memory_space<vmem>>, vector<1x128xf32>
    %c1 = arith.constant 1 : index
    %c0_1 = arith.constant 0 : index
    %1 = vector.load %arg2[%c1, %c0_1] : memref<2x128xf32, #tpu.memory_space<vmem>>, vector<1x128xf32>
    %c0_2 = arith.constant 0 : index
    %c0_3 = arith.constant 0 : index
    %2 = vector.load %arg1[%c0_2, %c0_3] : memref<32x128xf32, #tpu.memory_space<vmem>>, vector<32x128xf32>
    %3 = vector.broadcast %0 : vector<1x128xf32> to vector<32x128xf32>
    %4 = arith.mulf %2, %3 : vector<32x128xf32>
    %5 = vector.broadcast %1 : vector<1x128xf32> to vector<32x128xf32>
    %6 = arith.addf %4, %5 : vector<32x128xf32>
    %cst = arith.constant 0.000000e+00 : f32
    %7 = vector.broadcast %cst : f32 to vector<32x128xf32>
    %8 = arith.maximumf %6, %7 : vector<32x128xf32>
    %9 = arith.truncf %8 : vector<32x128xf32> to vector<32x128xbf16>
    %c0_4 = arith.constant 0 : index
    %c0_5 = arith.constant 0 : index
    %10 = vector.load %arg3[%c0_4, %c0_5] : memref<32x128xbf16, #tpu.memory_space<vmem>>, vector<32x128xbf16>
    tpu.vector_store %arg3[%c0_4, %c0_5], %9 {strides = array<i32>} : memref<32x128xbf16, #tpu.memory_space<vmem>>, vector<32x128xbf16>,
    return
  }
  func.func @transform_0(%arg0: i32) -> (i32, i32) {
    %c0_i32 = arith.constant 0 : i32
    %c0_i32_0 = arith.constant 0 : i32
    return %arg0, %c0_i32 : i32, i32
  }
  func.func @transform_1(%arg0: i32) -> (i32, i32) {
    %c0_i32 = arith.constant 0 : i32
    %c0_i32_0 = arith.constant 0 : i32
    %c0_i32_1 = arith.constant 0 : i32
    return %c0_i32, %c0_i32_0 : i32, i32
  }
  func.func @transform_2(%arg0: i32) -> (i32, i32) {
    %c0_i32 = arith.constant 0 : i32
    %c0_i32_0 = arith.constant 0 : i32
    return %arg0, %c0_i32 : i32, i32
  }
}

module attributes {stable_mosaic.version = 11 : i64} {
  func.func @_gemm_stats_kernel(%arg0: i32, %arg1: memref<128x1024xbf16, #tpu.memory_space<vmem>>, %arg2: memref<1024x128xbf16, #tpu.memory_space<vmem>>, %arg3: memref<128x128xf32, #tpu.memory_space<vmem>>, %arg4: memref<2x128xf32, #tpu.memory_space<vmem>>) attributes {dimension_semantics = [#tpu.dimension_semantics<arbitrary>], iteration_bounds = array<i64: 1>, scalar_prefetch = 0 : i64, scratch_operands = 0 : i64, tpu.core_type = #tpu.core_type<tc>, window_params = [{transform_indices = @transform_0, window_bounds = array<i64: 128, 1024>}, {pipeline_mode = #tpu.pipeline_mode<synchronous>, transform_indices = @transform_1, window_bounds = array<i64: 1024, 128>}, {transform_indices = @transform_2, window_bounds = array<i64: 128, 128>}, {pipeline_mode = #tpu.pipeline_mode<synchronous>, transform_indices = @transform_3, window_bounds = array<i64: 2, 128>}]} {
    %c0 = arith.constant 0 : index
    %c0_0 = arith.constant 0 : index
    %0 = vector.load %arg1[%c0, %c0_0] : memref<128x1024xbf16, #tpu.memory_space<vmem>>, vector<128x1024xbf16>
    %c0_1 = arith.constant 0 : index
    %c0_2 = arith.constant 0 : index
    %1 = vector.load %arg2[%c0_1, %c0_2] : memref<1024x128xbf16, #tpu.memory_space<vmem>>, vector<1024x128xbf16>
    %cst = arith.constant dense<0.000000e+00> : vector<128x128xf32>
    %2 = tpu.matmul %0, %1, %cst {dimension_numbers = #tpu.dot_dimension_numbers<[1], [0], [0], [1], [0, 0, 1, 1], [], []>} : vector<128x1024xbf16>, vector<1024x128xbf16>, vector<128x128xf32> -> vector<128x128xf32>
    %c0_3 = arith.constant 0 : index
    %c0_4 = arith.constant 0 : index
    %3 = vector.load %arg3[%c0_3, %c0_4] : memref<128x128xf32, #tpu.memory_space<vmem>>, vector<128x128xf32>
    tpu.vector_store %arg3[%c0_3, %c0_4], %2 {strides = array<i32>} : memref<128x128xf32, #tpu.memory_space<vmem>>, vector<128x128xf32>,
    %c0_i32 = arith.constant 0 : i32
    %4 = arith.cmpi eq, %arg0, %c0_i32 : i32
    %5 = arith.extui %4 : i1 to i32
    %c0_i32_5 = arith.constant 0 : i32
    %6 = arith.cmpi ne, %5, %c0_i32_5 : i32
    scf.if %6 {
      %cst_12 = arith.constant 0.000000e+00 : f32
      %16 = vector.broadcast %cst_12 : f32 to vector<2x128xf32>
      %c0_13 = arith.constant 0 : index
      %c0_14 = arith.constant 0 : index
      %17 = vector.load %arg4[%c0_13, %c0_14] : memref<2x128xf32, #tpu.memory_space<vmem>>, vector<2x128xf32>
      tpu.vector_store %arg4[%c0_13, %c0_14], %16 {strides = array<i32>} : memref<2x128xf32, #tpu.memory_space<vmem>>, vector<2x128xf32>,
    } else {
    }
    %cst_6 = arith.constant dense<0.000000e+00> : vector<128xf32>
    %7 = vector.multi_reduction <add>, %2, %cst_6 [0] : vector<128x128xf32> to vector<128xf32>
    %8 = vector.shape_cast %7 : vector<128xf32> to vector<1x128xf32>
    %9 = arith.mulf %2, %2 : vector<128x128xf32>
    %cst_7 = arith.constant dense<0.000000e+00> : vector<128xf32>
    %10 = vector.multi_reduction <add>, %9, %cst_7 [0] : vector<128x128xf32> to vector<128xf32>
    %11 = vector.shape_cast %10 : vector<128xf32> to vector<1x128xf32>
    %c0_8 = arith.constant 0 : index
    %c0_9 = arith.constant 0 : index
    %12 = vector.load %arg4[%c0_8, %c0_9] : memref<2x128xf32, #tpu.memory_space<vmem>>, vector<2x128xf32>
    %13 = tpu.concatenate %8, %11 in 0 : vector<1x128xf32>, vector<1x128xf32> -> vector<2x128xf32>
    %14 = arith.addf %12, %13 : vector<2x128xf32>
    %c0_10 = arith.constant 0 : index
    %c0_11 = arith.constant 0 : index
    %15 = vector.load %arg4[%c0_10, %c0_11] : memref<2x128xf32, #tpu.memory_space<vmem>>, vector<2x128xf32>
    tpu.vector_store %arg4[%c0_10, %c0_11], %14 {strides = array<i32>} : memref<2x128xf32, #tpu.memory_space<vmem>>, vector<2x128xf32>,
    return
  }
  func.func @transform_0(%arg0: i32) -> (i32, i32) {
    %c0_i32 = arith.constant 0 : i32
    %c0_i32_0 = arith.constant 0 : i32
    return %arg0, %c0_i32 : i32, i32
  }
  func.func @transform_1(%arg0: i32) -> (i32, i32) {
    %c0_i32 = arith.constant 0 : i32
    %c0_i32_0 = arith.constant 0 : i32
    %c0_i32_1 = arith.constant 0 : i32
    return %c0_i32, %c0_i32_0 : i32, i32
  }
  func.func @transform_2(%arg0: i32) -> (i32, i32) {
    %c0_i32 = arith.constant 0 : i32
    %c0_i32_0 = arith.constant 0 : i32
    return %arg0, %c0_i32 : i32, i32
  }
  func.func @transform_3(%arg0: i32) -> (i32, i32) {
    %c0_i32 = arith.constant 0 : i32
    %c0_i32_0 = arith.constant 0 : i32
    %c0_i32_1 = arith.constant 0 : i32
    return %c0_i32, %c0_i32_0 : i32, i32
  }
}

module attributes {stable_mosaic.version = 11 : i64} {
  func.func @_bn_relu_kernel(%arg0: i32, %arg1: memref<128x128xf32, #tpu.memory_space<vmem>>, %arg2: memref<2x128xf32, #tpu.memory_space<vmem>>, %arg3: memref<128x128xbf16, #tpu.memory_space<vmem>>) attributes {dimension_semantics = [#tpu.dimension_semantics<parallel>], iteration_bounds = array<i64: 1>, scalar_prefetch = 0 : i64, scratch_operands = 0 : i64, tpu.core_type = #tpu.core_type<tc>, window_params = [{transform_indices = @transform_0, window_bounds = array<i64: 128, 128>}, {pipeline_mode = #tpu.pipeline_mode<synchronous>, transform_indices = @transform_1, window_bounds = array<i64: 2, 128>}, {transform_indices = @transform_2, window_bounds = array<i64: 128, 128>}]} {
    %c0 = arith.constant 0 : index
    %c0_0 = arith.constant 0 : index
    %0 = vector.load %arg2[%c0, %c0_0] : memref<2x128xf32, #tpu.memory_space<vmem>>, vector<1x128xf32>
    %c1 = arith.constant 1 : index
    %c0_1 = arith.constant 0 : index
    %1 = vector.load %arg2[%c1, %c0_1] : memref<2x128xf32, #tpu.memory_space<vmem>>, vector<1x128xf32>
    %c0_2 = arith.constant 0 : index
    %c0_3 = arith.constant 0 : index
    %2 = vector.load %arg1[%c0_2, %c0_3] : memref<128x128xf32, #tpu.memory_space<vmem>>, vector<128x128xf32>
    %3 = vector.broadcast %0 : vector<1x128xf32> to vector<128x128xf32>
    %4 = arith.mulf %2, %3 : vector<128x128xf32>
    %5 = vector.broadcast %1 : vector<1x128xf32> to vector<128x128xf32>
    %6 = arith.addf %4, %5 : vector<128x128xf32>
    %cst = arith.constant 0.000000e+00 : f32
    %7 = vector.broadcast %cst : f32 to vector<128x128xf32>
    %8 = arith.maximumf %6, %7 : vector<128x128xf32>
    %9 = arith.truncf %8 : vector<128x128xf32> to vector<128x128xbf16>
    %c0_4 = arith.constant 0 : index
    %c0_5 = arith.constant 0 : index
    %10 = vector.load %arg3[%c0_4, %c0_5] : memref<128x128xbf16, #tpu.memory_space<vmem>>, vector<128x128xbf16>
    tpu.vector_store %arg3[%c0_4, %c0_5], %9 {strides = array<i32>} : memref<128x128xbf16, #tpu.memory_space<vmem>>, vector<128x128xbf16>,
    return
  }
  func.func @transform_0(%arg0: i32) -> (i32, i32) {
    %c0_i32 = arith.constant 0 : i32
    %c0_i32_0 = arith.constant 0 : i32
    return %arg0, %c0_i32 : i32, i32
  }
  func.func @transform_1(%arg0: i32) -> (i32, i32) {
    %c0_i32 = arith.constant 0 : i32
    %c0_i32_0 = arith.constant 0 : i32
    %c0_i32_1 = arith.constant 0 : i32
    return %c0_i32, %c0_i32_0 : i32, i32
  }
  func.func @transform_2(%arg0: i32) -> (i32, i32) {
    %c0_i32 = arith.constant 0 : i32
    %c0_i32_0 = arith.constant 0 : i32
    return %arg0, %c0_i32 : i32, i32
  }
}

module attributes {stable_mosaic.version = 11 : i64} {
  func.func @_gemm_stats_kernel(%arg0: i32, %arg1: memref<512x512xbf16, #tpu.memory_space<vmem>>, %arg2: memref<512x128xbf16, #tpu.memory_space<vmem>>, %arg3: memref<512x128xf32, #tpu.memory_space<vmem>>, %arg4: memref<2x128xf32, #tpu.memory_space<vmem>>) attributes {dimension_semantics = [#tpu.dimension_semantics<arbitrary>], iteration_bounds = array<i64: 1>, scalar_prefetch = 0 : i64, scratch_operands = 0 : i64, tpu.core_type = #tpu.core_type<tc>, window_params = [{transform_indices = @transform_0, window_bounds = array<i64: 512, 512>}, {pipeline_mode = #tpu.pipeline_mode<synchronous>, transform_indices = @transform_1, window_bounds = array<i64: 512, 128>}, {transform_indices = @transform_2, window_bounds = array<i64: 512, 128>}, {pipeline_mode = #tpu.pipeline_mode<synchronous>, transform_indices = @transform_3, window_bounds = array<i64: 2, 128>}]} {
    %c0 = arith.constant 0 : index
    %c0_0 = arith.constant 0 : index
    %0 = vector.load %arg1[%c0, %c0_0] : memref<512x512xbf16, #tpu.memory_space<vmem>>, vector<512x512xbf16>
    %c0_1 = arith.constant 0 : index
    %c0_2 = arith.constant 0 : index
    %1 = vector.load %arg2[%c0_1, %c0_2] : memref<512x128xbf16, #tpu.memory_space<vmem>>, vector<512x128xbf16>
    %cst = arith.constant dense<0.000000e+00> : vector<512x128xf32>
    %2 = tpu.matmul %0, %1, %cst {dimension_numbers = #tpu.dot_dimension_numbers<[1], [0], [0], [1], [0, 0, 1, 1], [], []>} : vector<512x512xbf16>, vector<512x128xbf16>, vector<512x128xf32> -> vector<512x128xf32>
    %c0_3 = arith.constant 0 : index
    %c0_4 = arith.constant 0 : index
    %3 = vector.load %arg3[%c0_3, %c0_4] : memref<512x128xf32, #tpu.memory_space<vmem>>, vector<512x128xf32>
    tpu.vector_store %arg3[%c0_3, %c0_4], %2 {strides = array<i32>} : memref<512x128xf32, #tpu.memory_space<vmem>>, vector<512x128xf32>,
    %c0_i32 = arith.constant 0 : i32
    %4 = arith.cmpi eq, %arg0, %c0_i32 : i32
    %5 = arith.extui %4 : i1 to i32
    %c0_i32_5 = arith.constant 0 : i32
    %6 = arith.cmpi ne, %5, %c0_i32_5 : i32
    scf.if %6 {
      %cst_12 = arith.constant 0.000000e+00 : f32
      %16 = vector.broadcast %cst_12 : f32 to vector<2x128xf32>
      %c0_13 = arith.constant 0 : index
      %c0_14 = arith.constant 0 : index
      %17 = vector.load %arg4[%c0_13, %c0_14] : memref<2x128xf32, #tpu.memory_space<vmem>>, vector<2x128xf32>
      tpu.vector_store %arg4[%c0_13, %c0_14], %16 {strides = array<i32>} : memref<2x128xf32, #tpu.memory_space<vmem>>, vector<2x128xf32>,
    } else {
    }
    %cst_6 = arith.constant dense<0.000000e+00> : vector<128xf32>
    %7 = vector.multi_reduction <add>, %2, %cst_6 [0] : vector<512x128xf32> to vector<128xf32>
    %8 = vector.shape_cast %7 : vector<128xf32> to vector<1x128xf32>
    %9 = arith.mulf %2, %2 : vector<512x128xf32>
    %cst_7 = arith.constant dense<0.000000e+00> : vector<128xf32>
    %10 = vector.multi_reduction <add>, %9, %cst_7 [0] : vector<512x128xf32> to vector<128xf32>
    %11 = vector.shape_cast %10 : vector<128xf32> to vector<1x128xf32>
    %c0_8 = arith.constant 0 : index
    %c0_9 = arith.constant 0 : index
    %12 = vector.load %arg4[%c0_8, %c0_9] : memref<2x128xf32, #tpu.memory_space<vmem>>, vector<2x128xf32>
    %13 = tpu.concatenate %8, %11 in 0 : vector<1x128xf32>, vector<1x128xf32> -> vector<2x128xf32>
    %14 = arith.addf %12, %13 : vector<2x128xf32>
    %c0_10 = arith.constant 0 : index
    %c0_11 = arith.constant 0 : index
    %15 = vector.load %arg4[%c0_10, %c0_11] : memref<2x128xf32, #tpu.memory_space<vmem>>, vector<2x128xf32>
    tpu.vector_store %arg4[%c0_10, %c0_11], %14 {strides = array<i32>} : memref<2x128xf32, #tpu.memory_space<vmem>>, vector<2x128xf32>,
    return
  }
  func.func @transform_0(%arg0: i32) -> (i32, i32) {
    %c0_i32 = arith.constant 0 : i32
    %c0_i32_0 = arith.constant 0 : i32
    return %arg0, %c0_i32 : i32, i32
  }
  func.func @transform_1(%arg0: i32) -> (i32, i32) {
    %c0_i32 = arith.constant 0 : i32
    %c0_i32_0 = arith.constant 0 : i32
    %c0_i32_1 = arith.constant 0 : i32
    return %c0_i32, %c0_i32_0 : i32, i32
  }
  func.func @transform_2(%arg0: i32) -> (i32, i32) {
    %c0_i32 = arith.constant 0 : i32
    %c0_i32_0 = arith.constant 0 : i32
    return %arg0, %c0_i32 : i32, i32
  }
  func.func @transform_3(%arg0: i32) -> (i32, i32) {
    %c0_i32 = arith.constant 0 : i32
    %c0_i32_0 = arith.constant 0 : i32
    %c0_i32_1 = arith.constant 0 : i32
    return %c0_i32, %c0_i32_0 : i32, i32
  }
}

module attributes {stable_mosaic.version = 11 : i64} {
  func.func @_bn_relu_kernel(%arg0: i32, %arg1: memref<512x128xf32, #tpu.memory_space<vmem>>, %arg2: memref<2x128xf32, #tpu.memory_space<vmem>>, %arg3: memref<512x128xbf16, #tpu.memory_space<vmem>>) attributes {dimension_semantics = [#tpu.dimension_semantics<parallel>], iteration_bounds = array<i64: 1>, scalar_prefetch = 0 : i64, scratch_operands = 0 : i64, tpu.core_type = #tpu.core_type<tc>, window_params = [{transform_indices = @transform_0, window_bounds = array<i64: 512, 128>}, {pipeline_mode = #tpu.pipeline_mode<synchronous>, transform_indices = @transform_1, window_bounds = array<i64: 2, 128>}, {transform_indices = @transform_2, window_bounds = array<i64: 512, 128>}]} {
    %c0 = arith.constant 0 : index
    %c0_0 = arith.constant 0 : index
    %0 = vector.load %arg2[%c0, %c0_0] : memref<2x128xf32, #tpu.memory_space<vmem>>, vector<1x128xf32>
    %c1 = arith.constant 1 : index
    %c0_1 = arith.constant 0 : index
    %1 = vector.load %arg2[%c1, %c0_1] : memref<2x128xf32, #tpu.memory_space<vmem>>, vector<1x128xf32>
    %c0_2 = arith.constant 0 : index
    %c0_3 = arith.constant 0 : index
    %2 = vector.load %arg1[%c0_2, %c0_3] : memref<512x128xf32, #tpu.memory_space<vmem>>, vector<512x128xf32>
    %3 = vector.broadcast %0 : vector<1x128xf32> to vector<512x128xf32>
    %4 = arith.mulf %2, %3 : vector<512x128xf32>
    %5 = vector.broadcast %1 : vector<1x128xf32> to vector<512x128xf32>
    %6 = arith.addf %4, %5 : vector<512x128xf32>
    %cst = arith.constant 0.000000e+00 : f32
    %7 = vector.broadcast %cst : f32 to vector<512x128xf32>
    %8 = arith.maximumf %6, %7 : vector<512x128xf32>
    %9 = arith.truncf %8 : vector<512x128xf32> to vector<512x128xbf16>
    %c0_4 = arith.constant 0 : index
    %c0_5 = arith.constant 0 : index
    %10 = vector.load %arg3[%c0_4, %c0_5] : memref<512x128xbf16, #tpu.memory_space<vmem>>, vector<512x128xbf16>
    tpu.vector_store %arg3[%c0_4, %c0_5], %9 {strides = array<i32>} : memref<512x128xbf16, #tpu.memory_space<vmem>>, vector<512x128xbf16>,
    return
  }
  func.func @transform_0(%arg0: i32) -> (i32, i32) {
    %c0_i32 = arith.constant 0 : i32
    %c0_i32_0 = arith.constant 0 : i32
    return %arg0, %c0_i32 : i32, i32
  }
  func.func @transform_1(%arg0: i32) -> (i32, i32) {
    %c0_i32 = arith.constant 0 : i32
    %c0_i32_0 = arith.constant 0 : i32
    %c0_i32_1 = arith.constant 0 : i32
    return %c0_i32, %c0_i32_0 : i32, i32
  }
  func.func @transform_2(%arg0: i32) -> (i32, i32) {
    %c0_i32 = arith.constant 0 : i32
    %c0_i32_0 = arith.constant 0 : i32
    return %arg0, %c0_i32 : i32, i32
  }
}

module attributes {stable_mosaic.version = 11 : i64} {
  func.func @_gemm_stats_kernel(%arg0: i32, %arg1: memref<1024x256xbf16, #tpu.memory_space<vmem>>, %arg2: memref<256x128xbf16, #tpu.memory_space<vmem>>, %arg3: memref<1024x128xf32, #tpu.memory_space<vmem>>, %arg4: memref<2x128xf32, #tpu.memory_space<vmem>>) attributes {dimension_semantics = [#tpu.dimension_semantics<arbitrary>], iteration_bounds = array<i64: 2>, scalar_prefetch = 0 : i64, scratch_operands = 0 : i64, tpu.core_type = #tpu.core_type<tc>, window_params = [{transform_indices = @transform_0, window_bounds = array<i64: 1024, 256>}, {pipeline_mode = #tpu.pipeline_mode<synchronous>, transform_indices = @transform_1, window_bounds = array<i64: 256, 128>}, {transform_indices = @transform_2, window_bounds = array<i64: 1024, 128>}, {pipeline_mode = #tpu.pipeline_mode<synchronous>, transform_indices = @transform_3, window_bounds = array<i64: 2, 128>}]} {
    %c0 = arith.constant 0 : index
    %c0_0 = arith.constant 0 : index
    %0 = vector.load %arg1[%c0, %c0_0] : memref<1024x256xbf16, #tpu.memory_space<vmem>>, vector<1024x256xbf16>
    %c0_1 = arith.constant 0 : index
    %c0_2 = arith.constant 0 : index
    %1 = vector.load %arg2[%c0_1, %c0_2] : memref<256x128xbf16, #tpu.memory_space<vmem>>, vector<256x128xbf16>
    %cst = arith.constant dense<0.000000e+00> : vector<1024x128xf32>
    %2 = tpu.matmul %0, %1, %cst {dimension_numbers = #tpu.dot_dimension_numbers<[1], [0], [0], [1], [0, 0, 1, 1], [], []>} : vector<1024x256xbf16>, vector<256x128xbf16>, vector<1024x128xf32> -> vector<1024x128xf32>
    %c0_3 = arith.constant 0 : index
    %c0_4 = arith.constant 0 : index
    %3 = vector.load %arg3[%c0_3, %c0_4] : memref<1024x128xf32, #tpu.memory_space<vmem>>, vector<1024x128xf32>
    tpu.vector_store %arg3[%c0_3, %c0_4], %2 {strides = array<i32>} : memref<1024x128xf32, #tpu.memory_space<vmem>>, vector<1024x128xf32>,
    %c0_i32 = arith.constant 0 : i32
    %4 = arith.cmpi eq, %arg0, %c0_i32 : i32
    %5 = arith.extui %4 : i1 to i32
    %c0_i32_5 = arith.constant 0 : i32
    %6 = arith.cmpi ne, %5, %c0_i32_5 : i32
    scf.if %6 {
      %cst_12 = arith.constant 0.000000e+00 : f32
      %16 = vector.broadcast %cst_12 : f32 to vector<2x128xf32>
      %c0_13 = arith.constant 0 : index
      %c0_14 = arith.constant 0 : index
      %17 = vector.load %arg4[%c0_13, %c0_14] : memref<2x128xf32, #tpu.memory_space<vmem>>, vector<2x128xf32>
      tpu.vector_store %arg4[%c0_13, %c0_14], %16 {strides = array<i32>} : memref<2x128xf32, #tpu.memory_space<vmem>>, vector<2x128xf32>,
    } else {
    }
    %cst_6 = arith.constant dense<0.000000e+00> : vector<128xf32>
    %7 = vector.multi_reduction <add>, %2, %cst_6 [0] : vector<1024x128xf32> to vector<128xf32>
    %8 = vector.shape_cast %7 : vector<128xf32> to vector<1x128xf32>
    %9 = arith.mulf %2, %2 : vector<1024x128xf32>
    %cst_7 = arith.constant dense<0.000000e+00> : vector<128xf32>
    %10 = vector.multi_reduction <add>, %9, %cst_7 [0] : vector<1024x128xf32> to vector<128xf32>
    %11 = vector.shape_cast %10 : vector<128xf32> to vector<1x128xf32>
    %c0_8 = arith.constant 0 : index
    %c0_9 = arith.constant 0 : index
    %12 = vector.load %arg4[%c0_8, %c0_9] : memref<2x128xf32, #tpu.memory_space<vmem>>, vector<2x128xf32>
    %13 = tpu.concatenate %8, %11 in 0 : vector<1x128xf32>, vector<1x128xf32> -> vector<2x128xf32>
    %14 = arith.addf %12, %13 : vector<2x128xf32>
    %c0_10 = arith.constant 0 : index
    %c0_11 = arith.constant 0 : index
    %15 = vector.load %arg4[%c0_10, %c0_11] : memref<2x128xf32, #tpu.memory_space<vmem>>, vector<2x128xf32>
    tpu.vector_store %arg4[%c0_10, %c0_11], %14 {strides = array<i32>} : memref<2x128xf32, #tpu.memory_space<vmem>>, vector<2x128xf32>,
    return
  }
  func.func @transform_0(%arg0: i32) -> (i32, i32) {
    %c0_i32 = arith.constant 0 : i32
    %c0_i32_0 = arith.constant 0 : i32
    return %arg0, %c0_i32 : i32, i32
  }
  func.func @transform_1(%arg0: i32) -> (i32, i32) {
    %c0_i32 = arith.constant 0 : i32
    %c0_i32_0 = arith.constant 0 : i32
    %c0_i32_1 = arith.constant 0 : i32
    return %c0_i32, %c0_i32_0 : i32, i32
  }
  func.func @transform_2(%arg0: i32) -> (i32, i32) {
    %c0_i32 = arith.constant 0 : i32
    %c0_i32_0 = arith.constant 0 : i32
    return %arg0, %c0_i32 : i32, i32
  }
  func.func @transform_3(%arg0: i32) -> (i32, i32) {
    %c0_i32 = arith.constant 0 : i32
    %c0_i32_0 = arith.constant 0 : i32
    %c0_i32_1 = arith.constant 0 : i32
    return %c0_i32, %c0_i32_0 : i32, i32
  }
}

module attributes {stable_mosaic.version = 11 : i64} {
  func.func @_bn_relu_kernel(%arg0: i32, %arg1: memref<1024x128xf32, #tpu.memory_space<vmem>>, %arg2: memref<2x128xf32, #tpu.memory_space<vmem>>, %arg3: memref<1024x128xbf16, #tpu.memory_space<vmem>>) attributes {dimension_semantics = [#tpu.dimension_semantics<parallel>], iteration_bounds = array<i64: 2>, scalar_prefetch = 0 : i64, scratch_operands = 0 : i64, tpu.core_type = #tpu.core_type<tc>, window_params = [{transform_indices = @transform_0, window_bounds = array<i64: 1024, 128>}, {pipeline_mode = #tpu.pipeline_mode<synchronous>, transform_indices = @transform_1, window_bounds = array<i64: 2, 128>}, {transform_indices = @transform_2, window_bounds = array<i64: 1024, 128>}]} {
    %c0 = arith.constant 0 : index
    %c0_0 = arith.constant 0 : index
    %0 = vector.load %arg2[%c0, %c0_0] : memref<2x128xf32, #tpu.memory_space<vmem>>, vector<1x128xf32>
    %c1 = arith.constant 1 : index
    %c0_1 = arith.constant 0 : index
    %1 = vector.load %arg2[%c1, %c0_1] : memref<2x128xf32, #tpu.memory_space<vmem>>, vector<1x128xf32>
    %c0_2 = arith.constant 0 : index
    %c0_3 = arith.constant 0 : index
    %2 = vector.load %arg1[%c0_2, %c0_3] : memref<1024x128xf32, #tpu.memory_space<vmem>>, vector<1024x128xf32>
    %3 = vector.broadcast %0 : vector<1x128xf32> to vector<1024x128xf32>
    %4 = arith.mulf %2, %3 : vector<1024x128xf32>
    %5 = vector.broadcast %1 : vector<1x128xf32> to vector<1024x128xf32>
    %6 = arith.addf %4, %5 : vector<1024x128xf32>
    %cst = arith.constant 0.000000e+00 : f32
    %7 = vector.broadcast %cst : f32 to vector<1024x128xf32>
    %8 = arith.maximumf %6, %7 : vector<1024x128xf32>
    %9 = arith.truncf %8 : vector<1024x128xf32> to vector<1024x128xbf16>
    %c0_4 = arith.constant 0 : index
    %c0_5 = arith.constant 0 : index
    %10 = vector.load %arg3[%c0_4, %c0_5] : memref<1024x128xbf16, #tpu.memory_space<vmem>>, vector<1024x128xbf16>
    tpu.vector_store %arg3[%c0_4, %c0_5], %9 {strides = array<i32>} : memref<1024x128xbf16, #tpu.memory_space<vmem>>, vector<1024x128xbf16>,
    return
  }
  func.func @transform_0(%arg0: i32) -> (i32, i32) {
    %c0_i32 = arith.constant 0 : i32
    %c0_i32_0 = arith.constant 0 : i32
    return %arg0, %c0_i32 : i32, i32
  }
  func.func @transform_1(%arg0: i32) -> (i32, i32) {
    %c0_i32 = arith.constant 0 : i32
    %c0_i32_0 = arith.constant 0 : i32
    %c0_i32_1 = arith.constant 0 : i32
    return %c0_i32, %c0_i32_0 : i32, i32
  }
  func.func @transform_2(%arg0: i32) -> (i32, i32) {
    %c0_i32 = arith.constant 0 : i32
    %c0_i32_0 = arith.constant 0 : i32
    return %arg0, %c0_i32 : i32, i32
  }
}

module attributes {stable_mosaic.version = 11 : i64} {
  func.func @_gemm_tanh_kernel(%arg0: i32, %arg1: memref<1024x128xbf16, #tpu.memory_space<vmem>>, %arg2: memref<128x128xbf16, #tpu.memory_space<vmem>>, %arg3: memref<1024x128xf32, #tpu.memory_space<vmem>>) attributes {dimension_semantics = [#tpu.dimension_semantics<parallel>], iteration_bounds = array<i64: 8>, scalar_prefetch = 0 : i64, scratch_operands = 0 : i64, tpu.core_type = #tpu.core_type<tc>, window_params = [{transform_indices = @transform_0, window_bounds = array<i64: 1024, 128>}, {pipeline_mode = #tpu.pipeline_mode<synchronous>, transform_indices = @transform_1, window_bounds = array<i64: 128, 128>}, {transform_indices = @transform_2, window_bounds = array<i64: 1024, 128>}]} {
    %c0 = arith.constant 0 : index
    %c0_0 = arith.constant 0 : index
    %0 = vector.load %arg1[%c0, %c0_0] : memref<1024x128xbf16, #tpu.memory_space<vmem>>, vector<1024x128xbf16>
    %c0_1 = arith.constant 0 : index
    %c0_2 = arith.constant 0 : index
    %1 = vector.load %arg2[%c0_1, %c0_2] : memref<128x128xbf16, #tpu.memory_space<vmem>>, vector<128x128xbf16>
    %cst = arith.constant dense<0.000000e+00> : vector<1024x128xf32>
    %2 = tpu.matmul %0, %1, %cst {dimension_numbers = #tpu.dot_dimension_numbers<[1], [0], [0], [1], [0, 0, 1, 1], [], []>} : vector<1024x128xbf16>, vector<128x128xbf16>, vector<1024x128xf32> -> vector<1024x128xf32>
    %3 = math.tanh %2 : vector<1024x128xf32>
    %c0_3 = arith.constant 0 : index
    %c0_4 = arith.constant 0 : index
    %4 = vector.load %arg3[%c0_3, %c0_4] : memref<1024x128xf32, #tpu.memory_space<vmem>>, vector<1024x128xf32>
    tpu.vector_store %arg3[%c0_3, %c0_4], %3 {strides = array<i32>} : memref<1024x128xf32, #tpu.memory_space<vmem>>, vector<1024x128xf32>,
    return
  }
  func.func @transform_0(%arg0: i32) -> (i32, i32) {
    %c0_i32 = arith.constant 0 : i32
    %c0_i32_0 = arith.constant 0 : i32
    return %arg0, %c0_i32 : i32, i32
  }
  func.func @transform_1(%arg0: i32) -> (i32, i32) {
    %c0_i32 = arith.constant 0 : i32
    %c0_i32_0 = arith.constant 0 : i32
    %c0_i32_1 = arith.constant 0 : i32
    return %c0_i32, %c0_i32_0 : i32, i32
  }
  func.func @transform_2(%arg0: i32) -> (i32, i32) {
    %c0_i32 = arith.constant 0 : i32
    %c0_i32_0 = arith.constant 0 : i32
    return %arg0, %c0_i32 : i32, i32
  }
}

</mosaic_0001>

<bundles_post_ra>
// kernel: generator_forward.10
= control target key start
LH: loop header
LB: loop body
LE: loop exit
PB: predicated region body
PF: predicated region fallthrough
CT: control target
= control target key end

     0   :  { %s121_s0 = inlined_call_operand.vmem [shape: f32[32,128], index: 0, kind: input, shape index: {}]   ;;  %s122_s1 = inlined_call_operand.vmem [shape: f32[2,128], index: 1, kind: input, shape index: {}]   ;;  %s123_s2 = inlined_call_operand.vmem [shape: bf16[32,128], index: 2, kind: output, shape index: {}]  }
   0x1   :  { %v61_v0 = vld [vmem:[%s122_s1] ss:$0 sm:$0xff]  ;;  %v62_v1 = vld [vmem:[%s122_s1 + $0x1] ss:$0 sm:$0xff]  ;;  %v14_v3 = vld [vmem:[%s121_s0 + $0x8] sm:$0xff] }
   0x2   :  { %v13_v2 = vld [vmem:[%s121_s0] sm:$0xff]  ;;  %v15_v5 = vld [vmem:[%s121_s0 + $0x10] sm:$0xff]  ;;  %v16_v6 = vld [vmem:[%s121_s0 + $0x18] sm:$0xff]  ;;  %v22_v7 = vmul.f32 %v61_v0, %v14_v3 }
   0x3   :  { %v21_v4 = vmul.f32 %v61_v0, %v13_v2  ;;  %v23_v8 = vmul.f32 %v61_v0, %v15_v5  ;;  %v24_v9 = vmul.f32 %v61_v0, %v16_v6 }
   0x4   :  { %v30_v11 = vadd.f32 %v62_v1, %v22_v7 }
   0x5   :  { %v29_v10 = vadd.f32 %v62_v1, %v21_v4  ;;  %v31_v12 = vadd.f32 %v62_v1, %v23_v8  ;;  %v32_v13 = vadd.f32 %v62_v1, %v24_v9 }
   0x6   :  { %v34_v15 = vmax.f32 %v30_v11, 0.0 }
   0x7   :  { %v33_v14 = vmax.f32 %v29_v10, 0.0  ;;  %v35_v16 = vmax.f32 %v31_v12, 0.0  ;;  %v36_v17 = vmax.f32 %v32_v13, 0.0 }
   0x9   :  { %v74_v18 = vpack.c.bf16 %v34_v15, %v33_v14  ;;  %v79_v19 = vpack.c.bf16 %v36_v17, %v35_v16 }
   0xb   :  { %75 = vst [vmem:[%s123_s2] sm:$0xff] %v74_v18   ;;  %81 = vst [vmem:[%s123_s2 + $0x8] sm:$0xff] %v79_v19  }

// kernel: generator_forward.9
= control target key start
LH: loop header
LB: loop body
LE: loop exit
PB: predicated region body
PF: predicated region fallthrough
CT: control target
= control target key end

     0   :  { %v346_v20 = vmov 0.0   ;;  %vm247_vm0 = vcmask 1040384   ;;  %s448_s1 = inlined_call_operand.vmem [shape: bf16[256,128], index: 1, kind: input, shape index: {}]   ;;  %s449_s0 = inlined_call_operand.vmem [shape: bf16[32,256], index: 0, kind: input, shape index: {}]   ;;  %s450_s3 = inlined_call_operand.vmem [shape: f32[2,128], index: 3, kind: output, shape index: {1}]   ;;  %s451_s2 = inlined_call_operand.vmem [shape: f32[32,128], index: 2, kind: output, shape index: {0}]  }
   0x1   :  { %v324_v0 = vld [vmem:[%s448_s1 + $0x78] sm:$0xff]   ;;  %v326_v2 = vld [vmem:[%s448_s1 + $0x70] sm:$0xff]   ;;  %v328_v4 = vld [vmem:[%s448_s1 + $0x68] sm:$0xff]   ;;  %223 = vst [vmem:[%s450_s3] sm:$0x3] %v346_v20 }
   0x2   :  { %v325_v1 = vld [vmem:[%s448_s1 + $0x38] sm:$0xff]   ;;  %279 = vmatprep.subr.bf16.mxu0 %v324_v0  ;;  %307 = vmatprep.subr.bf16.mxu1 %v324_v0  ;;  %v327_v3 = vld [vmem:[%s448_s1 + $0x30] sm:$0xff]   ;;  %v329_v5 = vld [vmem:[%s448_s1 + $0x28] sm:$0xff]  }
   0x3   :  { %280 = vmatpush3.bf16.msra.mxu0 %v325_v1  ;;  %315 = vmatpush3.bf16.msra.mxu1 %v325_v1  ;;  %v330_v6 = vld [vmem:[%s448_s1 + $0x60] sm:$0xff]   ;;  %v332_v8 = vld [vmem:[%s448_s1 + $0x58] sm:$0xff]   ;;  %v334_v10 = vld [vmem:[%s448_s1 + $0x50] sm:$0xff]  }
   0x4   :  { %281 = vmatprep.subr.bf16.mxu0 %v326_v2  ;;  %308 = vmatprep.subr.bf16.mxu1 %v326_v2  ;;  %v331_v7 = vld [vmem:[%s448_s1 + $0x20] sm:$0xff]   ;;  %v333_v9 = vld [vmem:[%s448_s1 + $0x18] sm:$0xff]   ;;  %v335_v13 = vld [vmem:[%s448_s1 + $0x10] sm:$0xff]  }
   0x5   :  { %v342_v11 = vld [vmem:[%s449_s0 + $0x4] ss:$8 sps:$4 sm:$0xff]   ;;  %v345_v12 = vld [vmem:[%s449_s0 + $0x14] ss:$8 sps:$4 sm:$0xff]   ;;  %v340_v18 = vld [vmem:[%s449_s0] ss:$8 sps:$4 sm:$0xff]  }
   0x6   :  { %v336_v14 = vld [vmem:[%s448_s1 + $0x48] sm:$0xff]   ;;  %198 = vmatprep.mubr.bf16.mxu0 %v342_v11  ;;  %206 = vmatprep.mubr.bf16.mxu1 %v345_v12  ;;  %v338_v16 = vld [vmem:[%s448_s1 + $0x40] sm:$0xff]   ;;  %v343_v19 = vld [vmem:[%s449_s0 + $0x10] ss:$8 sps:$4 sm:$0xff]  }
   0x7   :  { %282 = vmatpush3.bf16.msra.mxu0 %v327_v3  ;;  %316 = vmatpush3.bf16.msra.mxu1 %v327_v3  ;;  %v337_v15 = vld [vmem:[%s448_s1 + $0x8] sm:$0xff]   ;;  %v339_v17 = vld [vmem:[%s448_s1] sm:$0xff]  }
   0x8   :  { %283 = vmatprep.subr.bf16.mxu0 %v328_v4  ;;  %309 = vmatprep.subr.bf16.mxu1 %v328_v4  ;;  %v246_v55 = vld [vmem:[%s450_s3] sm:$0x3] }
   0xb   :  { %284 = vmatpush3.bf16.msra.mxu0 %v329_v5  ;;  %317 = vmatpush3.bf16.msra.mxu1 %v329_v5 }
   0xc   :  { %285 = vmatprep.subr.bf16.mxu0 %v330_v6  ;;  %310 = vmatprep.subr.bf16.mxu1 %v330_v6 }
   0xf   :  { %286 = vmatpush3.bf16.msra.mxu0 %v331_v7  ;;  %318 = vmatpush3.bf16.msra.mxu1 %v331_v7 }
  0x10   :  { %287 = vmatprep.subr.bf16.mxu0 %v332_v8  ;;  %311 = vmatprep.subr.bf16.mxu1 %v332_v8 }
  0x13   :  { %288 = vmatpush3.bf16.msra.mxu0 %v333_v9  ;;  %319 = vmatpush3.bf16.msra.mxu1 %v333_v9 }
  0x14   :  { %289 = vmatprep.subr.bf16.mxu0 %v334_v10  ;;  %312 = vmatprep.subr.bf16.mxu1 %v334_v10 }
  0x17   :  { %290 = vmatpush3.bf16.msra.mxu0 %v335_v13  ;;  %320 = vmatpush3.bf16.msra.mxu1 %v335_v13 }
  0x18   :  { %291 = vmatprep.subr.bf16.mxu0 %v336_v14  ;;  %313 = vmatprep.subr.bf16.mxu1 %v336_v14 }
  0x1b   :  { %292 = vmatpush3.bf16.msra.mxu0 %v337_v15  ;;  %321 = vmatpush3.bf16.msra.mxu1 %v337_v15 }
  0x1c   :  { %293 = vmatprep.subr.bf16.mxu0 %v338_v16  ;;  %314 = vmatprep.subr.bf16.mxu1 %v338_v16 }
  0x1f   :  { %294 = vmatpush3.bf16.msra.mxu0 %v339_v17  ;;  %322 = vmatpush3.bf16.msra.mxu1 %v339_v17 }
  0x22   :  { %199 = vmatmul.mubr.bf16.vlgmr.msra.gmra.mxu0 %v340_v18  ;;  %207 = vmatmul.mubr.bf16.vlgmr.msra.gmra.mxu1 %v343_v19 }
  0xe2   :  { %v295_v21 = vpop.f32.mrf.mxu0  ;;  %v301_v22 = vpop.f32.mrf.mxu1 }
  0xe4   :  { %v296_v23 = vpop.f32.mrf.mxu0  ;;  %v302_v24 = vpop.f32.mrf.mxu1 }
  0xe5   :  { %v297_v25 = vadd.f32 %v296_v23, %v295_v21  ;;  %v303_v26 = vadd.f32 %v302_v24, %v301_v22 }
  0xe6   :  { %v298_v27 = vpop.f32.mrf.mxu0  ;;  %v304_v28 = vpop.f32.mrf.mxu1 }
  0xe7   :  { %215 = vst [vmem:[%s451_s2] sm:$0xff] %v297_v25  ;;  %217 = vst [vmem:[%s451_s2 + $0x10] sm:$0xff] %v303_v26  ;;  %v233_v33 = vmul.f32 %v297_v25, %v297_v25  ;;  %v235_v36 = vmul.f32 %v303_v26, %v303_v26 }
  0xe8   :  { %v299_v29 = vpop.f32.mrf.mxu0  ;;  %v305_v30 = vpop.f32.mrf.mxu1 }
  0xe9   :  { %v300_v31 = vadd.f32 %v299_v29, %v298_v27  ;;  %v306_v32 = vadd.f32 %v305_v30, %v304_v28 }
  0xeb   :  { %216 = vst [vmem:[%s451_s2 + $0x8] sm:$0xff] %v300_v31  ;;  %v224_v34 = vadd.f32 %v300_v31, %v297_v25  ;;  %v234_v35 = vmul.f32 %v300_v31, %v300_v31  ;;  %218 = vst [vmem:[%s451_s2 + $0x18] sm:$0xff] %v306_v32  ;;  %v236_v40 = vmul.f32 %v306_v32, %v306_v32 }
  0xed   :  { %v237_v37 = vadd.f32 %v234_v35, %v233_v33  ;;  %v225_v38 = vadd.f32 %v303_v26, %v224_v34 }
  0xef   :  { %v226_v39 = vadd.f32 %v306_v32, %v225_v38  ;;  %v238_v41 = vadd.f32 %v237_v37, %v235_v36 }
  0xf1   :  { %v227_v42 = vrot.slane %v226_v39, 4  ;;  %v239_v43 = vadd.f32 %v238_v41, %v236_v40 }
  0xf3   :  { %v228_v44 = vadd.f32 %v227_v42, %v226_v39  ;;  %v240_v45 = vrot.slane %v239_v43, 4 }
  0xf5   :  { %v229_v46 = vrot.slane %v228_v44, 2  ;;  %v241_v47 = vadd.f32 %v240_v45, %v239_v43 }
  0xf7   :  { %v230_v48 = vadd.f32 %v229_v46, %v228_v44  ;;  %v242_v49 = vrot.slane %v241_v47, 2 }
  0xf9   :  { %v231_v50 = vrot.slane %v230_v48, 1  ;;  %v243_v51 = vadd.f32 %v242_v49, %v241_v47 }
  0xfb   :  { %v244_v52 = vrot.slane %v243_v51, 1  ;;  %v232_v53 = vadd.f32 %v231_v50, %v230_v48 }
  0xfd   :  { %v245_v54 = vadd.f32 %v244_v52, %v243_v51 }
  0xff   :  { %v248_v56 = vsel %vm247_vm0, %v232_v53, %v245_v54 }
 0x100   :  { %v249_v57 = vadd.f32 %v248_v56, %v246_v55 }
 0x102   :  { %250 = vst [vmem:[%s450_s3] sm:$0x3] %v249_v57 }

// kernel: generator_forward.12
= control target key start
LH: loop header
LB: loop body
LE: loop exit
PB: predicated region body
PF: predicated region fallthrough
CT: control target
= control target key end

     0   :  { %s379_s0 = inlined_call_operand.vmem [shape: f32[128,128], index: 0, kind: input, shape index: {}]   ;;  %s380_s1 = inlined_call_operand.vmem [shape: f32[2,128], index: 1, kind: input, shape index: {}]   ;;  %s381_s2 = inlined_call_operand.vmem [shape: bf16[128,128], index: 2, kind: output, shape index: {}]  }
   0x1   :  { %v268_v0 = vld [vmem:[%s380_s1] ss:$0 sm:$0xff]  ;;  %v273_v1 = vld [vmem:[%s380_s1 + $0x1] ss:$0 sm:$0xff]  ;;  %v14_v3 = vld [vmem:[%s379_s0 + $0x8] sm:$0xff] }
   0x2   :  { %v13_v2 = vld [vmem:[%s379_s0] sm:$0xff]  ;;  %v15_v5 = vld [vmem:[%s379_s0 + $0x10] sm:$0xff]  ;;  %v16_v6 = vld [vmem:[%s379_s0 + $0x18] sm:$0xff]  ;;  %v34_v7 = vmul.f32 %v268_v0, %v14_v3 }
   0x3   :  { %v33_v4 = vmul.f32 %v268_v0, %v13_v2  ;;  %v35_v8 = vmul.f32 %v268_v0, %v15_v5  ;;  %v36_v9 = vmul.f32 %v268_v0, %v16_v6  ;;  %v17_v10 = vld [vmem:[%s379_s0 + $0x20] sm:$0xff]  ;;  %v18_v11 = vld [vmem:[%s379_s0 + $0x28] sm:$0xff]  ;;  %v19_v12 = vld [vmem:[%s379_s0 + $0x30] sm:$0xff] }
   0x4   :  { %v37_v14 = vmul.f32 %v268_v0, %v17_v10  ;;  %v38_v15 = vmul.f32 %v268_v0, %v18_v11  ;;  %v20_v16 = vld [vmem:[%s379_s0 + $0x38] sm:$0xff]  ;;  %v39_v17 = vmul.f32 %v268_v0, %v19_v12  ;;  %v54_v18 = vadd.f32 %v273_v1, %v34_v7  ;;  %v21_v22 = vld [vmem:[%s379_s0 + $0x40] sm:$0xff]  ;;  %v22_v27 = vld [vmem:[%s379_s0 + $0x48] sm:$0xff] }
   0x5   :  { %v53_v13 = vadd.f32 %v273_v1, %v33_v4  ;;  %v55_v19 = vadd.f32 %v273_v1, %v35_v8  ;;  %v56_v20 = vadd.f32 %v273_v1, %v36_v9  ;;  %v40_v21 = vmul.f32 %v268_v0, %v20_v16  ;;  %v23_v32 = vld [vmem:[%s379_s0 + $0x50] sm:$0xff]  ;;  %v24_v33 = vld [vmem:[%s379_s0 + $0x58] sm:$0xff]  ;;  %v25_v38 = vld [vmem:[%s379_s0 + $0x60] sm:$0xff] }
   0x6   :  { %v57_v24 = vadd.f32 %v273_v1, %v37_v14  ;;  %v58_v25 = vadd.f32 %v273_v1, %v38_v15  ;;  %v59_v26 = vadd.f32 %v273_v1, %v39_v17  ;;  %v70_v28 = vmax.f32 %v54_v18, 0.0  ;;  %v26_v39 = vld [vmem:[%s379_s0 + $0x68] sm:$0xff]  ;;  %v27_v44 = vld [vmem:[%s379_s0 + $0x70] sm:$0xff]  ;;  %v28_v49 = vld [vmem:[%s379_s0 + $0x78] sm:$0xff] }
   0x7   :  { %v69_v23 = vmax.f32 %v53_v13, 0.0  ;;  %v71_v29 = vmax.f32 %v55_v19, 0.0  ;;  %v72_v30 = vmax.f32 %v56_v20, 0.0  ;;  %v60_v31 = vadd.f32 %v273_v1, %v40_v21 }
   0x8   :  { %v73_v34 = vmax.f32 %v57_v24, 0.0  ;;  %v74_v35 = vmax.f32 %v58_v25, 0.0  ;;  %v75_v36 = vmax.f32 %v59_v26, 0.0  ;;  %v41_v37 = vmul.f32 %v268_v0, %v21_v22 }
   0x9   :  { %v206_v40 = vpack.c.bf16 %v70_v28, %v69_v23  ;;  %v211_v41 = vpack.c.bf16 %v72_v30, %v71_v29  ;;  %v76_v42 = vmax.f32 %v60_v31, 0.0  ;;  %v42_v43 = vmul.f32 %v268_v0, %v22_v27 }
   0xa   :  { %v216_v45 = vpack.c.bf16 %v74_v35, %v73_v34  ;;  %v61_v46 = vadd.f32 %v273_v1, %v41_v37  ;;  %v43_v47 = vmul.f32 %v268_v0, %v23_v32  ;;  %v44_v48 = vmul.f32 %v268_v0, %v24_v33 }
   0xb   :  { %207 = vst [vmem:[%s381_s2] sm:$0xff] %v206_v40   ;;  %243 = vst [vmem:[%s381_s2 + $0x8] sm:$0xff] %v211_v41   ;;  %v221_v50 = vpack.c.bf16 %v76_v42, %v75_v36  ;;  %v62_v51 = vadd.f32 %v273_v1, %v42_v43  ;;  %v45_v52 = vmul.f32 %v268_v0, %v25_v38 }
   0xc   :  { %v46_v53 = vmul.f32 %v268_v0, %v26_v39  ;;  %244 = vst [vmem:[%s381_s2 + $0x10] sm:$0xff] %v216_v45   ;;  %v77_v54 = vmax.f32 %v61_v46, 0.0  ;;  %v63_v55 = vadd.f32 %v273_v1, %v43_v47  ;;  %v64_v56 = vadd.f32 %v273_v1, %v44_v48 }
   0xd   :  { %v47_v57 = vmul.f32 %v268_v0, %v27_v44  ;;  %245 = vst [vmem:[%s381_s2 + $0x18] sm:$0xff] %v221_v50   ;;  %v78_v58 = vmax.f32 %v62_v51, 0.0  ;;  %v65_v59 = vadd.f32 %v273_v1, %v45_v52  ;;  %v48_v61 = vmul.f32 %v268_v0, %v28_v49 }
   0xe   :  { %v66_v60 = vadd.f32 %v273_v1, %v46_v53  ;;  %v79_v62 = vmax.f32 %v63_v55, 0.0  ;;  %v80_v63 = vmax.f32 %v64_v56, 0.0 }
   0xf   :  { %v67_v2 = vadd.f32 %v273_v1, %v47_v57  ;;  %v226_v3 = vpack.c.bf16 %v78_v58, %v77_v54  ;;  %v81_v4 = vmax.f32 %v65_v59, 0.0  ;;  %v68_v6 = vadd.f32 %v273_v1, %v48_v61 }
  0x10   :  { %v82_v5 = vmax.f32 %v66_v60, 0.0  ;;  %v231_v7 = vpack.c.bf16 %v80_v63, %v79_v62 }
  0x11   :  { %v83_v8 = vmax.f32 %v67_v2, 0.0  ;;  %246 = vst [vmem:[%s381_s2 + $0x20] sm:$0xff] %v226_v3   ;;  %v84_v10 = vmax.f32 %v68_v6, 0.0 }
  0x12   :  { %v236_v9 = vpack.c.bf16 %v82_v5, %v81_v4  ;;  %247 = vst [vmem:[%s381_s2 + $0x28] sm:$0xff] %v231_v7  }
  0x13   :  { %v241_v0 = vpack.c.bf16 %v84_v10, %v83_v8 }
  0x14   :  { %248 = vst [vmem:[%s381_s2 + $0x30] sm:$0xff] %v236_v9  }
  0x15   :  { %249 = vst [vmem:[%s381_s2 + $0x38] sm:$0xff] %v241_v0  }

// kernel: generator_forward.11
= control target key start
LH: loop header
LB: loop body
LE: loop exit
PB: predicated region body
PF: predicated region fallthrough
CT: control target
= control target key end

     0   :  { %vm1378_vm0 = vcmask 1040384   ;;  %s2493_s1 = inlined_call_operand.vmem [shape: bf16[1024,128], index: 1, kind: input, shape index: {}]   ;;  %s2494_s0 = inlined_call_operand.vmem [shape: bf16[128,1024], index: 0, kind: input, shape index: {}]   ;;  %s2495_s3 = inlined_call_operand.vmem [shape: f32[2,128], index: 3, kind: output, shape index: {1}]   ;;  %s2496_s2 = inlined_call_operand.vmem [shape: f32[128,128], index: 2, kind: output, shape index: {0}]  }
   0x1   :  { %v1775_v0 = vld [vmem:[%s2493_s1 + $0x78] sm:$0xff]   ;;  %v1779_v4 = vld [vmem:[%s2493_s1 + $0x70] sm:$0xff]   ;;  %v1783_v8 = vld [vmem:[%s2493_s1 + $0x68] sm:$0xff]  }
   0x2   :  { %v1776_v1 = vld [vmem:[%s2493_s1 + $0xf8] sm:$0xff]   ;;  %1518 = vmatprep.subr.bf16.mxu0 %v1775_v0  ;;  %v1780_v5 = vld [vmem:[%s2493_s1 + $0xf0] sm:$0xff]   ;;  %v1784_v9 = vld [vmem:[%s2493_s1 + $0xe8] sm:$0xff]  }
   0x3   :  { %v1777_v2 = vld [vmem:[%s2493_s1 + $0x38] sm:$0xff]   ;;  %1582 = vmatprep.subr.bf16.mxu1 %v1776_v1  ;;  %v1781_v6 = vld [vmem:[%s2493_s1 + $0x30] sm:$0xff]   ;;  %v1785_v10 = vld [vmem:[%s2493_s1 + $0x28] sm:$0xff]  }
   0x4   :  { %v1778_v3 = vld [vmem:[%s2493_s1 + $0xb8] sm:$0xff]   ;;  %1519 = vmatpush3.bf16.msra.mxu0 %v1777_v2  ;;  %v1782_v7 = vld [vmem:[%s2493_s1 + $0xb0] sm:$0xff]   ;;  %v1786_v11 = vld [vmem:[%s2493_s1 + $0xa8] sm:$0xff]  }
   0x5   :  { %1583 = vmatpush3.bf16.msra.mxu1 %v1778_v3  ;;  %1520 = vmatprep.subr.bf16.mxu0 %v1779_v4  ;;  %v1787_v12 = vld [vmem:[%s2493_s1 + $0x60] sm:$0xff]   ;;  %v1791_v16 = vld [vmem:[%s2493_s1 + $0x58] sm:$0xff]   ;;  %v1795_v20 = vld [vmem:[%s2493_s1 + $0x50] sm:$0xff]  }
   0x6   :  { %1584 = vmatprep.subr.bf16.mxu1 %v1780_v5  ;;  %v1788_v13 = vld [vmem:[%s2493_s1 + $0xe0] sm:$0xff]   ;;  %v1792_v17 = vld [vmem:[%s2493_s1 + $0xd8] sm:$0xff]   ;;  %v1796_v21 = vld [vmem:[%s2493_s1 + $0xd0] sm:$0xff]  }
   0x7   :  { %v1789_v14 = vld [vmem:[%s2493_s1 + $0x20] sm:$0xff]   ;;  %v1793_v18 = vld [vmem:[%s2493_s1 + $0x18] sm:$0xff]   ;;  %v1797_v22 = vld [vmem:[%s2493_s1 + $0x10] sm:$0xff]  }
   0x8   :  { %1521 = vmatpush3.bf16.msra.mxu0 %v1781_v6  ;;  %v1790_v15 = vld [vmem:[%s2493_s1 + $0xa0] sm:$0xff]   ;;  %v1794_v19 = vld [vmem:[%s2493_s1 + $0x98] sm:$0xff]   ;;  %v1798_v23 = vld [vmem:[%s2493_s1 + $0x90] sm:$0xff]  }
   0x9   :  { %1585 = vmatpush3.bf16.msra.mxu1 %v1782_v7  ;;  %1522 = vmatprep.subr.bf16.mxu0 %v1783_v8  ;;  %v1799_v24 = vld [vmem:[%s2493_s1 + $0x48] sm:$0xff]   ;;  %v1803_v28 = vld [vmem:[%s2493_s1 + $0x40] sm:$0xff]   ;;  %v1807_v40 = vld [vmem:[%s2493_s1 + $0x178] sm:$0xff]  }
   0xa   :  { %1586 = vmatprep.subr.bf16.mxu1 %v1784_v9  ;;  %v1800_v25 = vld [vmem:[%s2493_s1 + $0xc8] sm:$0xff]   ;;  %v1804_v29 = vld [vmem:[%s2493_s1 + $0xc0] sm:$0xff]   ;;  %v1808_v41 = vld [vmem:[%s2493_s1 + $0x138] sm:$0xff]  }
   0xb   :  { %v1801_v26 = vld [vmem:[%s2493_s1 + $0x8] sm:$0xff]   ;;  %v1805_v30 = vld [vmem:[%s2493_s1] sm:$0xff]   ;;  %v1809_v42 = vld [vmem:[%s2493_s1 + $0x1f8] sm:$0xff]  }
   0xc   :  { %1523 = vmatpush3.bf16.msra.mxu0 %v1785_v10  ;;  %v1802_v27 = vld [vmem:[%s2493_s1 + $0x88] sm:$0xff]   ;;  %v1806_v31 = vld [vmem:[%s2493_s1 + $0x80] sm:$0xff]   ;;  %v1810_v43 = vld [vmem:[%s2493_s1 + $0x1b8] sm:$0xff]  }
   0xd   :  { %1587 = vmatpush3.bf16.msra.mxu1 %v1786_v11  ;;  %1524 = vmatprep.subr.bf16.mxu0 %v1787_v12  ;;  %v14_v32 = vld [vmem:[%s2494_s0] sm:$0xff]  ;;  %v15_v34 = vld [vmem:[%s2494_s0 + $0x8] sm:$0xff]  ;;  %v1811_v50 = vld [vmem:[%s2493_s1 + $0x170] sm:$0xff]  }
   0xe   :  { %1588 = vmatprep.subr.bf16.mxu1 %v1788_v13  ;;  %v18_v33 = vld [vmem:[%s2494_s0 + $0x20] sm:$0xff]  ;;  %v19_v37 = vld [vmem:[%s2494_s0 + $0x28] sm:$0xff]  ;;  %v1812_v52 = vld [vmem:[%s2493_s1 + $0x130] sm:$0xff]  }
   0xf   :  { %v1390_v35 = vcombine.low %v14_v32, %v18_v33  ;;  %v1391_v36 = vcombine.high %v14_v32, %v18_v33  ;;  %v1392_v38 = vcombine.low %v15_v34, %v19_v37  ;;  %v1393_v39 = vcombine.high %v15_v34, %v19_v37  ;;  %v22_v44 = vld [vmem:[%s2494_s0 + $0x40] sm:$0xff]  ;;  %v23_v47 = vld [vmem:[%s2494_s0 + $0x48] sm:$0xff]  ;;  %v1813_v54 = vld [vmem:[%s2493_s1 + $0x1f0] sm:$0xff]  }
  0x10   :  { %1525 = vmatpush3.bf16.msra.mxu0 %v1789_v14  ;;  %v26_v45 = vld [vmem:[%s2494_s0 + $0x60] sm:$0xff]  ;;  %v27_v48 = vld [vmem:[%s2494_s0 + $0x68] sm:$0xff]  ;;  %v1814_v55 = vld [vmem:[%s2493_s1 + $0x1b0] sm:$0xff]  }
  0x11   :  { %1589 = vmatpush3.bf16.msra.mxu1 %v1790_v15  ;;  %1526 = vmatprep.subr.bf16.mxu0 %v1791_v16  ;;  %v1399_v46 = vcombine.high %v22_v44, %v26_v45  ;;  %v1401_v49 = vcombine.high %v23_v47, %v27_v48  ;;  %v1398_v51 = vcombine.low %v22_v44, %v26_v45  ;;  %v30_v56 = vld [vmem:[%s2494_s0 + $0x80] sm:$0xff]  ;;  %v31_v58 = vld [vmem:[%s2494_s0 + $0x88] sm:$0xff]  ;;  %v1829_v32 = vld [vmem:[%s2493_s1 + $0x1d0] sm:$0xff]  }
  0x12   :  { %1590 = vmatprep.subr.bf16.mxu1 %v1792_v17  ;;  %942 = vmatprep.mubr.bf16.mxu0 %v1391_v36  ;;  %v1400_v53 = vcombine.low %v23_v47, %v27_v48  ;;  %v34_v57 = vld [vmem:[%s2494_s0 + $0xa0] sm:$0xff]  ;;  %v35_v59 = vld [vmem:[%s2494_s0 + $0xa8] sm:$0xff]  ;;  %v1830_v33 = vld [vmem:[%s2493_s1 + $0x190] sm:$0xff]  }
  0x13   :  { %1039 = vmatprep.mubr.bf16.mxu1 %v1393_v39  ;;  %v1407_v60 = vcombine.high %v30_v56, %v34_v57  ;;  %v1409_v61 = vcombine.high %v31_v58, %v35_v59  ;;  %v1815_v62 = vld [vmem:[%s2493_s1 + $0x168] sm:$0xff]   ;;  %v1406_v2 = vcombine.low %v30_v56, %v34_v57  ;;  %v38_v3 = vld [vmem:[%s2494_s0 + $0xc0] sm:$0xff]  ;;  %v1408_v6 = vcombine.low %v31_v58, %v35_v59 }
  0x14   :  { %1527 = vmatpush3.bf16.msra.mxu0 %v1793_v18  ;;  %v1816_v63 = vld [vmem:[%s2493_s1 + $0x128] sm:$0xff]   ;;  %v42_v4 = vld [vmem:[%s2494_s0 + $0xe0] sm:$0xff]  ;;  %v1823_v18 = vld [vmem:[%s2493_s1 + $0x158] sm:$0xff]  }
  0x15   :  { %1591 = vmatpush3.bf16.msra.mxu1 %v1794_v19  ;;  %1528 = vmatprep.subr.bf16.mxu0 %v1795_v20  ;;  %v1817_v0 = vld [vmem:[%s2493_s1 + $0x1e8] sm:$0xff]   ;;  %v1415_v7 = vcombine.high %v38_v3, %v42_v4  ;;  %v1819_v10 = vld [vmem:[%s2493_s1 + $0x160] sm:$0xff]   ;;  %v1414_v19 = vcombine.low %v38_v3, %v42_v4  ;;  %v1824_v20 = vld [vmem:[%s2493_s1 + $0x118] sm:$0xff]  }
  0x16   :  { %1592 = vmatprep.subr.bf16.mxu1 %v1796_v21  ;;  %v1818_v1 = vld [vmem:[%s2493_s1 + $0x1a8] sm:$0xff]   ;;  %v1820_v11 = vld [vmem:[%s2493_s1 + $0x120] sm:$0xff]  }
  0x17   :  { %v39_v5 = vld [vmem:[%s2494_s0 + $0xc8] sm:$0xff]  ;;  %v1821_v12 = vld [vmem:[%s2493_s1 + $0x1e0] sm:$0xff]  }
  0x18   :  { %1529 = vmatpush3.bf16.msra.mxu0 %v1797_v22  ;;  %v43_v8 = vld [vmem:[%s2494_s0 + $0xe8] sm:$0xff]  ;;  %v1822_v13 = vld [vmem:[%s2493_s1 + $0x1a0] sm:$0xff]  }
  0x19   :  { %1593 = vmatpush3.bf16.msra.mxu1 %v1798_v23  ;;  %1530 = vmatprep.subr.bf16.mxu0 %v1799_v24  ;;  %v1417_v9 = vcombine.high %v39_v5, %v43_v8  ;;  %v46_v14 = vld [vmem:[%s2494_s0 + $0x100] sm:$0xff]  ;;  %v47_v16 = vld [vmem:[%s2494_s0 + $0x108] sm:$0xff]  ;;  %v1416_v21 = vcombine.low %v39_v5, %v43_v8  ;;  %v1825_v23 = vld [vmem:[%s2493_s1 + $0x1d8] sm:$0xff]  }
  0x1a   :  { %1594 = vmatprep.subr.bf16.mxu1 %v1800_v25  ;;  %v50_v15 = vld [vmem:[%s2494_s0 + $0x120] sm:$0xff]  ;;  %v51_v17 = vld [vmem:[%s2494_s0 + $0x128] sm:$0xff]  ;;  %v1826_v25 = vld [vmem:[%s2493_s1 + $0x198] sm:$0xff]  }
  0x1b   :  { %v1423_v22 = vcombine.high %v46_v14, %v50_v15  ;;  %v1425_v24 = vcombine.high %v47_v16, %v51_v17  ;;  %v1422_v34 = vcombine.low %v46_v14, %v50_v15  ;;  %v1832_v39 = vld [vmem:[%s2493_s1 + $0x108] sm:$0xff]   ;;  %v1836_v48 = vld [vmem:[%s2493_s1 + $0x100] sm:$0xff]   ;;  %v25_v8 = vld [vmem:[%s2494_s0 + $0x58] sm:$0xff] }
  0x1c   :  { %1531 = vmatpush3.bf16.msra.mxu0 %v1801_v26  ;;  %v54_v26 = vld [vmem:[%s2494_s0 + $0x140] sm:$0xff]  ;;  %v63_v44 = vld [vmem:[%s2494_s0 + $0x188] sm:$0xff]  ;;  %v32_v14 = vld [vmem:[%s2494_s0 + $0x90] sm:$0xff] }
  0x1d   :  { %1595 = vmatpush3.bf16.msra.mxu1 %v1802_v27  ;;  %1532 = vmatprep.subr.bf16.mxu0 %v1803_v28  ;;  %v58_v27 = vld [vmem:[%s2494_s0 + $0x160] sm:$0xff]  ;;  %v1827_v28 = vld [vmem:[%s2493_s1 + $0x150] sm:$0xff]   ;;  %v67_v45 = vld [vmem:[%s2494_s0 + $0x1a8] sm:$0xff] }
  0x1e   :  { %1596 = vmatprep.subr.bf16.mxu1 %v1804_v29  ;;  %v55_v29 = vld [vmem:[%s2494_s0 + $0x148] sm:$0xff]  ;;  %v1431_v36 = vcombine.high %v54_v26, %v58_v27  ;;  %v1430_v47 = vcombine.low %v54_v26, %v58_v27  ;;  %v1440_v59 = vcombine.low %v63_v44, %v67_v45  ;;  %v36_v15 = vld [vmem:[%s2494_s0 + $0xb0] sm:$0xff] }
  0x1f   :  { %v71_v56 = vld [vmem:[%s2494_s0 + $0x1c8] sm:$0xff]  ;;  %v1410_v26 = vcombine.low %v32_v14, %v36_v15 }
  0x20   :  { %1533 = vmatpush3.bf16.msra.mxu0 %v1805_v30  ;;  %v59_v30 = vld [vmem:[%s2494_s0 + $0x168] sm:$0xff] }
  0x21   :  { %1597 = vmatpush3.bf16.msra.mxu1 %v1806_v31  ;;  %1646 = vmatprep.subr.bf16.mxu0 %v1807_v40  ;;  %v1828_v31 = vld [vmem:[%s2493_s1 + $0x110] sm:$0xff]   ;;  %v1433_v37 = vcombine.high %v55_v29, %v59_v30  ;;  %v1833_v40 = vld [vmem:[%s2493_s1 + $0x1c8] sm:$0xff]  }
  0x22   :  { %1710 = vmatprep.subr.bf16.mxu1 %v1809_v42  ;;  %v66_v42 = vld [vmem:[%s2494_s0 + $0x1a0] sm:$0xff]  ;;  %v75_v57 = vld [vmem:[%s2494_s0 + $0x1e8] sm:$0xff] }
  0x23   :  { %943 = vmatmul.mubr.bf16.vlgmr.msra.gmra.mxu0 %v1390_v35  ;;  %v1424_v35 = vcombine.low %v47_v16, %v51_v17  ;;  %v1448_v3 = vcombine.low %v71_v56, %v75_v57  ;;  %v33_v16 = vld [vmem:[%s2494_s0 + $0x98] sm:$0xff] }
  0x24   :  { %1040 = vmatmul.mubr.bf16.vlgmr.msra.gmra.mxu1 %v1392_v38  ;;  %1647 = vmatpush3.bf16.msra.mxu0 %v1808_v41  ;;  %v1831_v38 = vld [vmem:[%s2493_s1 + $0x148] sm:$0xff]   ;;  %v62_v41 = vld [vmem:[%s2494_s0 + $0x180] sm:$0xff]  ;;  %v37_v17 = vld [vmem:[%s2494_s0 + $0xb8] sm:$0xff] }
  0x25   :  { %1711 = vmatpush3.bf16.msra.mxu1 %v1810_v43  ;;  %950 = vmatprep.mubr.bf16.mxu0 %v1399_v46  ;;  %v1834_v43 = vld [vmem:[%s2493_s1 + $0x188] sm:$0xff]   ;;  %v1835_v46 = vld [vmem:[%s2493_s1 + $0x140] sm:$0xff]   ;;  %v1438_v58 = vcombine.low %v62_v41, %v66_v42  ;;  %v1412_v27 = vcombine.low %v33_v16, %v37_v17 }
  0x26   :  { %1047 = vmatprep.mubr.bf16.mxu1 %v1401_v49  ;;  %1648 = vmatprep.subr.bf16.mxu0 %v1811_v50  ;;  %v1432_v49 = vcombine.low %v55_v29, %v59_v30  ;;  %v1439_v50 = vcombine.high %v62_v41, %v66_v42  ;;  %v48_v30 = vld [vmem:[%s2494_s0 + $0x110] sm:$0xff]  ;;  %v61_v41 = vld [vmem:[%s2494_s0 + $0x178] sm:$0xff] }
  0x27   :  { %1712 = vmatprep.subr.bf16.mxu1 %v1813_v54  ;;  %v70_v54 = vld [vmem:[%s2494_s0 + $0x1c0] sm:$0xff] }
  0x28   :  { %1649 = vmatpush3.bf16.msra.mxu0 %v1812_v52  ;;  %v1441_v52 = vcombine.high %v63_v44, %v67_v45 }
  0x29   :  { %1713 = vmatpush3.bf16.msra.mxu1 %v1814_v55  ;;  %1650 = vmatprep.subr.bf16.mxu0 %v1815_v62  ;;  %v74_v55 = vld [vmem:[%s2494_s0 + $0x1e0] sm:$0xff]  ;;  %v16_v62 = vld [vmem:[%s2494_s0 + $0x10] sm:$0xff] }
  0x2a   :  { %1714 = vmatprep.subr.bf16.mxu1 %v1817_v0  ;;  %v17_v0 = vld [vmem:[%s2494_s0 + $0x18] sm:$0xff] }
  0x2b   :  { %951 = vmatmul.mubr.bf16.gmra.mxu0 %v1398_v51  ;;  %v1837_v51 = vld [vmem:[%s2493_s1 + $0x1c0] sm:$0xff]  }
  0x2c   :  { %1048 = vmatmul.mubr.bf16.gmra.mxu1 %v1400_v53  ;;  %958 = vmatprep.mubr.bf16.mxu0 %v1407_v60  ;;  %v1838_v53 = vld [vmem:[%s2493_s1 + $0x180] sm:$0xff]   ;;  %v1447_v60 = vcombine.high %v70_v54, %v74_v55 }
  0x2d   :  { %1055 = vmatprep.mubr.bf16.mxu1 %v1409_v61  ;;  %1651 = vmatpush3.bf16.msra.mxu0 %v1816_v63  ;;  %v1449_v61 = vcombine.high %v71_v56, %v75_v57  ;;  %v20_v63 = vld [vmem:[%s2494_s0 + $0x30] sm:$0xff]  ;;  %v73_v56 = vld [vmem:[%s2494_s0 + $0x1d8] sm:$0xff] }
  0x2e   :  { %1715 = vmatpush3.bf16.msra.mxu1 %v1818_v1  ;;  %1652 = vmatprep.subr.bf16.mxu0 %v1819_v10  ;;  %v21_v1 = vld [vmem:[%s2494_s0 + $0x38] sm:$0xff]  ;;  %v1395_v4 = vcombine.high %v16_v62, %v20_v63  ;;  %v1394_v10 = vcombine.low %v16_v62, %v20_v63 }
  0x2f   :  { %1716 = vmatprep.subr.bf16.mxu1 %v1821_v12  ;;  %v1397_v5 = vcombine.high %v17_v0, %v21_v1  ;;  %v77_v57 = vld [vmem:[%s2494_s0 + $0x1f8] sm:$0xff] }
  0x30   :  { %v1452_v63 = vcombine.low %v73_v56, %v77_v57 }
  0x31   :  { %1653 = vmatpush3.bf16.msra.mxu0 %v1820_v11  ;;  %v1396_v11 = vcombine.low %v17_v0, %v21_v1 }
  0x32   :  { %1717 = vmatpush3.bf16.msra.mxu1 %v1822_v13  ;;  %1654 = vmatprep.subr.bf16.mxu0 %v1823_v18 }
  0x33   :  { %959 = vmatmul.mubr.bf16.gmra.mxu0 %v1406_v2  ;;  %1718 = vmatprep.subr.bf16.mxu1 %v1825_v23  ;;  %v1446_v2 = vcombine.low %v70_v54, %v74_v55  ;;  %v44_v23 = vld [vmem:[%s2494_s0 + $0xf0] sm:$0xff] }
  0x34   :  { %1056 = vmatmul.mubr.bf16.gmra.mxu1 %v1408_v6  ;;  %966 = vmatprep.mubr.bf16.mxu0 %v1415_v7  ;;  %v24_v6 = vld [vmem:[%s2494_s0 + $0x50] sm:$0xff] }
  0x35   :  { %1063 = vmatprep.mubr.bf16.mxu1 %v1417_v9  ;;  %1655 = vmatpush3.bf16.msra.mxu0 %v1824_v20  ;;  %v28_v7 = vld [vmem:[%s2494_s0 + $0x70] sm:$0xff]  ;;  %v29_v9 = vld [vmem:[%s2494_s0 + $0x78] sm:$0xff]  ;;  %v1411_v20 = vcombine.high %v32_v14, %v36_v15 }
  0x36   :  { %1719 = vmatpush3.bf16.msra.mxu1 %v1826_v25  ;;  %1656 = vmatprep.subr.bf16.mxu0 %v1827_v28  ;;  %v1403_v12 = vcombine.high %v24_v6, %v28_v7  ;;  %v1405_v13 = vcombine.high %v25_v8, %v29_v9  ;;  %v1402_v18 = vcombine.low %v24_v6, %v28_v7  ;;  %v45_v25 = vld [vmem:[%s2494_s0 + $0xf8] sm:$0xff]  ;;  %v72_v54 = vld [vmem:[%s2494_s0 + $0x1d0] sm:$0xff]  ;;  %v1839_v7 = vmov 0.0  }
  0x37   :  { %1720 = vmatprep.subr.bf16.mxu1 %v1829_v32  ;;  %v49_v32 = vld [vmem:[%s2494_s0 + $0x118] sm:$0xff]  ;;  %v76_v55 = vld [vmem:[%s2494_s0 + $0x1f0] sm:$0xff]  ;;  %1318 = vst [vmem:[%s2495_s3] sm:$0x3] %v1839_v7 }
  0x38   :  { %v1450_v62 = vcombine.low %v72_v54, %v76_v55 }
  0x39   :  { %1657 = vmatpush3.bf16.msra.mxu0 %v1828_v31  ;;  %v52_v31 = vld [vmem:[%s2494_s0 + $0x130] sm:$0xff] }
  0x3a   :  { %1721 = vmatpush3.bf16.msra.mxu1 %v1830_v33  ;;  %1658 = vmatprep.subr.bf16.mxu0 %v1831_v38  ;;  %v53_v33 = vld [vmem:[%s2494_s0 + $0x138] sm:$0xff]  ;;  %v56_v38 = vld [vmem:[%s2494_s0 + $0x150] sm:$0xff]  ;;  %v1426_v42 = vcombine.low %v48_v30, %v52_v31 }
  0x3b   :  { %967 = vmatmul.mubr.bf16.gmra.mxu0 %v1414_v19  ;;  %1722 = vmatprep.subr.bf16.mxu1 %v1833_v40  ;;  %v1404_v19 = vcombine.low %v25_v8, %v29_v9  ;;  %v57_v40 = vld [vmem:[%s2494_s0 + $0x158] sm:$0xff] }
  0x3c   :  { %1064 = vmatmul.mubr.bf16.gmra.mxu1 %v1416_v21  ;;  %974 = vmatprep.mubr.bf16.mxu0 %v1423_v22  ;;  %v1413_v21 = vcombine.high %v33_v16, %v37_v17  ;;  %v40_v22 = vld [vmem:[%s2494_s0 + $0xd0] sm:$0xff]  ;;  %v1437_v45 = vcombine.high %v57_v40, %v61_v41 }
  0x3d   :  { %1071 = vmatprep.mubr.bf16.mxu1 %v1425_v24  ;;  %1659 = vmatpush3.bf16.msra.mxu0 %v1832_v39  ;;  %v41_v24 = vld [vmem:[%s2494_s0 + $0xd8] sm:$0xff]  ;;  %v1419_v28 = vcombine.high %v40_v22, %v44_v23  ;;  %v60_v39 = vld [vmem:[%s2494_s0 + $0x170] sm:$0xff] }
  0x3e   :  { %1723 = vmatpush3.bf16.msra.mxu1 %v1834_v43  ;;  %1660 = vmatprep.subr.bf16.mxu0 %v1835_v46  ;;  %v1421_v29 = vcombine.high %v41_v24, %v45_v25  ;;  %v1428_v43 = vcombine.low %v49_v32, %v53_v33  ;;  %v1435_v44 = vcombine.high %v56_v38, %v60_v39  ;;  %v64_v46 = vld [vmem:[%s2494_s0 + $0x190] sm:$0xff] }
  0x3f   :  { %1724 = vmatprep.subr.bf16.mxu1 %v1837_v51  ;;  %v1436_v51 = vcombine.low %v57_v40, %v61_v41 }
  0x41   :  { %1661 = vmatpush3.bf16.msra.mxu0 %v1836_v48  ;;  %v65_v48 = vld [vmem:[%s2494_s0 + $0x198] sm:$0xff] }
  0x42   :  { %1725 = vmatpush3.bf16.msra.mxu1 %v1838_v53 }
  0x43   :  { %975 = vmatmul.mubr.bf16.gmra.mxu0 %v1422_v34  ;;  %v1418_v34 = vcombine.low %v40_v22, %v44_v23 }
  0x44   :  { %1072 = vmatmul.mubr.bf16.gmra.mxu1 %v1424_v35  ;;  %982 = vmatprep.mubr.bf16.mxu0 %v1431_v36  ;;  %v1420_v35 = vcombine.low %v41_v24, %v45_v25  ;;  %v1427_v36 = vcombine.high %v48_v30, %v52_v31 }
  0x45   :  { %1079 = vmatprep.mubr.bf16.mxu1 %v1433_v37  ;;  %v1429_v37 = vcombine.high %v49_v32, %v53_v33 }
  0x4b   :  { %983 = vmatmul.mubr.bf16.gmra.mxu0 %v1430_v47  ;;  %v68_v47 = vld [vmem:[%s2494_s0 + $0x1b0] sm:$0xff] }
  0x4c   :  { %1080 = vmatmul.mubr.bf16.gmra.mxu1 %v1432_v49  ;;  %990 = vmatprep.mubr.bf16.mxu0 %v1439_v50  ;;  %v69_v49 = vld [vmem:[%s2494_s0 + $0x1b8] sm:$0xff]  ;;  %v1434_v50 = vcombine.low %v56_v38, %v60_v39 }
  0x4d   :  { %1087 = vmatprep.mubr.bf16.mxu1 %v1441_v52  ;;  %v1443_v52 = vcombine.high %v64_v46, %v68_v47  ;;  %v1445_v53 = vcombine.high %v65_v48, %v69_v49 }
  0x53   :  { %991 = vmatmul.mubr.bf16.gmra.mxu0 %v1438_v58  ;;  %v1442_v58 = vcombine.low %v64_v46, %v68_v47 }
  0x54   :  { %1088 = vmatmul.mubr.bf16.gmra.mxu1 %v1440_v59  ;;  %998 = vmatprep.mubr.bf16.mxu0 %v1447_v60  ;;  %v1444_v59 = vcombine.low %v65_v48, %v69_v49  ;;  %v1451_v60 = vcombine.high %v72_v54, %v76_v55 }
  0x55   :  { %1095 = vmatprep.mubr.bf16.mxu1 %v1449_v61  ;;  %v1453_v61 = vcombine.high %v73_v56, %v77_v57 }
  0x5b   :  { %999 = vmatmul.mubr.bf16.gmra.mxu0 %v1446_v2 }
  0x5c   :  { %1096 = vmatmul.mubr.bf16.gmra.mxu1 %v1448_v3  ;;  %1136 = vmatprep.mubr.bf16.mxu0 %v1395_v4 }
  0x5d   :  { %1233 = vmatprep.mubr.bf16.mxu1 %v1397_v5 }
  0x63   :  { %1137 = vmatmul.mubr.bf16.vlgmr.msra.gmra.mxu0 %v1394_v10 }
  0x64   :  { %1234 = vmatmul.mubr.bf16.vlgmr.msra.gmra.mxu1 %v1396_v11  ;;  %1144 = vmatprep.mubr.bf16.mxu0 %v1403_v12 }
  0x65   :  { %1241 = vmatprep.mubr.bf16.mxu1 %v1405_v13 }
  0x6b   :  { %1145 = vmatmul.mubr.bf16.gmra.mxu0 %v1402_v18 }
  0x6c   :  { %1242 = vmatmul.mubr.bf16.gmra.mxu1 %v1404_v19  ;;  %1152 = vmatprep.mubr.bf16.mxu0 %v1411_v20 }
  0x6d   :  { %1249 = vmatprep.mubr.bf16.mxu1 %v1413_v21 }
  0x73   :  { %1153 = vmatmul.mubr.bf16.gmra.mxu0 %v1410_v26 }
  0x74   :  { %1250 = vmatmul.mubr.bf16.gmra.mxu1 %v1412_v27  ;;  %1160 = vmatprep.mubr.bf16.mxu0 %v1419_v28 }
  0x75   :  { %1257 = vmatprep.mubr.bf16.mxu1 %v1421_v29 }
  0x7b   :  { %1161 = vmatmul.mubr.bf16.gmra.mxu0 %v1418_v34 }
  0x7c   :  { %1258 = vmatmul.mubr.bf16.gmra.mxu1 %v1420_v35  ;;  %1168 = vmatprep.mubr.bf16.mxu0 %v1427_v36 }
  0x7d   :  { %1265 = vmatprep.mubr.bf16.mxu1 %v1429_v37 }
  0x83   :  { %1169 = vmatmul.mubr.bf16.gmra.mxu0 %v1426_v42 }
  0x84   :  { %1266 = vmatmul.mubr.bf16.gmra.mxu1 %v1428_v43  ;;  %1176 = vmatprep.mubr.bf16.mxu0 %v1435_v44 }
  0x85   :  { %1273 = vmatprep.mubr.bf16.mxu1 %v1437_v45 }
  0x8b   :  { %1177 = vmatmul.mubr.bf16.gmra.mxu0 %v1434_v50 }
  0x8c   :  { %1274 = vmatmul.mubr.bf16.gmra.mxu1 %v1436_v51  ;;  %1184 = vmatprep.mubr.bf16.mxu0 %v1443_v52 }
  0x8d   :  { %1281 = vmatprep.mubr.bf16.mxu1 %v1445_v53 }
  0x93   :  { %1185 = vmatmul.mubr.bf16.gmra.mxu0 %v1442_v58 }
  0x94   :  { %1282 = vmatmul.mubr.bf16.gmra.mxu1 %v1444_v59  ;;  %1192 = vmatprep.mubr.bf16.mxu0 %v1451_v60 }
  0x95   :  { %1289 = vmatprep.mubr.bf16.mxu1 %v1453_v61 }
  0x9b   :  { %1193 = vmatmul.mubr.bf16.gmra.mxu0 %v1450_v62 }
  0x9c   :  { %1290 = vmatmul.mubr.bf16.gmra.mxu1 %v1452_v63 }
  0xe3   :  { %v2244_v0 = vpop.f32.mrf.mxu0 }
  0xe4   :  { %v2246_v1 = vpop.f32.mrf.mxu1 }
  0xe5   :  { %v2248_v2 = vpop.f32.mrf.mxu0 }
  0xe6   :  { %v2250_v3 = vpop.f32.mrf.mxu1  ;;  %v1536_v7 = vadd.f32 %v2248_v2, %v2244_v0 }
  0xe7   :  { %v2252_v4 = vpop.f32.mrf.mxu0 }
  0xe8   :  { %v2254_v5 = vpop.f32.mrf.mxu1 }
  0xe9   :  { %v2256_v6 = vpop.f32.mrf.mxu0 }
  0xea   :  { %v2261_v8 = vpop.f32.mrf.mxu1 }
  0xeb   :  { %v2263_v9 = vpop.f32.mrf.mxu0 }
  0xec   :  { %v2265_v10 = vpop.f32.mrf.mxu1 }
  0xed   :  { %v2267_v11 = vpop.f32.mrf.mxu0 }
  0xee   :  { %v2269_v12 = vpop.f32.mrf.mxu1 }
  0xef   :  { %v2271_v13 = vpop.f32.mrf.mxu0 }
  0xf0   :  { %v2273_v14 = vpop.f32.mrf.mxu1 }
  0xf1   :  { %v2275_v15 = vpop.f32.mrf.mxu0 }
  0xf2   :  { %v2277_v16 = vpop.f32.mrf.mxu1 }
  0xf3   :  { %v2279_v17 = vpop.f32.mrf.mxu0 }
  0xf4   :  { %v2281_v18 = vpop.f32.mrf.mxu1 }
  0xf5   :  { %v2283_v19 = vpop.f32.mrf.mxu0 }
  0xf6   :  { %v2285_v20 = vpop.f32.mrf.mxu1 }
  0xf7   :  { %v2287_v21 = vpop.f32.mrf.mxu0 }
  0xf8   :  { %v2289_v22 = vpop.f32.mrf.mxu1 }
  0xf9   :  { %v2291_v23 = vpop.f32.mrf.mxu0 }
  0xfa   :  { %v2293_v24 = vpop.f32.mrf.mxu1 }
  0xfb   :  { %v2295_v25 = vpop.f32.mrf.mxu0 }
  0xfc   :  { %v2297_v26 = vpop.f32.mrf.mxu1 }
  0xfd   :  { %v2299_v27 = vpop.f32.mrf.mxu0 }
  0xfe   :  { %v2301_v28 = vpop.f32.mrf.mxu1 }
  0xff   :  { %v2303_v29 = vpop.f32.mrf.mxu0 }
 0x100   :  { %v2305_v30 = vpop.f32.mrf.mxu1 }
 0x101   :  { %v2307_v31 = vpop.f32.mrf.mxu0 }
 0x102   :  { %v2309_v32 = vpop.f32.mrf.mxu1 }
 0x103   :  { %v2311_v33 = vpop.f32.mrf.mxu0 }
 0x104   :  { %v2313_v34 = vpop.f32.mrf.mxu1 }
 0x105   :  { %v2315_v35 = vpop.f32.mrf.mxu0 }
 0x106   :  { %v2317_v36 = vpop.f32.mrf.mxu1 }
 0x107   :  { %v2319_v37 = vpop.f32.mrf.mxu0 }
 0x108   :  { %v2321_v38 = vpop.f32.mrf.mxu1 }
 0x109   :  { %v2323_v39 = vpop.f32.mrf.mxu0 }
 0x10a   :  { %v2325_v40 = vpop.f32.mrf.mxu1 }
 0x10b   :  { %v2327_v41 = vpop.f32.mrf.mxu0 }
 0x10c   :  { %v2329_v42 = vpop.f32.mrf.mxu1 }
 0x10d   :  { %v2331_v43 = vpop.f32.mrf.mxu0 }
 0x10e   :  { %v2333_v44 = vpop.f32.mrf.mxu1 }
 0x10f   :  { %v2335_v45 = vpop.f32.mrf.mxu0 }
 0x110   :  { %v2337_v46 = vpop.f32.mrf.mxu1 }
 0x111   :  { %v2339_v47 = vpop.f32.mrf.mxu0 }
 0x112   :  { %v2341_v48 = vpop.f32.mrf.mxu1 }
 0x113   :  { %v2343_v49 = vpop.f32.mrf.mxu0 }
 0x114   :  { %v2345_v50 = vpop.f32.mrf.mxu1 }
 0x115   :  { %2497 = vst [vmem:[#allocation2_spill] sm:$0xff] %v2345_v50  ;;  %v2347_v51 = vpop.f32.mrf.mxu0 }
 0x116   :  { %v2349_v52 = vpop.f32.mrf.mxu1 }
 0x117   :  { %2498 = vst [vmem:[#allocation3_spill] sm:$0xff] %v2349_v52  ;;  %v2351_v53 = vpop.f32.mrf.mxu0 }
 0x118   :  { %2499 = vst [vmem:[#allocation4_spill] sm:$0xff] %v2351_v53  ;;  %v2353_v54 = vpop.f32.mrf.mxu1 }
 0x119   :  { %2500 = vst [vmem:[#allocation5_spill] sm:$0xff] %v2353_v54  ;;  %v2355_v55 = vpop.f32.mrf.mxu0 }
 0x11a   :  { %2501 = vst [vmem:[#allocation6_spill] sm:$0xff] %v2355_v55  ;;  %v2357_v56 = vpop.f32.mrf.mxu1 }
 0x11b   :  { %2502 = vst [vmem:[#allocation7_spill] sm:$0xff] %v2357_v56  ;;  %v2359_v57 = vpop.f32.mrf.mxu0  ;;  %v1600_v56 = vadd.f32 %v2250_v3, %v2246_v1  ;;  %v1542_v1 = vadd.f32 %v2267_v11, %v2263_v9  ;;  %v1606_v3 = vadd.f32 %v2269_v12, %v2265_v10  ;;  %v1545_v9 = vadd.f32 %v2275_v15, %v2271_v13 }
 0x11c   :  { %2503 = vst [vmem:[#allocation8_spill] sm:$0xff] %v2359_v57  ;;  %v2361_v58 = vpop.f32.mrf.mxu1  ;;  %v1609_v10 = vadd.f32 %v2277_v16, %v2273_v14  ;;  %v1548_v13 = vadd.f32 %v2283_v19, %v2279_v17  ;;  %v1612_v14 = vadd.f32 %v2285_v20, %v2281_v18  ;;  %v1551_v18 = vadd.f32 %v2291_v23, %v2287_v21 }
 0x11d   :  { %2504 = vst [vmem:[#allocation9_spill] sm:$0xff] %v2361_v58  ;;  %v2363_v59 = vpop.f32.mrf.mxu0  ;;  %v1615_v20 = vadd.f32 %v2293_v24, %v2289_v22  ;;  %v1554_v21 = vadd.f32 %v2299_v27, %v2295_v25  ;;  %v1618_v22 = vadd.f32 %v2301_v28, %v2297_v26  ;;  %v1557_v26 = vadd.f32 %v2307_v31, %v2303_v29 }
 0x11e   :  { %2505 = vst [vmem:[#allocation10_spill] sm:$0xff] %v2363_v59  ;;  %v2365_v60 = vpop.f32.mrf.mxu1  ;;  %v1042_v59 = vadd.f32 %v1600_v56, %v1536_v7  ;;  %v1053_v16 = vadd.f32 %v1609_v10, %v1545_v9  ;;  %v1058_v17 = vadd.f32 %v1612_v14, %v1548_v13  ;;  %v1621_v28 = vadd.f32 %v2309_v32, %v2305_v30 }
 0x11f   :  { %2506 = vst [vmem:[#allocation11_spill] sm:$0xff] %v2365_v60  ;;  %v2367_v61 = vpop.f32.mrf.mxu0  ;;  %v1539_v60 = vadd.f32 %v2256_v6, %v2252_v4  ;;  %v1061_v24 = vadd.f32 %v1615_v20, %v1551_v18  ;;  %v1066_v25 = vadd.f32 %v1618_v22, %v1554_v21  ;;  %v1560_v29 = vadd.f32 %v2315_v35, %v2311_v33 }
 0x120   :  { %2507 = vst [vmem:[#allocation12_spill] sm:$0xff] %v2367_v61  ;;  %v2369_v62 = vpop.f32.mrf.mxu1  ;;  %v1624_v30 = vadd.f32 %v2317_v36, %v2313_v34  ;;  %v1069_v32 = vadd.f32 %v1621_v28, %v1557_v26  ;;  %v1563_v34 = vadd.f32 %v2323_v39, %v2319_v37  ;;  %v1627_v36 = vadd.f32 %v2325_v40, %v2321_v38 }
 0x121   :  { %2508 = vst [vmem:[#allocation13_spill] sm:$0xff] %v2369_v62  ;;  %v2371_v63 = vpop.f32.mrf.mxu0  ;;  %v1603_v62 = vadd.f32 %v2261_v8, %v2254_v5  ;;  %v1566_v37 = vadd.f32 %v2331_v43, %v2327_v41  ;;  %v1630_v38 = vadd.f32 %v2333_v44, %v2329_v42  ;;  %v1569_v42 = vadd.f32 %v2339_v47, %v2335_v45  ;;  %v2511_v47 = vld [vmem:[#allocation2_spill] sm:$0xff] }
 0x122   :  { %2509 = vst [vmem:[#allocation14_spill] sm:$0xff] %v2371_v63  ;;  %v2377_v54 = vpop.f32.mrf.mxu1  ;;  %v1074_v33 = vadd.f32 %v1624_v30, %v1560_v29  ;;  %v1077_v40 = vadd.f32 %v1627_v36, %v1563_v34  ;;  %v1633_v44 = vadd.f32 %v2341_v48, %v2337_v46  ;;  %v1572_v45 = vadd.f32 %v2347_v51, %v2343_v49  ;;  %v2513_v51 = vld [vmem:[#allocation4_spill] sm:$0xff] }
 0x123   :  { %2510 = vst [vmem:[#allocation15_spill] sm:$0xff] %v2377_v54  ;;  %v1662_v57 = vpop.f32.mrf.mxu0  ;;  %v1045_v56 = vadd.f32 %v1603_v62, %v1539_v60  ;;  %v1082_v41 = vadd.f32 %v1630_v38, %v1566_v37 }
 0x124   :  { %v1726_v58 = vpop.f32.mrf.mxu1  ;;  %v2519_v38 = vld [vmem:[#allocation9_spill] sm:$0xff] }
 0x125   :  { %v1663_v55 = vpop.f32.mrf.mxu0 }
 0x126   :  { %v1664_v61 = vadd.f32 %v1663_v55, %v1662_v57  ;;  %v1727_v63 = vpop.f32.mrf.mxu1  ;;  %v1050_v57 = vadd.f32 %v1606_v3, %v1542_v1 }
 0x127   :  { %v1665_v53 = vpop.f32.mrf.mxu0  ;;  %v1728_v0 = vadd.f32 %v1727_v63, %v1726_v58 }
 0x128   :  { %v1139_v52 = vadd.f32 %v1664_v61, %v1042_v59  ;;  %v1729_v2 = vpop.f32.mrf.mxu1 }
 0x129   :  { %v1666_v54 = vpop.f32.mrf.mxu0 }
 0x12a   :  { %v1236_v7 = vadd.f32 %v1728_v0, %v1139_v52  ;;  %v1667_v50 = vadd.f32 %v1666_v54, %v1665_v53  ;;  %v1730_v4 = vpop.f32.mrf.mxu1 }
 0x12b   :  { %v1668_v6 = vpop.f32.mrf.mxu0  ;;  %v1731_v8 = vadd.f32 %v1730_v4, %v1729_v2 }
 0x12c   :  { %1298 = vst [vmem:[%s2496_s2] sm:$0xff] %v1236_v7  ;;  %v1142_v5 = vadd.f32 %v1667_v50, %v1045_v56  ;;  %v1732_v55 = vpop.f32.mrf.mxu1  ;;  %v1340_v53 = vmul.f32 %v1236_v7, %v1236_v7 }
 0x12d   :  { %v1669_v58 = vpop.f32.mrf.mxu0 }
 0x12e   :  { %v1239_v11 = vadd.f32 %v1731_v8, %v1142_v5  ;;  %v1670_v12 = vadd.f32 %v1669_v58, %v1668_v6  ;;  %v1733_v52 = vpop.f32.mrf.mxu1 }
 0x12f   :  { %v1671_v54 = vpop.f32.mrf.mxu0  ;;  %v1734_v61 = vadd.f32 %v1733_v52, %v1732_v55 }
 0x130   :  { %1299 = vst [vmem:[%s2496_s2 + $0x8] sm:$0xff] %v1239_v11  ;;  %v1319_v50 = vadd.f32 %v1239_v11, %v1236_v7  ;;  %v1341_v59 = vmul.f32 %v1239_v11, %v1239_v11  ;;  %v1147_v60 = vadd.f32 %v1670_v12, %v1050_v57  ;;  %v1735_v62 = vpop.f32.mrf.mxu1 }
 0x131   :  { %v1672_v15 = vpop.f32.mrf.mxu0 }
 0x132   :  { %v1356_v63 = vadd.f32 %v1341_v59, %v1340_v53  ;;  %v1244_v0 = vadd.f32 %v1734_v61, %v1147_v60  ;;  %v1673_v2 = vadd.f32 %v1672_v15, %v1671_v54  ;;  %v1736_v1 = vpop.f32.mrf.mxu1 }
 0x133   :  { %v1674_v3 = vpop.f32.mrf.mxu0  ;;  %v1737_v6 = vadd.f32 %v1736_v1, %v1735_v62 }
 0x134   :  { %1300 = vst [vmem:[%s2496_s2 + $0x10] sm:$0xff] %v1244_v0  ;;  %v1320_v56 = vadd.f32 %v1319_v50, %v1244_v0  ;;  %v1342_v7 = vmul.f32 %v1244_v0, %v1244_v0  ;;  %v1150_v4 = vadd.f32 %v1673_v2, %v1053_v16  ;;  %v1738_v5 = vpop.f32.mrf.mxu1 }
 0x135   :  { %v1675_v19 = vpop.f32.mrf.mxu0 }
 0x136   :  { %v1357_v8 = vadd.f32 %v1356_v63, %v1342_v7  ;;  %v1247_v55 = vadd.f32 %v1737_v6, %v1150_v4  ;;  %v1676_v57 = vadd.f32 %v1675_v19, %v1674_v3  ;;  %v1739_v58 = vpop.f32.mrf.mxu1 }
 0x137   :  { %v1677_v9 = vpop.f32.mrf.mxu0  ;;  %v1740_v52 = vadd.f32 %v1739_v58, %v1738_v5 }
 0x138   :  { %1301 = vst [vmem:[%s2496_s2 + $0x18] sm:$0xff] %v1247_v55  ;;  %v1321_v10 = vadd.f32 %v1320_v56, %v1247_v55  ;;  %v1343_v11 = vmul.f32 %v1247_v55, %v1247_v55  ;;  %v1155_v12 = vadd.f32 %v1676_v57, %v1058_v17  ;;  %v1741_v53 = vpop.f32.mrf.mxu1 }
 0x139   :  { %v1678_v23 = vpop.f32.mrf.mxu0 }
 0x13a   :  { %v1358_v54 = vadd.f32 %v1357_v8, %v1343_v11  ;;  %v1252_v50 = vadd.f32 %v1740_v52, %v1155_v12  ;;  %v1679_v59 = vadd.f32 %v1678_v23, %v1677_v9  ;;  %v1742_v60 = vpop.f32.mrf.mxu1 }
 0x13b   :  { %v1680_v61 = vpop.f32.mrf.mxu0  ;;  %v1743_v15 = vadd.f32 %v1742_v60, %v1741_v53 }
 0x13c   :  { %1302 = vst [vmem:[%s2496_s2 + $0x20] sm:$0xff] %v1252_v50  ;;  %v1322_v62 = vadd.f32 %v1321_v10, %v1252_v50  ;;  %v1344_v13 = vmul.f32 %v1252_v50, %v1252_v50  ;;  %v1158_v14 = vadd.f32 %v1679_v59, %v1061_v24  ;;  %v1744_v16 = vpop.f32.mrf.mxu1 }
 0x13d   :  { %v1681_v27 = vpop.f32.mrf.mxu0 }
 0x13e   :  { %v1359_v63 = vadd.f32 %v1358_v54, %v1344_v13  ;;  %v1255_v0 = vadd.f32 %v1743_v15, %v1158_v14  ;;  %v1682_v2 = vadd.f32 %v1681_v27, %v1680_v61  ;;  %v1745_v1 = vpop.f32.mrf.mxu1 }
 0x13f   :  { %v1683_v3 = vpop.f32.mrf.mxu0  ;;  %v1746_v6 = vadd.f32 %v1745_v1, %v1744_v16 }
 0x140   :  { %1303 = vst [vmem:[%s2496_s2 + $0x28] sm:$0xff] %v1255_v0  ;;  %v1323_v56 = vadd.f32 %v1322_v62, %v1255_v0  ;;  %v1345_v7 = vmul.f32 %v1255_v0, %v1255_v0  ;;  %v1163_v4 = vadd.f32 %v1682_v2, %v1066_v25  ;;  %v1747_v5 = vpop.f32.mrf.mxu1 }
 0x141   :  { %v1684_v31 = vpop.f32.mrf.mxu0 }
 0x142   :  { %v1360_v17 = vadd.f32 %v1359_v63, %v1345_v7  ;;  %v1260_v18 = vadd.f32 %v1746_v6, %v1163_v4  ;;  %v1685_v19 = vadd.f32 %v1684_v31, %v1683_v3  ;;  %v1748_v20 = vpop.f32.mrf.mxu1  ;;  %v2512_v6 = vld [vmem:[#allocation3_spill] sm:$0xff] }
 0x143   :  { %v1686_v8 = vpop.f32.mrf.mxu0  ;;  %v1749_v9 = vadd.f32 %v1748_v20, %v1747_v5  ;;  %v1636_v46 = vadd.f32 %v2512_v6, %v2511_v47  ;;  %v1085_v5 = vadd.f32 %v1633_v44, %v1569_v42  ;;  %v2521_v44 = vld [vmem:[#allocation12_spill] sm:$0xff] }
 0x144   :  { %1304 = vst [vmem:[%s2496_s2 + $0x30] sm:$0xff] %v1260_v18  ;;  %v1324_v55 = vadd.f32 %v1323_v56, %v1260_v18  ;;  %v1346_v57 = vmul.f32 %v1260_v18, %v1260_v18  ;;  %v1166_v58 = vadd.f32 %v1685_v19, %v1069_v32  ;;  %v1750_v10 = vpop.f32.mrf.mxu1 }
 0x145   :  { %v1687_v35 = vpop.f32.mrf.mxu0  ;;  %v1090_v49 = vadd.f32 %v1636_v46, %v1572_v45 }
 0x146   :  { %v1361_v11 = vadd.f32 %v1360_v17, %v1346_v57  ;;  %v1263_v12 = vadd.f32 %v1749_v9, %v1166_v58  ;;  %v1688_v52 = vadd.f32 %v1687_v35, %v1686_v8  ;;  %v1751_v53 = vpop.f32.mrf.mxu1  ;;  %v2514_v57 = vld [vmem:[#allocation6_spill] sm:$0xff] }
 0x147   :  { %v1689_v21 = vpop.f32.mrf.mxu0  ;;  %v1752_v54 = vadd.f32 %v1751_v53, %v1750_v10  ;;  %v1575_v58 = vadd.f32 %v2514_v57, %v2513_v51  ;;  %v2515_v10 = vld [vmem:[#allocation5_spill] sm:$0xff] }
 0x148   :  { %1305 = vst [vmem:[%s2496_s2 + $0x38] sm:$0xff] %v1263_v12  ;;  %v1325_v22 = vadd.f32 %v1324_v55, %v1263_v12  ;;  %v1347_v23 = vmul.f32 %v1263_v12, %v1263_v12  ;;  %v1171_v24 = vadd.f32 %v1688_v52, %v1074_v33  ;;  %v1753_v50 = vpop.f32.mrf.mxu1  ;;  %v2516_v33 = vld [vmem:[#allocation7_spill] sm:$0xff] }
 0x149   :  { %v1690_v39 = vpop.f32.mrf.mxu0  ;;  %v1639_v34 = vadd.f32 %v2516_v33, %v2515_v10 }
 0x14a   :  { %v1362_v59 = vadd.f32 %v1361_v11, %v1347_v23  ;;  %v1268_v60 = vadd.f32 %v1752_v54, %v1171_v24  ;;  %v1691_v61 = vadd.f32 %v1690_v39, %v1689_v21  ;;  %v1754_v62 = vpop.f32.mrf.mxu1  ;;  %v2517_v54 = vld [vmem:[#allocation8_spill] sm:$0xff]  ;;  %v2520_v39 = vld [vmem:[#allocation11_spill] sm:$0xff] }
 0x14b   :  { %v1692_v13 = vpop.f32.mrf.mxu0  ;;  %v1755_v25 = vadd.f32 %v1754_v62, %v1753_v50  ;;  %v2518_v50 = vld [vmem:[#allocation10_spill] sm:$0xff] }
 0x14c   :  { %1306 = vst [vmem:[%s2496_s2 + $0x40] sm:$0xff] %v1268_v60  ;;  %v1326_v14 = vadd.f32 %v1325_v22, %v1268_v60  ;;  %v1348_v15 = vmul.f32 %v1268_v60, %v1268_v60  ;;  %v1174_v16 = vadd.f32 %v1691_v61, %v1077_v40  ;;  %v1756_v26 = vpop.f32.mrf.mxu1  ;;  %v1578_v37 = vadd.f32 %v2518_v50, %v2517_v54 }
 0x14d   :  { %v1693_v43 = vpop.f32.mrf.mxu0  ;;  %v1642_v40 = vadd.f32 %v2520_v39, %v2519_v38  ;;  %v1093_v60 = vadd.f32 %v1639_v34, %v1575_v58 }
 0x14e   :  { %v1363_v27 = vadd.f32 %v1362_v59, %v1348_v15  ;;  %v1271_v28 = vadd.f32 %v1755_v25, %v1174_v16  ;;  %v1694_v63 = vadd.f32 %v1693_v43, %v1692_v13  ;;  %v1757_v0 = vpop.f32.mrf.mxu1 }
 0x14f   :  { %v1695_v2 = vpop.f32.mrf.mxu0  ;;  %v1758_v7 = vadd.f32 %v1757_v0, %v1756_v26  ;;  %v1098_v43 = vadd.f32 %v1642_v40, %v1578_v37  ;;  %v2523_v0 = vld [vmem:[#allocation13_spill] sm:$0xff] }
 0x150   :  { %1307 = vst [vmem:[%s2496_s2 + $0x48] sm:$0xff] %v1271_v28  ;;  %v1327_v1 = vadd.f32 %v1326_v14, %v1271_v28  ;;  %v1349_v3 = vmul.f32 %v1271_v28, %v1271_v28  ;;  %v1179_v56 = vadd.f32 %v1694_v63, %v1082_v41  ;;  %v1759_v4 = vpop.f32.mrf.mxu1 }
 0x151   :  { %v1696_v48 = vpop.f32.mrf.mxu0 }
 0x152   :  { %v1364_v29 = vadd.f32 %v1363_v27, %v1349_v3  ;;  %v1276_v30 = vadd.f32 %v1758_v7, %v1179_v56  ;;  %v1697_v31 = vadd.f32 %v1696_v48, %v1695_v2  ;;  %v1760_v32 = vpop.f32.mrf.mxu1  ;;  %v2522_v27 = vld [vmem:[#allocation14_spill] sm:$0xff]  ;;  %v2524_v2 = vld [vmem:[#allocation15_spill] sm:$0xff] }
 0x153   :  { %v1698_v17 = vpop.f32.mrf.mxu0  ;;  %v1761_v8 = vadd.f32 %v1760_v32, %v1759_v4  ;;  %v1581_v28 = vadd.f32 %v2522_v27, %v2521_v44 }
 0x154   :  { %1308 = vst [vmem:[%s2496_s2 + $0x50] sm:$0xff] %v1276_v30  ;;  %v1328_v18 = vadd.f32 %v1327_v1, %v1276_v30  ;;  %v1350_v19 = vmul.f32 %v1276_v30, %v1276_v30  ;;  %v1182_v20 = vadd.f32 %v1697_v31, %v1085_v5  ;;  %v1762_v55 = vpop.f32.mrf.mxu1  ;;  %v1645_v1 = vadd.f32 %v2524_v2, %v2523_v0 }
 0x155   :  { %v1699_v9 = vpop.f32.mrf.mxu0 }
 0x156   :  { %v1365_v35 = vadd.f32 %v1364_v29, %v1350_v19  ;;  %v1279_v36 = vadd.f32 %v1761_v8, %v1182_v20  ;;  %v1700_v11 = vadd.f32 %v1699_v9, %v1698_v17  ;;  %v1763_v12 = vpop.f32.mrf.mxu1  ;;  %v1101_v30 = vadd.f32 %v1645_v1, %v1581_v28 }
 0x157   :  { %v1701_v52 = vpop.f32.mrf.mxu0  ;;  %v1764_v23 = vadd.f32 %v1763_v12, %v1762_v55 }
 0x158   :  { %1309 = vst [vmem:[%s2496_s2 + $0x58] sm:$0xff] %v1279_v36  ;;  %v1329_v53 = vadd.f32 %v1328_v18, %v1279_v36  ;;  %v1351_v21 = vmul.f32 %v1279_v36, %v1279_v36  ;;  %v1187_v22 = vadd.f32 %v1700_v11, %v1090_v49  ;;  %v1765_v24 = vpop.f32.mrf.mxu1 }
 0x159   :  { %v1702_v59 = vpop.f32.mrf.mxu0 }
 0x15a   :  { %v1366_v61 = vadd.f32 %v1365_v35, %v1351_v21  ;;  %v1284_v62 = vadd.f32 %v1764_v23, %v1187_v22  ;;  %v1703_v13 = vadd.f32 %v1702_v59, %v1701_v52  ;;  %v1766_v14 = vpop.f32.mrf.mxu1 }
 0x15b   :  { %v1704_v15 = vpop.f32.mrf.mxu0  ;;  %v1767_v41 = vadd.f32 %v1766_v14, %v1765_v24  ;;  %v1377_v24 = vld [vmem:[%s2495_s3] sm:$0x3] }
 0x15c   :  { %1310 = vst [vmem:[%s2496_s2 + $0x60] sm:$0xff] %v1284_v62  ;;  %v1330_v16 = vadd.f32 %v1329_v53, %v1284_v62  ;;  %v1352_v25 = vmul.f32 %v1284_v62, %v1284_v62  ;;  %v1190_v26 = vadd.f32 %v1703_v13, %v1093_v60  ;;  %v1768_v42 = vpop.f32.mrf.mxu1 }
 0x15d   :  { %v1705_v63 = vpop.f32.mrf.mxu0 }
 0x15e   :  { %v1367_v3 = vadd.f32 %v1366_v61, %v1352_v25  ;;  %v1287_v56 = vadd.f32 %v1767_v41, %v1190_v26  ;;  %v1706_v7 = vadd.f32 %v1705_v63, %v1704_v15  ;;  %v1769_v4 = vpop.f32.mrf.mxu1 }
 0x15f   :  { %v1707_v45 = vpop.f32.mrf.mxu0  ;;  %v1770_v48 = vadd.f32 %v1769_v4, %v1768_v42 }
 0x160   :  { %1311 = vst [vmem:[%s2496_s2 + $0x68] sm:$0xff] %v1287_v56  ;;  %v1331_v47 = vadd.f32 %v1330_v16, %v1287_v56  ;;  %v1353_v6 = vmul.f32 %v1287_v56, %v1287_v56  ;;  %v1195_v46 = vadd.f32 %v1706_v7, %v1098_v43  ;;  %v1771_v5 = vpop.f32.mrf.mxu1 }
 0x161   :  { %v1708_v29 = vpop.f32.mrf.mxu0 }
 0x162   :  { %v1368_v31 = vadd.f32 %v1367_v3, %v1353_v6  ;;  %v1292_v32 = vadd.f32 %v1770_v48, %v1195_v46  ;;  %v1709_v17 = vadd.f32 %v1708_v29, %v1707_v45  ;;  %v1772_v18 = vpop.f32.mrf.mxu1 }
 0x163   :  { %v1773_v55 = vadd.f32 %v1772_v18, %v1771_v5 }
 0x164   :  { %1312 = vst [vmem:[%s2496_s2 + $0x70] sm:$0xff] %v1292_v32  ;;  %v1332_v19 = vadd.f32 %v1331_v47, %v1292_v32  ;;  %v1354_v20 = vmul.f32 %v1292_v32, %v1292_v32  ;;  %v1198_v8 = vadd.f32 %v1709_v17, %v1101_v30 }
 0x166   :  { %v1369_v49 = vadd.f32 %v1368_v31, %v1354_v20  ;;  %v1295_v51 = vadd.f32 %v1773_v55, %v1198_v8 }
 0x168   :  { %1313 = vst [vmem:[%s2496_s2 + $0x78] sm:$0xff] %v1295_v51  ;;  %v1333_v57 = vadd.f32 %v1332_v19, %v1295_v51  ;;  %v1355_v58 = vmul.f32 %v1295_v51, %v1295_v51 }
 0x16a   :  { %v1334_v9 = vrot.slane %v1333_v57, 4  ;;  %v1370_v10 = vadd.f32 %v1369_v49, %v1355_v58 }
 0x16c   :  { %v1335_v33 = vadd.f32 %v1334_v9, %v1333_v57  ;;  %v1371_v34 = vrot.slane %v1370_v10, 4 }
 0x16e   :  { %v1336_v35 = vrot.slane %v1335_v33, 2  ;;  %v1372_v36 = vadd.f32 %v1371_v34, %v1370_v10 }
 0x170   :  { %v1337_v11 = vadd.f32 %v1336_v35, %v1335_v33  ;;  %v1373_v12 = vrot.slane %v1372_v36, 2 }
 0x172   :  { %v1338_v52 = vrot.slane %v1337_v11, 1  ;;  %v1374_v53 = vadd.f32 %v1373_v12, %v1372_v36 }
 0x174   :  { %v1375_v21 = vrot.slane %v1374_v53, 1  ;;  %v1339_v22 = vadd.f32 %v1338_v52, %v1337_v11 }
 0x176   :  { %v1376_v23 = vadd.f32 %v1375_v21, %v1374_v53 }
 0x178   :  { %v1379_v54 = vsel %vm1378_vm0, %v1339_v22, %v1376_v23 }
 0x179   :  { %v1380_v50 = vadd.f32 %v1379_v54, %v1377_v24 }
 0x17b   :  { %1381 = vst [vmem:[%s2495_s3] sm:$0x3] %v1380_v50 }

// kernel: generator_forward.14
= control target key start
LH: loop header
LB: loop body
LE: loop exit
PB: predicated region body
PF: predicated region fallthrough
CT: control target
= control target key end

     0   :  { %s1363_s0 = inlined_call_operand.vmem [shape: f32[512,128], index: 0, kind: input, shape index: {}]   ;;  %s1364_s1 = inlined_call_operand.vmem [shape: f32[2,128], index: 1, kind: input, shape index: {}]   ;;  %s1365_s2 = inlined_call_operand.vmem [shape: bf16[512,128], index: 2, kind: output, shape index: {}]  }
   0x1   :  { %v940_v0 = vld [vmem:[%s1364_s1] ss:$0 sm:$0xff]  ;;  %v945_v1 = vld [vmem:[%s1364_s1 + $0x1] ss:$0 sm:$0xff]  ;;  %v14_v3 = vld [vmem:[%s1363_s0 + $0x8] sm:$0xff] }
   0x2   :  { %v13_v2 = vld [vmem:[%s1363_s0] sm:$0xff]  ;;  %v15_v5 = vld [vmem:[%s1363_s0 + $0x10] sm:$0xff]  ;;  %v16_v6 = vld [vmem:[%s1363_s0 + $0x18] sm:$0xff]  ;;  %v82_v7 = vmul.f32 %v940_v0, %v14_v3 }
   0x3   :  { %v81_v4 = vmul.f32 %v940_v0, %v13_v2  ;;  %v83_v8 = vmul.f32 %v940_v0, %v15_v5  ;;  %v84_v9 = vmul.f32 %v940_v0, %v16_v6  ;;  %v17_v10 = vld [vmem:[%s1363_s0 + $0x20] sm:$0xff]  ;;  %v18_v11 = vld [vmem:[%s1363_s0 + $0x28] sm:$0xff]  ;;  %v19_v12 = vld [vmem:[%s1363_s0 + $0x30] sm:$0xff] }
   0x4   :  { %v85_v14 = vmul.f32 %v940_v0, %v17_v10  ;;  %v86_v15 = vmul.f32 %v940_v0, %v18_v11  ;;  %v20_v16 = vld [vmem:[%s1363_s0 + $0x38] sm:$0xff]  ;;  %v87_v17 = vmul.f32 %v940_v0, %v19_v12  ;;  %v150_v18 = vadd.f32 %v945_v1, %v82_v7  ;;  %v21_v22 = vld [vmem:[%s1363_s0 + $0x40] sm:$0xff]  ;;  %v22_v27 = vld [vmem:[%s1363_s0 + $0x48] sm:$0xff] }
   0x5   :  { %v149_v13 = vadd.f32 %v945_v1, %v81_v4  ;;  %v151_v19 = vadd.f32 %v945_v1, %v83_v8  ;;  %v152_v20 = vadd.f32 %v945_v1, %v84_v9  ;;  %v88_v21 = vmul.f32 %v940_v0, %v20_v16  ;;  %v23_v32 = vld [vmem:[%s1363_s0 + $0x50] sm:$0xff]  ;;  %v24_v33 = vld [vmem:[%s1363_s0 + $0x58] sm:$0xff]  ;;  %v25_v38 = vld [vmem:[%s1363_s0 + $0x60] sm:$0xff] }
   0x6   :  { %v153_v24 = vadd.f32 %v945_v1, %v85_v14  ;;  %v154_v25 = vadd.f32 %v945_v1, %v86_v15  ;;  %v155_v26 = vadd.f32 %v945_v1, %v87_v17  ;;  %v214_v28 = vmax.f32 %v150_v18, 0.0  ;;  %v26_v39 = vld [vmem:[%s1363_s0 + $0x68] sm:$0xff]  ;;  %v27_v44 = vld [vmem:[%s1363_s0 + $0x70] sm:$0xff]  ;;  %v28_v49 = vld [vmem:[%s1363_s0 + $0x78] sm:$0xff] }
   0x7   :  { %v213_v23 = vmax.f32 %v149_v13, 0.0  ;;  %v215_v29 = vmax.f32 %v151_v19, 0.0  ;;  %v216_v30 = vmax.f32 %v152_v20, 0.0  ;;  %v156_v31 = vadd.f32 %v945_v1, %v88_v21  ;;  %v29_v54 = vld [vmem:[%s1363_s0 + $0x80] sm:$0xff]  ;;  %v30_v63 = vld [vmem:[%s1363_s0 + $0x88] sm:$0xff]  ;;  %v31_v6 = vld [vmem:[%s1363_s0 + $0x90] sm:$0xff] }
   0x8   :  { %v217_v34 = vmax.f32 %v153_v24, 0.0  ;;  %v218_v35 = vmax.f32 %v154_v25, 0.0  ;;  %v219_v36 = vmax.f32 %v155_v26, 0.0  ;;  %v89_v37 = vmul.f32 %v940_v0, %v21_v22  ;;  %v32_v7 = vld [vmem:[%s1363_s0 + $0x98] sm:$0xff]  ;;  %v33_v12 = vld [vmem:[%s1363_s0 + $0xa0] sm:$0xff]  ;;  %v34_v13 = vld [vmem:[%s1363_s0 + $0xa8] sm:$0xff] }
   0x9   :  { %v734_v40 = vpack.c.bf16 %v214_v28, %v213_v23  ;;  %v739_v41 = vpack.c.bf16 %v216_v30, %v215_v29  ;;  %v220_v42 = vmax.f32 %v156_v31, 0.0  ;;  %v90_v43 = vmul.f32 %v940_v0, %v22_v27  ;;  %v35_v18 = vld [vmem:[%s1363_s0 + $0xb0] sm:$0xff]  ;;  %v36_v23 = vld [vmem:[%s1363_s0 + $0xb8] sm:$0xff]  ;;  %v37_v28 = vld [vmem:[%s1363_s0 + $0xc0] sm:$0xff] }
   0xa   :  { %v744_v45 = vpack.c.bf16 %v218_v35, %v217_v34  ;;  %v157_v46 = vadd.f32 %v945_v1, %v89_v37  ;;  %v91_v47 = vmul.f32 %v940_v0, %v23_v32  ;;  %v92_v48 = vmul.f32 %v940_v0, %v24_v33  ;;  %v38_v37 = vld [vmem:[%s1363_s0 + $0xc8] sm:$0xff] }
   0xb   :  { %735 = vst [vmem:[%s1365_s2] sm:$0xff] %v734_v40   ;;  %891 = vst [vmem:[%s1365_s2 + $0x8] sm:$0xff] %v739_v41   ;;  %v749_v50 = vpack.c.bf16 %v220_v42, %v219_v36  ;;  %v158_v51 = vadd.f32 %v945_v1, %v90_v43  ;;  %v93_v52 = vmul.f32 %v940_v0, %v25_v38  ;;  %v39_v42 = vld [vmem:[%s1363_s0 + $0xd0] sm:$0xff]  ;;  %v40_v43 = vld [vmem:[%s1363_s0 + $0xd8] sm:$0xff] }
   0xc   :  { %v94_v53 = vmul.f32 %v940_v0, %v26_v39  ;;  %892 = vst [vmem:[%s1365_s2 + $0x10] sm:$0xff] %v744_v45   ;;  %v221_v55 = vmax.f32 %v157_v46, 0.0  ;;  %v159_v56 = vadd.f32 %v945_v1, %v91_v47  ;;  %v160_v57 = vadd.f32 %v945_v1, %v92_v48  ;;  %v41_v48 = vld [vmem:[%s1363_s0 + $0xe0] sm:$0xff] }
   0xd   :  { %v95_v58 = vmul.f32 %v940_v0, %v27_v44  ;;  %893 = vst [vmem:[%s1365_s2 + $0x18] sm:$0xff] %v749_v50   ;;  %v222_v59 = vmax.f32 %v158_v51, 0.0  ;;  %v161_v60 = vadd.f32 %v945_v1, %v93_v52  ;;  %v96_v62 = vmul.f32 %v940_v0, %v28_v49  ;;  %v42_v49 = vld [vmem:[%s1363_s0 + $0xe8] sm:$0xff] }
   0xe   :  { %v162_v61 = vadd.f32 %v945_v1, %v94_v53  ;;  %v223_v2 = vmax.f32 %v159_v56, 0.0  ;;  %v224_v3 = vmax.f32 %v160_v57, 0.0  ;;  %v97_v5 = vmul.f32 %v940_v0, %v29_v54  ;;  %v43_v54 = vld [vmem:[%s1363_s0 + $0xf0] sm:$0xff] }
   0xf   :  { %v163_v4 = vadd.f32 %v945_v1, %v95_v58  ;;  %v754_v8 = vpack.c.bf16 %v222_v59, %v221_v55  ;;  %v225_v9 = vmax.f32 %v161_v60, 0.0  ;;  %v164_v11 = vadd.f32 %v945_v1, %v96_v62  ;;  %v44_v59 = vld [vmem:[%s1363_s0 + $0xf8] sm:$0xff] }
  0x10   :  { %v226_v10 = vmax.f32 %v162_v61, 0.0  ;;  %v759_v14 = vpack.c.bf16 %v224_v3, %v223_v2  ;;  %v98_v16 = vmul.f32 %v940_v0, %v30_v63  ;;  %v165_v17 = vadd.f32 %v945_v1, %v97_v5  ;;  %v45_v2 = vld [vmem:[%s1363_s0 + $0x100] sm:$0xff] }
  0x11   :  { %v227_v15 = vmax.f32 %v163_v4, 0.0  ;;  %894 = vst [vmem:[%s1365_s2 + $0x20] sm:$0xff] %v754_v8   ;;  %v228_v20 = vmax.f32 %v164_v11, 0.0  ;;  %v99_v21 = vmul.f32 %v940_v0, %v31_v6  ;;  %v100_v22 = vmul.f32 %v940_v0, %v32_v7  ;;  %v46_v11 = vld [vmem:[%s1363_s0 + $0x108] sm:$0xff] }
  0x12   :  { %v764_v19 = vpack.c.bf16 %v226_v10, %v225_v9  ;;  %895 = vst [vmem:[%s1365_s2 + $0x28] sm:$0xff] %v759_v14   ;;  %v166_v24 = vadd.f32 %v945_v1, %v98_v16  ;;  %v229_v25 = vmax.f32 %v165_v17, 0.0  ;;  %v101_v26 = vmul.f32 %v940_v0, %v33_v12  ;;  %v47_v16 = vld [vmem:[%s1363_s0 + $0x110] sm:$0xff]  ;;  %v48_v17 = vld [vmem:[%s1363_s0 + $0x118] sm:$0xff] }
  0x13   :  { %v102_v27 = vmul.f32 %v940_v0, %v34_v13  ;;  %v769_v29 = vpack.c.bf16 %v228_v20, %v227_v15  ;;  %v167_v30 = vadd.f32 %v945_v1, %v99_v21  ;;  %v168_v31 = vadd.f32 %v945_v1, %v100_v22  ;;  %v49_v22 = vld [vmem:[%s1363_s0 + $0x120] sm:$0xff] }
  0x14   :  { %896 = vst [vmem:[%s1365_s2 + $0x30] sm:$0xff] %v764_v19   ;;  %v103_v32 = vmul.f32 %v940_v0, %v35_v18  ;;  %v230_v33 = vmax.f32 %v166_v24, 0.0  ;;  %v169_v34 = vadd.f32 %v945_v1, %v101_v26  ;;  %v104_v36 = vmul.f32 %v940_v0, %v36_v23  ;;  %v50_v23 = vld [vmem:[%s1363_s0 + $0x128] sm:$0xff] }
  0x15   :  { %v170_v35 = vadd.f32 %v945_v1, %v102_v27  ;;  %897 = vst [vmem:[%s1365_s2 + $0x38] sm:$0xff] %v769_v29   ;;  %v231_v38 = vmax.f32 %v167_v30, 0.0  ;;  %v232_v39 = vmax.f32 %v168_v31, 0.0  ;;  %v105_v41 = vmul.f32 %v940_v0, %v37_v28  ;;  %v51_v28 = vld [vmem:[%s1363_s0 + $0x130] sm:$0xff] }
  0x16   :  { %v171_v40 = vadd.f32 %v945_v1, %v103_v32  ;;  %v774_v44 = vpack.c.bf16 %v230_v33, %v229_v25  ;;  %v233_v45 = vmax.f32 %v169_v34, 0.0  ;;  %v172_v47 = vadd.f32 %v945_v1, %v104_v36  ;;  %v52_v33 = vld [vmem:[%s1363_s0 + $0x138] sm:$0xff] }
  0x17   :  { %v234_v46 = vmax.f32 %v170_v35, 0.0  ;;  %v779_v50 = vpack.c.bf16 %v232_v39, %v231_v38  ;;  %v106_v52 = vmul.f32 %v940_v0, %v38_v37  ;;  %v173_v53 = vadd.f32 %v945_v1, %v105_v41  ;;  %v53_v38 = vld [vmem:[%s1363_s0 + $0x140] sm:$0xff] }
  0x18   :  { %v235_v51 = vmax.f32 %v171_v40, 0.0  ;;  %898 = vst [vmem:[%s1365_s2 + $0x40] sm:$0xff] %v774_v44   ;;  %v236_v56 = vmax.f32 %v172_v47, 0.0  ;;  %v107_v57 = vmul.f32 %v940_v0, %v39_v42  ;;  %v108_v58 = vmul.f32 %v940_v0, %v40_v43  ;;  %v54_v47 = vld [vmem:[%s1363_s0 + $0x148] sm:$0xff] }
  0x19   :  { %v784_v55 = vpack.c.bf16 %v234_v46, %v233_v45  ;;  %899 = vst [vmem:[%s1365_s2 + $0x48] sm:$0xff] %v779_v50   ;;  %v174_v60 = vadd.f32 %v945_v1, %v106_v52  ;;  %v237_v61 = vmax.f32 %v173_v53, 0.0  ;;  %v109_v62 = vmul.f32 %v940_v0, %v41_v48  ;;  %v55_v52 = vld [vmem:[%s1363_s0 + $0x150] sm:$0xff]  ;;  %v56_v53 = vld [vmem:[%s1363_s0 + $0x158] sm:$0xff] }
  0x1a   :  { %v110_v63 = vmul.f32 %v940_v0, %v42_v49  ;;  %v789_v3 = vpack.c.bf16 %v236_v56, %v235_v51  ;;  %v175_v4 = vadd.f32 %v945_v1, %v107_v57  ;;  %v176_v5 = vadd.f32 %v945_v1, %v108_v58  ;;  %v57_v58 = vld [vmem:[%s1363_s0 + $0x160] sm:$0xff] }
  0x1b   :  { %900 = vst [vmem:[%s1365_s2 + $0x50] sm:$0xff] %v784_v55   ;;  %v111_v6 = vmul.f32 %v940_v0, %v43_v54  ;;  %v238_v7 = vmax.f32 %v174_v60, 0.0  ;;  %v177_v8 = vadd.f32 %v945_v1, %v109_v62  ;;  %v112_v10 = vmul.f32 %v940_v0, %v44_v59  ;;  %v58_v59 = vld [vmem:[%s1363_s0 + $0x168] sm:$0xff] }
  0x1c   :  { %v178_v9 = vadd.f32 %v945_v1, %v110_v63  ;;  %901 = vst [vmem:[%s1365_s2 + $0x58] sm:$0xff] %v789_v3   ;;  %v239_v12 = vmax.f32 %v175_v4, 0.0  ;;  %v240_v13 = vmax.f32 %v176_v5, 0.0  ;;  %v113_v15 = vmul.f32 %v940_v0, %v45_v2  ;;  %v59_v2 = vld [vmem:[%s1363_s0 + $0x170] sm:$0xff] }
  0x1d   :  { %v179_v14 = vadd.f32 %v945_v1, %v111_v6  ;;  %v794_v18 = vpack.c.bf16 %v238_v7, %v237_v61  ;;  %v241_v19 = vmax.f32 %v177_v8, 0.0  ;;  %v180_v21 = vadd.f32 %v945_v1, %v112_v10  ;;  %v60_v7 = vld [vmem:[%s1363_s0 + $0x178] sm:$0xff] }
  0x1e   :  { %v242_v20 = vmax.f32 %v178_v9, 0.0  ;;  %v799_v24 = vpack.c.bf16 %v240_v13, %v239_v12  ;;  %v114_v26 = vmul.f32 %v940_v0, %v46_v11  ;;  %v181_v27 = vadd.f32 %v945_v1, %v113_v15  ;;  %v61_v12 = vld [vmem:[%s1363_s0 + $0x180] sm:$0xff] }
  0x1f   :  { %v243_v25 = vmax.f32 %v179_v14, 0.0  ;;  %902 = vst [vmem:[%s1365_s2 + $0x60] sm:$0xff] %v794_v18   ;;  %v244_v30 = vmax.f32 %v180_v21, 0.0  ;;  %v115_v31 = vmul.f32 %v940_v0, %v47_v16  ;;  %v116_v32 = vmul.f32 %v940_v0, %v48_v17  ;;  %v62_v21 = vld [vmem:[%s1363_s0 + $0x188] sm:$0xff] }
  0x20   :  { %v804_v29 = vpack.c.bf16 %v242_v20, %v241_v19  ;;  %903 = vst [vmem:[%s1365_s2 + $0x68] sm:$0xff] %v799_v24   ;;  %v182_v34 = vadd.f32 %v945_v1, %v114_v26  ;;  %v245_v35 = vmax.f32 %v181_v27, 0.0  ;;  %v117_v36 = vmul.f32 %v940_v0, %v49_v22  ;;  %v63_v26 = vld [vmem:[%s1363_s0 + $0x190] sm:$0xff]  ;;  %v64_v27 = vld [vmem:[%s1363_s0 + $0x198] sm:$0xff] }
  0x21   :  { %v118_v37 = vmul.f32 %v940_v0, %v50_v23  ;;  %v809_v39 = vpack.c.bf16 %v244_v30, %v243_v25  ;;  %v183_v40 = vadd.f32 %v945_v1, %v115_v31  ;;  %v184_v41 = vadd.f32 %v945_v1, %v116_v32  ;;  %v65_v32 = vld [vmem:[%s1363_s0 + $0x1a0] sm:$0xff] }
  0x22   :  { %904 = vst [vmem:[%s1365_s2 + $0x70] sm:$0xff] %v804_v29   ;;  %v119_v42 = vmul.f32 %v940_v0, %v51_v28  ;;  %v246_v43 = vmax.f32 %v182_v34, 0.0  ;;  %v185_v44 = vadd.f32 %v945_v1, %v117_v36  ;;  %v120_v46 = vmul.f32 %v940_v0, %v52_v33  ;;  %v66_v33 = vld [vmem:[%s1363_s0 + $0x1a8] sm:$0xff] }
  0x23   :  { %v186_v45 = vadd.f32 %v945_v1, %v118_v37  ;;  %905 = vst [vmem:[%s1365_s2 + $0x78] sm:$0xff] %v809_v39   ;;  %v247_v48 = vmax.f32 %v183_v40, 0.0  ;;  %v248_v49 = vmax.f32 %v184_v41, 0.0  ;;  %v121_v51 = vmul.f32 %v940_v0, %v53_v38  ;;  %v67_v38 = vld [vmem:[%s1363_s0 + $0x1b0] sm:$0xff] }
  0x24   :  { %v187_v50 = vadd.f32 %v945_v1, %v119_v42  ;;  %v814_v54 = vpack.c.bf16 %v246_v43, %v245_v35  ;;  %v249_v55 = vmax.f32 %v185_v44, 0.0  ;;  %v188_v57 = vadd.f32 %v945_v1, %v120_v46  ;;  %v68_v43 = vld [vmem:[%s1363_s0 + $0x1b8] sm:$0xff] }
  0x25   :  { %v250_v56 = vmax.f32 %v186_v45, 0.0  ;;  %v819_v60 = vpack.c.bf16 %v248_v49, %v247_v48  ;;  %v122_v62 = vmul.f32 %v940_v0, %v54_v47  ;;  %v189_v63 = vadd.f32 %v945_v1, %v121_v51  ;;  %v69_v48 = vld [vmem:[%s1363_s0 + $0x1c0] sm:$0xff] }
  0x26   :  { %v251_v61 = vmax.f32 %v187_v50, 0.0  ;;  %906 = vst [vmem:[%s1365_s2 + $0x80] sm:$0xff] %v814_v54   ;;  %v252_v4 = vmax.f32 %v188_v57, 0.0  ;;  %v123_v5 = vmul.f32 %v940_v0, %v55_v52  ;;  %v124_v6 = vmul.f32 %v940_v0, %v56_v53  ;;  %v70_v57 = vld [vmem:[%s1363_s0 + $0x1c8] sm:$0xff] }
  0x27   :  { %v824_v3 = vpack.c.bf16 %v250_v56, %v249_v55  ;;  %907 = vst [vmem:[%s1365_s2 + $0x88] sm:$0xff] %v819_v60   ;;  %v190_v8 = vadd.f32 %v945_v1, %v122_v62  ;;  %v253_v9 = vmax.f32 %v189_v63, 0.0  ;;  %v125_v10 = vmul.f32 %v940_v0, %v57_v58  ;;  %v71_v62 = vld [vmem:[%s1363_s0 + $0x1d0] sm:$0xff]  ;;  %v72_v63 = vld [vmem:[%s1363_s0 + $0x1d8] sm:$0xff] }
  0x28   :  { %v126_v11 = vmul.f32 %v940_v0, %v58_v59  ;;  %v829_v13 = vpack.c.bf16 %v252_v4, %v251_v61  ;;  %v191_v14 = vadd.f32 %v945_v1, %v123_v5  ;;  %v192_v15 = vadd.f32 %v945_v1, %v124_v6  ;;  %v73_v6 = vld [vmem:[%s1363_s0 + $0x1e0] sm:$0xff] }
  0x29   :  { %908 = vst [vmem:[%s1365_s2 + $0x90] sm:$0xff] %v824_v3   ;;  %v127_v16 = vmul.f32 %v940_v0, %v59_v2  ;;  %v254_v17 = vmax.f32 %v190_v8, 0.0  ;;  %v193_v18 = vadd.f32 %v945_v1, %v125_v10  ;;  %v128_v20 = vmul.f32 %v940_v0, %v60_v7  ;;  %v74_v7 = vld [vmem:[%s1363_s0 + $0x1e8] sm:$0xff] }
  0x2a   :  { %v194_v19 = vadd.f32 %v945_v1, %v126_v11  ;;  %909 = vst [vmem:[%s1365_s2 + $0x98] sm:$0xff] %v829_v13   ;;  %v255_v22 = vmax.f32 %v191_v14, 0.0  ;;  %v256_v23 = vmax.f32 %v192_v15, 0.0  ;;  %v129_v25 = vmul.f32 %v940_v0, %v61_v12  ;;  %v75_v12 = vld [vmem:[%s1363_s0 + $0x1f0] sm:$0xff] }
  0x2b   :  { %v195_v24 = vadd.f32 %v945_v1, %v127_v16  ;;  %v834_v28 = vpack.c.bf16 %v254_v17, %v253_v9  ;;  %v257_v29 = vmax.f32 %v193_v18, 0.0  ;;  %v196_v31 = vadd.f32 %v945_v1, %v128_v20  ;;  %v76_v17 = vld [vmem:[%s1363_s0 + $0x1f8] sm:$0xff] }
  0x2c   :  { %v258_v30 = vmax.f32 %v194_v19, 0.0  ;;  %v839_v34 = vpack.c.bf16 %v256_v23, %v255_v22  ;;  %v130_v36 = vmul.f32 %v940_v0, %v62_v21  ;;  %v197_v37 = vadd.f32 %v945_v1, %v129_v25 }
  0x2d   :  { %v259_v35 = vmax.f32 %v195_v24, 0.0  ;;  %910 = vst [vmem:[%s1365_s2 + $0xa0] sm:$0xff] %v834_v28   ;;  %v260_v40 = vmax.f32 %v196_v31, 0.0  ;;  %v131_v41 = vmul.f32 %v940_v0, %v63_v26  ;;  %v132_v42 = vmul.f32 %v940_v0, %v64_v27 }
  0x2e   :  { %v844_v39 = vpack.c.bf16 %v258_v30, %v257_v29  ;;  %911 = vst [vmem:[%s1365_s2 + $0xa8] sm:$0xff] %v839_v34   ;;  %v198_v44 = vadd.f32 %v945_v1, %v130_v36  ;;  %v261_v45 = vmax.f32 %v197_v37, 0.0  ;;  %v133_v46 = vmul.f32 %v940_v0, %v65_v32 }
  0x2f   :  { %v134_v47 = vmul.f32 %v940_v0, %v66_v33  ;;  %v849_v49 = vpack.c.bf16 %v260_v40, %v259_v35  ;;  %v199_v50 = vadd.f32 %v945_v1, %v131_v41  ;;  %v200_v51 = vadd.f32 %v945_v1, %v132_v42 }
  0x30   :  { %912 = vst [vmem:[%s1365_s2 + $0xb0] sm:$0xff] %v844_v39   ;;  %v135_v52 = vmul.f32 %v940_v0, %v67_v38  ;;  %v262_v53 = vmax.f32 %v198_v44, 0.0  ;;  %v201_v54 = vadd.f32 %v945_v1, %v133_v46  ;;  %v136_v56 = vmul.f32 %v940_v0, %v68_v43 }
  0x31   :  { %v202_v55 = vadd.f32 %v945_v1, %v134_v47  ;;  %913 = vst [vmem:[%s1365_s2 + $0xb8] sm:$0xff] %v849_v49   ;;  %v263_v58 = vmax.f32 %v199_v50, 0.0  ;;  %v264_v59 = vmax.f32 %v200_v51, 0.0  ;;  %v137_v61 = vmul.f32 %v940_v0, %v69_v48 }
  0x32   :  { %v203_v60 = vadd.f32 %v945_v1, %v135_v52  ;;  %v854_v2 = vpack.c.bf16 %v262_v53, %v261_v45  ;;  %v265_v3 = vmax.f32 %v201_v54, 0.0  ;;  %v204_v5 = vadd.f32 %v945_v1, %v136_v56 }
  0x33   :  { %v266_v4 = vmax.f32 %v202_v55, 0.0  ;;  %v859_v8 = vpack.c.bf16 %v264_v59, %v263_v58  ;;  %v138_v10 = vmul.f32 %v940_v0, %v70_v57  ;;  %v205_v11 = vadd.f32 %v945_v1, %v137_v61 }
  0x34   :  { %v267_v9 = vmax.f32 %v203_v60, 0.0  ;;  %914 = vst [vmem:[%s1365_s2 + $0xc0] sm:$0xff] %v854_v2   ;;  %v268_v14 = vmax.f32 %v204_v5, 0.0  ;;  %v139_v15 = vmul.f32 %v940_v0, %v71_v62  ;;  %v140_v16 = vmul.f32 %v940_v0, %v72_v63 }
  0x35   :  { %v864_v13 = vpack.c.bf16 %v266_v4, %v265_v3  ;;  %915 = vst [vmem:[%s1365_s2 + $0xc8] sm:$0xff] %v859_v8   ;;  %v206_v18 = vadd.f32 %v945_v1, %v138_v10  ;;  %v269_v19 = vmax.f32 %v205_v11, 0.0  ;;  %v141_v20 = vmul.f32 %v940_v0, %v73_v6 }
  0x36   :  { %v142_v21 = vmul.f32 %v940_v0, %v74_v7  ;;  %v869_v22 = vpack.c.bf16 %v268_v14, %v267_v9  ;;  %v207_v23 = vadd.f32 %v945_v1, %v139_v15  ;;  %v208_v24 = vadd.f32 %v945_v1, %v140_v16 }
  0x37   :  { %916 = vst [vmem:[%s1365_s2 + $0xd0] sm:$0xff] %v864_v13   ;;  %v143_v25 = vmul.f32 %v940_v0, %v75_v12  ;;  %v270_v26 = vmax.f32 %v206_v18, 0.0  ;;  %v209_v27 = vadd.f32 %v945_v1, %v141_v20  ;;  %v144_v29 = vmul.f32 %v940_v0, %v76_v17 }
  0x38   :  { %v210_v28 = vadd.f32 %v945_v1, %v142_v21  ;;  %917 = vst [vmem:[%s1365_s2 + $0xd8] sm:$0xff] %v869_v22   ;;  %v271_v30 = vmax.f32 %v207_v23, 0.0  ;;  %v272_v31 = vmax.f32 %v208_v24, 0.0 }
  0x39   :  { %v211_v32 = vadd.f32 %v945_v1, %v143_v25  ;;  %v874_v33 = vpack.c.bf16 %v270_v26, %v269_v19  ;;  %v273_v34 = vmax.f32 %v209_v27, 0.0  ;;  %v212_v36 = vadd.f32 %v945_v1, %v144_v29 }
  0x3a   :  { %v274_v35 = vmax.f32 %v210_v28, 0.0  ;;  %v879_v37 = vpack.c.bf16 %v272_v31, %v271_v30 }
  0x3b   :  { %v275_v38 = vmax.f32 %v211_v32, 0.0  ;;  %918 = vst [vmem:[%s1365_s2 + $0xe0] sm:$0xff] %v874_v33   ;;  %v276_v39 = vmax.f32 %v212_v36, 0.0 }
  0x3c   :  { %v884_v0 = vpack.c.bf16 %v274_v35, %v273_v34  ;;  %919 = vst [vmem:[%s1365_s2 + $0xe8] sm:$0xff] %v879_v37  }
  0x3d   :  { %v889_v40 = vpack.c.bf16 %v276_v39, %v275_v38 }
  0x3e   :  { %920 = vst [vmem:[%s1365_s2 + $0xf0] sm:$0xff] %v884_v0  }
  0x3f   :  { %921 = vst [vmem:[%s1365_s2 + $0xf8] sm:$0xff] %v889_v40  }

// kernel: generator_forward.13
= control target key start
LH: loop header
LB: loop body
LE: loop exit
PB: predicated region body
PF: predicated region fallthrough
CT: control target
= control target key end

     0   :  { %v2286_v0 = vmov 0   ;;  %vm1888_vm0 = vcmask 1040384   ;;  %s3159_s1 = inlined_call_operand.vmem [shape: bf16[512,128], index: 1, kind: input, shape index: {}]   ;;  %s3160_s0 = inlined_call_operand.vmem [shape: bf16[512,512], index: 0, kind: input, shape index: {}]   ;;  %s3161_s2 = inlined_call_operand.vmem [shape: f32[512,128], index: 2, kind: output, shape index: {0}]   ;;  %s3162_s3 = inlined_call_operand.vmem [shape: f32[2,128], index: 3, kind: output, shape index: {1}]  }
   0x1   :  { %1038 = vmatprep.subr.bf16.mxu0 %v2286_v0  ;;  %1327 = vmatprep.subr.bf16.mxu1 %v2286_v0  ;;  %v2062_v1 = vld [vmem:[%s3159_s1 + $0x38] sm:$0xff]   ;;  %v2064_v3 = vld [vmem:[%s3159_s1 + $0x30] sm:$0xff]   ;;  %v2066_v5 = vld [vmem:[%s3159_s1 + $0x28] sm:$0xff]  }
   0x2   :  { %v2063_v2 = vld [vmem:[%s3159_s1 + $0xb8] sm:$0xff]   ;;  %1039 = vmatpush1.bf16.msra.mxu0 %v2062_v1  ;;  %v2065_v4 = vld [vmem:[%s3159_s1 + $0xb0] sm:$0xff]   ;;  %v2067_v6 = vld [vmem:[%s3159_s1 + $0xa8] sm:$0xff]  }
   0x3   :  { %1328 = vmatpush1.bf16.msra.mxu1 %v2063_v2  ;;  %1040 = vmatprep.subr.bf16.mxu0 %v2286_v0  ;;  %v2068_v7 = vld [vmem:[%s3159_s1 + $0x20] sm:$0xff]   ;;  %v2070_v9 = vld [vmem:[%s3159_s1 + $0x18] sm:$0xff]   ;;  %v2072_v11 = vld [vmem:[%s3159_s1 + $0x10] sm:$0xff]  }
   0x4   :  { %1329 = vmatprep.subr.bf16.mxu1 %v2286_v0  ;;  %v2069_v8 = vld [vmem:[%s3159_s1 + $0xa0] sm:$0xff]   ;;  %v2071_v10 = vld [vmem:[%s3159_s1 + $0x98] sm:$0xff]   ;;  %v2073_v12 = vld [vmem:[%s3159_s1 + $0x90] sm:$0xff]  }
   0x5   :  { %v2074_v13 = vld [vmem:[%s3159_s1 + $0x8] sm:$0xff]   ;;  %v2076_v15 = vld [vmem:[%s3159_s1] sm:$0xff]   ;;  %v2078_v17 = vld [vmem:[%s3159_s1 + $0x78] sm:$0xff]  }
   0x6   :  { %1041 = vmatpush1.bf16.msra.mxu0 %v2064_v3  ;;  %v2075_v14 = vld [vmem:[%s3159_s1 + $0x88] sm:$0xff]   ;;  %v2077_v16 = vld [vmem:[%s3159_s1 + $0x80] sm:$0xff]   ;;  %v2079_v18 = vld [vmem:[%s3159_s1 + $0xf8] sm:$0xff]  }
   0x7   :  { %1330 = vmatpush1.bf16.msra.mxu1 %v2065_v4  ;;  %1042 = vmatprep.subr.bf16.mxu0 %v2286_v0  ;;  %v2096_v19 = vld [vmem:[%s3160_s0 + $0x4] ss:$16 sps:$4 sm:$0xff]   ;;  %v2099_v21 = vld [vmem:[%s3160_s0 + $0xc] ss:$16 sps:$4 sm:$0xff]   ;;  %v2094_v35 = vld [vmem:[%s3160_s0] ss:$16 sps:$4 sm:$0xff]  }
   0x8   :  { %1331 = vmatprep.subr.bf16.mxu1 %v2286_v0  ;;  %v2080_v20 = vld [vmem:[%s3159_s1 + $0x70] sm:$0xff]   ;;  %1070 = vmatprep.mubr.bf16.mxu0 %v2096_v19  ;;  %v2082_v23 = vld [vmem:[%s3159_s1 + $0x68] sm:$0xff]   ;;  %v2084_v25 = vld [vmem:[%s3159_s1 + $0x60] sm:$0xff]  }
   0x9   :  { %v2081_v22 = vld [vmem:[%s3159_s1 + $0xf0] sm:$0xff]   ;;  %1359 = vmatprep.mubr.bf16.mxu1 %v2099_v21  ;;  %v2083_v24 = vld [vmem:[%s3159_s1 + $0xe8] sm:$0xff]   ;;  %v2085_v26 = vld [vmem:[%s3159_s1 + $0xe0] sm:$0xff]  }
   0xa   :  { %1043 = vmatpush1.bf16.msra.mxu0 %v2066_v5  ;;  %v2086_v27 = vld [vmem:[%s3159_s1 + $0x58] sm:$0xff]   ;;  %v2088_v29 = vld [vmem:[%s3159_s1 + $0x50] sm:$0xff]   ;;  %v2090_v31 = vld [vmem:[%s3159_s1 + $0x48] sm:$0xff]  }
   0xb   :  { %1332 = vmatpush1.bf16.msra.mxu1 %v2067_v6  ;;  %1044 = vmatprep.subr.bf16.mxu0 %v2286_v0  ;;  %v2087_v28 = vld [vmem:[%s3159_s1 + $0xd8] sm:$0xff]   ;;  %v2089_v30 = vld [vmem:[%s3159_s1 + $0xd0] sm:$0xff]   ;;  %v2091_v32 = vld [vmem:[%s3159_s1 + $0xc8] sm:$0xff]  }
   0xc   :  { %1333 = vmatprep.subr.bf16.mxu1 %v2286_v0  ;;  %v2092_v33 = vld [vmem:[%s3159_s1 + $0x40] sm:$0xff]   ;;  %v2097_v36 = vld [vmem:[%s3160_s0 + $0x8] ss:$16 sps:$4 sm:$0xff]   ;;  %v2102_v38 = vld [vmem:[%s3160_s0 + $0x2c] ss:$16 sps:$4 sm:$0xff]  }
   0xd   :  { %v2093_v34 = vld [vmem:[%s3159_s1 + $0xc0] sm:$0xff]   ;;  %v2105_v40 = vld [vmem:[%s3160_s0 + $0x28] ss:$16 sps:$4 sm:$0xff]   ;;  %v2108_v42 = vld [vmem:[%s3160_s0 + $0x4c] ss:$16 sps:$4 sm:$0xff]  }
   0xe   :  { %1045 = vmatpush1.bf16.msra.mxu0 %v2068_v7  ;;  %v2100_v37 = vld [vmem:[%s3160_s0 + $0x24] ss:$16 sps:$4 sm:$0xff]   ;;  %v2104_v39 = vld [vmem:[%s3160_s0 + $0x20] ss:$16 sps:$4 sm:$0xff]   ;;  %v2111_v44 = vld [vmem:[%s3160_s0 + $0x48] ss:$16 sps:$4 sm:$0xff]  }
   0xf   :  { %1334 = vmatpush1.bf16.msra.mxu1 %v2069_v8  ;;  %1046 = vmatprep.subr.bf16.mxu0 %v2286_v0  ;;  %v2106_v41 = vld [vmem:[%s3160_s0 + $0x44] ss:$16 sps:$4 sm:$0xff]   ;;  %v2110_v43 = vld [vmem:[%s3160_s0 + $0x40] ss:$16 sps:$4 sm:$0xff]   ;;  %v2114_v46 = vld [vmem:[%s3160_s0 + $0x6c] ss:$16 sps:$4 sm:$0xff]  }
  0x10   :  { %1335 = vmatprep.subr.bf16.mxu1 %v2286_v0  ;;  %v2112_v45 = vld [vmem:[%s3160_s0 + $0x64] ss:$16 sps:$4 sm:$0xff]   ;;  %v2116_v47 = vld [vmem:[%s3160_s0 + $0x60] ss:$16 sps:$4 sm:$0xff]   ;;  %v2117_v48 = vld [vmem:[%s3160_s0 + $0x68] ss:$16 sps:$4 sm:$0xff]  }
  0x11   :  { %v2118_v49 = vld [vmem:[%s3160_s0 + $0x84] ss:$16 sps:$4 sm:$0xff]   ;;  %v2120_v50 = vld [vmem:[%s3160_s0 + $0x8c] ss:$16 sps:$4 sm:$0xff]   ;;  %v2122_v51 = vld [vmem:[%s3160_s0 + $0x80] ss:$16 sps:$4 sm:$0xff]  }
  0x12   :  { %1047 = vmatpush1.bf16.msra.mxu0 %v2070_v9  ;;  %v2123_v52 = vld [vmem:[%s3160_s0 + $0x88] ss:$16 sps:$4 sm:$0xff]   ;;  %v2124_v53 = vld [vmem:[%s3160_s0 + $0xa4] ss:$16 sps:$4 sm:$0xff]   ;;  %v2126_v54 = vld [vmem:[%s3160_s0 + $0xac] ss:$16 sps:$4 sm:$0xff]  }
  0x13   :  { %1336 = vmatpush1.bf16.msra.mxu1 %v2071_v10  ;;  %1048 = vmatprep.subr.bf16.mxu0 %v2286_v0  ;;  %v2128_v55 = vld [vmem:[%s3160_s0 + $0xa0] ss:$16 sps:$4 sm:$0xff]   ;;  %v2129_v56 = vld [vmem:[%s3160_s0 + $0xa8] ss:$16 sps:$4 sm:$0xff]   ;;  %v2130_v57 = vld [vmem:[%s3160_s0 + $0xc4] ss:$16 sps:$4 sm:$0xff]  }
  0x14   :  { %1337 = vmatprep.subr.bf16.mxu1 %v2286_v0  ;;  %v2132_v58 = vld [vmem:[%s3160_s0 + $0xcc] ss:$16 sps:$4 sm:$0xff]   ;;  %v2134_v59 = vld [vmem:[%s3160_s0 + $0xc0] ss:$16 sps:$4 sm:$0xff]   ;;  %v2135_v60 = vld [vmem:[%s3160_s0 + $0xc8] ss:$16 sps:$4 sm:$0xff]  }
  0x15   :  { %v2136_v61 = vld [vmem:[%s3160_s0 + $0xe4] ss:$16 sps:$4 sm:$0xff]   ;;  %v2138_v62 = vld [vmem:[%s3160_s0 + $0xec] ss:$16 sps:$4 sm:$0xff]   ;;  %v2140_v63 = vld [vmem:[%s3160_s0 + $0xe0] ss:$16 sps:$4 sm:$0xff]  }
  0x16   :  { %1049 = vmatpush1.bf16.msra.mxu0 %v2072_v11  ;;  %v2142_v1 = vld [vmem:[%s3160_s0 + $0x104] ss:$16 sps:$4 sm:$0xff]   ;;  %v2144_v2 = vld [vmem:[%s3160_s0 + $0x10c] ss:$16 sps:$4 sm:$0xff]   ;;  %v2146_v3 = vld [vmem:[%s3160_s0 + $0x100] ss:$16 sps:$4 sm:$0xff]  }
  0x17   :  { %1338 = vmatpush1.bf16.msra.mxu1 %v2073_v12  ;;  %1050 = vmatprep.subr.bf16.mxu0 %v2286_v0  ;;  %v2147_v4 = vld [vmem:[%s3160_s0 + $0x108] ss:$16 sps:$4 sm:$0xff]   ;;  %v2148_v5 = vld [vmem:[%s3160_s0 + $0x124] ss:$16 sps:$4 sm:$0xff]   ;;  %v2150_v6 = vld [vmem:[%s3160_s0 + $0x12c] ss:$16 sps:$4 sm:$0xff]  }
  0x18   :  { %1339 = vmatprep.subr.bf16.mxu1 %v2286_v0  ;;  %v2152_v7 = vld [vmem:[%s3160_s0 + $0x120] ss:$16 sps:$4 sm:$0xff]   ;;  %v2153_v8 = vld [vmem:[%s3160_s0 + $0x128] ss:$16 sps:$4 sm:$0xff]   ;;  %v2154_v9 = vld [vmem:[%s3160_s0 + $0x144] ss:$16 sps:$4 sm:$0xff]  }
  0x19   :  { %v2156_v10 = vld [vmem:[%s3160_s0 + $0x14c] ss:$16 sps:$4 sm:$0xff]   ;;  %v2158_v11 = vld [vmem:[%s3160_s0 + $0x140] ss:$16 sps:$4 sm:$0xff]   ;;  %v2159_v12 = vld [vmem:[%s3160_s0 + $0x148] ss:$16 sps:$4 sm:$0xff]  }
  0x1a   :  { %1051 = vmatpush1.bf16.msra.mxu0 %v2074_v13  ;;  %v2160_v13 = vld [vmem:[%s3160_s0 + $0x164] ss:$16 sps:$4 sm:$0xff]   ;;  %v2170_v19 = vld [vmem:[%s3160_s0 + $0x180] ss:$16 sps:$4 sm:$0xff]  }
  0x1b   :  { %1340 = vmatpush1.bf16.msra.mxu1 %v2075_v14  ;;  %1052 = vmatprep.subr.bf16.mxu0 %v2286_v0  ;;  %v2162_v14 = vld [vmem:[%s3160_s0 + $0x16c] ss:$16 sps:$4 sm:$0xff]   ;;  %v2172_v21 = vld [vmem:[%s3160_s0 + $0x1a4] ss:$16 sps:$4 sm:$0xff]  }
  0x1c   :  { %1341 = vmatprep.subr.bf16.mxu1 %v2286_v0 }
  0x1e   :  { %1053 = vmatpush1.bf16.msra.mxu0 %v2076_v15  ;;  %v2164_v15 = vld [vmem:[%s3160_s0 + $0x160] ss:$16 sps:$4 sm:$0xff]  }
  0x1f   :  { %1342 = vmatpush1.bf16.msra.mxu1 %v2077_v16  ;;  %1054 = vmatprep.subr.bf16.mxu0 %v2286_v0  ;;  %v2165_v16 = vld [vmem:[%s3160_s0 + $0x168] ss:$16 sps:$4 sm:$0xff]  }
  0x20   :  { %1343 = vmatprep.subr.bf16.mxu1 %v2286_v0 }
  0x22   :  { %1055 = vmatpush2.bf16.msra.mxu0 %v2078_v17  ;;  %v2166_v17 = vld [vmem:[%s3160_s0 + $0x184] ss:$16 sps:$4 sm:$0xff]  }
  0x23   :  { %1344 = vmatpush2.bf16.msra.mxu1 %v2079_v18  ;;  %1056 = vmatprep.subr.bf16.mxu0 %v2286_v0  ;;  %v2168_v18 = vld [vmem:[%s3160_s0 + $0x18c] ss:$16 sps:$4 sm:$0xff]  }
  0x24   :  { %1345 = vmatprep.subr.bf16.mxu1 %v2286_v0 }
  0x26   :  { %1057 = vmatpush2.bf16.msra.mxu0 %v2080_v20  ;;  %v2171_v20 = vld [vmem:[%s3160_s0 + $0x188] ss:$16 sps:$4 sm:$0xff]  }
  0x27   :  { %1346 = vmatpush2.bf16.msra.mxu1 %v2081_v22  ;;  %1058 = vmatprep.subr.bf16.mxu0 %v2286_v0  ;;  %v2174_v22 = vld [vmem:[%s3160_s0 + $0x1ac] ss:$16 sps:$4 sm:$0xff]  }
  0x28   :  { %1347 = vmatprep.subr.bf16.mxu1 %v2286_v0 }
  0x2a   :  { %1059 = vmatpush2.bf16.msra.mxu0 %v2082_v23  ;;  %v2176_v23 = vld [vmem:[%s3160_s0 + $0x1a0] ss:$16 sps:$4 sm:$0xff]  }
  0x2b   :  { %1348 = vmatpush2.bf16.msra.mxu1 %v2083_v24  ;;  %1060 = vmatprep.subr.bf16.mxu0 %v2286_v0  ;;  %v2177_v24 = vld [vmem:[%s3160_s0 + $0x1a8] ss:$16 sps:$4 sm:$0xff]  }
  0x2c   :  { %1349 = vmatprep.subr.bf16.mxu1 %v2286_v0 }
  0x2e   :  { %1061 = vmatpush2.bf16.msra.mxu0 %v2084_v25  ;;  %v2178_v25 = vld [vmem:[%s3160_s0 + $0x1c4] ss:$16 sps:$4 sm:$0xff]  }
  0x2f   :  { %1350 = vmatpush2.bf16.msra.mxu1 %v2085_v26  ;;  %1062 = vmatprep.subr.bf16.mxu0 %v2286_v0  ;;  %v2180_v26 = vld [vmem:[%s3160_s0 + $0x1cc] ss:$16 sps:$4 sm:$0xff]  }
  0x30   :  { %1351 = vmatprep.subr.bf16.mxu1 %v2286_v0 }
  0x32   :  { %1063 = vmatpush2.bf16.msra.mxu0 %v2086_v27  ;;  %v2182_v27 = vld [vmem:[%s3160_s0 + $0x1c0] ss:$16 sps:$4 sm:$0xff]  }
  0x33   :  { %1352 = vmatpush2.bf16.msra.mxu1 %v2087_v28  ;;  %1064 = vmatprep.subr.bf16.mxu0 %v2286_v0  ;;  %v2183_v28 = vld [vmem:[%s3160_s0 + $0x1c8] ss:$16 sps:$4 sm:$0xff]  }
  0x34   :  { %1353 = vmatprep.subr.bf16.mxu1 %v2286_v0 }
  0x36   :  { %1065 = vmatpush2.bf16.msra.mxu0 %v2088_v29  ;;  %v2184_v29 = vld [vmem:[%s3160_s0 + $0x1e4] ss:$16 sps:$4 sm:$0xff]  }
  0x37   :  { %1354 = vmatpush2.bf16.msra.mxu1 %v2089_v30  ;;  %1066 = vmatprep.subr.bf16.mxu0 %v2286_v0  ;;  %v2186_v30 = vld [vmem:[%s3160_s0 + $0x1ec] ss:$16 sps:$4 sm:$0xff]  }
  0x38   :  { %1355 = vmatprep.subr.bf16.mxu1 %v2286_v0 }
  0x3a   :  { %1067 = vmatpush2.bf16.msra.mxu0 %v2090_v31  ;;  %v2188_v31 = vld [vmem:[%s3160_s0 + $0x1e0] ss:$16 sps:$4 sm:$0xff]  }
  0x3b   :  { %1356 = vmatpush2.bf16.msra.mxu1 %v2091_v32  ;;  %1068 = vmatprep.subr.bf16.mxu0 %v2286_v0  ;;  %v2189_v32 = vld [vmem:[%s3160_s0 + $0x1e8] ss:$16 sps:$4 sm:$0xff]  }
  0x3c   :  { %1357 = vmatprep.subr.bf16.mxu1 %v2286_v0  ;;  %v2141_v0 = vld [vmem:[%s3160_s0 + $0xe8] ss:$16 sps:$4 sm:$0xff]  }
  0x3e   :  { %1069 = vmatpush2.bf16.msra.mxu0 %v2092_v33  ;;  %v2190_v33 = vld [vmem:[%s3160_s0 + $0x204] ss:$16 sps:$4 sm:$0xff]  }
  0x3f   :  { %1358 = vmatpush2.bf16.msra.mxu1 %v2093_v34  ;;  %v2192_v34 = vld [vmem:[%s3160_s0 + $0x20c] ss:$16 sps:$4 sm:$0xff]  }
  0x41   :  { %1071 = vmatmul.mubr.bf16.vlgmr.msra.gmra.mxu0 %v2094_v35  ;;  %v2194_v35 = vld [vmem:[%s3160_s0 + $0x200] ss:$16 sps:$4 sm:$0xff]  }
  0x42   :  { %1360 = vmatmul.mubr.bf16.vlgmr.msra.gmra.mxu1 %v2097_v36  ;;  %1078 = vmatprep.mubr.bf16.mxu0 %v2100_v37  ;;  %v2195_v36 = vld [vmem:[%s3160_s0 + $0x208] ss:$16 sps:$4 sm:$0xff]   ;;  %v2196_v37 = vld [vmem:[%s3160_s0 + $0x224] ss:$16 sps:$4 sm:$0xff]  }
  0x43   :  { %1367 = vmatprep.mubr.bf16.mxu1 %v2102_v38  ;;  %v2198_v38 = vld [vmem:[%s3160_s0 + $0x22c] ss:$16 sps:$4 sm:$0xff]  }
  0x49   :  { %1079 = vmatmul.mubr.bf16.gmra.mxu0 %v2104_v39  ;;  %v2200_v39 = vld [vmem:[%s3160_s0 + $0x220] ss:$16 sps:$4 sm:$0xff]  }
  0x4a   :  { %1368 = vmatmul.mubr.bf16.gmra.mxu1 %v2105_v40  ;;  %1086 = vmatprep.mubr.bf16.mxu0 %v2106_v41  ;;  %v2201_v40 = vld [vmem:[%s3160_s0 + $0x228] ss:$16 sps:$4 sm:$0xff]   ;;  %v2202_v41 = vld [vmem:[%s3160_s0 + $0x244] ss:$16 sps:$4 sm:$0xff]  }
  0x4b   :  { %1375 = vmatprep.mubr.bf16.mxu1 %v2108_v42  ;;  %v2204_v42 = vld [vmem:[%s3160_s0 + $0x24c] ss:$16 sps:$4 sm:$0xff]  }
  0x51   :  { %1087 = vmatmul.mubr.bf16.gmra.mxu0 %v2110_v43  ;;  %v2206_v43 = vld [vmem:[%s3160_s0 + $0x240] ss:$16 sps:$4 sm:$0xff]  }
  0x52   :  { %1376 = vmatmul.mubr.bf16.gmra.mxu1 %v2111_v44  ;;  %1094 = vmatprep.mubr.bf16.mxu0 %v2112_v45  ;;  %v2207_v44 = vld [vmem:[%s3160_s0 + $0x248] ss:$16 sps:$4 sm:$0xff]   ;;  %v2208_v45 = vld [vmem:[%s3160_s0 + $0x264] ss:$16 sps:$4 sm:$0xff]  }
  0x53   :  { %1383 = vmatprep.mubr.bf16.mxu1 %v2114_v46  ;;  %v2210_v46 = vld [vmem:[%s3160_s0 + $0x26c] ss:$16 sps:$4 sm:$0xff]  }
  0x59   :  { %1095 = vmatmul.mubr.bf16.gmra.mxu0 %v2116_v47  ;;  %v2212_v47 = vld [vmem:[%s3160_s0 + $0x260] ss:$16 sps:$4 sm:$0xff]  }
  0x5a   :  { %1384 = vmatmul.mubr.bf16.gmra.mxu1 %v2117_v48  ;;  %1102 = vmatprep.mubr.bf16.mxu0 %v2118_v49  ;;  %v2213_v48 = vld [vmem:[%s3160_s0 + $0x268] ss:$16 sps:$4 sm:$0xff]   ;;  %v2214_v49 = vld [vmem:[%s3160_s0 + $0x284] ss:$16 sps:$4 sm:$0xff]  }
  0x5b   :  { %1391 = vmatprep.mubr.bf16.mxu1 %v2120_v50  ;;  %v2216_v50 = vld [vmem:[%s3160_s0 + $0x28c] ss:$16 sps:$4 sm:$0xff]  }
  0x61   :  { %1103 = vmatmul.mubr.bf16.gmra.mxu0 %v2122_v51  ;;  %v2218_v51 = vld [vmem:[%s3160_s0 + $0x280] ss:$16 sps:$4 sm:$0xff]  }
  0x62   :  { %1392 = vmatmul.mubr.bf16.gmra.mxu1 %v2123_v52  ;;  %1110 = vmatprep.mubr.bf16.mxu0 %v2124_v53  ;;  %v2219_v52 = vld [vmem:[%s3160_s0 + $0x288] ss:$16 sps:$4 sm:$0xff]   ;;  %v2220_v53 = vld [vmem:[%s3160_s0 + $0x2a4] ss:$16 sps:$4 sm:$0xff]  }
  0x63   :  { %1399 = vmatprep.mubr.bf16.mxu1 %v2126_v54  ;;  %v2222_v54 = vld [vmem:[%s3160_s0 + $0x2ac] ss:$16 sps:$4 sm:$0xff]  }
  0x69   :  { %1111 = vmatmul.mubr.bf16.gmra.mxu0 %v2128_v55  ;;  %v2224_v55 = vld [vmem:[%s3160_s0 + $0x2a0] ss:$16 sps:$4 sm:$0xff]  }
  0x6a   :  { %1400 = vmatmul.mubr.bf16.gmra.mxu1 %v2129_v56  ;;  %1118 = vmatprep.mubr.bf16.mxu0 %v2130_v57  ;;  %v2225_v56 = vld [vmem:[%s3160_s0 + $0x2a8] ss:$16 sps:$4 sm:$0xff]   ;;  %v2226_v57 = vld [vmem:[%s3160_s0 + $0x2c4] ss:$16 sps:$4 sm:$0xff]  }
  0x6b   :  { %1407 = vmatprep.mubr.bf16.mxu1 %v2132_v58  ;;  %v2228_v58 = vld [vmem:[%s3160_s0 + $0x2cc] ss:$16 sps:$4 sm:$0xff]  }
  0x71   :  { %1119 = vmatmul.mubr.bf16.gmra.mxu0 %v2134_v59  ;;  %v2230_v59 = vld [vmem:[%s3160_s0 + $0x2c0] ss:$16 sps:$4 sm:$0xff]  }
  0x72   :  { %1408 = vmatmul.mubr.bf16.gmra.mxu1 %v2135_v60  ;;  %1126 = vmatprep.mubr.bf16.mxu0 %v2136_v61  ;;  %v2231_v60 = vld [vmem:[%s3160_s0 + $0x2c8] ss:$16 sps:$4 sm:$0xff]   ;;  %v2232_v61 = vld [vmem:[%s3160_s0 + $0x2e4] ss:$16 sps:$4 sm:$0xff]  }
  0x73   :  { %1415 = vmatprep.mubr.bf16.mxu1 %v2138_v62  ;;  %v2234_v62 = vld [vmem:[%s3160_s0 + $0x2ec] ss:$16 sps:$4 sm:$0xff]  }
  0x79   :  { %1127 = vmatmul.mubr.bf16.gmra.mxu0 %v2140_v63  ;;  %v2236_v63 = vld [vmem:[%s3160_s0 + $0x2e0] ss:$16 sps:$4 sm:$0xff]  }
  0x7a   :  { %1416 = vmatmul.mubr.bf16.gmra.mxu1 %v2141_v0  ;;  %1134 = vmatprep.mubr.bf16.mxu0 %v2142_v1  ;;  %v2237_v0 = vld [vmem:[%s3160_s0 + $0x2e8] ss:$16 sps:$4 sm:$0xff]   ;;  %v2238_v1 = vld [vmem:[%s3160_s0 + $0x304] ss:$16 sps:$4 sm:$0xff]  }
  0x7b   :  { %1423 = vmatprep.mubr.bf16.mxu1 %v2144_v2  ;;  %v2240_v2 = vld [vmem:[%s3160_s0 + $0x30c] ss:$16 sps:$4 sm:$0xff]  }
  0x81   :  { %1135 = vmatmul.mubr.bf16.gmra.mxu0 %v2146_v3  ;;  %v2242_v3 = vld [vmem:[%s3160_s0 + $0x300] ss:$16 sps:$4 sm:$0xff]  }
  0x82   :  { %1424 = vmatmul.mubr.bf16.gmra.mxu1 %v2147_v4  ;;  %1142 = vmatprep.mubr.bf16.mxu0 %v2148_v5  ;;  %v2243_v4 = vld [vmem:[%s3160_s0 + $0x308] ss:$16 sps:$4 sm:$0xff]   ;;  %v2244_v5 = vld [vmem:[%s3160_s0 + $0x324] ss:$16 sps:$4 sm:$0xff]  }
  0x83   :  { %1431 = vmatprep.mubr.bf16.mxu1 %v2150_v6  ;;  %v2246_v6 = vld [vmem:[%s3160_s0 + $0x32c] ss:$16 sps:$4 sm:$0xff]  }
  0x89   :  { %1143 = vmatmul.mubr.bf16.gmra.mxu0 %v2152_v7 }
  0x8a   :  { %1432 = vmatmul.mubr.bf16.gmra.mxu1 %v2153_v8  ;;  %1150 = vmatprep.mubr.bf16.mxu0 %v2154_v9 }
  0x8b   :  { %1439 = vmatprep.mubr.bf16.mxu1 %v2156_v10 }
  0x91   :  { %1151 = vmatmul.mubr.bf16.gmra.mxu0 %v2158_v11 }
  0x92   :  { %1440 = vmatmul.mubr.bf16.gmra.mxu1 %v2159_v12  ;;  %1158 = vmatprep.mubr.bf16.mxu0 %v2160_v13  ;;  %v2248_v13 = vld [vmem:[%s3160_s0 + $0x320] ss:$16 sps:$4 sm:$0xff]  }
  0x93   :  { %1447 = vmatprep.mubr.bf16.mxu1 %v2162_v14 }
  0x99   :  { %1159 = vmatmul.mubr.bf16.gmra.mxu0 %v2164_v15  ;;  %v2249_v15 = vld [vmem:[%s3160_s0 + $0x328] ss:$16 sps:$4 sm:$0xff]  }
  0x9a   :  { %1448 = vmatmul.mubr.bf16.gmra.mxu1 %v2165_v16  ;;  %1166 = vmatprep.mubr.bf16.mxu0 %v2166_v17  ;;  %v2250_v16 = vld [vmem:[%s3160_s0 + $0x344] ss:$16 sps:$4 sm:$0xff]  }
  0x9b   :  { %1455 = vmatprep.mubr.bf16.mxu1 %v2168_v18 }
  0xa1   :  { %1167 = vmatmul.mubr.bf16.gmra.mxu0 %v2170_v19  ;;  %v2252_v19 = vld [vmem:[%s3160_s0 + $0x34c] ss:$16 sps:$4 sm:$0xff]  }
  0xa2   :  { %1456 = vmatmul.mubr.bf16.gmra.mxu1 %v2171_v20  ;;  %1174 = vmatprep.mubr.bf16.mxu0 %v2172_v21 }
  0xa3   :  { %1463 = vmatprep.mubr.bf16.mxu1 %v2174_v22 }
  0xa9   :  { %1175 = vmatmul.mubr.bf16.gmra.mxu0 %v2176_v23 }
  0xaa   :  { %1464 = vmatmul.mubr.bf16.gmra.mxu1 %v2177_v24  ;;  %1182 = vmatprep.mubr.bf16.mxu0 %v2178_v25 }
  0xab   :  { %1471 = vmatprep.mubr.bf16.mxu1 %v2180_v26 }
  0xb1   :  { %1183 = vmatmul.mubr.bf16.gmra.mxu0 %v2182_v27 }
  0xb2   :  { %1472 = vmatmul.mubr.bf16.gmra.mxu1 %v2183_v28  ;;  %1190 = vmatprep.mubr.bf16.mxu0 %v2184_v29 }
  0xb3   :  { %1479 = vmatprep.mubr.bf16.mxu1 %v2186_v30 }
  0xb9   :  { %1191 = vmatmul.mubr.bf16.gmra.mxu0 %v2188_v31 }
  0xba   :  { %1480 = vmatmul.mubr.bf16.gmra.mxu1 %v2189_v32  ;;  %1198 = vmatprep.mubr.bf16.mxu0 %v2190_v33  ;;  %v2254_v33 = vld [vmem:[%s3160_s0 + $0x340] ss:$16 sps:$4 sm:$0xff]  }
  0xbb   :  { %1487 = vmatprep.mubr.bf16.mxu1 %v2192_v34 }
  0xc1   :  { %1199 = vmatmul.mubr.bf16.gmra.mxu0 %v2194_v35  ;;  %v2255_v35 = vld [vmem:[%s3160_s0 + $0x348] ss:$16 sps:$4 sm:$0xff]  }
  0xc2   :  { %1488 = vmatmul.mubr.bf16.gmra.mxu1 %v2195_v36  ;;  %1206 = vmatprep.mubr.bf16.mxu0 %v2196_v37  ;;  %v2256_v36 = vld [vmem:[%s3160_s0 + $0x364] ss:$16 sps:$4 sm:$0xff]  }
  0xc3   :  { %1495 = vmatprep.mubr.bf16.mxu1 %v2198_v38 }
  0xc9   :  { %1207 = vmatmul.mubr.bf16.gmra.mxu0 %v2200_v39 }
  0xca   :  { %1496 = vmatmul.mubr.bf16.gmra.mxu1 %v2201_v40  ;;  %1214 = vmatprep.mubr.bf16.mxu0 %v2202_v41  ;;  %v2258_v40 = vld [vmem:[%s3160_s0 + $0x36c] ss:$16 sps:$4 sm:$0xff]  }
  0xcb   :  { %1503 = vmatprep.mubr.bf16.mxu1 %v2204_v42 }
  0xd1   :  { %1215 = vmatmul.mubr.bf16.gmra.mxu0 %v2206_v43 }
  0xd2   :  { %1504 = vmatmul.mubr.bf16.gmra.mxu1 %v2207_v44  ;;  %1222 = vmatprep.mubr.bf16.mxu0 %v2208_v45 }
  0xd3   :  { %1511 = vmatprep.mubr.bf16.mxu1 %v2210_v46 }
  0xd9   :  { %1223 = vmatmul.mubr.bf16.gmra.mxu0 %v2212_v47 }
  0xda   :  { %1512 = vmatmul.mubr.bf16.gmra.mxu1 %v2213_v48  ;;  %1230 = vmatprep.mubr.bf16.mxu0 %v2214_v49 }
  0xdb   :  { %1519 = vmatprep.mubr.bf16.mxu1 %v2216_v50 }
  0xe1   :  { %1231 = vmatmul.mubr.bf16.gmra.mxu0 %v2218_v51 }
  0xe2   :  { %1520 = vmatmul.mubr.bf16.gmra.mxu1 %v2219_v52  ;;  %1238 = vmatprep.mubr.bf16.mxu0 %v2220_v53  ;;  %v2260_v53 = vld [vmem:[%s3160_s0 + $0x360] ss:$16 sps:$4 sm:$0xff]  }
  0xe3   :  { %1527 = vmatprep.mubr.bf16.mxu1 %v2222_v54 }
  0xe9   :  { %1239 = vmatmul.mubr.bf16.gmra.mxu0 %v2224_v55  ;;  %v2261_v55 = vld [vmem:[%s3160_s0 + $0x368] ss:$16 sps:$4 sm:$0xff]  }
  0xea   :  { %1528 = vmatmul.mubr.bf16.gmra.mxu1 %v2225_v56  ;;  %1246 = vmatprep.mubr.bf16.mxu0 %v2226_v57  ;;  %v2264_v56 = vld [vmem:[%s3160_s0 + $0x384] ss:$16 sps:$4 sm:$0xff]  }
  0xeb   :  { %1535 = vmatprep.mubr.bf16.mxu1 %v2228_v58 }
  0xf1   :  { %1247 = vmatmul.mubr.bf16.gmra.mxu0 %v2230_v59 }
  0xf2   :  { %1536 = vmatmul.mubr.bf16.gmra.mxu1 %v2231_v60  ;;  %1254 = vmatprep.mubr.bf16.mxu0 %v2232_v61  ;;  %v2267_v60 = vld [vmem:[%s3160_s0 + $0x38c] ss:$16 sps:$4 sm:$0xff]  }
  0xf3   :  { %1543 = vmatprep.mubr.bf16.mxu1 %v2234_v62 }
  0xf9   :  { %1255 = vmatmul.mubr.bf16.gmra.mxu0 %v2236_v63 }
  0xfa   :  { %1544 = vmatmul.mubr.bf16.gmra.mxu1 %v2237_v0  ;;  %1262 = vmatprep.mubr.bf16.mxu0 %v2238_v1 }
  0xfb   :  { %1551 = vmatprep.mubr.bf16.mxu1 %v2240_v2 }
 0x101   :  { %v1072_v7 = vpop.f32.mrf.mxu0  ;;  %1263 = vmatmul.mubr.bf16.gmra.mxu0 %v2242_v3 }
 0x102   :  { %v1361_v8 = vpop.f32.mrf.mxu1  ;;  %1552 = vmatmul.mubr.bf16.gmra.mxu1 %v2243_v4  ;;  %1270 = vmatprep.mubr.bf16.mxu0 %v2244_v5 }
 0x103   :  { %v1362_v9 = vadd.f32 %v1361_v8, %v1072_v7  ;;  %v1074_v10 = vpop.f32.mrf.mxu0  ;;  %1559 = vmatprep.mubr.bf16.mxu1 %v2246_v6 }
 0x104   :  { %v1363_v11 = vpop.f32.mrf.mxu1 }
 0x105   :  { %1616 = vst [vmem:[%s3161_s2] sm:$0xff] %v1362_v9  ;;  %v1075_v12 = vpop.f32.mrf.mxu0  ;;  %v1754_v21 = vmul.f32 %v1362_v9, %v1362_v9  ;;  %v2265_v11 = vld [vmem:[%s3160_s0 + $0x388] ss:$16 sps:$4 sm:$0xff]  }
 0x106   :  { %v1364_v14 = vpop.f32.mrf.mxu1 }
 0x107   :  { %v1365_v17 = vadd.f32 %v1364_v14, %v1075_v12  ;;  %v1077_v18 = vpop.f32.mrf.mxu0  ;;  %v2270_v12 = vld [vmem:[%s3160_s0 + $0x3a4] ss:$16 sps:$4 sm:$0xff]  }
 0x108   :  { %v1366_v20 = vpop.f32.mrf.mxu1 }
 0x109   :  { %1617 = vst [vmem:[%s3161_s2 + $0x8] sm:$0xff] %v1365_v17  ;;  %v1685_v22 = vadd.f32 %v1365_v17, %v1362_v9  ;;  %v1755_v23 = vmul.f32 %v1365_v17, %v1365_v17  ;;  %v1080_v24 = vpop.f32.mrf.mxu0  ;;  %1271 = vmatmul.mubr.bf16.gmra.mxu0 %v2248_v13  ;;  %v2262_v9 = vld [vmem:[%s3160_s0 + $0x380] ss:$16 sps:$4 sm:$0xff]  }
 0x10a   :  { %v1369_v25 = vpop.f32.mrf.mxu1  ;;  %1560 = vmatmul.mubr.bf16.gmra.mxu1 %v2249_v15  ;;  %1278 = vmatprep.mubr.bf16.mxu0 %v2250_v16  ;;  %v2273_v16 = vld [vmem:[%s3160_s0 + $0x3ac] ss:$16 sps:$4 sm:$0xff]  }
 0x10b   :  { %v1818_v26 = vadd.f32 %v1755_v23, %v1754_v21  ;;  %v1370_v27 = vadd.f32 %v1369_v25, %v1080_v24  ;;  %v1082_v28 = vpop.f32.mrf.mxu0  ;;  %1567 = vmatprep.mubr.bf16.mxu1 %v2252_v19 }
 0x10c   :  { %v1371_v29 = vpop.f32.mrf.mxu1 }
 0x10d   :  { %1618 = vst [vmem:[%s3161_s2 + $0x10] sm:$0xff] %v1370_v27  ;;  %v1686_v30 = vadd.f32 %v1685_v22, %v1370_v27  ;;  %v1756_v31 = vmul.f32 %v1370_v27, %v1370_v27  ;;  %v1083_v32 = vpop.f32.mrf.mxu0  ;;  %v2268_v29 = vld [vmem:[%s3160_s0 + $0x3a0] ss:$16 sps:$4 sm:$0xff]  }
 0x10e   :  { %v1372_v34 = vpop.f32.mrf.mxu1 }
 0x10f   :  { %v1819_v37 = vadd.f32 %v1818_v26, %v1756_v31  ;;  %v1373_v38 = vadd.f32 %v1372_v34, %v1083_v32  ;;  %v1085_v39 = vpop.f32.mrf.mxu0  ;;  %v2271_v31 = vld [vmem:[%s3160_s0 + $0x3a8] ss:$16 sps:$4 sm:$0xff]   ;;  %v2276_v32 = vld [vmem:[%s3160_s0 + $0x3c4] ss:$16 sps:$4 sm:$0xff]  }
 0x110   :  { %v1374_v41 = vpop.f32.mrf.mxu1 }
 0x111   :  { %1619 = vst [vmem:[%s3161_s2 + $0x18] sm:$0xff] %v1373_v38  ;;  %v1687_v42 = vadd.f32 %v1686_v30, %v1373_v38  ;;  %v1757_v43 = vmul.f32 %v1373_v38, %v1373_v38  ;;  %v1088_v44 = vpop.f32.mrf.mxu0  ;;  %1279 = vmatmul.mubr.bf16.gmra.mxu0 %v2254_v33 }
 0x112   :  { %v1377_v45 = vpop.f32.mrf.mxu1  ;;  %1568 = vmatmul.mubr.bf16.gmra.mxu1 %v2255_v35  ;;  %1286 = vmatprep.mubr.bf16.mxu0 %v2256_v36  ;;  %v2279_v36 = vld [vmem:[%s3160_s0 + $0x3cc] ss:$16 sps:$4 sm:$0xff]  }
 0x113   :  { %v1820_v46 = vadd.f32 %v1819_v37, %v1757_v43  ;;  %v1378_v47 = vadd.f32 %v1377_v45, %v1088_v44  ;;  %v1090_v48 = vpop.f32.mrf.mxu0  ;;  %1575 = vmatprep.mubr.bf16.mxu1 %v2258_v40 }
 0x114   :  { %v1379_v49 = vpop.f32.mrf.mxu1 }
 0x115   :  { %1620 = vst [vmem:[%s3161_s2 + $0x20] sm:$0xff] %v1378_v47  ;;  %v1688_v50 = vadd.f32 %v1687_v42, %v1378_v47  ;;  %v1758_v51 = vmul.f32 %v1378_v47, %v1378_v47  ;;  %v1091_v52 = vpop.f32.mrf.mxu0  ;;  %v2274_v49 = vld [vmem:[%s3160_s0 + $0x3c0] ss:$16 sps:$4 sm:$0xff]  }
 0x116   :  { %v1380_v54 = vpop.f32.mrf.mxu1 }
 0x117   :  { %v1821_v57 = vadd.f32 %v1820_v46, %v1758_v51  ;;  %v1381_v58 = vadd.f32 %v1380_v54, %v1091_v52  ;;  %v1093_v59 = vpop.f32.mrf.mxu0  ;;  %v2277_v51 = vld [vmem:[%s3160_s0 + $0x3c8] ss:$16 sps:$4 sm:$0xff]   ;;  %v2282_v52 = vld [vmem:[%s3160_s0 + $0x3e4] ss:$16 sps:$4 sm:$0xff]  }
 0x118   :  { %v1382_v61 = vpop.f32.mrf.mxu1 }
 0x119   :  { %1621 = vst [vmem:[%s3161_s2 + $0x28] sm:$0xff] %v1381_v58  ;;  %v1689_v62 = vadd.f32 %v1688_v50, %v1381_v58  ;;  %v1759_v63 = vmul.f32 %v1381_v58, %v1381_v58  ;;  %v1096_v0 = vpop.f32.mrf.mxu0  ;;  %1287 = vmatmul.mubr.bf16.gmra.mxu0 %v2260_v53 }
 0x11a   :  { %v1385_v1 = vpop.f32.mrf.mxu1  ;;  %1576 = vmatmul.mubr.bf16.gmra.mxu1 %v2261_v55  ;;  %1294 = vmatprep.mubr.bf16.mxu0 %v2264_v56  ;;  %v2285_v56 = vld [vmem:[%s3160_s0 + $0x3ec] ss:$16 sps:$4 sm:$0xff]  }
 0x11b   :  { %v1822_v2 = vadd.f32 %v1821_v57, %v1759_v63  ;;  %v1386_v3 = vadd.f32 %v1385_v1, %v1096_v0  ;;  %v1098_v4 = vpop.f32.mrf.mxu0  ;;  %1583 = vmatprep.mubr.bf16.mxu1 %v2267_v60 }
 0x11c   :  { %v1387_v5 = vpop.f32.mrf.mxu1 }
 0x11d   :  { %1622 = vst [vmem:[%s3161_s2 + $0x30] sm:$0xff] %v1386_v3  ;;  %v1690_v6 = vadd.f32 %v1689_v62, %v1386_v3  ;;  %v1760_v7 = vmul.f32 %v1386_v3, %v1386_v3  ;;  %v1099_v8 = vpop.f32.mrf.mxu0  ;;  %v2280_v5 = vld [vmem:[%s3160_s0 + $0x3e0] ss:$16 sps:$4 sm:$0xff]  }
 0x11e   :  { %v1388_v10 = vpop.f32.mrf.mxu1 }
 0x11f   :  { %v1823_v13 = vadd.f32 %v1822_v2, %v1760_v7  ;;  %v1389_v14 = vadd.f32 %v1388_v10, %v1099_v8  ;;  %v1101_v15 = vpop.f32.mrf.mxu0  ;;  %v2283_v7 = vld [vmem:[%s3160_s0 + $0x3e8] ss:$16 sps:$4 sm:$0xff]  }
 0x120   :  { %v1390_v17 = vpop.f32.mrf.mxu1 }
 0x121   :  { %1623 = vst [vmem:[%s3161_s2 + $0x38] sm:$0xff] %v1389_v14  ;;  %v1691_v18 = vadd.f32 %v1690_v6, %v1389_v14  ;;  %v1761_v19 = vmul.f32 %v1389_v14, %v1389_v14  ;;  %v1104_v20 = vpop.f32.mrf.mxu0  ;;  %1295 = vmatmul.mubr.bf16.gmra.mxu0 %v2262_v9 }
 0x122   :  { %v1393_v21 = vpop.f32.mrf.mxu1  ;;  %1584 = vmatmul.mubr.bf16.gmra.mxu1 %v2265_v11  ;;  %1302 = vmatprep.mubr.bf16.mxu0 %v2270_v12 }
 0x123   :  { %v1824_v22 = vadd.f32 %v1823_v13, %v1761_v19  ;;  %v1394_v23 = vadd.f32 %v1393_v21, %v1104_v20  ;;  %v1106_v24 = vpop.f32.mrf.mxu0  ;;  %1591 = vmatprep.mubr.bf16.mxu1 %v2273_v16 }
 0x124   :  { %v1395_v25 = vpop.f32.mrf.mxu1 }
 0x125   :  { %1624 = vst [vmem:[%s3161_s2 + $0x40] sm:$0xff] %v1394_v23  ;;  %v1692_v26 = vadd.f32 %v1691_v18, %v1394_v23  ;;  %v1762_v27 = vmul.f32 %v1394_v23, %v1394_v23  ;;  %v1107_v28 = vpop.f32.mrf.mxu0 }
 0x126   :  { %v1396_v30 = vpop.f32.mrf.mxu1 }
 0x127   :  { %v1825_v33 = vadd.f32 %v1824_v22, %v1762_v27  ;;  %v1397_v34 = vadd.f32 %v1396_v30, %v1107_v28  ;;  %v1109_v35 = vpop.f32.mrf.mxu0 }
 0x128   :  { %v1398_v37 = vpop.f32.mrf.mxu1 }
 0x129   :  { %1625 = vst [vmem:[%s3161_s2 + $0x48] sm:$0xff] %v1397_v34  ;;  %v1693_v38 = vadd.f32 %v1692_v26, %v1397_v34  ;;  %v1763_v39 = vmul.f32 %v1397_v34, %v1397_v34  ;;  %v1112_v40 = vpop.f32.mrf.mxu0  ;;  %1303 = vmatmul.mubr.bf16.gmra.mxu0 %v2268_v29 }
 0x12a   :  { %v1401_v41 = vpop.f32.mrf.mxu1  ;;  %1592 = vmatmul.mubr.bf16.gmra.mxu1 %v2271_v31  ;;  %1310 = vmatprep.mubr.bf16.mxu0 %v2276_v32 }
 0x12b   :  { %v1826_v42 = vadd.f32 %v1825_v33, %v1763_v39  ;;  %v1402_v43 = vadd.f32 %v1401_v41, %v1112_v40  ;;  %v1114_v44 = vpop.f32.mrf.mxu0  ;;  %1599 = vmatprep.mubr.bf16.mxu1 %v2279_v36 }
 0x12c   :  { %v1403_v45 = vpop.f32.mrf.mxu1 }
 0x12d   :  { %1626 = vst [vmem:[%s3161_s2 + $0x50] sm:$0xff] %v1402_v43  ;;  %v1694_v46 = vadd.f32 %v1693_v38, %v1402_v43  ;;  %v1764_v47 = vmul.f32 %v1402_v43, %v1402_v43  ;;  %v1115_v48 = vpop.f32.mrf.mxu0 }
 0x12e   :  { %v1404_v50 = vpop.f32.mrf.mxu1 }
 0x12f   :  { %v1827_v53 = vadd.f32 %v1826_v42, %v1764_v47  ;;  %v1405_v54 = vadd.f32 %v1404_v50, %v1115_v48  ;;  %v1117_v55 = vpop.f32.mrf.mxu0 }
 0x130   :  { %v1406_v57 = vpop.f32.mrf.mxu1 }
 0x131   :  { %1627 = vst [vmem:[%s3161_s2 + $0x58] sm:$0xff] %v1405_v54  ;;  %v1695_v58 = vadd.f32 %v1694_v46, %v1405_v54  ;;  %v1765_v59 = vmul.f32 %v1405_v54, %v1405_v54  ;;  %v1120_v60 = vpop.f32.mrf.mxu0  ;;  %1311 = vmatmul.mubr.bf16.gmra.mxu0 %v2274_v49 }
 0x132   :  { %v1409_v61 = vpop.f32.mrf.mxu1  ;;  %1600 = vmatmul.mubr.bf16.gmra.mxu1 %v2277_v51  ;;  %1318 = vmatprep.mubr.bf16.mxu0 %v2282_v52 }
 0x133   :  { %v1828_v62 = vadd.f32 %v1827_v53, %v1765_v59  ;;  %v1410_v63 = vadd.f32 %v1409_v61, %v1120_v60  ;;  %v1122_v0 = vpop.f32.mrf.mxu0  ;;  %1607 = vmatprep.mubr.bf16.mxu1 %v2285_v56 }
 0x134   :  { %v1411_v1 = vpop.f32.mrf.mxu1 }
 0x135   :  { %1628 = vst [vmem:[%s3161_s2 + $0x60] sm:$0xff] %v1410_v63  ;;  %v1696_v2 = vadd.f32 %v1695_v58, %v1410_v63  ;;  %v1766_v3 = vmul.f32 %v1410_v63, %v1410_v63  ;;  %v1123_v4 = vpop.f32.mrf.mxu0 }
 0x136   :  { %v1412_v6 = vpop.f32.mrf.mxu1 }
 0x137   :  { %v1829_v8 = vadd.f32 %v1828_v62, %v1766_v3  ;;  %v1413_v9 = vadd.f32 %v1412_v6, %v1123_v4  ;;  %v1125_v10 = vpop.f32.mrf.mxu0 }
 0x138   :  { %v1414_v11 = vpop.f32.mrf.mxu1 }
 0x139   :  { %1629 = vst [vmem:[%s3161_s2 + $0x68] sm:$0xff] %v1413_v9  ;;  %v1697_v12 = vadd.f32 %v1696_v2, %v1413_v9  ;;  %v1767_v13 = vmul.f32 %v1413_v9, %v1413_v9  ;;  %v1128_v14 = vpop.f32.mrf.mxu0  ;;  %1319 = vmatmul.mubr.bf16.gmra.mxu0 %v2280_v5 }
 0x13a   :  { %v1417_v15 = vpop.f32.mrf.mxu1  ;;  %1608 = vmatmul.mubr.bf16.gmra.mxu1 %v2283_v7 }
 0x13b   :  { %v1830_v16 = vadd.f32 %v1829_v8, %v1767_v13  ;;  %v1418_v17 = vadd.f32 %v1417_v15, %v1128_v14  ;;  %v1130_v18 = vpop.f32.mrf.mxu0 }
 0x13c   :  { %v1419_v19 = vpop.f32.mrf.mxu1 }
 0x13d   :  { %1630 = vst [vmem:[%s3161_s2 + $0x70] sm:$0xff] %v1418_v17  ;;  %v1698_v20 = vadd.f32 %v1697_v12, %v1418_v17  ;;  %v1768_v21 = vmul.f32 %v1418_v17, %v1418_v17  ;;  %v1131_v22 = vpop.f32.mrf.mxu0 }
 0x13e   :  { %v1420_v23 = vpop.f32.mrf.mxu1 }
 0x13f   :  { %v1831_v24 = vadd.f32 %v1830_v16, %v1768_v21  ;;  %v1421_v25 = vadd.f32 %v1420_v23, %v1131_v22  ;;  %v1133_v26 = vpop.f32.mrf.mxu0 }
 0x140   :  { %v1422_v27 = vpop.f32.mrf.mxu1 }
 0x141   :  { %1631 = vst [vmem:[%s3161_s2 + $0x78] sm:$0xff] %v1421_v25  ;;  %v1699_v28 = vadd.f32 %v1698_v20, %v1421_v25  ;;  %v1769_v29 = vmul.f32 %v1421_v25, %v1421_v25  ;;  %v1136_v30 = vpop.f32.mrf.mxu0 }
 0x142   :  { %v1425_v31 = vpop.f32.mrf.mxu1 }
 0x143   :  { %v1832_v32 = vadd.f32 %v1831_v24, %v1769_v29  ;;  %v1426_v33 = vadd.f32 %v1425_v31, %v1136_v30  ;;  %v1138_v34 = vpop.f32.mrf.mxu0 }
 0x144   :  { %v1427_v35 = vpop.f32.mrf.mxu1 }
 0x145   :  { %1632 = vst [vmem:[%s3161_s2 + $0x80] sm:$0xff] %v1426_v33  ;;  %v1700_v36 = vadd.f32 %v1699_v28, %v1426_v33  ;;  %v1770_v37 = vmul.f32 %v1426_v33, %v1426_v33  ;;  %v1139_v38 = vpop.f32.mrf.mxu0 }
 0x146   :  { %v1428_v39 = vpop.f32.mrf.mxu1 }
 0x147   :  { %v1833_v40 = vadd.f32 %v1832_v32, %v1770_v37  ;;  %v1429_v41 = vadd.f32 %v1428_v39, %v1139_v38  ;;  %v1141_v42 = vpop.f32.mrf.mxu0 }
 0x148   :  { %v1430_v43 = vpop.f32.mrf.mxu1 }
 0x149   :  { %1633 = vst [vmem:[%s3161_s2 + $0x88] sm:$0xff] %v1429_v41  ;;  %v1701_v44 = vadd.f32 %v1700_v36, %v1429_v41  ;;  %v1771_v45 = vmul.f32 %v1429_v41, %v1429_v41  ;;  %v1144_v46 = vpop.f32.mrf.mxu0 }
 0x14a   :  { %v1433_v47 = vpop.f32.mrf.mxu1 }
 0x14b   :  { %v1834_v48 = vadd.f32 %v1833_v40, %v1771_v45  ;;  %v1434_v49 = vadd.f32 %v1433_v47, %v1144_v46  ;;  %v1146_v50 = vpop.f32.mrf.mxu0 }
 0x14c   :  { %v1435_v51 = vpop.f32.mrf.mxu1 }
 0x14d   :  { %1634 = vst [vmem:[%s3161_s2 + $0x90] sm:$0xff] %v1434_v49  ;;  %v1702_v52 = vadd.f32 %v1701_v44, %v1434_v49  ;;  %v1772_v53 = vmul.f32 %v1434_v49, %v1434_v49  ;;  %v1147_v54 = vpop.f32.mrf.mxu0 }
 0x14e   :  { %v1436_v55 = vpop.f32.mrf.mxu1 }
 0x14f   :  { %v1835_v56 = vadd.f32 %v1834_v48, %v1772_v53  ;;  %v1437_v57 = vadd.f32 %v1436_v55, %v1147_v54  ;;  %v1149_v58 = vpop.f32.mrf.mxu0 }
 0x150   :  { %v1438_v59 = vpop.f32.mrf.mxu1 }
 0x151   :  { %1635 = vst [vmem:[%s3161_s2 + $0x98] sm:$0xff] %v1437_v57  ;;  %v1703_v60 = vadd.f32 %v1702_v52, %v1437_v57  ;;  %v1773_v61 = vmul.f32 %v1437_v57, %v1437_v57  ;;  %v1152_v62 = vpop.f32.mrf.mxu0 }
 0x152   :  { %v1441_v63 = vpop.f32.mrf.mxu1 }
 0x153   :  { %v1836_v0 = vadd.f32 %v1835_v56, %v1773_v61  ;;  %v1442_v1 = vadd.f32 %v1441_v63, %v1152_v62  ;;  %v1154_v2 = vpop.f32.mrf.mxu0 }
 0x154   :  { %v1443_v3 = vpop.f32.mrf.mxu1 }
 0x155   :  { %1636 = vst [vmem:[%s3161_s2 + $0xa0] sm:$0xff] %v1442_v1  ;;  %v1704_v4 = vadd.f32 %v1703_v60, %v1442_v1  ;;  %v1774_v5 = vmul.f32 %v1442_v1, %v1442_v1  ;;  %v1155_v6 = vpop.f32.mrf.mxu0 }
 0x156   :  { %v1444_v7 = vpop.f32.mrf.mxu1 }
 0x157   :  { %v1837_v8 = vadd.f32 %v1836_v0, %v1774_v5  ;;  %v1445_v9 = vadd.f32 %v1444_v7, %v1155_v6  ;;  %v1157_v10 = vpop.f32.mrf.mxu0 }
 0x158   :  { %v1446_v11 = vpop.f32.mrf.mxu1 }
 0x159   :  { %1637 = vst [vmem:[%s3161_s2 + $0xa8] sm:$0xff] %v1445_v9  ;;  %v1705_v12 = vadd.f32 %v1704_v4, %v1445_v9  ;;  %v1775_v13 = vmul.f32 %v1445_v9, %v1445_v9  ;;  %v1160_v14 = vpop.f32.mrf.mxu0 }
 0x15a   :  { %v1449_v15 = vpop.f32.mrf.mxu1 }
 0x15b   :  { %v1838_v16 = vadd.f32 %v1837_v8, %v1775_v13  ;;  %v1450_v17 = vadd.f32 %v1449_v15, %v1160_v14  ;;  %v1162_v18 = vpop.f32.mrf.mxu0 }
 0x15c   :  { %v1451_v19 = vpop.f32.mrf.mxu1 }
 0x15d   :  { %1638 = vst [vmem:[%s3161_s2 + $0xb0] sm:$0xff] %v1450_v17  ;;  %v1706_v20 = vadd.f32 %v1705_v12, %v1450_v17  ;;  %v1776_v21 = vmul.f32 %v1450_v17, %v1450_v17  ;;  %v1163_v22 = vpop.f32.mrf.mxu0 }
 0x15e   :  { %v1452_v23 = vpop.f32.mrf.mxu1 }
 0x15f   :  { %v1839_v24 = vadd.f32 %v1838_v16, %v1776_v21  ;;  %v1453_v25 = vadd.f32 %v1452_v23, %v1163_v22  ;;  %v1165_v26 = vpop.f32.mrf.mxu0 }
 0x160   :  { %v1454_v27 = vpop.f32.mrf.mxu1 }
 0x161   :  { %1639 = vst [vmem:[%s3161_s2 + $0xb8] sm:$0xff] %v1453_v25  ;;  %v1707_v28 = vadd.f32 %v1706_v20, %v1453_v25  ;;  %v1777_v29 = vmul.f32 %v1453_v25, %v1453_v25  ;;  %v1168_v30 = vpop.f32.mrf.mxu0 }
 0x162   :  { %v1457_v31 = vpop.f32.mrf.mxu1 }
 0x163   :  { %v1840_v32 = vadd.f32 %v1839_v24, %v1777_v29  ;;  %v1458_v33 = vadd.f32 %v1457_v31, %v1168_v30  ;;  %v1170_v34 = vpop.f32.mrf.mxu0 }
 0x164   :  { %v1459_v35 = vpop.f32.mrf.mxu1 }
 0x165   :  { %1640 = vst [vmem:[%s3161_s2 + $0xc0] sm:$0xff] %v1458_v33  ;;  %v1708_v36 = vadd.f32 %v1707_v28, %v1458_v33  ;;  %v1778_v37 = vmul.f32 %v1458_v33, %v1458_v33  ;;  %v1171_v38 = vpop.f32.mrf.mxu0 }
 0x166   :  { %v1460_v39 = vpop.f32.mrf.mxu1 }
 0x167   :  { %v1841_v40 = vadd.f32 %v1840_v32, %v1778_v37  ;;  %v1461_v41 = vadd.f32 %v1460_v39, %v1171_v38  ;;  %v1173_v42 = vpop.f32.mrf.mxu0  ;;  %v2287_v32 = vmov 0.0  }
 0x168   :  { %v1462_v43 = vpop.f32.mrf.mxu1  ;;  %1684 = vst [vmem:[%s3162_s3] sm:$0x3] %v2287_v32 }
 0x169   :  { %1641 = vst [vmem:[%s3161_s2 + $0xc8] sm:$0xff] %v1461_v41  ;;  %v1709_v44 = vadd.f32 %v1708_v36, %v1461_v41  ;;  %v1779_v45 = vmul.f32 %v1461_v41, %v1461_v41  ;;  %v1176_v46 = vpop.f32.mrf.mxu0 }
 0x16a   :  { %v1465_v47 = vpop.f32.mrf.mxu1 }
 0x16b   :  { %v1842_v48 = vadd.f32 %v1841_v40, %v1779_v45  ;;  %v1466_v49 = vadd.f32 %v1465_v47, %v1176_v46  ;;  %v1178_v50 = vpop.f32.mrf.mxu0 }
 0x16c   :  { %v1467_v51 = vpop.f32.mrf.mxu1 }
 0x16d   :  { %1642 = vst [vmem:[%s3161_s2 + $0xd0] sm:$0xff] %v1466_v49  ;;  %v1710_v52 = vadd.f32 %v1709_v44, %v1466_v49  ;;  %v1780_v53 = vmul.f32 %v1466_v49, %v1466_v49  ;;  %v1179_v54 = vpop.f32.mrf.mxu0 }
 0x16e   :  { %v1468_v55 = vpop.f32.mrf.mxu1 }
 0x16f   :  { %v1843_v56 = vadd.f32 %v1842_v48, %v1780_v53  ;;  %v1469_v57 = vadd.f32 %v1468_v55, %v1179_v54  ;;  %v1181_v58 = vpop.f32.mrf.mxu0 }
 0x170   :  { %v1470_v59 = vpop.f32.mrf.mxu1 }
 0x171   :  { %1643 = vst [vmem:[%s3161_s2 + $0xd8] sm:$0xff] %v1469_v57  ;;  %v1711_v60 = vadd.f32 %v1710_v52, %v1469_v57  ;;  %v1781_v61 = vmul.f32 %v1469_v57, %v1469_v57  ;;  %v1184_v62 = vpop.f32.mrf.mxu0 }
 0x172   :  { %v1473_v63 = vpop.f32.mrf.mxu1 }
 0x173   :  { %v1844_v0 = vadd.f32 %v1843_v56, %v1781_v61  ;;  %v1474_v1 = vadd.f32 %v1473_v63, %v1184_v62  ;;  %v1186_v2 = vpop.f32.mrf.mxu0 }
 0x174   :  { %v1475_v3 = vpop.f32.mrf.mxu1 }
 0x175   :  { %1644 = vst [vmem:[%s3161_s2 + $0xe0] sm:$0xff] %v1474_v1  ;;  %v1712_v4 = vadd.f32 %v1711_v60, %v1474_v1  ;;  %v1782_v5 = vmul.f32 %v1474_v1, %v1474_v1  ;;  %v1187_v6 = vpop.f32.mrf.mxu0 }
 0x176   :  { %v1476_v7 = vpop.f32.mrf.mxu1 }
 0x177   :  { %v1845_v8 = vadd.f32 %v1844_v0, %v1782_v5  ;;  %v1477_v9 = vadd.f32 %v1476_v7, %v1187_v6  ;;  %v1189_v10 = vpop.f32.mrf.mxu0 }
 0x178   :  { %v1478_v11 = vpop.f32.mrf.mxu1 }
 0x179   :  { %1645 = vst [vmem:[%s3161_s2 + $0xe8] sm:$0xff] %v1477_v9  ;;  %v1713_v12 = vadd.f32 %v1712_v4, %v1477_v9  ;;  %v1783_v13 = vmul.f32 %v1477_v9, %v1477_v9  ;;  %v1192_v14 = vpop.f32.mrf.mxu0 }
 0x17a   :  { %v1481_v15 = vpop.f32.mrf.mxu1 }
 0x17b   :  { %v1846_v16 = vadd.f32 %v1845_v8, %v1783_v13  ;;  %v1482_v17 = vadd.f32 %v1481_v15, %v1192_v14  ;;  %v1194_v18 = vpop.f32.mrf.mxu0 }
 0x17c   :  { %v1483_v19 = vpop.f32.mrf.mxu1 }
 0x17d   :  { %1646 = vst [vmem:[%s3161_s2 + $0xf0] sm:$0xff] %v1482_v17  ;;  %v1714_v20 = vadd.f32 %v1713_v12, %v1482_v17  ;;  %v1784_v21 = vmul.f32 %v1482_v17, %v1482_v17  ;;  %v1195_v22 = vpop.f32.mrf.mxu0 }
 0x17e   :  { %v1484_v23 = vpop.f32.mrf.mxu1 }
 0x17f   :  { %v1847_v24 = vadd.f32 %v1846_v16, %v1784_v21  ;;  %v1485_v25 = vadd.f32 %v1484_v23, %v1195_v22  ;;  %v1197_v26 = vpop.f32.mrf.mxu0 }
 0x180   :  { %v1486_v27 = vpop.f32.mrf.mxu1 }
 0x181   :  { %1647 = vst [vmem:[%s3161_s2 + $0xf8] sm:$0xff] %v1485_v25  ;;  %v1715_v28 = vadd.f32 %v1714_v20, %v1485_v25  ;;  %v1785_v29 = vmul.f32 %v1485_v25, %v1485_v25  ;;  %v1200_v30 = vpop.f32.mrf.mxu0 }
 0x182   :  { %v1489_v31 = vpop.f32.mrf.mxu1 }
 0x183   :  { %v2919_v33 = vadd.f32 %v1847_v24, %v1785_v29  ;;  %v2921_v34 = vadd.f32 %v1489_v31, %v1200_v30  ;;  %v1202_v35 = vpop.f32.mrf.mxu0 }
 0x184   :  { %v1491_v36 = vpop.f32.mrf.mxu1 }
 0x185   :  { %1648 = vst [vmem:[%s3161_s2 + $0x100] sm:$0xff] %v2921_v34  ;;  %v2928_v37 = vadd.f32 %v1715_v28, %v2921_v34  ;;  %v1203_v38 = vpop.f32.mrf.mxu0 }
 0x186   :  { %v1492_v39 = vpop.f32.mrf.mxu1 }
 0x187   :  { %v2930_v40 = vadd.f32 %v1492_v39, %v1203_v38  ;;  %v1205_v41 = vpop.f32.mrf.mxu0 }
 0x188   :  { %v1494_v42 = vpop.f32.mrf.mxu1 }
 0x189   :  { %1649 = vst [vmem:[%s3161_s2 + $0x108] sm:$0xff] %v2930_v40  ;;  %v1208_v43 = vpop.f32.mrf.mxu0 }
 0x18a   :  { %v1497_v44 = vpop.f32.mrf.mxu1 }
 0x18b   :  { %v2936_v45 = vadd.f32 %v1497_v44, %v1208_v43  ;;  %v1210_v46 = vpop.f32.mrf.mxu0 }
 0x18c   :  { %v1499_v47 = vpop.f32.mrf.mxu1 }
 0x18d   :  { %1650 = vst [vmem:[%s3161_s2 + $0x110] sm:$0xff] %v2936_v45  ;;  %v1211_v48 = vpop.f32.mrf.mxu0 }
 0x18e   :  { %v1500_v49 = vpop.f32.mrf.mxu1 }
 0x18f   :  { %v2942_v50 = vadd.f32 %v1500_v49, %v1211_v48  ;;  %v1213_v51 = vpop.f32.mrf.mxu0 }
 0x190   :  { %v1502_v52 = vpop.f32.mrf.mxu1 }
 0x191   :  { %1651 = vst [vmem:[%s3161_s2 + $0x118] sm:$0xff] %v2942_v50  ;;  %v1216_v53 = vpop.f32.mrf.mxu0 }
 0x192   :  { %v1505_v54 = vpop.f32.mrf.mxu1 }
 0x193   :  { %v2948_v55 = vadd.f32 %v1505_v54, %v1216_v53  ;;  %v1218_v56 = vpop.f32.mrf.mxu0 }
 0x194   :  { %v1507_v57 = vpop.f32.mrf.mxu1  ;;  %v1786_v56 = vmul.f32 %v2921_v34, %v2921_v34  ;;  %v1788_v34 = vmul.f32 %v2936_v45, %v2936_v45 }
 0x195   :  { %1652 = vst [vmem:[%s3161_s2 + $0x120] sm:$0xff] %v2948_v55  ;;  %v1219_v58 = vpop.f32.mrf.mxu0 }
 0x196   :  { %v1508_v59 = vpop.f32.mrf.mxu1 }
 0x197   :  { %v2954_v60 = vadd.f32 %v1508_v59, %v1219_v58  ;;  %v1221_v61 = vpop.f32.mrf.mxu0  ;;  %v1787_v59 = vmul.f32 %v2930_v40, %v2930_v40 }
 0x198   :  { %v1510_v62 = vpop.f32.mrf.mxu1 }
 0x199   :  { %1653 = vst [vmem:[%s3161_s2 + $0x128] sm:$0xff] %v2954_v60  ;;  %v1224_v63 = vpop.f32.mrf.mxu0 }
 0x19a   :  { %v1513_v0 = vpop.f32.mrf.mxu1 }
 0x19b   :  { %v2960_v1 = vadd.f32 %v1513_v0, %v1224_v63  ;;  %v1226_v2 = vpop.f32.mrf.mxu0  ;;  %v1849_v0 = vadd.f32 %v2919_v33, %v1786_v56 }
 0x19c   :  { %v1515_v3 = vpop.f32.mrf.mxu1  ;;  %v1717_v2 = vadd.f32 %v2928_v37, %v2930_v40 }
 0x19d   :  { %1654 = vst [vmem:[%s3161_s2 + $0x130] sm:$0xff] %v2960_v1  ;;  %v1227_v4 = vpop.f32.mrf.mxu0 }
 0x19e   :  { %v1516_v5 = vpop.f32.mrf.mxu1 }
 0x19f   :  { %v2966_v6 = vadd.f32 %v1516_v5, %v1227_v4  ;;  %v1229_v7 = vpop.f32.mrf.mxu0  ;;  %v1850_v5 = vadd.f32 %v1849_v0, %v1787_v59 }
 0x1a0   :  { %v1518_v8 = vpop.f32.mrf.mxu1  ;;  %v1718_v7 = vadd.f32 %v1717_v2, %v2936_v45 }
 0x1a1   :  { %1655 = vst [vmem:[%s3161_s2 + $0x138] sm:$0xff] %v2966_v6  ;;  %v1232_v9 = vpop.f32.mrf.mxu0  ;;  %v1789_v8 = vmul.f32 %v2942_v50, %v2942_v50  ;;  %v1851_v40 = vadd.f32 %v1850_v5, %v1788_v34 }
 0x1a2   :  { %v1521_v10 = vpop.f32.mrf.mxu1 }
 0x1a3   :  { %v2972_v11 = vadd.f32 %v1521_v10, %v1232_v9  ;;  %v1234_v12 = vpop.f32.mrf.mxu0  ;;  %v1719_v10 = vadd.f32 %v1718_v7, %v2942_v50 }
 0x1a4   :  { %v1523_v13 = vpop.f32.mrf.mxu1  ;;  %v1790_v12 = vmul.f32 %v2948_v55, %v2948_v55 }
 0x1a5   :  { %1656 = vst [vmem:[%s3161_s2 + $0x140] sm:$0xff] %v2972_v11  ;;  %v1235_v14 = vpop.f32.mrf.mxu0 }
 0x1a6   :  { %v1524_v15 = vpop.f32.mrf.mxu1 }
 0x1a7   :  { %v2978_v16 = vadd.f32 %v1524_v15, %v1235_v14  ;;  %v1237_v17 = vpop.f32.mrf.mxu0  ;;  %v1852_v14 = vadd.f32 %v1851_v40, %v1789_v8  ;;  %v1720_v15 = vadd.f32 %v1719_v10, %v2948_v55 }
 0x1a8   :  { %v1526_v18 = vpop.f32.mrf.mxu1  ;;  %v1791_v17 = vmul.f32 %v2954_v60, %v2954_v60 }
 0x1a9   :  { %1657 = vst [vmem:[%s3161_s2 + $0x148] sm:$0xff] %v2978_v16  ;;  %v1240_v19 = vpop.f32.mrf.mxu0 }
 0x1aa   :  { %v1529_v20 = vpop.f32.mrf.mxu1 }
 0x1ab   :  { %v2984_v21 = vadd.f32 %v1529_v20, %v1240_v19  ;;  %v1242_v22 = vpop.f32.mrf.mxu0  ;;  %v1853_v20 = vadd.f32 %v1852_v14, %v1790_v12 }
 0x1ac   :  { %v1531_v23 = vpop.f32.mrf.mxu1  ;;  %v1721_v22 = vadd.f32 %v1720_v15, %v2954_v60 }
 0x1ad   :  { %1658 = vst [vmem:[%s3161_s2 + $0x150] sm:$0xff] %v2984_v21  ;;  %v1243_v24 = vpop.f32.mrf.mxu0  ;;  %v1792_v23 = vmul.f32 %v2960_v1, %v2960_v1 }
 0x1ae   :  { %v1532_v25 = vpop.f32.mrf.mxu1 }
 0x1af   :  { %v2990_v26 = vadd.f32 %v1532_v25, %v1243_v24  ;;  %v1245_v27 = vpop.f32.mrf.mxu0  ;;  %v1854_v25 = vadd.f32 %v1853_v20, %v1791_v17 }
 0x1b0   :  { %v1534_v28 = vpop.f32.mrf.mxu1  ;;  %v1722_v27 = vadd.f32 %v1721_v22, %v2960_v1 }
 0x1b1   :  { %1659 = vst [vmem:[%s3161_s2 + $0x158] sm:$0xff] %v2990_v26  ;;  %v1248_v29 = vpop.f32.mrf.mxu0  ;;  %v1793_v28 = vmul.f32 %v2966_v6, %v2966_v6 }
 0x1b2   :  { %v1537_v30 = vpop.f32.mrf.mxu1 }
 0x1b3   :  { %v2996_v31 = vadd.f32 %v1537_v30, %v1248_v29  ;;  %v1250_v32 = vpop.f32.mrf.mxu0 }
 0x1b4   :  { %v1539_v35 = vpop.f32.mrf.mxu1  ;;  %v1855_v32 = vadd.f32 %v1854_v25, %v1792_v23 }
 0x1b5   :  { %1660 = vst [vmem:[%s3161_s2 + $0x160] sm:$0xff] %v2996_v31  ;;  %v1251_v36 = vpop.f32.mrf.mxu0  ;;  %v1723_v35 = vadd.f32 %v1722_v27, %v2966_v6  ;;  %v1798_v0 = vmul.f32 %v2996_v31, %v2996_v31 }
 0x1b6   :  { %v1540_v38 = vpop.f32.mrf.mxu1 }
 0x1b7   :  { %v3002_v39 = vadd.f32 %v1540_v38, %v1251_v36  ;;  %v1253_v41 = vpop.f32.mrf.mxu0  ;;  %v1794_v36 = vmul.f32 %v2972_v11, %v2972_v11 }
 0x1b8   :  { %v1542_v42 = vpop.f32.mrf.mxu1  ;;  %v1856_v41 = vadd.f32 %v1855_v32, %v1793_v28 }
 0x1b9   :  { %1661 = vst [vmem:[%s3161_s2 + $0x168] sm:$0xff] %v3002_v39  ;;  %v1256_v43 = vpop.f32.mrf.mxu0  ;;  %v1724_v42 = vadd.f32 %v1723_v35, %v2972_v11 }
 0x1ba   :  { %v1545_v44 = vpop.f32.mrf.mxu1 }
 0x1bb   :  { %v3008_v46 = vadd.f32 %v1545_v44, %v1256_v43  ;;  %v1258_v47 = vpop.f32.mrf.mxu0  ;;  %v1795_v43 = vmul.f32 %v2978_v16, %v2978_v16 }
 0x1bc   :  { %v1547_v48 = vpop.f32.mrf.mxu1 }
 0x1bd   :  { %1662 = vst [vmem:[%s3161_s2 + $0x170] sm:$0xff] %v3008_v46  ;;  %v1259_v49 = vpop.f32.mrf.mxu0  ;;  %v1857_v48 = vadd.f32 %v1856_v41, %v1794_v36 }
 0x1be   :  { %v1548_v51 = vpop.f32.mrf.mxu1 }
 0x1bf   :  { %v3014_v52 = vadd.f32 %v1548_v51, %v1259_v49  ;;  %v1261_v53 = vpop.f32.mrf.mxu0  ;;  %v1725_v49 = vadd.f32 %v1724_v42, %v2978_v16  ;;  %v1796_v51 = vmul.f32 %v2984_v21, %v2984_v21 }
 0x1c0   :  { %v1550_v54 = vpop.f32.mrf.mxu1 }
 0x1c1   :  { %1663 = vst [vmem:[%s3161_s2 + $0x178] sm:$0xff] %v3014_v52  ;;  %v1264_v57 = vpop.f32.mrf.mxu0  ;;  %v1858_v54 = vadd.f32 %v1857_v48, %v1795_v43  ;;  %v1726_v56 = vadd.f32 %v1725_v49, %v2984_v21 }
 0x1c2   :  { %v1553_v58 = vpop.f32.mrf.mxu1 }
 0x1c3   :  { %v3024_v61 = vadd.f32 %v1553_v58, %v1264_v57  ;;  %v1266_v62 = vpop.f32.mrf.mxu0  ;;  %v1797_v57 = vmul.f32 %v2990_v26, %v2990_v26 }
 0x1c4   :  { %v1555_v63 = vpop.f32.mrf.mxu1  ;;  %v1859_v62 = vadd.f32 %v1858_v54, %v1796_v51 }
 0x1c5   :  { %1664 = vst [vmem:[%s3161_s2 + $0x180] sm:$0xff] %v3024_v61  ;;  %v1267_v3 = vpop.f32.mrf.mxu0  ;;  %v1727_v63 = vadd.f32 %v1726_v56, %v2990_v26 }
 0x1c6   :  { %v1556_v4 = vpop.f32.mrf.mxu1  ;;  %v1860_v34 = vadd.f32 %v1859_v62, %v1797_v57 }
 0x1c7   :  { %v3038_v33 = vadd.f32 %v1556_v4, %v1267_v3  ;;  %v1269_v9 = vpop.f32.mrf.mxu0  ;;  %v1728_v3 = vadd.f32 %v1727_v63, %v2996_v31  ;;  %v1799_v4 = vmul.f32 %v3002_v39, %v3002_v39 }
 0x1c8   :  { %v1558_v37 = vpop.f32.mrf.mxu1  ;;  %v1861_v26 = vadd.f32 %v1860_v34, %v1798_v0 }
 0x1c9   :  { %1665 = vst [vmem:[%s3161_s2 + $0x188] sm:$0xff] %v3038_v33  ;;  %v1272_v13 = vpop.f32.mrf.mxu0  ;;  %v1729_v9 = vadd.f32 %v1728_v3, %v3002_v39  ;;  %v1800_v37 = vmul.f32 %v3008_v46, %v3008_v46  ;;  %v1803_v23 = vmul.f32 %v3038_v33, %v3038_v33 }
 0x1ca   :  { %v1561_v45 = vpop.f32.mrf.mxu1  ;;  %v1862_v12 = vadd.f32 %v1861_v26, %v1799_v4 }
 0x1cb   :  { %v3050_v18 = vadd.f32 %v1561_v45, %v1272_v13  ;;  %v1274_v19 = vpop.f32.mrf.mxu0  ;;  %v1730_v31 = vadd.f32 %v1729_v9, %v3008_v46  ;;  %v1801_v13 = vmul.f32 %v3014_v52, %v3014_v52 }
 0x1cc   :  { %v1563_v50 = vpop.f32.mrf.mxu1  ;;  %v1863_v17 = vadd.f32 %v1862_v12, %v1800_v37  ;;  %v1802_v19 = vmul.f32 %v3024_v61, %v3024_v61 }
 0x1cd   :  { %1666 = vst [vmem:[%s3161_s2 + $0x190] sm:$0xff] %v3050_v18  ;;  %v1275_v24 = vpop.f32.mrf.mxu0  ;;  %v1731_v39 = vadd.f32 %v1730_v31, %v3014_v52  ;;  %v1804_v28 = vmul.f32 %v3050_v18, %v3050_v18 }
 0x1ce   :  { %v1564_v55 = vpop.f32.mrf.mxu1  ;;  %v1864_v22 = vadd.f32 %v1863_v17, %v1801_v13 }
 0x1cf   :  { %v3062_v29 = vadd.f32 %v1564_v55, %v1275_v24  ;;  %v1277_v30 = vpop.f32.mrf.mxu0  ;;  %v1732_v46 = vadd.f32 %v1731_v39, %v3024_v61 }
 0x1d0   :  { %v1566_v60 = vpop.f32.mrf.mxu1  ;;  %v1865_v27 = vadd.f32 %v1864_v22, %v1802_v19 }
 0x1d1   :  { %1667 = vst [vmem:[%s3161_s2 + $0x198] sm:$0xff] %v3062_v29  ;;  %v1280_v38 = vpop.f32.mrf.mxu0  ;;  %v1733_v52 = vadd.f32 %v1732_v46, %v3038_v33  ;;  %v1805_v35 = vmul.f32 %v3062_v29, %v3062_v29 }
 0x1d2   :  { %v1569_v1 = vpop.f32.mrf.mxu1  ;;  %v1866_v32 = vadd.f32 %v1865_v27, %v1803_v23 }
 0x1d3   :  { %v3074_v44 = vadd.f32 %v1569_v1, %v1280_v38  ;;  %v1282_v47 = vpop.f32.mrf.mxu0  ;;  %v1734_v61 = vadd.f32 %v1733_v52, %v3050_v18 }
 0x1d4   :  { %v1571_v6 = vpop.f32.mrf.mxu1  ;;  %v1867_v41 = vadd.f32 %v1866_v32, %v1804_v28 }
 0x1d5   :  { %1668 = vst [vmem:[%s3161_s2 + $0x1a0] sm:$0xff] %v3074_v44  ;;  %v1283_v53 = vpop.f32.mrf.mxu0  ;;  %v1735_v33 = vadd.f32 %v1734_v61, %v3062_v29  ;;  %v1806_v42 = vmul.f32 %v3074_v44, %v3074_v44 }
 0x1d6   :  { %v1572_v11 = vpop.f32.mrf.mxu1  ;;  %v1868_v6 = vadd.f32 %v1867_v41, %v1805_v35 }
 0x1d7   :  { %v3086_v58 = vadd.f32 %v1572_v11, %v1283_v53  ;;  %v1285_v59 = vpop.f32.mrf.mxu0  ;;  %v1736_v18 = vadd.f32 %v1735_v33, %v3074_v44 }
 0x1d8   :  { %v1574_v16 = vpop.f32.mrf.mxu1  ;;  %v1869_v11 = vadd.f32 %v1868_v6, %v1806_v42 }
 0x1d9   :  { %1669 = vst [vmem:[%s3161_s2 + $0x1a8] sm:$0xff] %v3086_v58  ;;  %v1288_v2 = vpop.f32.mrf.mxu0  ;;  %v1807_v48 = vmul.f32 %v3086_v58, %v3086_v58  ;;  %v1737_v29 = vadd.f32 %v1736_v18, %v3086_v58 }
 0x1da   :  { %v1577_v21 = vpop.f32.mrf.mxu1 }
 0x1db   :  { %v1578_v5 = vadd.f32 %v1577_v21, %v1288_v2  ;;  %v1290_v7 = vpop.f32.mrf.mxu0  ;;  %v1870_v59 = vadd.f32 %v1869_v11, %v1807_v48 }
 0x1dc   :  { %v1579_v8 = vpop.f32.mrf.mxu1 }
 0x1dd   :  { %1670 = vst [vmem:[%s3161_s2 + $0x1b0] sm:$0xff] %v1578_v5  ;;  %v1291_v40 = vpop.f32.mrf.mxu0  ;;  %v1808_v54 = vmul.f32 %v1578_v5, %v1578_v5  ;;  %v1738_v16 = vadd.f32 %v1737_v29, %v1578_v5 }
 0x1de   :  { %v1580_v10 = vpop.f32.mrf.mxu1 }
 0x1df   :  { %v1581_v45 = vadd.f32 %v1580_v10, %v1291_v40  ;;  %v1293_v14 = vpop.f32.mrf.mxu0  ;;  %v1871_v2 = vadd.f32 %v1870_v59, %v1808_v54 }
 0x1e0   :  { %v1582_v15 = vpop.f32.mrf.mxu1 }
 0x1e1   :  { %1671 = vst [vmem:[%s3161_s2 + $0x1b8] sm:$0xff] %v1581_v45  ;;  %v1296_v50 = vpop.f32.mrf.mxu0  ;;  %v1809_v62 = vmul.f32 %v1581_v45, %v1581_v45  ;;  %v1739_v21 = vadd.f32 %v1738_v16, %v1581_v45  ;;  %v1887_v16 = vld [vmem:[%s3162_s3] sm:$0x3] }
 0x1e2   :  { %v1585_v20 = vpop.f32.mrf.mxu1 }
 0x1e3   :  { %v1586_v24 = vadd.f32 %v1585_v20, %v1296_v50  ;;  %v1298_v55 = vpop.f32.mrf.mxu0  ;;  %v1872_v4 = vadd.f32 %v1871_v2, %v1809_v62 }
 0x1e4   :  { %v1587_v25 = vpop.f32.mrf.mxu1 }
 0x1e5   :  { %1672 = vst [vmem:[%s3161_s2 + $0x1c0] sm:$0xff] %v1586_v24  ;;  %v1299_v30 = vpop.f32.mrf.mxu0  ;;  %v1810_v34 = vmul.f32 %v1586_v24, %v1586_v24  ;;  %v1740_v7 = vadd.f32 %v1739_v21, %v1586_v24 }
 0x1e6   :  { %v1588_v60 = vpop.f32.mrf.mxu1 }
 0x1e7   :  { %v1589_v36 = vadd.f32 %v1588_v60, %v1299_v30  ;;  %v1301_v38 = vpop.f32.mrf.mxu0  ;;  %v1873_v5 = vadd.f32 %v1872_v4, %v1810_v34 }
 0x1e8   :  { %v1590_v1 = vpop.f32.mrf.mxu1 }
 0x1e9   :  { %1673 = vst [vmem:[%s3161_s2 + $0x1c8] sm:$0xff] %v1589_v36  ;;  %v1304_v43 = vpop.f32.mrf.mxu0  ;;  %v1811_v8 = vmul.f32 %v1589_v36, %v1589_v36  ;;  %v1741_v40 = vadd.f32 %v1740_v7, %v1589_v36 }
 0x1ea   :  { %v1593_v47 = vpop.f32.mrf.mxu1 }
 0x1eb   :  { %v1594_v49 = vadd.f32 %v1593_v47, %v1304_v43  ;;  %v1306_v51 = vpop.f32.mrf.mxu0  ;;  %v1874_v13 = vadd.f32 %v1873_v5, %v1811_v8 }
 0x1ec   :  { %v1595_v53 = vpop.f32.mrf.mxu1 }
 0x1ed   :  { %1674 = vst [vmem:[%s3161_s2 + $0x1d0] sm:$0xff] %v1594_v49  ;;  %v1307_v56 = vpop.f32.mrf.mxu0  ;;  %v1812_v10 = vmul.f32 %v1594_v49, %v1594_v49  ;;  %v1742_v45 = vadd.f32 %v1741_v40, %v1594_v49 }
 0x1ee   :  { %v1596_v57 = vpop.f32.mrf.mxu1 }
 0x1ef   :  { %v1597_v44 = vadd.f32 %v1596_v57, %v1307_v56  ;;  %v1309_v63 = vpop.f32.mrf.mxu0  ;;  %v1875_v19 = vadd.f32 %v1874_v13, %v1812_v10 }
 0x1f0   :  { %v1598_v0 = vpop.f32.mrf.mxu1 }
 0x1f1   :  { %1675 = vst [vmem:[%s3161_s2 + $0x1d8] sm:$0xff] %v1597_v44  ;;  %v1312_v58 = vpop.f32.mrf.mxu0  ;;  %v1813_v14 = vmul.f32 %v1597_v44, %v1597_v44  ;;  %v1743_v50 = vadd.f32 %v1742_v45, %v1597_v44 }
 0x1f2   :  { %v1601_v3 = vpop.f32.mrf.mxu1 }
 0x1f3   :  { %v1602_v26 = vadd.f32 %v1601_v3, %v1312_v58  ;;  %v1314_v9 = vpop.f32.mrf.mxu0  ;;  %v1876_v23 = vadd.f32 %v1875_v19, %v1813_v14 }
 0x1f4   :  { %v1603_v37 = vpop.f32.mrf.mxu1 }
 0x1f5   :  { %1676 = vst [vmem:[%s3161_s2 + $0x1e0] sm:$0xff] %v1602_v26  ;;  %v1315_v12 = vpop.f32.mrf.mxu0  ;;  %v1814_v20 = vmul.f32 %v1602_v26, %v1602_v26  ;;  %v1744_v24 = vadd.f32 %v1743_v50, %v1602_v26 }
 0x1f6   :  { %v1604_v31 = vpop.f32.mrf.mxu1 }
 0x1f7   :  { %v1605_v15 = vadd.f32 %v1604_v31, %v1315_v12  ;;  %v1317_v17 = vpop.f32.mrf.mxu0  ;;  %v1877_v28 = vadd.f32 %v1876_v23, %v1814_v20 }
 0x1f8   :  { %v1606_v39 = vpop.f32.mrf.mxu1 }
 0x1f9   :  { %1677 = vst [vmem:[%s3161_s2 + $0x1e8] sm:$0xff] %v1605_v15  ;;  %v1320_v22 = vpop.f32.mrf.mxu0  ;;  %v1815_v55 = vmul.f32 %v1605_v15, %v1605_v15  ;;  %v1745_v30 = vadd.f32 %v1744_v24, %v1605_v15 }
 0x1fa   :  { %v1609_v46 = vpop.f32.mrf.mxu1 }
 0x1fb   :  { %v1610_v25 = vadd.f32 %v1609_v46, %v1320_v22  ;;  %v1322_v27 = vpop.f32.mrf.mxu0  ;;  %v1878_v35 = vadd.f32 %v1877_v28, %v1815_v55 }
 0x1fc   :  { %v1611_v52 = vpop.f32.mrf.mxu1 }
 0x1fd   :  { %1678 = vst [vmem:[%s3161_s2 + $0x1f0] sm:$0xff] %v1610_v25  ;;  %v1816_v60 = vmul.f32 %v1610_v25, %v1610_v25  ;;  %v1323_v32 = vpop.f32.mrf.mxu0  ;;  %v1746_v36 = vadd.f32 %v1745_v30, %v1610_v25 }
 0x1fe   :  { %v1612_v61 = vpop.f32.mrf.mxu1 }
 0x1ff   :  { %v1613_v38 = vadd.f32 %v1612_v61, %v1323_v32  ;;  %v1325_v1 = vpop.f32.mrf.mxu0  ;;  %v1879_v33 = vadd.f32 %v1878_v35, %v1816_v60 }
 0x200   :  { %v1614_v41 = vpop.f32.mrf.mxu1 }
 0x201   :  { %1679 = vst [vmem:[%s3161_s2 + $0x1f8] sm:$0xff] %v1613_v38  ;;  %v1747_v42 = vadd.f32 %v1746_v36, %v1613_v38  ;;  %v1817_v43 = vmul.f32 %v1613_v38, %v1613_v38 }
 0x203   :  { %v1748_v47 = vrot.slane %v1747_v42, 4  ;;  %v1880_v6 = vadd.f32 %v1879_v33, %v1817_v43 }
 0x205   :  { %v1749_v18 = vadd.f32 %v1748_v47, %v1747_v42  ;;  %v1881_v48 = vrot.slane %v1880_v6, 4 }
 0x207   :  { %v1750_v49 = vrot.slane %v1749_v18, 2  ;;  %v1882_v51 = vadd.f32 %v1881_v48, %v1880_v6 }
 0x209   :  { %v1751_v53 = vadd.f32 %v1750_v49, %v1749_v18  ;;  %v1883_v11 = vrot.slane %v1882_v51, 2 }
 0x20b   :  { %v1752_v29 = vrot.slane %v1751_v53, 1  ;;  %v1884_v54 = vadd.f32 %v1883_v11, %v1882_v51 }
 0x20d   :  { %v1885_v56 = vrot.slane %v1884_v54, 1  ;;  %v1753_v57 = vadd.f32 %v1752_v29, %v1751_v53 }
 0x20f   :  { %v1886_v59 = vadd.f32 %v1885_v56, %v1884_v54 }
 0x211   :  { %v1889_v62 = vsel %vm1888_vm0, %v1753_v57, %v1886_v59 }
 0x212   :  { %v1890_v44 = vadd.f32 %v1889_v62, %v1887_v16 }
 0x214   :  { %1891 = vst [vmem:[%s3162_s3] sm:$0x3] %v1890_v44 }

// kernel: generator_forward.15
= control target key start
LH: loop header
LB: loop body
LE: loop exit
PB: predicated region body
PF: predicated region fallthrough
CT: control target
= control target key end

     0   :  { %s2649_s12 = smov 0   ;;  %s3794_s0 = inlined_call_operand.vmem [shape: bf16[2048,256], index: 0, kind: input, shape index: {}]   ;;  %s3795_s1 = inlined_call_operand.vmem [shape: bf16[256,128], index: 1, kind: input, shape index: {}]   ;;  %s3796_s2 = inlined_call_operand.vmem [shape: f32[2048,128], index: 2, kind: output, shape index: {0}]   ;;  %s3797_s3 = inlined_call_operand.vmem [shape: f32[2,128], index: 3, kind: output, shape index: {1}]  }
   0x1 LB: > { %s2211_s13 = sadd.s32 4294967295, %s2625_s12   ;;  %p2215_p0 = scmp.ge.s32.totalorder %s2625_s12, 1  ;;  %s2625_s12 = sphi %s2649_s12, %s14_s12  }
   0x2   : > { %p137_p1 = scmp.lt.s32.totalorder %s2625_s12, 3 }
   0x4   : > { %p138_p2 = pnand %p2215_p0, %p137_p1 }
   0x6   : > { %141 = sbr.rel (%p138_p2) target bundleno = 809 (0x329), region = 28 }
   0xb   : > { %v2411_v0 = vld [vmem:[%s3795_s1 + $0x38] sm:$0xff]   ;;  %v2627_v1 = vmov 0   ;;  %s2216_s16 = sshll.u32 %s2211_s13, 7  ;;  %v2412_v2 = vld [vmem:[%s3795_s1 + $0x30] sm:$0xff]   ;;  %v2413_v3 = vld [vmem:[%s3795_s1 + $0x28] sm:$0xff]   ;;  %p2365_p4 = scmp.ne.s32.totalorder %s2211_s13, 0 }
   0xc   : > { %1072 = vmatprep.subr.bf16.mxu0 %v2627_v1  ;;  %2369 = vmatprep.subr.bf16.mxu1 %v2627_v1  ;;  %p163_p3 = scmp.lt.s32.totalorder %s2216_s16, 255  ;;  %v2414_v4 = vld [vmem:[%s3795_s1 + $0x20] sm:$0xff]   ;;  %v2415_v5 = vld [vmem:[%s3795_s1 + $0x18] sm:$0xff]   ;;  %v2416_v7 = vld [vmem:[%s3795_s1 + $0x10] sm:$0xff]  }
   0xd   : > { %1073 = vmatpush1.bf16.msra.mxu0 %v2411_v0  ;;  %2385 = vmatpush1.bf16.msra.mxu1 %v2411_v0  ;;  %v2417_v9 = vld [vmem:[%s3795_s1 + $0x8] sm:$0xff]   ;;  %v2418_v10 = vld [vmem:[%s3795_s1] sm:$0xff]   ;;  %v2419_v11 = vld [vmem:[%s3795_s1 + $0x78] sm:$0xff]  }
   0xe   : > { %1074 = vmatprep.subr.bf16.mxu0 %v2627_v1  ;;  %2370 = vmatprep.subr.bf16.mxu1 %v2627_v1  ;;  %s4103_s16 = smov (!%p163_p3, %s2216_s16), 255  ;;  %v2420_v12 = vld [vmem:[%s3795_s1 + $0x70] sm:$0xff]   ;;  %v2421_v13 = vld [vmem:[%s3795_s1 + $0x68] sm:$0xff]   ;;  %v2422_v14 = vld [vmem:[%s3795_s1 + $0x60] sm:$0xff]  }
   0xf   : > { %s2368_s23 = sshll.u32 %s4103_s16, 3  ;;  %v2423_v15 = vld [vmem:[%s3795_s1 + $0x58] sm:$0xff]   ;;  %v2424_v16 = vld [vmem:[%s3795_s1 + $0x50] sm:$0xff]   ;;  %v2425_v17 = vld [vmem:[%s3795_s1 + $0x48] sm:$0xff]  }
  0x10   : > { %s2690_s28 = scalar_lea.vmem %s3794_s0, %s2368_s23  ;;  %v2426_v18 = vld [vmem:[%s3795_s1 + $0x40] sm:$0xff]   ;;  %s2856_s4 = scalar_lea.vmem %s3796_s2, %s2368_s23 }
  0x11   : > { %1075 = vmatpush1.bf16.msra.mxu0 %v2412_v2  ;;  %2386 = vmatpush1.bf16.msra.mxu1 %v2412_v2  ;;  %v2429_v6 = vld [vmem:[%s2690_s28 + $0x4] ss:$8 sps:$4 sm:$0xff]   ;;  %v2427_v19 = vld [vmem:[%s2690_s28] ss:$8 sps:$4 sm:$0xff]   ;;  %v2433_v21 = vld [vmem:[%s2690_s28 + $0x14] ss:$8 sps:$4 sm:$0xff]  }
  0x12   : > { %1076 = vmatprep.subr.bf16.mxu0 %v2627_v1  ;;  %2371 = vmatprep.subr.bf16.mxu1 %v2627_v1  ;;  %v2432_v8 = vld [vmem:[%s2690_s28 + $0x204] ss:$8 sps:$4 sm:$0xff]   ;;  %v2430_v20 = vld [vmem:[%s2690_s28 + $0x200] ss:$8 sps:$4 sm:$0xff]   ;;  %v2435_v22 = vld [vmem:[%s2690_s28 + $0x214] ss:$8 sps:$4 sm:$0xff]  }
  0x13   : > { %1104 = vmatprep.mubr.bf16.mxu0 %v2429_v6  ;;  %1360 = vmatprep.mubr.bf16.mxu1 %v2432_v8  ;;  %v2437_v23 = vld [vmem:[%s2690_s28 + $0x10] ss:$8 sps:$4 sm:$0xff]   ;;  %v2439_v25 = vld [vmem:[%s2690_s28 + $0x24] ss:$8 sps:$4 sm:$0xff]   ;;  %v2443_v27 = vld [vmem:[%s2690_s28 + $0x20] ss:$8 sps:$4 sm:$0xff]  }
  0x14   : > { %v2438_v24 = vld [vmem:[%s2690_s28 + $0x210] ss:$8 sps:$4 sm:$0xff]   ;;  %v2441_v26 = vld [vmem:[%s2690_s28 + $0x224] ss:$8 sps:$4 sm:$0xff]   ;;  %v2444_v28 = vld [vmem:[%s2690_s28 + $0x220] ss:$8 sps:$4 sm:$0xff]  }
  0x15   : > { %1077 = vmatpush1.bf16.msra.mxu0 %v2413_v3  ;;  %2387 = vmatpush1.bf16.msra.mxu1 %v2413_v3  ;;  %v2445_v29 = vld [vmem:[%s2690_s28 + $0x34] ss:$8 sps:$4 sm:$0xff]   ;;  %v2449_v31 = vld [vmem:[%s2690_s28 + $0x30] ss:$8 sps:$4 sm:$0xff]   ;;  %v2451_v33 = vld [vmem:[%s2690_s28 + $0x44] ss:$8 sps:$4 sm:$0xff]  }
  0x16   : > { %1078 = vmatprep.subr.bf16.mxu0 %v2627_v1  ;;  %2372 = vmatprep.subr.bf16.mxu1 %v2627_v1  ;;  %v2447_v30 = vld [vmem:[%s2690_s28 + $0x234] ss:$8 sps:$4 sm:$0xff]   ;;  %v2450_v32 = vld [vmem:[%s2690_s28 + $0x230] ss:$8 sps:$4 sm:$0xff]   ;;  %v2453_v34 = vld [vmem:[%s2690_s28 + $0x244] ss:$8 sps:$4 sm:$0xff]  }
  0x17   : > { %v2455_v35 = vld [vmem:[%s2690_s28 + $0x40] ss:$8 sps:$4 sm:$0xff]   ;;  %v2457_v37 = vld [vmem:[%s2690_s28 + $0x54] ss:$8 sps:$4 sm:$0xff]   ;;  %v2461_v39 = vld [vmem:[%s2690_s28 + $0x50] ss:$8 sps:$4 sm:$0xff]  }
  0x18   : > { %v2456_v36 = vld [vmem:[%s2690_s28 + $0x240] ss:$8 sps:$4 sm:$0xff]   ;;  %v2459_v38 = vld [vmem:[%s2690_s28 + $0x254] ss:$8 sps:$4 sm:$0xff]   ;;  %v2462_v40 = vld [vmem:[%s2690_s28 + $0x250] ss:$8 sps:$4 sm:$0xff]  }
  0x19   : > { %1079 = vmatpush1.bf16.msra.mxu0 %v2414_v4  ;;  %2388 = vmatpush1.bf16.msra.mxu1 %v2414_v4  ;;  %v2463_v41 = vld [vmem:[%s2690_s28 + $0x64] ss:$8 sps:$4 sm:$0xff]   ;;  %v2467_v43 = vld [vmem:[%s2690_s28 + $0x60] ss:$8 sps:$4 sm:$0xff]   ;;  %v2469_v45 = vld [vmem:[%s2690_s28 + $0x74] ss:$8 sps:$4 sm:$0xff]  }
  0x1a   : > { %1080 = vmatprep.subr.bf16.mxu0 %v2627_v1  ;;  %2373 = vmatprep.subr.bf16.mxu1 %v2627_v1  ;;  %v2465_v42 = vld [vmem:[%s2690_s28 + $0x264] ss:$8 sps:$4 sm:$0xff]   ;;  %v2468_v44 = vld [vmem:[%s2690_s28 + $0x260] ss:$8 sps:$4 sm:$0xff]   ;;  %v2471_v46 = vld [vmem:[%s2690_s28 + $0x274] ss:$8 sps:$4 sm:$0xff]  }
  0x1b   : > { %v2473_v47 = vld [vmem:[%s2690_s28 + $0x70] ss:$8 sps:$4 sm:$0xff]   ;;  %v2475_v49 = vld [vmem:[%s2690_s28 + $0x84] ss:$8 sps:$4 sm:$0xff]   ;;  %v2479_v51 = vld [vmem:[%s2690_s28 + $0x80] ss:$8 sps:$4 sm:$0xff]  }
  0x1c   : > { %v2474_v48 = vld [vmem:[%s2690_s28 + $0x270] ss:$8 sps:$4 sm:$0xff]   ;;  %v2477_v50 = vld [vmem:[%s2690_s28 + $0x284] ss:$8 sps:$4 sm:$0xff]   ;;  %v2480_v52 = vld [vmem:[%s2690_s28 + $0x280] ss:$8 sps:$4 sm:$0xff]  }
  0x1d   : > { %1081 = vmatpush1.bf16.msra.mxu0 %v2415_v5  ;;  %2389 = vmatpush1.bf16.msra.mxu1 %v2415_v5  ;;  %v2481_v53 = vld [vmem:[%s2690_s28 + $0x94] ss:$8 sps:$4 sm:$0xff]   ;;  %v2485_v55 = vld [vmem:[%s2690_s28 + $0x90] ss:$8 sps:$4 sm:$0xff]   ;;  %v2487_v57 = vld [vmem:[%s2690_s28 + $0xa4] ss:$8 sps:$4 sm:$0xff]  }
  0x1e   : > { %1082 = vmatprep.subr.bf16.mxu0 %v2627_v1  ;;  %2374 = vmatprep.subr.bf16.mxu1 %v2627_v1  ;;  %v2483_v54 = vld [vmem:[%s2690_s28 + $0x294] ss:$8 sps:$4 sm:$0xff]   ;;  %v2486_v56 = vld [vmem:[%s2690_s28 + $0x290] ss:$8 sps:$4 sm:$0xff]   ;;  %v2489_v58 = vld [vmem:[%s2690_s28 + $0x2a4] ss:$8 sps:$4 sm:$0xff]  }
  0x1f   : > { %v2491_v59 = vld [vmem:[%s2690_s28 + $0xa0] ss:$8 sps:$4 sm:$0xff]   ;;  %v2493_v61 = vld [vmem:[%s2690_s28 + $0xb4] ss:$8 sps:$4 sm:$0xff]   ;;  %v2497_v63 = vld [vmem:[%s2690_s28 + $0xb0] ss:$8 sps:$4 sm:$0xff]  }
  0x20   : > { %v2492_v60 = vld [vmem:[%s2690_s28 + $0x2a0] ss:$8 sps:$4 sm:$0xff]   ;;  %v2495_v62 = vld [vmem:[%s2690_s28 + $0x2b4] ss:$8 sps:$4 sm:$0xff]   ;;  %v2498_v0 = vld [vmem:[%s2690_s28 + $0x2b0] ss:$8 sps:$4 sm:$0xff]  }
  0x21   : > { %1083 = vmatpush1.bf16.msra.mxu0 %v2416_v7  ;;  %2390 = vmatpush1.bf16.msra.mxu1 %v2416_v7  ;;  %v2501_v2 = vld [vmem:[%s2690_s28 + $0x2c4] ss:$8 sps:$4 sm:$0xff]   ;;  %v2503_v3 = vld [vmem:[%s2690_s28 + $0xc0] ss:$8 sps:$4 sm:$0xff]   ;;  %v2505_v5 = vld [vmem:[%s2690_s28 + $0xd4] ss:$8 sps:$4 sm:$0xff]  }
  0x22   : > { %1084 = vmatprep.subr.bf16.mxu0 %v2627_v1  ;;  %2375 = vmatprep.subr.bf16.mxu1 %v2627_v1  ;;  %v2504_v4 = vld [vmem:[%s2690_s28 + $0x2c0] ss:$8 sps:$4 sm:$0xff]   ;;  %v2507_v6 = vld [vmem:[%s2690_s28 + $0x2d4] ss:$8 sps:$4 sm:$0xff]   ;;  %v2509_v7 = vld [vmem:[%s2690_s28 + $0xd0] ss:$8 sps:$4 sm:$0xff]  }
  0x23   : > { %v2510_v8 = vld [vmem:[%s2690_s28 + $0x2d0] ss:$8 sps:$4 sm:$0xff]  }
  0x25   : > { %1085 = vmatpush1.bf16.msra.mxu0 %v2417_v9  ;;  %2391 = vmatpush1.bf16.msra.mxu1 %v2417_v9  ;;  %v2511_v9 = vld [vmem:[%s2690_s28 + $0xe4] ss:$8 sps:$4 sm:$0xff]  }
  0x26   : > { %1086 = vmatprep.subr.bf16.mxu0 %v2627_v1  ;;  %2376 = vmatprep.subr.bf16.mxu1 %v2627_v1 }
  0x29   : > { %1087 = vmatpush1.bf16.msra.mxu0 %v2418_v10  ;;  %2392 = vmatpush1.bf16.msra.mxu1 %v2418_v10  ;;  %v2513_v10 = vld [vmem:[%s2690_s28 + $0x2e4] ss:$8 sps:$4 sm:$0xff]  }
  0x2a   : > { %1088 = vmatprep.subr.bf16.mxu0 %v2627_v1  ;;  %2377 = vmatprep.subr.bf16.mxu1 %v2627_v1 }
  0x2d   : > { %1089 = vmatpush2.bf16.msra.mxu0 %v2419_v11  ;;  %2393 = vmatpush2.bf16.msra.mxu1 %v2419_v11  ;;  %v2515_v11 = vld [vmem:[%s2690_s28 + $0xe0] ss:$8 sps:$4 sm:$0xff]  }
  0x2e   : > { %1090 = vmatprep.subr.bf16.mxu0 %v2627_v1  ;;  %2378 = vmatprep.subr.bf16.mxu1 %v2627_v1 }
  0x31   : > { %1091 = vmatpush2.bf16.msra.mxu0 %v2420_v12  ;;  %2394 = vmatpush2.bf16.msra.mxu1 %v2420_v12  ;;  %v2516_v12 = vld [vmem:[%s2690_s28 + $0x2e0] ss:$8 sps:$4 sm:$0xff]  }
  0x32   : > { %1092 = vmatprep.subr.bf16.mxu0 %v2627_v1  ;;  %2379 = vmatprep.subr.bf16.mxu1 %v2627_v1 }
  0x35   : > { %1093 = vmatpush2.bf16.msra.mxu0 %v2421_v13  ;;  %2395 = vmatpush2.bf16.msra.mxu1 %v2421_v13  ;;  %v2517_v13 = vld [vmem:[%s2690_s28 + $0xf4] ss:$8 sps:$4 sm:$0xff]  }
  0x36   : > { %1094 = vmatprep.subr.bf16.mxu0 %v2627_v1  ;;  %2380 = vmatprep.subr.bf16.mxu1 %v2627_v1 }
  0x39   : > { %1095 = vmatpush2.bf16.msra.mxu0 %v2422_v14  ;;  %2396 = vmatpush2.bf16.msra.mxu1 %v2422_v14  ;;  %v2519_v14 = vld [vmem:[%s2690_s28 + $0x2f4] ss:$8 sps:$4 sm:$0xff]  }
  0x3a   : > { %1096 = vmatprep.subr.bf16.mxu0 %v2627_v1  ;;  %2381 = vmatprep.subr.bf16.mxu1 %v2627_v1 }
  0x3d   : > { %1097 = vmatpush2.bf16.msra.mxu0 %v2423_v15  ;;  %2397 = vmatpush2.bf16.msra.mxu1 %v2423_v15  ;;  %v2521_v15 = vld [vmem:[%s2690_s28 + $0xf0] ss:$8 sps:$4 sm:$0xff]  }
  0x3e   : > { %1098 = vmatprep.subr.bf16.mxu0 %v2627_v1  ;;  %2382 = vmatprep.subr.bf16.mxu1 %v2627_v1 }
  0x41   : > { %1099 = vmatpush2.bf16.msra.mxu0 %v2424_v16  ;;  %2398 = vmatpush2.bf16.msra.mxu1 %v2424_v16  ;;  %v2522_v16 = vld [vmem:[%s2690_s28 + $0x2f0] ss:$8 sps:$4 sm:$0xff]  }
  0x42   : > { %1100 = vmatprep.subr.bf16.mxu0 %v2627_v1  ;;  %2383 = vmatprep.subr.bf16.mxu1 %v2627_v1 }
  0x45   : > { %1101 = vmatpush2.bf16.msra.mxu0 %v2425_v17  ;;  %2399 = vmatpush2.bf16.msra.mxu1 %v2425_v17  ;;  %v2523_v17 = vld [vmem:[%s2690_s28 + $0x104] ss:$8 sps:$4 sm:$0xff]  }
  0x46   : > { %1102 = vmatprep.subr.bf16.mxu0 %v2627_v1  ;;  %2384 = vmatprep.subr.bf16.mxu1 %v2627_v1  ;;  %v2499_v1 = vld [vmem:[%s2690_s28 + $0xc4] ss:$8 sps:$4 sm:$0xff]  }
  0x49   : > { %1103 = vmatpush2.bf16.msra.mxu0 %v2426_v18  ;;  %2400 = vmatpush2.bf16.msra.mxu1 %v2426_v18  ;;  %v2525_v18 = vld [vmem:[%s2690_s28 + $0x304] ss:$8 sps:$4 sm:$0xff]  }
  0x4c   : > { %1105 = vmatmul.mubr.bf16.vlgmr.msra.gmra.mxu0 %v2427_v19  ;;  %1361 = vmatmul.mubr.bf16.vlgmr.msra.gmra.mxu1 %v2430_v20  ;;  %v2527_v19 = vld [vmem:[%s2690_s28 + $0x100] ss:$8 sps:$4 sm:$0xff]  }
  0x4d   : > { %1112 = vmatprep.mubr.bf16.mxu0 %v2433_v21  ;;  %1368 = vmatprep.mubr.bf16.mxu1 %v2435_v22  ;;  %v2528_v20 = vld [vmem:[%s2690_s28 + $0x300] ss:$8 sps:$4 sm:$0xff]   ;;  %v2529_v21 = vld [vmem:[%s2690_s28 + $0x114] ss:$8 sps:$4 sm:$0xff]  }
  0x4e   : > { %v2531_v22 = vld [vmem:[%s2690_s28 + $0x314] ss:$8 sps:$4 sm:$0xff]  }
  0x54   : > { %1113 = vmatmul.mubr.bf16.gmra.mxu0 %v2437_v23  ;;  %1369 = vmatmul.mubr.bf16.gmra.mxu1 %v2438_v24  ;;  %v2533_v23 = vld [vmem:[%s2690_s28 + $0x110] ss:$8 sps:$4 sm:$0xff]  }
  0x55   : > { %1120 = vmatprep.mubr.bf16.mxu0 %v2439_v25  ;;  %1376 = vmatprep.mubr.bf16.mxu1 %v2441_v26  ;;  %v2534_v24 = vld [vmem:[%s2690_s28 + $0x310] ss:$8 sps:$4 sm:$0xff]   ;;  %v2535_v25 = vld [vmem:[%s2690_s28 + $0x124] ss:$8 sps:$4 sm:$0xff]  }
  0x56   : > { %v2537_v26 = vld [vmem:[%s2690_s28 + $0x324] ss:$8 sps:$4 sm:$0xff]  }
  0x5c   : > { %1121 = vmatmul.mubr.bf16.gmra.mxu0 %v2443_v27  ;;  %1377 = vmatmul.mubr.bf16.gmra.mxu1 %v2444_v28  ;;  %v2539_v27 = vld [vmem:[%s2690_s28 + $0x120] ss:$8 sps:$4 sm:$0xff]  }
  0x5d   : > { %1128 = vmatprep.mubr.bf16.mxu0 %v2445_v29  ;;  %1384 = vmatprep.mubr.bf16.mxu1 %v2447_v30  ;;  %v2540_v28 = vld [vmem:[%s2690_s28 + $0x320] ss:$8 sps:$4 sm:$0xff]   ;;  %v2541_v29 = vld [vmem:[%s2690_s28 + $0x134] ss:$8 sps:$4 sm:$0xff]  }
  0x5e   : > { %v2543_v30 = vld [vmem:[%s2690_s28 + $0x334] ss:$8 sps:$4 sm:$0xff]  }
  0x64   : > { %1129 = vmatmul.mubr.bf16.gmra.mxu0 %v2449_v31  ;;  %1385 = vmatmul.mubr.bf16.gmra.mxu1 %v2450_v32  ;;  %v2545_v31 = vld [vmem:[%s2690_s28 + $0x130] ss:$8 sps:$4 sm:$0xff]  }
  0x65   : > { %1136 = vmatprep.mubr.bf16.mxu0 %v2451_v33  ;;  %1392 = vmatprep.mubr.bf16.mxu1 %v2453_v34  ;;  %v2546_v32 = vld [vmem:[%s2690_s28 + $0x330] ss:$8 sps:$4 sm:$0xff]   ;;  %v2547_v33 = vld [vmem:[%s2690_s28 + $0x144] ss:$8 sps:$4 sm:$0xff]  }
  0x66   : > { %v2549_v34 = vld [vmem:[%s2690_s28 + $0x344] ss:$8 sps:$4 sm:$0xff]  }
  0x6c   : > { %1137 = vmatmul.mubr.bf16.gmra.mxu0 %v2455_v35  ;;  %1393 = vmatmul.mubr.bf16.gmra.mxu1 %v2456_v36  ;;  %v2551_v35 = vld [vmem:[%s2690_s28 + $0x140] ss:$8 sps:$4 sm:$0xff]  }
  0x6d   : > { %1144 = vmatprep.mubr.bf16.mxu0 %v2457_v37  ;;  %1400 = vmatprep.mubr.bf16.mxu1 %v2459_v38  ;;  %v2552_v36 = vld [vmem:[%s2690_s28 + $0x340] ss:$8 sps:$4 sm:$0xff]   ;;  %v2553_v37 = vld [vmem:[%s2690_s28 + $0x154] ss:$8 sps:$4 sm:$0xff]  }
  0x6e   : > { %v2555_v38 = vld [vmem:[%s2690_s28 + $0x354] ss:$8 sps:$4 sm:$0xff]  }
  0x74   : > { %1145 = vmatmul.mubr.bf16.gmra.mxu0 %v2461_v39  ;;  %1401 = vmatmul.mubr.bf16.gmra.mxu1 %v2462_v40  ;;  %v2557_v39 = vld [vmem:[%s2690_s28 + $0x150] ss:$8 sps:$4 sm:$0xff]  }
  0x75   : > { %1152 = vmatprep.mubr.bf16.mxu0 %v2463_v41  ;;  %1408 = vmatprep.mubr.bf16.mxu1 %v2465_v42  ;;  %v2558_v40 = vld [vmem:[%s2690_s28 + $0x350] ss:$8 sps:$4 sm:$0xff]   ;;  %v2559_v41 = vld [vmem:[%s2690_s28 + $0x164] ss:$8 sps:$4 sm:$0xff]  }
  0x76   : > { %v2561_v42 = vld [vmem:[%s2690_s28 + $0x364] ss:$8 sps:$4 sm:$0xff]  }
  0x7c   : > { %1153 = vmatmul.mubr.bf16.gmra.mxu0 %v2467_v43  ;;  %1409 = vmatmul.mubr.bf16.gmra.mxu1 %v2468_v44  ;;  %v2563_v43 = vld [vmem:[%s2690_s28 + $0x160] ss:$8 sps:$4 sm:$0xff]  }
  0x7d   : > { %1160 = vmatprep.mubr.bf16.mxu0 %v2469_v45  ;;  %1416 = vmatprep.mubr.bf16.mxu1 %v2471_v46  ;;  %v2564_v44 = vld [vmem:[%s2690_s28 + $0x360] ss:$8 sps:$4 sm:$0xff]   ;;  %v2565_v45 = vld [vmem:[%s2690_s28 + $0x174] ss:$8 sps:$4 sm:$0xff]  }
  0x7e   : > { %v2567_v46 = vld [vmem:[%s2690_s28 + $0x374] ss:$8 sps:$4 sm:$0xff]  }
  0x84   : > { %1161 = vmatmul.mubr.bf16.gmra.mxu0 %v2473_v47  ;;  %1417 = vmatmul.mubr.bf16.gmra.mxu1 %v2474_v48  ;;  %v2569_v47 = vld [vmem:[%s2690_s28 + $0x170] ss:$8 sps:$4 sm:$0xff]  }
  0x85   : > { %1168 = vmatprep.mubr.bf16.mxu0 %v2475_v49  ;;  %1424 = vmatprep.mubr.bf16.mxu1 %v2477_v50  ;;  %v2570_v48 = vld [vmem:[%s2690_s28 + $0x370] ss:$8 sps:$4 sm:$0xff]   ;;  %v2571_v49 = vld [vmem:[%s2690_s28 + $0x184] ss:$8 sps:$4 sm:$0xff]  }
  0x86   : > { %v2573_v50 = vld [vmem:[%s2690_s28 + $0x384] ss:$8 sps:$4 sm:$0xff]  }
  0x8c   : > { %1169 = vmatmul.mubr.bf16.gmra.mxu0 %v2479_v51  ;;  %1425 = vmatmul.mubr.bf16.gmra.mxu1 %v2480_v52  ;;  %v2575_v51 = vld [vmem:[%s2690_s28 + $0x180] ss:$8 sps:$4 sm:$0xff]  }
  0x8d   : > { %1176 = vmatprep.mubr.bf16.mxu0 %v2481_v53  ;;  %1432 = vmatprep.mubr.bf16.mxu1 %v2483_v54  ;;  %v2576_v52 = vld [vmem:[%s2690_s28 + $0x380] ss:$8 sps:$4 sm:$0xff]   ;;  %v2577_v53 = vld [vmem:[%s2690_s28 + $0x194] ss:$8 sps:$4 sm:$0xff]  }
  0x8e   : > { %v2579_v54 = vld [vmem:[%s2690_s28 + $0x394] ss:$8 sps:$4 sm:$0xff]  }
  0x94   : > { %1177 = vmatmul.mubr.bf16.gmra.mxu0 %v2485_v55  ;;  %1433 = vmatmul.mubr.bf16.gmra.mxu1 %v2486_v56 }
  0x95   : > { %1184 = vmatprep.mubr.bf16.mxu0 %v2487_v57  ;;  %1440 = vmatprep.mubr.bf16.mxu1 %v2489_v58 }
  0x9c   : > { %1185 = vmatmul.mubr.bf16.gmra.mxu0 %v2491_v59  ;;  %1441 = vmatmul.mubr.bf16.gmra.mxu1 %v2492_v60 }
  0x9d   : > { %1192 = vmatprep.mubr.bf16.mxu0 %v2493_v61  ;;  %1448 = vmatprep.mubr.bf16.mxu1 %v2495_v62  ;;  %v2581_v61 = vld [vmem:[%s2690_s28 + $0x190] ss:$8 sps:$4 sm:$0xff]  }
  0x9e   : > { %v2582_v62 = vld [vmem:[%s2690_s28 + $0x390] ss:$8 sps:$4 sm:$0xff]  }
  0xa4   : > { %1193 = vmatmul.mubr.bf16.gmra.mxu0 %v2497_v63  ;;  %1449 = vmatmul.mubr.bf16.gmra.mxu1 %v2498_v0  ;;  %v2583_v63 = vld [vmem:[%s2690_s28 + $0x1a4] ss:$8 sps:$4 sm:$0xff]  }
  0xa5   : > { %1200 = vmatprep.mubr.bf16.mxu0 %v2499_v1  ;;  %1456 = vmatprep.mubr.bf16.mxu1 %v2501_v2  ;;  %v2585_v0 = vld [vmem:[%s2690_s28 + $0x3a4] ss:$8 sps:$4 sm:$0xff]  }
  0xac   : > { %1201 = vmatmul.mubr.bf16.gmra.mxu0 %v2503_v3  ;;  %1457 = vmatmul.mubr.bf16.gmra.mxu1 %v2504_v4 }
  0xad   : > { %1208 = vmatprep.mubr.bf16.mxu0 %v2505_v5  ;;  %1464 = vmatprep.mubr.bf16.mxu1 %v2507_v6 }
  0xb4   : > { %1209 = vmatmul.mubr.bf16.gmra.mxu0 %v2509_v7  ;;  %1465 = vmatmul.mubr.bf16.gmra.mxu1 %v2510_v8 }
  0xb5   : > { %1216 = vmatprep.mubr.bf16.mxu0 %v2511_v9  ;;  %1472 = vmatprep.mubr.bf16.mxu1 %v2513_v10  ;;  %v2587_v9 = vld [vmem:[%s2690_s28 + $0x1a0] ss:$8 sps:$4 sm:$0xff]  }
  0xb6   : > { %v2588_v10 = vld [vmem:[%s2690_s28 + $0x3a0] ss:$8 sps:$4 sm:$0xff]  }
  0xbc   : > { %1217 = vmatmul.mubr.bf16.gmra.mxu0 %v2515_v11  ;;  %1473 = vmatmul.mubr.bf16.gmra.mxu1 %v2516_v12  ;;  %v2589_v11 = vld [vmem:[%s2690_s28 + $0x1b4] ss:$8 sps:$4 sm:$0xff]  }
  0xbd   : > { %1224 = vmatprep.mubr.bf16.mxu0 %v2517_v13  ;;  %1480 = vmatprep.mubr.bf16.mxu1 %v2519_v14  ;;  %v2591_v12 = vld [vmem:[%s2690_s28 + $0x3b4] ss:$8 sps:$4 sm:$0xff]  }
  0xc4   : > { %1225 = vmatmul.mubr.bf16.gmra.mxu0 %v2521_v15  ;;  %1481 = vmatmul.mubr.bf16.gmra.mxu1 %v2522_v16 }
  0xc5   : > { %1232 = vmatprep.mubr.bf16.mxu0 %v2523_v17  ;;  %1488 = vmatprep.mubr.bf16.mxu1 %v2525_v18 }
  0xcc   : > { %1233 = vmatmul.mubr.bf16.gmra.mxu0 %v2527_v19  ;;  %1489 = vmatmul.mubr.bf16.gmra.mxu1 %v2528_v20 }
  0xcd   : > { %1240 = vmatprep.mubr.bf16.mxu0 %v2529_v21  ;;  %1496 = vmatprep.mubr.bf16.mxu1 %v2531_v22  ;;  %v2593_v21 = vld [vmem:[%s2690_s28 + $0x1b0] ss:$8 sps:$4 sm:$0xff]  }
  0xce   : > { %v2594_v22 = vld [vmem:[%s2690_s28 + $0x3b0] ss:$8 sps:$4 sm:$0xff]  }
  0xd4   : > { %1241 = vmatmul.mubr.bf16.gmra.mxu0 %v2533_v23  ;;  %1497 = vmatmul.mubr.bf16.gmra.mxu1 %v2534_v24  ;;  %v2597_v23 = vld [vmem:[%s2690_s28 + $0x1c4] ss:$8 sps:$4 sm:$0xff]  }
  0xd5   : > { %1248 = vmatprep.mubr.bf16.mxu0 %v2535_v25  ;;  %1504 = vmatprep.mubr.bf16.mxu1 %v2537_v26  ;;  %v2600_v24 = vld [vmem:[%s2690_s28 + $0x3c4] ss:$8 sps:$4 sm:$0xff]  }
  0xdc   : > { %1249 = vmatmul.mubr.bf16.gmra.mxu0 %v2539_v27  ;;  %1505 = vmatmul.mubr.bf16.gmra.mxu1 %v2540_v28 }
  0xdd   : > { %1256 = vmatprep.mubr.bf16.mxu0 %v2541_v29  ;;  %1512 = vmatprep.mubr.bf16.mxu1 %v2543_v30 }
  0xe4   : > { %1257 = vmatmul.mubr.bf16.gmra.mxu0 %v2545_v31  ;;  %1513 = vmatmul.mubr.bf16.gmra.mxu1 %v2546_v32 }
  0xe5   : > { %1264 = vmatprep.mubr.bf16.mxu0 %v2547_v33  ;;  %1520 = vmatprep.mubr.bf16.mxu1 %v2549_v34  ;;  %v2595_v33 = vld [vmem:[%s2690_s28 + $0x1c0] ss:$8 sps:$4 sm:$0xff]  }
  0xe6   : > { %v2598_v34 = vld [vmem:[%s2690_s28 + $0x3c0] ss:$8 sps:$4 sm:$0xff]  }
  0xec   : > { %1265 = vmatmul.mubr.bf16.gmra.mxu0 %v2551_v35  ;;  %1521 = vmatmul.mubr.bf16.gmra.mxu1 %v2552_v36  ;;  %v2603_v35 = vld [vmem:[%s2690_s28 + $0x1d4] ss:$8 sps:$4 sm:$0xff]  }
  0xed   : > { %1272 = vmatprep.mubr.bf16.mxu0 %v2553_v37  ;;  %1528 = vmatprep.mubr.bf16.mxu1 %v2555_v38  ;;  %v2606_v36 = vld [vmem:[%s2690_s28 + $0x3d4] ss:$8 sps:$4 sm:$0xff]  }
  0xf4   : > { %1273 = vmatmul.mubr.bf16.gmra.mxu0 %v2557_v39  ;;  %1529 = vmatmul.mubr.bf16.gmra.mxu1 %v2558_v40 }
  0xf5   : > { %1280 = vmatprep.mubr.bf16.mxu0 %v2559_v41  ;;  %1536 = vmatprep.mubr.bf16.mxu1 %v2561_v42 }
  0xfc   : > { %1281 = vmatmul.mubr.bf16.gmra.mxu0 %v2563_v43  ;;  %1537 = vmatmul.mubr.bf16.gmra.mxu1 %v2564_v44 }
  0xfd   : > { %1288 = vmatprep.mubr.bf16.mxu0 %v2565_v45  ;;  %1544 = vmatprep.mubr.bf16.mxu1 %v2567_v46  ;;  %v2601_v45 = vld [vmem:[%s2690_s28 + $0x1d0] ss:$8 sps:$4 sm:$0xff]  }
  0xfe   : > { %v2604_v46 = vld [vmem:[%s2690_s28 + $0x3d0] ss:$8 sps:$4 sm:$0xff]  }
 0x104   : > { %1289 = vmatmul.mubr.bf16.gmra.mxu0 %v2569_v47  ;;  %1545 = vmatmul.mubr.bf16.gmra.mxu1 %v2570_v48  ;;  %v2609_v47 = vld [vmem:[%s2690_s28 + $0x1e4] ss:$8 sps:$4 sm:$0xff]  }
 0x105   : > { %1296 = vmatprep.mubr.bf16.mxu0 %v2571_v49  ;;  %1552 = vmatprep.mubr.bf16.mxu1 %v2573_v50  ;;  %v2612_v48 = vld [vmem:[%s2690_s28 + $0x3e4] ss:$8 sps:$4 sm:$0xff]  }
 0x10c   : > { %v2858_v55 = vpop.f32.mrf.mxu0  ;;  %1297 = vmatmul.mubr.bf16.gmra.mxu0 %v2575_v51  ;;  %v2860_v56 = vpop.f32.mrf.mxu1  ;;  %1553 = vmatmul.mubr.bf16.gmra.mxu1 %v2576_v52 }
 0x10d   : > { %3950 = vst [vmem:[#allocation2_spill] sm:$0xff] %v2860_v56  ;;  %1617 = vst [vmem:[%s2856_s4] sm:$0xff] %v2858_v55  ;;  %1304 = vmatprep.mubr.bf16.mxu0 %v2577_v53  ;;  %1560 = vmatprep.mubr.bf16.mxu1 %v2579_v54 }
 0x10e   : > { %1681 = vst [vmem:[%s2856_s4 + $0x200] sm:$0xff] %v2860_v56  ;;  %v1108_v57 = vpop.f32.mrf.mxu0  ;;  %v1364_v58 = vpop.f32.mrf.mxu1 }
 0x110   : > { %v2866_v59 = vpop.f32.mrf.mxu0  ;;  %v2868_v60 = vpop.f32.mrf.mxu1 }
 0x111   : > { %3951 = vst [vmem:[#allocation3_spill] sm:$0xff] %v2868_v60  ;;  %1618 = vst [vmem:[%s2856_s4 + $0x8] sm:$0xff] %v2866_v59 }
 0x112   : > { %1682 = vst [vmem:[%s2856_s4 + $0x208] sm:$0xff] %v2868_v60  ;;  %v1111_v1 = vpop.f32.mrf.mxu0  ;;  %v1367_v2 = vpop.f32.mrf.mxu1 }
 0x114   : > { %v2878_v3 = vpop.f32.mrf.mxu0  ;;  %1305 = vmatmul.mubr.bf16.gmra.mxu0 %v2581_v61  ;;  %v2880_v4 = vpop.f32.mrf.mxu1  ;;  %1561 = vmatmul.mubr.bf16.gmra.mxu1 %v2582_v62  ;;  %v2607_v61 = vld [vmem:[%s2690_s28 + $0x1e0] ss:$8 sps:$4 sm:$0xff]  }
 0x115   : > { %3952 = vst [vmem:[#allocation4_spill] sm:$0xff] %v2880_v4  ;;  %1619 = vst [vmem:[%s2856_s4 + $0x10] sm:$0xff] %v2878_v3  ;;  %1312 = vmatprep.mubr.bf16.mxu0 %v2583_v63  ;;  %1568 = vmatprep.mubr.bf16.mxu1 %v2585_v0  ;;  %v2610_v62 = vld [vmem:[%s2690_s28 + $0x3e0] ss:$8 sps:$4 sm:$0xff]   ;;  %v2615_v63 = vld [vmem:[%s2690_s28 + $0x1f4] ss:$8 sps:$4 sm:$0xff]  }
 0x116   : > { %1683 = vst [vmem:[%s2856_s4 + $0x210] sm:$0xff] %v2880_v4  ;;  %v1116_v5 = vpop.f32.mrf.mxu0  ;;  %v1372_v6 = vpop.f32.mrf.mxu1  ;;  %v2618_v0 = vld [vmem:[%s2690_s28 + $0x3f4] ss:$8 sps:$4 sm:$0xff]  }
 0x118   : > { %v2886_v7 = vpop.f32.mrf.mxu0  ;;  %v2888_v8 = vpop.f32.mrf.mxu1 }
 0x119   : > { %3953 = vst [vmem:[#allocation5_spill] sm:$0xff] %v2888_v8  ;;  %1620 = vst [vmem:[%s2856_s4 + $0x18] sm:$0xff] %v2886_v7 }
 0x11a   : > { %1684 = vst [vmem:[%s2856_s4 + $0x218] sm:$0xff] %v2888_v8  ;;  %v1119_v13 = vpop.f32.mrf.mxu0  ;;  %v1375_v14 = vpop.f32.mrf.mxu1 }
 0x11b   : > { %v2613_v13 = vld [vmem:[%s2690_s28 + $0x1f0] ss:$8 sps:$4 sm:$0xff]  }
 0x11c   : > { %v2898_v15 = vpop.f32.mrf.mxu0  ;;  %1313 = vmatmul.mubr.bf16.gmra.mxu0 %v2587_v9  ;;  %v2900_v16 = vpop.f32.mrf.mxu1  ;;  %1569 = vmatmul.mubr.bf16.gmra.mxu1 %v2588_v10  ;;  %v2616_v14 = vld [vmem:[%s2690_s28 + $0x3f0] ss:$8 sps:$4 sm:$0xff]  }
 0x11d   : > { %3954 = vst [vmem:[#allocation6_spill] sm:$0xff] %v2900_v16  ;;  %1621 = vst [vmem:[%s2856_s4 + $0x20] sm:$0xff] %v2898_v15  ;;  %1320 = vmatprep.mubr.bf16.mxu0 %v2589_v11  ;;  %1576 = vmatprep.mubr.bf16.mxu1 %v2591_v12 }
 0x11e   : > { %1685 = vst [vmem:[%s2856_s4 + $0x220] sm:$0xff] %v2900_v16  ;;  %v1124_v17 = vpop.f32.mrf.mxu0  ;;  %v1380_v18 = vpop.f32.mrf.mxu1 }
 0x120   : > { %v2906_v19 = vpop.f32.mrf.mxu0  ;;  %v2908_v20 = vpop.f32.mrf.mxu1 }
 0x121   : > { %3955 = vst [vmem:[#allocation7_spill] sm:$0xff] %v2908_v20  ;;  %1622 = vst [vmem:[%s2856_s4 + $0x28] sm:$0xff] %v2906_v19 }
 0x122   : > { %1686 = vst [vmem:[%s2856_s4 + $0x228] sm:$0xff] %v2908_v20  ;;  %v1127_v25 = vpop.f32.mrf.mxu0  ;;  %v1383_v26 = vpop.f32.mrf.mxu1 }
 0x124   : > { %v2918_v27 = vpop.f32.mrf.mxu0  ;;  %1321 = vmatmul.mubr.bf16.gmra.mxu0 %v2593_v21  ;;  %v2920_v28 = vpop.f32.mrf.mxu1  ;;  %1577 = vmatmul.mubr.bf16.gmra.mxu1 %v2594_v22 }
 0x125   : > { %3956 = vst [vmem:[#allocation8_spill] sm:$0xff] %v2920_v28  ;;  %1623 = vst [vmem:[%s2856_s4 + $0x30] sm:$0xff] %v2918_v27  ;;  %1328 = vmatprep.mubr.bf16.mxu0 %v2597_v23  ;;  %1584 = vmatprep.mubr.bf16.mxu1 %v2600_v24 }
 0x126   : > { %1687 = vst [vmem:[%s2856_s4 + $0x230] sm:$0xff] %v2920_v28  ;;  %v1132_v29 = vpop.f32.mrf.mxu0  ;;  %v1388_v30 = vpop.f32.mrf.mxu1 }
 0x128   : > { %v2926_v31 = vpop.f32.mrf.mxu0  ;;  %v2928_v32 = vpop.f32.mrf.mxu1 }
 0x129   : > { %3957 = vst [vmem:[#allocation9_spill] sm:$0xff] %v2928_v32  ;;  %1624 = vst [vmem:[%s2856_s4 + $0x38] sm:$0xff] %v2926_v31 }
 0x12a   : > { %1688 = vst [vmem:[%s2856_s4 + $0x238] sm:$0xff] %v2928_v32  ;;  %v1135_v37 = vpop.f32.mrf.mxu0  ;;  %v1391_v38 = vpop.f32.mrf.mxu1 }
 0x12c   : > { %v2938_v39 = vpop.f32.mrf.mxu0  ;;  %1329 = vmatmul.mubr.bf16.gmra.mxu0 %v2595_v33  ;;  %v2940_v40 = vpop.f32.mrf.mxu1  ;;  %1585 = vmatmul.mubr.bf16.gmra.mxu1 %v2598_v34 }
 0x12d   : > { %3958 = vst [vmem:[#allocation10_spill] sm:$0xff] %v2940_v40  ;;  %1625 = vst [vmem:[%s2856_s4 + $0x40] sm:$0xff] %v2938_v39  ;;  %1336 = vmatprep.mubr.bf16.mxu0 %v2603_v35  ;;  %1592 = vmatprep.mubr.bf16.mxu1 %v2606_v36 }
 0x12e   : > { %1689 = vst [vmem:[%s2856_s4 + $0x240] sm:$0xff] %v2940_v40  ;;  %v1140_v41 = vpop.f32.mrf.mxu0  ;;  %v1396_v42 = vpop.f32.mrf.mxu1 }
 0x130   : > { %v2946_v43 = vpop.f32.mrf.mxu0  ;;  %v2948_v44 = vpop.f32.mrf.mxu1 }
 0x131   : > { %3959 = vst [vmem:[#allocation11_spill] sm:$0xff] %v2948_v44  ;;  %1626 = vst [vmem:[%s2856_s4 + $0x48] sm:$0xff] %v2946_v43 }
 0x132   : > { %1690 = vst [vmem:[%s2856_s4 + $0x248] sm:$0xff] %v2948_v44  ;;  %v1143_v49 = vpop.f32.mrf.mxu0  ;;  %v1399_v50 = vpop.f32.mrf.mxu1 }
 0x134   : > { %v2958_v51 = vpop.f32.mrf.mxu0  ;;  %1337 = vmatmul.mubr.bf16.gmra.mxu0 %v2601_v45  ;;  %v2960_v52 = vpop.f32.mrf.mxu1  ;;  %1593 = vmatmul.mubr.bf16.gmra.mxu1 %v2604_v46 }
 0x135   : > { %3960 = vst [vmem:[#allocation12_spill] sm:$0xff] %v2960_v52  ;;  %1627 = vst [vmem:[%s2856_s4 + $0x50] sm:$0xff] %v2958_v51  ;;  %1344 = vmatprep.mubr.bf16.mxu0 %v2609_v47  ;;  %1600 = vmatprep.mubr.bf16.mxu1 %v2612_v48 }
 0x136   : > { %1691 = vst [vmem:[%s2856_s4 + $0x250] sm:$0xff] %v2960_v52  ;;  %v1148_v53 = vpop.f32.mrf.mxu0  ;;  %v1404_v54 = vpop.f32.mrf.mxu1 }
 0x138   : > { %v2966_v57 = vpop.f32.mrf.mxu0  ;;  %v2968_v58 = vpop.f32.mrf.mxu1 }
 0x139   : > { %3961 = vst [vmem:[#allocation13_spill] sm:$0xff] %v2968_v58  ;;  %1628 = vst [vmem:[%s2856_s4 + $0x58] sm:$0xff] %v2966_v57 }
 0x13a   : > { %1692 = vst [vmem:[%s2856_s4 + $0x258] sm:$0xff] %v2968_v58  ;;  %v1151_v1 = vpop.f32.mrf.mxu0  ;;  %v1407_v2 = vpop.f32.mrf.mxu1 }
 0x13c   : > { %v2978_v5 = vpop.f32.mrf.mxu0  ;;  %1345 = vmatmul.mubr.bf16.gmra.mxu0 %v2607_v61  ;;  %v2980_v6 = vpop.f32.mrf.mxu1  ;;  %1601 = vmatmul.mubr.bf16.gmra.mxu1 %v2610_v62 }
 0x13d   : > { %3962 = vst [vmem:[#allocation14_spill] sm:$0xff] %v2980_v6  ;;  %1629 = vst [vmem:[%s2856_s4 + $0x60] sm:$0xff] %v2978_v5  ;;  %1352 = vmatprep.mubr.bf16.mxu0 %v2615_v63  ;;  %1608 = vmatprep.mubr.bf16.mxu1 %v2618_v0 }
 0x13e   : > { %1693 = vst [vmem:[%s2856_s4 + $0x260] sm:$0xff] %v2980_v6  ;;  %v1156_v9 = vpop.f32.mrf.mxu0  ;;  %v1412_v10 = vpop.f32.mrf.mxu1 }
 0x140   : > { %v2986_v11 = vpop.f32.mrf.mxu0  ;;  %v2988_v12 = vpop.f32.mrf.mxu1 }
 0x141   : > { %3963 = vst [vmem:[#allocation15_spill] sm:$0xff] %v2988_v12  ;;  %1630 = vst [vmem:[%s2856_s4 + $0x68] sm:$0xff] %v2986_v11 }
 0x142   : > { %1694 = vst [vmem:[%s2856_s4 + $0x268] sm:$0xff] %v2988_v12  ;;  %v1159_v17 = vpop.f32.mrf.mxu0  ;;  %v1415_v18 = vpop.f32.mrf.mxu1 }
 0x144   : > { %v2996_v21 = vpop.f32.mrf.mxu0  ;;  %1353 = vmatmul.mubr.bf16.gmra.mxu0 %v2613_v13  ;;  %v2998_v22 = vpop.f32.mrf.mxu1  ;;  %1609 = vmatmul.mubr.bf16.gmra.mxu1 %v2616_v14 }
 0x145   : > { %3964 = vst [vmem:[#allocation16_spill] sm:$0xff] %v2998_v22  ;;  %1631 = vst [vmem:[%s2856_s4 + $0x70] sm:$0xff] %v2996_v21 }
 0x146   : > { %1695 = vst [vmem:[%s2856_s4 + $0x270] sm:$0xff] %v2998_v22  ;;  %v1164_v23 = vpop.f32.mrf.mxu0  ;;  %v1420_v24 = vpop.f32.mrf.mxu1 }
 0x148   : > { %v3004_v25 = vpop.f32.mrf.mxu0  ;;  %v3006_v26 = vpop.f32.mrf.mxu1 }
 0x149   : > { %3965 = vst [vmem:[#allocation17_spill] sm:$0xff] %v3006_v26  ;;  %1632 = vst [vmem:[%s2856_s4 + $0x78] sm:$0xff] %v3004_v25 }
 0x14a   : > { %1696 = vst [vmem:[%s2856_s4 + $0x278] sm:$0xff] %v3006_v26  ;;  %v1167_v29 = vpop.f32.mrf.mxu0  ;;  %v1423_v30 = vpop.f32.mrf.mxu1 }
 0x14c   : > { %v3012_v33 = vpop.f32.mrf.mxu0  ;;  %v3014_v34 = vpop.f32.mrf.mxu1 }
 0x14d   : > { %3966 = vst [vmem:[#allocation18_spill] sm:$0xff] %v3014_v34  ;;  %1633 = vst [vmem:[%s2856_s4 + $0x80] sm:$0xff] %v3012_v33 }
 0x14e   : > { %1697 = vst [vmem:[%s2856_s4 + $0x280] sm:$0xff] %v3014_v34  ;;  %v1172_v35 = vpop.f32.mrf.mxu0  ;;  %v1428_v36 = vpop.f32.mrf.mxu1 }
 0x150   : > { %v3020_v37 = vpop.f32.mrf.mxu0  ;;  %v3022_v38 = vpop.f32.mrf.mxu1 }
 0x151   : > { %3967 = vst [vmem:[#allocation19_spill] sm:$0xff] %v3022_v38  ;;  %1634 = vst [vmem:[%s2856_s4 + $0x88] sm:$0xff] %v3020_v37 }
 0x152   : > { %1698 = vst [vmem:[%s2856_s4 + $0x288] sm:$0xff] %v3022_v38  ;;  %v1175_v41 = vpop.f32.mrf.mxu0  ;;  %v1431_v42 = vpop.f32.mrf.mxu1 }
 0x154   : > { %v3028_v45 = vpop.f32.mrf.mxu0  ;;  %v3030_v46 = vpop.f32.mrf.mxu1 }
 0x155   : > { %3968 = vst [vmem:[#allocation20_spill] sm:$0xff] %v3030_v46  ;;  %1635 = vst [vmem:[%s2856_s4 + $0x90] sm:$0xff] %v3028_v45 }
 0x156   : > { %1699 = vst [vmem:[%s2856_s4 + $0x290] sm:$0xff] %v3030_v46  ;;  %v1180_v47 = vpop.f32.mrf.mxu0  ;;  %v1436_v48 = vpop.f32.mrf.mxu1 }
 0x158   : > { %v3036_v49 = vpop.f32.mrf.mxu0  ;;  %v3038_v50 = vpop.f32.mrf.mxu1 }
 0x159   : > { %3969 = vst [vmem:[#allocation21_spill] sm:$0xff] %v3038_v50  ;;  %1636 = vst [vmem:[%s2856_s4 + $0x98] sm:$0xff] %v3036_v49 }
 0x15a   : > { %1700 = vst [vmem:[%s2856_s4 + $0x298] sm:$0xff] %v3038_v50  ;;  %v1183_v53 = vpop.f32.mrf.mxu0  ;;  %v1439_v54 = vpop.f32.mrf.mxu1 }
 0x15c   : > { %v3044_v61 = vpop.f32.mrf.mxu0  ;;  %v3046_v62 = vpop.f32.mrf.mxu1 }
 0x15d   : > { %3970 = vst [vmem:[#allocation22_spill] sm:$0xff] %v3046_v62  ;;  %1637 = vst [vmem:[%s2856_s4 + $0xa0] sm:$0xff] %v3044_v61 }
 0x15e   : > { %1701 = vst [vmem:[%s2856_s4 + $0x2a0] sm:$0xff] %v3046_v62  ;;  %v1188_v63 = vpop.f32.mrf.mxu0  ;;  %v1444_v0 = vpop.f32.mrf.mxu1 }
 0x160   : > { %v3052_v1 = vpop.f32.mrf.mxu0  ;;  %v3054_v2 = vpop.f32.mrf.mxu1 }
 0x161   : > { %3971 = vst [vmem:[#allocation23_spill] sm:$0xff] %v3054_v2  ;;  %1638 = vst [vmem:[%s2856_s4 + $0xa8] sm:$0xff] %v3052_v1 }
 0x162   : > { %1702 = vst [vmem:[%s2856_s4 + $0x2a8] sm:$0xff] %v3054_v2  ;;  %v1191_v9 = vpop.f32.mrf.mxu0  ;;  %v1447_v10 = vpop.f32.mrf.mxu1 }
 0x164   : > { %v3060_v13 = vpop.f32.mrf.mxu0  ;;  %v3062_v14 = vpop.f32.mrf.mxu1 }
 0x165   : > { %3972 = vst [vmem:[#allocation24_spill] sm:$0xff] %v3062_v14  ;;  %1639 = vst [vmem:[%s2856_s4 + $0xb0] sm:$0xff] %v3060_v13 }
 0x166   : > { %1703 = vst [vmem:[%s2856_s4 + $0x2b0] sm:$0xff] %v3062_v14  ;;  %v1196_v17 = vpop.f32.mrf.mxu0  ;;  %v1452_v18 = vpop.f32.mrf.mxu1 }
 0x168   : > { %v3068_v23 = vpop.f32.mrf.mxu0  ;;  %v3070_v24 = vpop.f32.mrf.mxu1 }
 0x169   : > { %3973 = vst [vmem:[#allocation25_spill] sm:$0xff] %v3070_v24  ;;  %1640 = vst [vmem:[%s2856_s4 + $0xb8] sm:$0xff] %v3068_v23 }
 0x16a   : > { %1704 = vst [vmem:[%s2856_s4 + $0x2b8] sm:$0xff] %v3070_v24  ;;  %v1199_v29 = vpop.f32.mrf.mxu0  ;;  %v1455_v30 = vpop.f32.mrf.mxu1 }
 0x16c   : > { %v3076_v35 = vpop.f32.mrf.mxu0  ;;  %v3078_v36 = vpop.f32.mrf.mxu1 }
 0x16d   : > { %3974 = vst [vmem:[#allocation26_spill] sm:$0xff] %v3078_v36  ;;  %1641 = vst [vmem:[%s2856_s4 + $0xc0] sm:$0xff] %v3076_v35 }
 0x16e   : > { %1705 = vst [vmem:[%s2856_s4 + $0x2c0] sm:$0xff] %v3078_v36  ;;  %v1204_v41 = vpop.f32.mrf.mxu0  ;;  %v1460_v42 = vpop.f32.mrf.mxu1 }
 0x170   : > { %v3084_v47 = vpop.f32.mrf.mxu0  ;;  %v3086_v48 = vpop.f32.mrf.mxu1 }
 0x171   : > { %3975 = vst [vmem:[#allocation27_spill] sm:$0xff] %v3086_v48  ;;  %1642 = vst [vmem:[%s2856_s4 + $0xc8] sm:$0xff] %v3084_v47 }
 0x172   : > { %1706 = vst [vmem:[%s2856_s4 + $0x2c8] sm:$0xff] %v3086_v48  ;;  %v1207_v53 = vpop.f32.mrf.mxu0  ;;  %v1463_v54 = vpop.f32.mrf.mxu1 }
 0x174   : > { %v3092_v63 = vpop.f32.mrf.mxu0  ;;  %v3094_v0 = vpop.f32.mrf.mxu1 }
 0x175   : > { %3976 = vst [vmem:[#allocation28_spill] sm:$0xff] %v3094_v0  ;;  %1643 = vst [vmem:[%s2856_s4 + $0xd0] sm:$0xff] %v3092_v63 }
 0x176   : > { %1707 = vst [vmem:[%s2856_s4 + $0x2d0] sm:$0xff] %v3094_v0  ;;  %v1212_v9 = vpop.f32.mrf.mxu0  ;;  %v1468_v10 = vpop.f32.mrf.mxu1 }
 0x178   : > { %v3100_v17 = vpop.f32.mrf.mxu0  ;;  %v3102_v18 = vpop.f32.mrf.mxu1 }
 0x179   : > { %3977 = vst [vmem:[#allocation29_spill] sm:$0xff] %v3102_v18  ;;  %1644 = vst [vmem:[%s2856_s4 + $0xd8] sm:$0xff] %v3100_v17 }
 0x17a   : > { %1708 = vst [vmem:[%s2856_s4 + $0x2d8] sm:$0xff] %v3102_v18  ;;  %v1215_v29 = vpop.f32.mrf.mxu0  ;;  %v1471_v30 = vpop.f32.mrf.mxu1 }
 0x17c   : > { %v3108_v41 = vpop.f32.mrf.mxu0  ;;  %v3110_v42 = vpop.f32.mrf.mxu1 }
 0x17d   : > { %3978 = vst [vmem:[#allocation30_spill] sm:$0xff] %v3110_v42  ;;  %1645 = vst [vmem:[%s2856_s4 + $0xe0] sm:$0xff] %v3108_v41 }
 0x17e   : > { %1709 = vst [vmem:[%s2856_s4 + $0x2e0] sm:$0xff] %v3110_v42  ;;  %v1220_v53 = vpop.f32.mrf.mxu0  ;;  %v1476_v54 = vpop.f32.mrf.mxu1 }
 0x180   : > { %v3116_v9 = vpop.f32.mrf.mxu0  ;;  %v3118_v10 = vpop.f32.mrf.mxu1 }
 0x181   : > { %3979 = vst [vmem:[#allocation31_spill] sm:$0xff] %v3118_v10  ;;  %1646 = vst [vmem:[%s2856_s4 + $0xe8] sm:$0xff] %v3116_v9 }
 0x182   : > { %1710 = vst [vmem:[%s2856_s4 + $0x2e8] sm:$0xff] %v3118_v10  ;;  %v1223_v29 = vpop.f32.mrf.mxu0  ;;  %v1479_v30 = vpop.f32.mrf.mxu1 }
 0x184   : > { %v3124_v18 = vpop.f32.mrf.mxu0  ;;  %v3126_v0 = vpop.f32.mrf.mxu1 }
 0x185   : > { %3980 = vst [vmem:[#allocation32_spill] sm:$0xff] %v3126_v0  ;;  %1647 = vst [vmem:[%s2856_s4 + $0xf0] sm:$0xff] %v3124_v18 }
 0x186   : > { %1711 = vst [vmem:[%s2856_s4 + $0x2f0] sm:$0xff] %v3126_v0  ;;  %v1228_v53 = vpop.f32.mrf.mxu0  ;;  %v1484_v54 = vpop.f32.mrf.mxu1 }
 0x188   : > { %v3132_v42 = vpop.f32.mrf.mxu0  ;;  %v3134_v48 = vpop.f32.mrf.mxu1 }
 0x189   : > { %3981 = vst [vmem:[#allocation33_spill] sm:$0xff] %v3134_v48  ;;  %1648 = vst [vmem:[%s2856_s4 + $0xf8] sm:$0xff] %v3132_v42 }
 0x18a   : > { %1712 = vst [vmem:[%s2856_s4 + $0x2f8] sm:$0xff] %v3134_v48  ;;  %v1231_v29 = vpop.f32.mrf.mxu0  ;;  %v1487_v30 = vpop.f32.mrf.mxu1 }
 0x18c   : > { %v3140_v10 = vpop.f32.mrf.mxu0  ;;  %v3142_v36 = vpop.f32.mrf.mxu1 }
 0x18d   : > { %3982 = vst [vmem:[#allocation34_spill] sm:$0xff] %v3142_v36  ;;  %1649 = vst [vmem:[%s2856_s4 + $0x100] sm:$0xff] %v3140_v10 }
 0x18e   : > { %1713 = vst [vmem:[%s2856_s4 + $0x300] sm:$0xff] %v3142_v36  ;;  %v1236_v53 = vpop.f32.mrf.mxu0  ;;  %v1492_v54 = vpop.f32.mrf.mxu1 }
 0x190   : > { %v3148_v0 = vpop.f32.mrf.mxu0  ;;  %v3150_v24 = vpop.f32.mrf.mxu1 }
 0x191   : > { %3983 = vst [vmem:[#allocation35_spill] sm:$0xff] %v3150_v24  ;;  %1650 = vst [vmem:[%s2856_s4 + $0x108] sm:$0xff] %v3148_v0 }
 0x192   : > { %1714 = vst [vmem:[%s2856_s4 + $0x308] sm:$0xff] %v3150_v24  ;;  %v1239_v29 = vpop.f32.mrf.mxu0  ;;  %v1495_v30 = vpop.f32.mrf.mxu1 }
 0x194   : > { %v3156_v48 = vpop.f32.mrf.mxu0  ;;  %v3158_v14 = vpop.f32.mrf.mxu1 }
 0x195   : > { %3984 = vst [vmem:[#allocation36_spill] sm:$0xff] %v3158_v14  ;;  %1651 = vst [vmem:[%s2856_s4 + $0x110] sm:$0xff] %v3156_v48 }
 0x196   : > { %1715 = vst [vmem:[%s2856_s4 + $0x310] sm:$0xff] %v3158_v14  ;;  %v1244_v53 = vpop.f32.mrf.mxu0  ;;  %v1500_v54 = vpop.f32.mrf.mxu1 }
 0x198   : > { %v3164_v36 = vpop.f32.mrf.mxu0  ;;  %v3166_v2 = vpop.f32.mrf.mxu1 }
 0x199   : > { %3985 = vst [vmem:[#allocation37_spill] sm:$0xff] %v3166_v2  ;;  %1652 = vst [vmem:[%s2856_s4 + $0x118] sm:$0xff] %v3164_v36 }
 0x19a   : > { %1716 = vst [vmem:[%s2856_s4 + $0x318] sm:$0xff] %v3166_v2  ;;  %v1247_v29 = vpop.f32.mrf.mxu0  ;;  %v1503_v30 = vpop.f32.mrf.mxu1 }
 0x19c   : > { %v3172_v24 = vpop.f32.mrf.mxu0  ;;  %v3174_v62 = vpop.f32.mrf.mxu1 }
 0x19d   : > { %3986 = vst [vmem:[#allocation38_spill] sm:$0xff] %v3174_v62  ;;  %1653 = vst [vmem:[%s2856_s4 + $0x120] sm:$0xff] %v3172_v24 }
 0x19e   : > { %1717 = vst [vmem:[%s2856_s4 + $0x320] sm:$0xff] %v3174_v62  ;;  %v1252_v53 = vpop.f32.mrf.mxu0  ;;  %v1508_v54 = vpop.f32.mrf.mxu1 }
 0x1a0   : > { %v3180_v14 = vpop.f32.mrf.mxu0  ;;  %v3182_v50 = vpop.f32.mrf.mxu1 }
 0x1a1   : > { %3987 = vst [vmem:[#allocation39_spill] sm:$0xff] %v3182_v50  ;;  %1654 = vst [vmem:[%s2856_s4 + $0x128] sm:$0xff] %v3180_v14 }
 0x1a2   : > { %1718 = vst [vmem:[%s2856_s4 + $0x328] sm:$0xff] %v3182_v50  ;;  %v1255_v29 = vpop.f32.mrf.mxu0  ;;  %v1511_v30 = vpop.f32.mrf.mxu1 }
 0x1a4   : > { %v3188_v2 = vpop.f32.mrf.mxu0  ;;  %v3190_v46 = vpop.f32.mrf.mxu1 }
 0x1a5   : > { %3988 = vst [vmem:[#allocation40_spill] sm:$0xff] %v3190_v46  ;;  %1655 = vst [vmem:[%s2856_s4 + $0x130] sm:$0xff] %v3188_v2 }
 0x1a6   : > { %1719 = vst [vmem:[%s2856_s4 + $0x330] sm:$0xff] %v3190_v46  ;;  %v1260_v53 = vpop.f32.mrf.mxu0  ;;  %v1516_v54 = vpop.f32.mrf.mxu1 }
 0x1a8   : > { %v3196_v62 = vpop.f32.mrf.mxu0  ;;  %v3198_v38 = vpop.f32.mrf.mxu1 }
 0x1a9   : > { %3989 = vst [vmem:[#allocation41_spill] sm:$0xff] %v3198_v38  ;;  %1656 = vst [vmem:[%s2856_s4 + $0x138] sm:$0xff] %v3196_v62 }
 0x1aa   : > { %1720 = vst [vmem:[%s2856_s4 + $0x338] sm:$0xff] %v3198_v38  ;;  %v1263_v29 = vpop.f32.mrf.mxu0  ;;  %v1519_v30 = vpop.f32.mrf.mxu1 }
 0x1ac   : > { %v3204_v50 = vpop.f32.mrf.mxu0  ;;  %v3206_v34 = vpop.f32.mrf.mxu1 }
 0x1ad   : > { %3990 = vst [vmem:[#allocation42_spill] sm:$0xff] %v3206_v34  ;;  %1657 = vst [vmem:[%s2856_s4 + $0x140] sm:$0xff] %v3204_v50 }
 0x1ae   : > { %1721 = vst [vmem:[%s2856_s4 + $0x340] sm:$0xff] %v3206_v34  ;;  %v1268_v53 = vpop.f32.mrf.mxu0  ;;  %v1524_v54 = vpop.f32.mrf.mxu1 }
 0x1b0   : > { %v3212_v46 = vpop.f32.mrf.mxu0  ;;  %v3214_v26 = vpop.f32.mrf.mxu1 }
 0x1b1   : > { %3991 = vst [vmem:[#allocation43_spill] sm:$0xff] %v3214_v26  ;;  %1658 = vst [vmem:[%s2856_s4 + $0x148] sm:$0xff] %v3212_v46 }
 0x1b2   : > { %1722 = vst [vmem:[%s2856_s4 + $0x348] sm:$0xff] %v3214_v26  ;;  %v1271_v29 = vpop.f32.mrf.mxu0  ;;  %v1527_v30 = vpop.f32.mrf.mxu1 }
 0x1b4   : > { %v3220_v38 = vpop.f32.mrf.mxu0  ;;  %v3222_v22 = vpop.f32.mrf.mxu1 }
 0x1b5   : > { %3992 = vst [vmem:[#allocation44_spill] sm:$0xff] %v3222_v22  ;;  %1659 = vst [vmem:[%s2856_s4 + $0x150] sm:$0xff] %v3220_v38 }
 0x1b6   : > { %1723 = vst [vmem:[%s2856_s4 + $0x350] sm:$0xff] %v3222_v22  ;;  %v1276_v53 = vpop.f32.mrf.mxu0  ;;  %v1532_v54 = vpop.f32.mrf.mxu1 }
 0x1b8   : > { %v3228_v34 = vpop.f32.mrf.mxu0  ;;  %v3230_v12 = vpop.f32.mrf.mxu1 }
 0x1b9   : > { %3993 = vst [vmem:[#allocation45_spill] sm:$0xff] %v3230_v12  ;;  %1660 = vst [vmem:[%s2856_s4 + $0x158] sm:$0xff] %v3228_v34 }
 0x1ba   : > { %1724 = vst [vmem:[%s2856_s4 + $0x358] sm:$0xff] %v3230_v12  ;;  %v1279_v29 = vpop.f32.mrf.mxu0  ;;  %v1535_v30 = vpop.f32.mrf.mxu1 }
 0x1bc   : > { %v3236_v26 = vpop.f32.mrf.mxu0  ;;  %v3238_v6 = vpop.f32.mrf.mxu1 }
 0x1bd   : > { %3994 = vst [vmem:[#allocation46_spill] sm:$0xff] %v3238_v6  ;;  %1661 = vst [vmem:[%s2856_s4 + $0x160] sm:$0xff] %v3236_v26 }
 0x1be   : > { %1725 = vst [vmem:[%s2856_s4 + $0x360] sm:$0xff] %v3238_v6  ;;  %v1284_v53 = vpop.f32.mrf.mxu0  ;;  %v1540_v54 = vpop.f32.mrf.mxu1 }
 0x1c0   : > { %v3244_v22 = vpop.f32.mrf.mxu0  ;;  %v3246_v58 = vpop.f32.mrf.mxu1 }
 0x1c1   : > { %3995 = vst [vmem:[#allocation47_spill] sm:$0xff] %v3246_v58  ;;  %1662 = vst [vmem:[%s2856_s4 + $0x168] sm:$0xff] %v3244_v22 }
 0x1c2   : > { %1726 = vst [vmem:[%s2856_s4 + $0x368] sm:$0xff] %v3246_v58  ;;  %v1287_v29 = vpop.f32.mrf.mxu0  ;;  %v1543_v30 = vpop.f32.mrf.mxu1 }
 0x1c4   : > { %v3252_v12 = vpop.f32.mrf.mxu0  ;;  %v3254_v52 = vpop.f32.mrf.mxu1 }
 0x1c5   : > { %3996 = vst [vmem:[#allocation48_spill] sm:$0xff] %v3254_v52  ;;  %1663 = vst [vmem:[%s2856_s4 + $0x170] sm:$0xff] %v3252_v12 }
 0x1c6   : > { %1727 = vst [vmem:[%s2856_s4 + $0x370] sm:$0xff] %v3254_v52  ;;  %v1292_v53 = vpop.f32.mrf.mxu0  ;;  %v1548_v54 = vpop.f32.mrf.mxu1 }
 0x1c8   : > { %v3260_v6 = vpop.f32.mrf.mxu0  ;;  %v3262_v44 = vpop.f32.mrf.mxu1 }
 0x1c9   : > { %3997 = vst [vmem:[#allocation49_spill] sm:$0xff] %v3262_v44  ;;  %1664 = vst [vmem:[%s2856_s4 + $0x178] sm:$0xff] %v3260_v6 }
 0x1ca   : > { %1728 = vst [vmem:[%s2856_s4 + $0x378] sm:$0xff] %v3262_v44  ;;  %v1295_v29 = vpop.f32.mrf.mxu0  ;;  %v1551_v30 = vpop.f32.mrf.mxu1 }
 0x1cc   : > { %v3268_v58 = vpop.f32.mrf.mxu0  ;;  %v3270_v40 = vpop.f32.mrf.mxu1 }
 0x1cd   : > { %3998 = vst [vmem:[#allocation50_spill] sm:$0xff] %v3270_v40  ;;  %1665 = vst [vmem:[%s2856_s4 + $0x180] sm:$0xff] %v3268_v58 }
 0x1ce   : > { %1729 = vst [vmem:[%s2856_s4 + $0x380] sm:$0xff] %v3270_v40  ;;  %v1300_v53 = vpop.f32.mrf.mxu0  ;;  %v1556_v54 = vpop.f32.mrf.mxu1 }
 0x1d0   : > { %v3276_v52 = vpop.f32.mrf.mxu0  ;;  %v3278_v32 = vpop.f32.mrf.mxu1 }
 0x1d1   : > { %3999 = vst [vmem:[#allocation51_spill] sm:$0xff] %v3278_v32  ;;  %1666 = vst [vmem:[%s2856_s4 + $0x188] sm:$0xff] %v3276_v52 }
 0x1d2   : > { %1730 = vst [vmem:[%s2856_s4 + $0x388] sm:$0xff] %v3278_v32  ;;  %v1303_v29 = vpop.f32.mrf.mxu0  ;;  %v1559_v30 = vpop.f32.mrf.mxu1 }
 0x1d4   : > { %v3284_v44 = vpop.f32.mrf.mxu0  ;;  %v3286_v28 = vpop.f32.mrf.mxu1 }
 0x1d5   : > { %4000 = vst [vmem:[#allocation52_spill] sm:$0xff] %v3286_v28  ;;  %1667 = vst [vmem:[%s2856_s4 + $0x190] sm:$0xff] %v3284_v44 }
 0x1d6   : > { %1731 = vst [vmem:[%s2856_s4 + $0x390] sm:$0xff] %v3286_v28  ;;  %v1308_v53 = vpop.f32.mrf.mxu0  ;;  %v1564_v54 = vpop.f32.mrf.mxu1 }
 0x1d8   : > { %v3292_v40 = vpop.f32.mrf.mxu0  ;;  %v3294_v20 = vpop.f32.mrf.mxu1 }
 0x1d9   : > { %4001 = vst [vmem:[#allocation53_spill] sm:$0xff] %v3294_v20  ;;  %1668 = vst [vmem:[%s2856_s4 + $0x198] sm:$0xff] %v3292_v40 }
 0x1da   : > { %1732 = vst [vmem:[%s2856_s4 + $0x398] sm:$0xff] %v3294_v20  ;;  %v1311_v29 = vpop.f32.mrf.mxu0  ;;  %v1567_v30 = vpop.f32.mrf.mxu1 }
 0x1dc   : > { %v3300_v32 = vpop.f32.mrf.mxu0  ;;  %v3302_v16 = vpop.f32.mrf.mxu1 }
 0x1dd   : > { %4002 = vst [vmem:[#allocation54_spill] sm:$0xff] %v3300_v32  ;;  %4003 = vst [vmem:[#allocation55_spill] sm:$0xff] %v3302_v16 }
 0x1de   : > { %1669 = vst [vmem:[%s2856_s4 + $0x1a0] sm:$0xff] %v3300_v32  ;;  %1733 = vst [vmem:[%s2856_s4 + $0x3a0] sm:$0xff] %v3302_v16  ;;  %v1316_v53 = vpop.f32.mrf.mxu0  ;;  %v1572_v54 = vpop.f32.mrf.mxu1 }
 0x1e0   : > { %v3308_v28 = vpop.f32.mrf.mxu0  ;;  %v3310_v8 = vpop.f32.mrf.mxu1 }
 0x1e1   : > { %4004 = vst [vmem:[#allocation56_spill] sm:$0xff] %v3308_v28  ;;  %4005 = vst [vmem:[#allocation57_spill] sm:$0xff] %v3310_v8 }
 0x1e2   : > { %1670 = vst [vmem:[%s2856_s4 + $0x1a8] sm:$0xff] %v3308_v28  ;;  %1734 = vst [vmem:[%s2856_s4 + $0x3a8] sm:$0xff] %v3310_v8  ;;  %v1319_v29 = vpop.f32.mrf.mxu0  ;;  %v1575_v30 = vpop.f32.mrf.mxu1 }
 0x1e4   : > { %v3316_v20 = vpop.f32.mrf.mxu0  ;;  %v3318_v4 = vpop.f32.mrf.mxu1 }
 0x1e5   : > { %4006 = vst [vmem:[#allocation58_spill] sm:$0xff] %v3316_v20  ;;  %4007 = vst [vmem:[#allocation59_spill] sm:$0xff] %v3318_v4 }
 0x1e6   : > { %1671 = vst [vmem:[%s2856_s4 + $0x1b0] sm:$0xff] %v3316_v20  ;;  %1735 = vst [vmem:[%s2856_s4 + $0x3b0] sm:$0xff] %v3318_v4  ;;  %v1324_v53 = vpop.f32.mrf.mxu0  ;;  %v1580_v54 = vpop.f32.mrf.mxu1 }
 0x1e8   : > { %v3324_v16 = vpop.f32.mrf.mxu0  ;;  %v3326_v60 = vpop.f32.mrf.mxu1 }
 0x1e9   : > { %4008 = vst [vmem:[#allocation60_spill] sm:$0xff] %v3324_v16  ;;  %4009 = vst [vmem:[#allocation61_spill] sm:$0xff] %v3326_v60 }
 0x1ea   : > { %1672 = vst [vmem:[%s2856_s4 + $0x1b8] sm:$0xff] %v3324_v16  ;;  %1736 = vst [vmem:[%s2856_s4 + $0x3b8] sm:$0xff] %v3326_v60  ;;  %v1327_v29 = vpop.f32.mrf.mxu0  ;;  %v1583_v30 = vpop.f32.mrf.mxu1 }
 0x1ec   : > { %v3332_v8 = vpop.f32.mrf.mxu0  ;;  %v3334_v56 = vpop.f32.mrf.mxu1 }
 0x1ed   : > { %4010 = vst [vmem:[#allocation62_spill] sm:$0xff] %v3332_v8  ;;  %4011 = vst [vmem:[#allocation63_spill] sm:$0xff] %v3334_v56 }
 0x1ee   : > { %1673 = vst [vmem:[%s2856_s4 + $0x1c0] sm:$0xff] %v3332_v8  ;;  %1737 = vst [vmem:[%s2856_s4 + $0x3c0] sm:$0xff] %v3334_v56  ;;  %v1332_v53 = vpop.f32.mrf.mxu0  ;;  %v1588_v54 = vpop.f32.mrf.mxu1 }
 0x1f0   : > { %v3340_v4 = vpop.f32.mrf.mxu0  ;;  %v3342_v16 = vpop.f32.mrf.mxu1 }
 0x1f1   : > { %4012 = vst [vmem:[#allocation64_spill] sm:$0xff] %v3340_v4  ;;  %4013 = vst [vmem:[#allocation65_spill] sm:$0xff] %v3342_v16 }
 0x1f2   : > { %1674 = vst [vmem:[%s2856_s4 + $0x1c8] sm:$0xff] %v3340_v4  ;;  %1738 = vst [vmem:[%s2856_s4 + $0x3c8] sm:$0xff] %v3342_v16  ;;  %v1335_v29 = vpop.f32.mrf.mxu0  ;;  %v1591_v30 = vpop.f32.mrf.mxu1 }
 0x1f4   : > { %v3348_v60 = vpop.f32.mrf.mxu0  ;;  %v3350_v8 = vpop.f32.mrf.mxu1 }
 0x1f5   : > { %4014 = vst [vmem:[#allocation66_spill] sm:$0xff] %v3348_v60  ;;  %4015 = vst [vmem:[#allocation67_spill] sm:$0xff] %v3350_v8 }
 0x1f6   : > { %1675 = vst [vmem:[%s2856_s4 + $0x1d0] sm:$0xff] %v3348_v60  ;;  %1739 = vst [vmem:[%s2856_s4 + $0x3d0] sm:$0xff] %v3350_v8  ;;  %v1340_v53 = vpop.f32.mrf.mxu0  ;;  %v1596_v54 = vpop.f32.mrf.mxu1 }
 0x1f8   : > { %v3356_v56 = vpop.f32.mrf.mxu0  ;;  %v3358_v4 = vpop.f32.mrf.mxu1 }
 0x1f9   : > { %4016 = vst [vmem:[#allocation68_spill] sm:$0xff] %v3356_v56  ;;  %4017 = vst [vmem:[#allocation69_spill] sm:$0xff] %v3358_v4 }
 0x1fa   : > { %1676 = vst [vmem:[%s2856_s4 + $0x1d8] sm:$0xff] %v3356_v56  ;;  %1740 = vst [vmem:[%s2856_s4 + $0x3d8] sm:$0xff] %v3358_v4  ;;  %v1343_v29 = vpop.f32.mrf.mxu0  ;;  %v1599_v30 = vpop.f32.mrf.mxu1 }
 0x1fc   : > { %v3364_v16 = vpop.f32.mrf.mxu0  ;;  %v3366_v60 = vpop.f32.mrf.mxu1 }
 0x1fd   : > { %4018 = vst [vmem:[#allocation70_spill] sm:$0xff] %v3364_v16  ;;  %4019 = vst [vmem:[#allocation71_spill] sm:$0xff] %v3366_v60 }
 0x1fe   : > { %1677 = vst [vmem:[%s2856_s4 + $0x1e0] sm:$0xff] %v3364_v16  ;;  %1741 = vst [vmem:[%s2856_s4 + $0x3e0] sm:$0xff] %v3366_v60  ;;  %v1348_v53 = vpop.f32.mrf.mxu0  ;;  %v1604_v54 = vpop.f32.mrf.mxu1 }
 0x200   : > { %v3372_v8 = vpop.f32.mrf.mxu0  ;;  %v3374_v56 = vpop.f32.mrf.mxu1 }
 0x201   : > { %4020 = vst [vmem:[#allocation72_spill] sm:$0xff] %v3372_v8  ;;  %4021 = vst [vmem:[#allocation73_spill] sm:$0xff] %v3374_v56 }
 0x202   : > { %1678 = vst [vmem:[%s2856_s4 + $0x1e8] sm:$0xff] %v3372_v8  ;;  %1742 = vst [vmem:[%s2856_s4 + $0x3e8] sm:$0xff] %v3374_v56  ;;  %v1351_v29 = vpop.f32.mrf.mxu0  ;;  %v1607_v30 = vpop.f32.mrf.mxu1 }
 0x204   : > { %v3380_v4 = vpop.f32.mrf.mxu0  ;;  %v3382_v20 = vpop.f32.mrf.mxu1 }
 0x205   : > { %4022 = vst [vmem:[#allocation74_spill] sm:$0xff] %v3380_v4  ;;  %4023 = vst [vmem:[#allocation75_spill] sm:$0xff] %v3382_v20 }
 0x206   : > { %1679 = vst [vmem:[%s2856_s4 + $0x1f0] sm:$0xff] %v3380_v4  ;;  %1743 = vst [vmem:[%s2856_s4 + $0x3f0] sm:$0xff] %v3382_v20  ;;  %v1356_v53 = vpop.f32.mrf.mxu0  ;;  %v1612_v54 = vpop.f32.mrf.mxu1  ;;  %1748 = sbr.rel (%p2365_p4) target bundleno = 525 (0x20d), region = 32 }
 0x208   : > { %v3388_v60 = vpop.f32.mrf.mxu0  ;;  %v3390_v16 = vpop.f32.mrf.mxu1 }
 0x209   : > { %4024 = vst [vmem:[#allocation76_spill] sm:$0xff] %v3388_v60  ;;  %4025 = vst [vmem:[#allocation77_spill] sm:$0xff] %v3390_v16 }
 0x20a   : > { %1680 = vst [vmem:[%s2856_s4 + $0x1f8] sm:$0xff] %v3388_v60  ;;  %1744 = vst [vmem:[%s2856_s4 + $0x3f8] sm:$0xff] %v3390_v16  ;;  %v1359_v29 = vpop.f32.mrf.mxu0  ;;  %v1615_v30 = vpop.f32.mrf.mxu1 }
 0x20b   : > { %v2628_v56 = vmov 0.0  }
 0x20c   : > { %1749 = vst [vmem:[%s3797_s3] sm:$0x3] %v2628_v56 }
 0x20d PF: > { %v1750_v53 = vadd.f32 %v2866_v59, %v2858_v55  ;;  %v1883_v8 = vmul.f32 %v2858_v55, %v2858_v55  ;;  %vm2145_vm0 = vcmask 1040384  }
 0x20f   : > { %v1751_v54 = vadd.f32 %v1750_v53, %v2878_v3  ;;  %v1884_v53 = vmul.f32 %v2866_v59, %v2866_v59  ;;  %v1888_v59 = vmul.f32 %v2906_v19, %v2906_v19 }
 0x211   : > { %v1752_v20 = vadd.f32 %v1751_v54, %v2886_v7 }
 0x213   : > { %v1753_v29 = vadd.f32 %v1752_v20, %v2898_v15  ;;  %v1885_v20 = vmul.f32 %v2878_v3, %v2878_v3 }
 0x215   : > { %v1754_v30 = vadd.f32 %v1753_v29, %v2906_v19 }
 0x217   : > { %v1755_v16 = vadd.f32 %v1754_v30, %v2918_v27  ;;  %v2011_v30 = vadd.f32 %v1884_v53, %v1883_v8  ;;  %v1890_v8 = vmul.f32 %v2926_v31, %v2926_v31 }
 0x219   : > { %v1756_v60 = vadd.f32 %v1755_v16, %v2926_v31  ;;  %v1886_v16 = vmul.f32 %v2886_v7, %v2886_v7  ;;  %v2012_v55 = vadd.f32 %v2011_v30, %v1885_v20  ;;  %v1891_v20 = vmul.f32 %v2938_v39, %v2938_v39 }
 0x21a   : > { %v1893_v30 = vmul.f32 %v2958_v51, %v2958_v51 }
 0x21b   : > { %v1757_v4 = vadd.f32 %v1756_v60, %v2938_v39 }
 0x21d   : > { %v1758_v56 = vadd.f32 %v1757_v4, %v2946_v43  ;;  %v1887_v4 = vmul.f32 %v2898_v15, %v2898_v15 }
 0x21f   : > { %v1759_v54 = vadd.f32 %v1758_v56, %v2958_v51  ;;  %v2013_v56 = vadd.f32 %v2012_v55, %v1886_v16  ;;  %v1895_v55 = vmul.f32 %v2978_v5, %v2978_v5 }
 0x221   : > { %v1760_v29 = vadd.f32 %v1759_v54, %v2966_v57  ;;  %v1889_v54 = vmul.f32 %v2918_v27, %v2918_v27  ;;  %v2014_v32 = vadd.f32 %v2013_v56, %v1887_v4  ;;  %v1896_v56 = vmul.f32 %v2986_v11, %v2986_v11 }
 0x223   : > { %v1761_v60 = vadd.f32 %v1760_v29, %v2978_v5  ;;  %v2015_v53 = vadd.f32 %v2014_v32, %v1888_v59  ;;  %v1894_v32 = vmul.f32 %v2966_v57, %v2966_v57 }
 0x225   : > { %v1762_v28 = vadd.f32 %v1761_v60, %v2986_v11  ;;  %v2016_v29 = vadd.f32 %v2015_v53, %v1889_v54  ;;  %v1897_v54 = vmul.f32 %v2996_v21, %v2996_v21 }
 0x227   : > { %v1763_v3 = vadd.f32 %v1762_v28, %v2996_v21  ;;  %v1892_v28 = vmul.f32 %v2946_v43, %v2946_v43  ;;  %v2017_v16 = vadd.f32 %v2016_v29, %v1890_v8  ;;  %v1898_v8 = vmul.f32 %v3004_v25, %v3004_v25 }
 0x228   : > { %v1900_v29 = vmul.f32 %v3020_v37, %v3020_v37 }
 0x229   : > { %v1764_v7 = vadd.f32 %v1763_v3, %v3004_v25  ;;  %v2018_v60 = vadd.f32 %v2017_v16, %v1891_v20 }
 0x22b   : > { %v1765_v15 = vadd.f32 %v1764_v7, %v3012_v33  ;;  %v2019_v4 = vadd.f32 %v2018_v60, %v1892_v28  ;;  %v1901_v28 = vmul.f32 %v3028_v45, %v3028_v45  ;;  %v1903_v60 = vmul.f32 %v3044_v61, %v3044_v61 }
 0x22d   : > { %v1766_v19 = vadd.f32 %v1765_v15, %v3020_v37  ;;  %v2020_v59 = vadd.f32 %v2019_v4, %v1893_v30  ;;  %v1899_v15 = vmul.f32 %v3012_v33, %v3012_v33 }
 0x22f   : > { %v1767_v27 = vadd.f32 %v1766_v19, %v3028_v45  ;;  %v2021_v3 = vadd.f32 %v2020_v59, %v1894_v32  ;;  %v1904_v32 = vmul.f32 %v3052_v1, %v3052_v1  ;;  %v1906_v59 = vmul.f32 %v3068_v23, %v3068_v23 }
 0x231   : > { %v1768_v31 = vadd.f32 %v1767_v27, %v3036_v49  ;;  %v2022_v7 = vadd.f32 %v2021_v3, %v1895_v55  ;;  %v1902_v27 = vmul.f32 %v3036_v49, %v3036_v49 }
 0x233   : > { %v1769_v39 = vadd.f32 %v1768_v31, %v3044_v61  ;;  %v2023_v53 = vadd.f32 %v2022_v7, %v1896_v56  ;;  %v1907_v56 = vmul.f32 %v3076_v35, %v3076_v35  ;;  %v1909_v7 = vmul.f32 %v3092_v63, %v3092_v63 }
 0x235   : > { %v1770_v43 = vadd.f32 %v1769_v39, %v3052_v1  ;;  %v2024_v20 = vadd.f32 %v2023_v53, %v1897_v54  ;;  %v1905_v39 = vmul.f32 %v3060_v13, %v3060_v13 }
 0x237   : > { %v1771_v51 = vadd.f32 %v1770_v43, %v3060_v13  ;;  %v2025_v19 = vadd.f32 %v2024_v20, %v1898_v8  ;;  %v1910_v8 = vmul.f32 %v3100_v17, %v3100_v17  ;;  %v1912_v20 = vmul.f32 %v3116_v9, %v3116_v9 }
 0x239   : > { %v1772_v57 = vadd.f32 %v1771_v51, %v3068_v23  ;;  %v2026_v16 = vadd.f32 %v2025_v19, %v1899_v15  ;;  %v1908_v51 = vmul.f32 %v3084_v47, %v3084_v47 }
 0x23b   : > { %v1773_v5 = vadd.f32 %v1772_v57, %v3076_v35  ;;  %v2027_v30 = vadd.f32 %v2026_v16, %v1900_v29  ;;  %v1913_v29 = vmul.f32 %v3124_v18, %v3124_v18  ;;  %v1915_v16 = vmul.f32 %v3140_v10, %v3140_v10 }
 0x23d   : > { %v1774_v11 = vadd.f32 %v1773_v5, %v3084_v47  ;;  %v2028_v31 = vadd.f32 %v2027_v30, %v1901_v28  ;;  %v1911_v5 = vmul.f32 %v3108_v41, %v3108_v41 }
 0x23f   : > { %v1775_v21 = vadd.f32 %v1774_v11, %v3092_v63  ;;  %v2029_v4 = vadd.f32 %v2028_v31, %v1902_v27  ;;  %v1916_v27 = vmul.f32 %v3148_v0, %v3148_v0  ;;  %v1918_v31 = vmul.f32 %v3164_v36, %v3164_v36 }
 0x241   : > { %v1776_v25 = vadd.f32 %v1775_v21, %v3100_v17  ;;  %v2030_v55 = vadd.f32 %v2029_v4, %v1903_v60  ;;  %v1914_v21 = vmul.f32 %v3132_v42, %v3132_v42 }
 0x243   : > { %v1777_v33 = vadd.f32 %v1776_v25, %v3108_v41  ;;  %v2031_v43 = vadd.f32 %v2030_v55, %v1904_v32  ;;  %v1919_v32 = vmul.f32 %v3172_v24, %v3172_v24  ;;  %v1921_v55 = vmul.f32 %v3188_v2, %v3188_v2 }
 0x245   : > { %v1778_v37 = vadd.f32 %v1777_v33, %v3116_v9  ;;  %v2032_v3 = vadd.f32 %v2031_v43, %v1905_v39  ;;  %v1917_v33 = vmul.f32 %v3156_v48, %v3156_v48 }
 0x247   : > { %v1779_v45 = vadd.f32 %v1778_v37, %v3124_v18  ;;  %v2033_v54 = vadd.f32 %v2032_v3, %v1906_v59  ;;  %v1922_v59 = vmul.f32 %v3196_v62, %v3196_v62  ;;  %v1924_v3 = vmul.f32 %v3212_v46, %v3212_v46 }
 0x249   : > { %v1780_v49 = vadd.f32 %v1779_v45, %v3132_v42  ;;  %v2034_v57 = vadd.f32 %v2033_v54, %v1907_v56  ;;  %v1920_v45 = vmul.f32 %v3180_v14, %v3180_v14 }
 0x24b   : > { %v1781_v61 = vadd.f32 %v1780_v49, %v3140_v10  ;;  %v2035_v53 = vadd.f32 %v2034_v57, %v1908_v51  ;;  %v1925_v51 = vmul.f32 %v3220_v38, %v3220_v38 }
 0x24d   : > { %v1782_v1 = vadd.f32 %v1781_v61, %v3148_v0  ;;  %v2036_v15 = vadd.f32 %v2035_v53, %v1909_v7  ;;  %v1923_v61 = vmul.f32 %v3204_v50, %v3204_v50 }
 0x24f   : > { %v1783_v13 = vadd.f32 %v1782_v1, %v3156_v48  ;;  %v2037_v11 = vadd.f32 %v2036_v15, %v1910_v8 }
 0x251   : > { %v1784_v23 = vadd.f32 %v1783_v13, %v3164_v36  ;;  %v2038_v19 = vadd.f32 %v2037_v11, %v1911_v5  ;;  %v1926_v13 = vmul.f32 %v3228_v34, %v3228_v34 }
 0x253   : > { %v1785_v35 = vadd.f32 %v1784_v23, %v3172_v24  ;;  %v2039_v28 = vadd.f32 %v2038_v19, %v1912_v20  ;;  %v1927_v23 = vmul.f32 %v3236_v26, %v3236_v26 }
 0x255   : > { %v1786_v47 = vadd.f32 %v1785_v35, %v3180_v14  ;;  %v2040_v25 = vadd.f32 %v2039_v28, %v1913_v29  ;;  %v1928_v35 = vmul.f32 %v3244_v22, %v3244_v22 }
 0x257   : > { %v1787_v63 = vadd.f32 %v1786_v47, %v3188_v2  ;;  %v2041_v30 = vadd.f32 %v2040_v25, %v1914_v21  ;;  %v1929_v47 = vmul.f32 %v3252_v12, %v3252_v12 }
 0x259   : > { %v1788_v17 = vadd.f32 %v1787_v63, %v3196_v62  ;;  %v2042_v60 = vadd.f32 %v2041_v30, %v1915_v16  ;;  %v1930_v63 = vmul.f32 %v3260_v6, %v3260_v6 }
 0x25b   : > { %v1789_v41 = vadd.f32 %v1788_v17, %v3204_v50  ;;  %v2043_v37 = vadd.f32 %v2042_v60, %v1916_v27  ;;  %v4026_v50 = vld [vmem:[#allocation54_spill] sm:$0xff]  ;;  %v1931_v17 = vmul.f32 %v3268_v58, %v3268_v58 }
 0x25d   : > { %v1790_v9 = vadd.f32 %v1789_v41, %v3212_v46  ;;  %v2044_v4 = vadd.f32 %v2043_v37, %v1917_v33  ;;  %v4027_v46 = vld [vmem:[#allocation56_spill] sm:$0xff]  ;;  %v1932_v41 = vmul.f32 %v3276_v52, %v3276_v52 }
 0x25f   : > { %v1791_v18 = vadd.f32 %v1790_v9, %v3220_v38  ;;  %v2045_v39 = vadd.f32 %v2044_v4, %v1918_v31  ;;  %v4028_v38 = vld [vmem:[#allocation58_spill] sm:$0xff]  ;;  %v1933_v9 = vmul.f32 %v3284_v44, %v3284_v44 }
 0x261   : > { %v1792_v42 = vadd.f32 %v1791_v18, %v3228_v34  ;;  %v2046_v49 = vadd.f32 %v2045_v39, %v1919_v32  ;;  %v4029_v34 = vld [vmem:[#allocation60_spill] sm:$0xff]  ;;  %v1934_v18 = vmul.f32 %v3292_v40, %v3292_v40 }
 0x263   : > { %v1793_v10 = vadd.f32 %v1792_v42, %v3236_v26  ;;  %v2047_v43 = vadd.f32 %v2046_v49, %v1920_v45  ;;  %v4030_v26 = vld [vmem:[#allocation62_spill] sm:$0xff]  ;;  %v1935_v42 = vmul.f32 %v4026_v50, %v4026_v50 }
 0x264   : > { %v4038_v49 = vld [vmem:[#allocation2_spill] sm:$0xff] }
 0x265   : > { %v1794_v0 = vadd.f32 %v1793_v10, %v3244_v22  ;;  %v2048_v56 = vadd.f32 %v2047_v43, %v1921_v55  ;;  %v4031_v22 = vld [vmem:[#allocation64_spill] sm:$0xff]  ;;  %v1936_v10 = vmul.f32 %v4027_v46, %v4027_v46 }
 0x267   : > { %v1795_v48 = vadd.f32 %v1794_v0, %v3252_v12  ;;  %v2049_v1 = vadd.f32 %v2048_v56, %v1922_v59  ;;  %v4032_v12 = vld [vmem:[#allocation66_spill] sm:$0xff]  ;;  %v1937_v0 = vmul.f32 %v4028_v38, %v4028_v38  ;;  %v1939_v59 = vmul.f32 %v4030_v26, %v4030_v26 }
 0x268   : > { %v1940_v56 = vmul.f32 %v4031_v22, %v4031_v22 }
 0x269   : > { %v1796_v36 = vadd.f32 %v1795_v48, %v3260_v6  ;;  %v2050_v54 = vadd.f32 %v2049_v1, %v1923_v61  ;;  %v4033_v6 = vld [vmem:[#allocation68_spill] sm:$0xff]  ;;  %v1938_v48 = vmul.f32 %v4029_v34, %v4029_v34 }
 0x26b   : > { %v1797_v24 = vadd.f32 %v1796_v36, %v3268_v58  ;;  %v2051_v7 = vadd.f32 %v2050_v54, %v1924_v3  ;;  %v4034_v58 = vld [vmem:[#allocation70_spill] sm:$0xff]  ;;  %v4040_v3 = vld [vmem:[#allocation4_spill] sm:$0xff]  ;;  %v4041_v54 = vld [vmem:[#allocation5_spill] sm:$0xff] }
 0x26d   : > { %v1798_v14 = vadd.f32 %v1797_v24, %v3276_v52  ;;  %v2052_v8 = vadd.f32 %v2051_v7, %v1925_v51  ;;  %v4035_v52 = vld [vmem:[#allocation72_spill] sm:$0xff]  ;;  %v4039_v24 = vld [vmem:[#allocation3_spill] sm:$0xff] }
 0x26f   : > { %v1799_v2 = vadd.f32 %v1798_v14, %v3284_v44  ;;  %v2053_v5 = vadd.f32 %v2052_v8, %v1926_v13  ;;  %v4036_v44 = vld [vmem:[#allocation74_spill] sm:$0xff]  ;;  %v1942_v13 = vmul.f32 %v4033_v6, %v4033_v6 }
 0x271   : > { %v1800_v62 = vadd.f32 %v1799_v2, %v3292_v40  ;;  %v2054_v20 = vadd.f32 %v2053_v5, %v1927_v23  ;;  %v4037_v40 = vld [vmem:[#allocation76_spill] sm:$0xff]  ;;  %v1941_v2 = vmul.f32 %v4032_v12, %v4032_v12  ;;  %v1943_v23 = vmul.f32 %v4034_v58, %v4034_v58 }
 0x273   : > { %v1801_v57 = vadd.f32 %v1800_v62, %v4026_v50  ;;  %v2055_v29 = vadd.f32 %v2054_v20, %v1928_v35  ;;  %v4042_v50 = vld [vmem:[#allocation6_spill] sm:$0xff]  ;;  %v1944_v35 = vmul.f32 %v4035_v52, %v4035_v52 }
 0x275   : > { %v1802_v53 = vadd.f32 %v1801_v57, %v4027_v46  ;;  %v2056_v21 = vadd.f32 %v2055_v29, %v1929_v47  ;;  %v4043_v46 = vld [vmem:[#allocation7_spill] sm:$0xff]  ;;  %v1945_v47 = vmul.f32 %v4036_v44, %v4036_v44 }
 0x277   : > { %v1803_v15 = vadd.f32 %v1802_v53, %v4028_v38  ;;  %v2057_v16 = vadd.f32 %v2056_v21, %v1930_v63  ;;  %v4044_v38 = vld [vmem:[#allocation8_spill] sm:$0xff]  ;;  %v1946_v63 = vmul.f32 %v4037_v40, %v4037_v40 }
 0x279   : > { %v1804_v11 = vadd.f32 %v1803_v15, %v4029_v34  ;;  %v2058_v27 = vadd.f32 %v2057_v16, %v1931_v17  ;;  %v4045_v34 = vld [vmem:[#allocation9_spill] sm:$0xff]  ;;  %v1947_v17 = vmul.f32 %v4038_v49, %v4038_v49 }
 0x27b   : > { %v1805_v19 = vadd.f32 %v1804_v11, %v4030_v26  ;;  %v2059_v33 = vadd.f32 %v2058_v27, %v1932_v41  ;;  %v4046_v26 = vld [vmem:[#allocation10_spill] sm:$0xff]  ;;  %v1948_v41 = vmul.f32 %v4039_v24, %v4039_v24 }
 0x27d   : > { %v1806_v28 = vadd.f32 %v1805_v19, %v4031_v22  ;;  %v2060_v31 = vadd.f32 %v2059_v33, %v1933_v9  ;;  %v4047_v22 = vld [vmem:[#allocation11_spill] sm:$0xff]  ;;  %v1949_v9 = vmul.f32 %v4040_v3, %v4040_v3 }
 0x27f   : > { %v1807_v25 = vadd.f32 %v1806_v28, %v4032_v12  ;;  %v2061_v32 = vadd.f32 %v2060_v31, %v1934_v18  ;;  %v4048_v12 = vld [vmem:[#allocation12_spill] sm:$0xff]  ;;  %v1950_v18 = vmul.f32 %v4041_v54, %v4041_v54 }
 0x281   : > { %v1808_v30 = vadd.f32 %v1807_v25, %v4033_v6  ;;  %v2062_v45 = vadd.f32 %v2061_v32, %v1935_v42  ;;  %v4049_v6 = vld [vmem:[#allocation13_spill] sm:$0xff]  ;;  %v1951_v42 = vmul.f32 %v4042_v50, %v4042_v50 }
 0x283   : > { %v1809_v60 = vadd.f32 %v1808_v30, %v4034_v58  ;;  %v2063_v55 = vadd.f32 %v2062_v45, %v1936_v10  ;;  %v4050_v58 = vld [vmem:[#allocation14_spill] sm:$0xff]  ;;  %v1952_v10 = vmul.f32 %v4043_v46, %v4043_v46 }
 0x285   : > { %v1810_v37 = vadd.f32 %v1809_v60, %v4035_v52  ;;  %v2064_v43 = vadd.f32 %v2063_v55, %v1937_v0  ;;  %v4051_v52 = vld [vmem:[#allocation15_spill] sm:$0xff]  ;;  %v1953_v0 = vmul.f32 %v4044_v38, %v4044_v38 }
 0x287   : > { %v1811_v4 = vadd.f32 %v1810_v37, %v4036_v44  ;;  %v2065_v14 = vadd.f32 %v2064_v43, %v1938_v48  ;;  %v4052_v44 = vld [vmem:[#allocation16_spill] sm:$0xff]  ;;  %v1954_v48 = vmul.f32 %v4045_v34, %v4045_v34 }
 0x289   : > { %v1812_v39 = vadd.f32 %v1811_v4, %v4037_v40  ;;  %v2066_v51 = vadd.f32 %v2065_v14, %v1939_v59  ;;  %v4053_v40 = vld [vmem:[#allocation17_spill] sm:$0xff]  ;;  %v1955_v59 = vmul.f32 %v4046_v26, %v4046_v26 }
 0x28b   : > { %v1813_v36 = vadd.f32 %v1812_v39, %v4038_v49  ;;  %v2067_v7 = vadd.f32 %v2066_v51, %v1940_v56  ;;  %v4054_v49 = vld [vmem:[#allocation18_spill] sm:$0xff]  ;;  %v1956_v56 = vmul.f32 %v4047_v22, %v4047_v22 }
 0x28d   : > { %v1814_v61 = vadd.f32 %v1813_v36, %v4039_v24  ;;  %v2068_v8 = vadd.f32 %v2067_v7, %v1941_v2  ;;  %v4055_v24 = vld [vmem:[#allocation19_spill] sm:$0xff]  ;;  %v1957_v2 = vmul.f32 %v4048_v12, %v4048_v12 }
 0x28f   : > { %v1815_v1 = vadd.f32 %v1814_v61, %v4040_v3  ;;  %v2069_v5 = vadd.f32 %v2068_v8, %v1942_v13  ;;  %v4056_v3 = vld [vmem:[#allocation20_spill] sm:$0xff]  ;;  %v1958_v13 = vmul.f32 %v4049_v6, %v4049_v6 }
 0x291   : > { %v1816_v62 = vadd.f32 %v1815_v1, %v4041_v54  ;;  %v2070_v20 = vadd.f32 %v2069_v5, %v1943_v23  ;;  %v4057_v54 = vld [vmem:[#allocation21_spill] sm:$0xff]  ;;  %v1959_v23 = vmul.f32 %v4050_v58, %v4050_v58 }
 0x293   : > { %v1817_v57 = vadd.f32 %v1816_v62, %v4042_v50  ;;  %v2071_v29 = vadd.f32 %v2070_v20, %v1944_v35  ;;  %v4058_v50 = vld [vmem:[#allocation22_spill] sm:$0xff]  ;;  %v1960_v35 = vmul.f32 %v4051_v52, %v4051_v52 }
 0x295   : > { %v1818_v53 = vadd.f32 %v1817_v57, %v4043_v46  ;;  %v2072_v21 = vadd.f32 %v2071_v29, %v1945_v47  ;;  %v4059_v46 = vld [vmem:[#allocation23_spill] sm:$0xff]  ;;  %v1961_v47 = vmul.f32 %v4052_v44, %v4052_v44 }
 0x297   : > { %v1819_v15 = vadd.f32 %v1818_v53, %v4044_v38  ;;  %v2073_v16 = vadd.f32 %v2072_v21, %v1946_v63  ;;  %v4060_v38 = vld [vmem:[#allocation24_spill] sm:$0xff]  ;;  %v1962_v63 = vmul.f32 %v4053_v40, %v4053_v40 }
 0x299   : > { %v1820_v11 = vadd.f32 %v1819_v15, %v4045_v34  ;;  %v2074_v27 = vadd.f32 %v2073_v16, %v1947_v17  ;;  %v4061_v34 = vld [vmem:[#allocation25_spill] sm:$0xff]  ;;  %v1963_v17 = vmul.f32 %v4054_v49, %v4054_v49 }
 0x29b   : > { %v1821_v19 = vadd.f32 %v1820_v11, %v4046_v26  ;;  %v2075_v33 = vadd.f32 %v2074_v27, %v1948_v41  ;;  %v4062_v26 = vld [vmem:[#allocation26_spill] sm:$0xff]  ;;  %v1964_v41 = vmul.f32 %v4055_v24, %v4055_v24 }
 0x29d   : > { %v1822_v28 = vadd.f32 %v1821_v19, %v4047_v22  ;;  %v2076_v31 = vadd.f32 %v2075_v33, %v1949_v9  ;;  %v4063_v22 = vld [vmem:[#allocation27_spill] sm:$0xff]  ;;  %v1965_v9 = vmul.f32 %v4056_v3, %v4056_v3 }
 0x29f   : > { %v1823_v25 = vadd.f32 %v1822_v28, %v4048_v12  ;;  %v2077_v32 = vadd.f32 %v2076_v31, %v1950_v18  ;;  %v4064_v12 = vld [vmem:[#allocation28_spill] sm:$0xff]  ;;  %v1966_v18 = vmul.f32 %v4057_v54, %v4057_v54 }
 0x2a1   : > { %v1824_v30 = vadd.f32 %v1823_v25, %v4049_v6  ;;  %v2078_v45 = vadd.f32 %v2077_v32, %v1951_v42  ;;  %v4065_v6 = vld [vmem:[#allocation29_spill] sm:$0xff]  ;;  %v1967_v42 = vmul.f32 %v4058_v50, %v4058_v50 }
 0x2a3   : > { %v1825_v60 = vadd.f32 %v1824_v30, %v4050_v58  ;;  %v2079_v55 = vadd.f32 %v2078_v45, %v1952_v10  ;;  %v4066_v58 = vld [vmem:[#allocation30_spill] sm:$0xff]  ;;  %v1968_v10 = vmul.f32 %v4059_v46, %v4059_v46 }
 0x2a5   : > { %v1826_v37 = vadd.f32 %v1825_v60, %v4051_v52  ;;  %v2080_v43 = vadd.f32 %v2079_v55, %v1953_v0  ;;  %v4067_v52 = vld [vmem:[#allocation31_spill] sm:$0xff]  ;;  %v1969_v0 = vmul.f32 %v4060_v38, %v4060_v38 }
 0x2a7   : > { %v1827_v4 = vadd.f32 %v1826_v37, %v4052_v44  ;;  %v2081_v14 = vadd.f32 %v2080_v43, %v1954_v48  ;;  %v4068_v44 = vld [vmem:[#allocation32_spill] sm:$0xff]  ;;  %v1970_v48 = vmul.f32 %v4061_v34, %v4061_v34 }
 0x2a9   : > { %v1828_v39 = vadd.f32 %v1827_v4, %v4053_v40  ;;  %v2082_v51 = vadd.f32 %v2081_v14, %v1955_v59  ;;  %v4069_v40 = vld [vmem:[#allocation33_spill] sm:$0xff]  ;;  %v1971_v59 = vmul.f32 %v4062_v26, %v4062_v26 }
 0x2ab   : > { %v1829_v36 = vadd.f32 %v1828_v39, %v4054_v49  ;;  %v2083_v7 = vadd.f32 %v2082_v51, %v1956_v56  ;;  %v4070_v49 = vld [vmem:[#allocation34_spill] sm:$0xff]  ;;  %v1972_v56 = vmul.f32 %v4063_v22, %v4063_v22 }
 0x2ad   : > { %v1830_v61 = vadd.f32 %v1829_v36, %v4055_v24  ;;  %v2084_v8 = vadd.f32 %v2083_v7, %v1957_v2  ;;  %v4071_v24 = vld [vmem:[#allocation35_spill] sm:$0xff]  ;;  %v1973_v2 = vmul.f32 %v4064_v12, %v4064_v12 }
 0x2af   : > { %v1831_v1 = vadd.f32 %v1830_v61, %v4056_v3  ;;  %v2085_v5 = vadd.f32 %v2084_v8, %v1958_v13  ;;  %v4072_v3 = vld [vmem:[#allocation36_spill] sm:$0xff]  ;;  %v1974_v13 = vmul.f32 %v4065_v6, %v4065_v6 }
 0x2b1   : > { %v1832_v62 = vadd.f32 %v1831_v1, %v4057_v54  ;;  %v2086_v20 = vadd.f32 %v2085_v5, %v1959_v23  ;;  %v4073_v54 = vld [vmem:[#allocation37_spill] sm:$0xff]  ;;  %v1975_v23 = vmul.f32 %v4066_v58, %v4066_v58 }
 0x2b3   : > { %v1833_v57 = vadd.f32 %v1832_v62, %v4058_v50  ;;  %v2087_v29 = vadd.f32 %v2086_v20, %v1960_v35  ;;  %v4074_v50 = vld [vmem:[#allocation38_spill] sm:$0xff]  ;;  %v1976_v35 = vmul.f32 %v4067_v52, %v4067_v52 }
 0x2b5   : > { %v1834_v53 = vadd.f32 %v1833_v57, %v4059_v46  ;;  %v2088_v21 = vadd.f32 %v2087_v29, %v1961_v47  ;;  %v4075_v46 = vld [vmem:[#allocation39_spill] sm:$0xff]  ;;  %v1977_v47 = vmul.f32 %v4068_v44, %v4068_v44 }
 0x2b7   : > { %v1835_v15 = vadd.f32 %v1834_v53, %v4060_v38  ;;  %v2089_v16 = vadd.f32 %v2088_v21, %v1962_v63  ;;  %v4076_v38 = vld [vmem:[#allocation40_spill] sm:$0xff]  ;;  %v1978_v63 = vmul.f32 %v4069_v40, %v4069_v40 }
 0x2b9   : > { %v1836_v11 = vadd.f32 %v1835_v15, %v4061_v34  ;;  %v2090_v27 = vadd.f32 %v2089_v16, %v1963_v17  ;;  %v4077_v34 = vld [vmem:[#allocation41_spill] sm:$0xff]  ;;  %v1979_v17 = vmul.f32 %v4070_v49, %v4070_v49 }
 0x2bb   : > { %v1837_v19 = vadd.f32 %v1836_v11, %v4062_v26  ;;  %v2091_v33 = vadd.f32 %v2090_v27, %v1964_v41  ;;  %v4078_v26 = vld [vmem:[#allocation42_spill] sm:$0xff]  ;;  %v1980_v41 = vmul.f32 %v4071_v24, %v4071_v24 }
 0x2bd   : > { %v1838_v28 = vadd.f32 %v1837_v19, %v4063_v22  ;;  %v2092_v31 = vadd.f32 %v2091_v33, %v1965_v9  ;;  %v4079_v22 = vld [vmem:[#allocation43_spill] sm:$0xff]  ;;  %v1981_v9 = vmul.f32 %v4072_v3, %v4072_v3 }
 0x2bf   : > { %v1839_v25 = vadd.f32 %v1838_v28, %v4064_v12  ;;  %v2093_v32 = vadd.f32 %v2092_v31, %v1966_v18  ;;  %v4080_v12 = vld [vmem:[#allocation44_spill] sm:$0xff]  ;;  %v1982_v18 = vmul.f32 %v4073_v54, %v4073_v54 }
 0x2c1   : > { %v1840_v30 = vadd.f32 %v1839_v25, %v4065_v6  ;;  %v2094_v45 = vadd.f32 %v2093_v32, %v1967_v42  ;;  %v4081_v6 = vld [vmem:[#allocation45_spill] sm:$0xff]  ;;  %v1983_v42 = vmul.f32 %v4074_v50, %v4074_v50 }
 0x2c3   : > { %v1841_v60 = vadd.f32 %v1840_v30, %v4066_v58  ;;  %v2095_v55 = vadd.f32 %v2094_v45, %v1968_v10  ;;  %v4082_v58 = vld [vmem:[#allocation46_spill] sm:$0xff]  ;;  %v1984_v10 = vmul.f32 %v4075_v46, %v4075_v46 }
 0x2c5   : > { %v1842_v37 = vadd.f32 %v1841_v60, %v4067_v52  ;;  %v2096_v43 = vadd.f32 %v2095_v55, %v1969_v0  ;;  %v4083_v52 = vld [vmem:[#allocation47_spill] sm:$0xff]  ;;  %v1985_v0 = vmul.f32 %v4076_v38, %v4076_v38 }
 0x2c7   : > { %v1843_v4 = vadd.f32 %v1842_v37, %v4068_v44  ;;  %v2097_v14 = vadd.f32 %v2096_v43, %v1970_v48  ;;  %v4084_v44 = vld [vmem:[#allocation48_spill] sm:$0xff]  ;;  %v1986_v48 = vmul.f32 %v4077_v34, %v4077_v34 }
 0x2c9   : > { %v1844_v39 = vadd.f32 %v1843_v4, %v4069_v40  ;;  %v2098_v51 = vadd.f32 %v2097_v14, %v1971_v59  ;;  %v4085_v40 = vld [vmem:[#allocation49_spill] sm:$0xff]  ;;  %v1987_v59 = vmul.f32 %v4078_v26, %v4078_v26 }
 0x2cb   : > { %v1845_v36 = vadd.f32 %v1844_v39, %v4070_v49  ;;  %v2099_v7 = vadd.f32 %v2098_v51, %v1972_v56  ;;  %v4086_v49 = vld [vmem:[#allocation50_spill] sm:$0xff]  ;;  %v1988_v56 = vmul.f32 %v4079_v22, %v4079_v22 }
 0x2cd   : > { %v1846_v61 = vadd.f32 %v1845_v36, %v4071_v24  ;;  %v2100_v8 = vadd.f32 %v2099_v7, %v1973_v2  ;;  %v4087_v24 = vld [vmem:[#allocation51_spill] sm:$0xff]  ;;  %v1989_v2 = vmul.f32 %v4080_v12, %v4080_v12 }
 0x2cf   : > { %v1847_v1 = vadd.f32 %v1846_v61, %v4072_v3  ;;  %v2101_v5 = vadd.f32 %v2100_v8, %v1974_v13  ;;  %v4088_v3 = vld [vmem:[#allocation52_spill] sm:$0xff]  ;;  %v1990_v13 = vmul.f32 %v4081_v6, %v4081_v6 }
 0x2d1   : > { %v1848_v62 = vadd.f32 %v1847_v1, %v4073_v54  ;;  %v2102_v20 = vadd.f32 %v2101_v5, %v1975_v23  ;;  %v4089_v54 = vld [vmem:[#allocation53_spill] sm:$0xff]  ;;  %v1991_v23 = vmul.f32 %v4082_v58, %v4082_v58 }
 0x2d3   : > { %v1849_v57 = vadd.f32 %v1848_v62, %v4074_v50  ;;  %v2103_v29 = vadd.f32 %v2102_v20, %v1976_v35  ;;  %v4090_v50 = vld [vmem:[#allocation55_spill] sm:$0xff]  ;;  %v1992_v35 = vmul.f32 %v4083_v52, %v4083_v52 }
 0x2d5   : > { %v1850_v53 = vadd.f32 %v1849_v57, %v4075_v46  ;;  %v2104_v21 = vadd.f32 %v2103_v29, %v1977_v47  ;;  %v4091_v46 = vld [vmem:[#allocation57_spill] sm:$0xff]  ;;  %v1993_v47 = vmul.f32 %v4084_v44, %v4084_v44 }
 0x2d7   : > { %v1851_v15 = vadd.f32 %v1850_v53, %v4076_v38  ;;  %v2105_v16 = vadd.f32 %v2104_v21, %v1978_v63  ;;  %v4092_v38 = vld [vmem:[#allocation59_spill] sm:$0xff]  ;;  %v1994_v63 = vmul.f32 %v4085_v40, %v4085_v40 }
 0x2d9   : > { %v1852_v11 = vadd.f32 %v1851_v15, %v4077_v34  ;;  %v2106_v27 = vadd.f32 %v2105_v16, %v1979_v17  ;;  %v4093_v34 = vld [vmem:[#allocation61_spill] sm:$0xff]  ;;  %v1995_v17 = vmul.f32 %v4086_v49, %v4086_v49 }
 0x2db   : > { %v1853_v19 = vadd.f32 %v1852_v11, %v4078_v26  ;;  %v2107_v33 = vadd.f32 %v2106_v27, %v1980_v41  ;;  %v4094_v26 = vld [vmem:[#allocation63_spill] sm:$0xff]  ;;  %v1996_v41 = vmul.f32 %v4087_v24, %v4087_v24 }
 0x2dd   : > { %v1854_v28 = vadd.f32 %v1853_v19, %v4079_v22  ;;  %v2108_v31 = vadd.f32 %v2107_v33, %v1981_v9  ;;  %v4095_v22 = vld [vmem:[#allocation65_spill] sm:$0xff]  ;;  %v1997_v9 = vmul.f32 %v4088_v3, %v4088_v3 }
 0x2df   : > { %v1855_v25 = vadd.f32 %v1854_v28, %v4080_v12  ;;  %v2109_v32 = vadd.f32 %v2108_v31, %v1982_v18  ;;  %v4096_v12 = vld [vmem:[#allocation67_spill] sm:$0xff]  ;;  %v1998_v18 = vmul.f32 %v4089_v54, %v4089_v54 }
 0x2e1   : > { %v1856_v30 = vadd.f32 %v1855_v25, %v4081_v6  ;;  %v2110_v45 = vadd.f32 %v2109_v32, %v1983_v42  ;;  %v4097_v6 = vld [vmem:[#allocation69_spill] sm:$0xff]  ;;  %v1999_v42 = vmul.f32 %v4090_v50, %v4090_v50 }
 0x2e3   : > { %v1857_v60 = vadd.f32 %v1856_v30, %v4082_v58  ;;  %v2111_v55 = vadd.f32 %v2110_v45, %v1984_v10  ;;  %v4098_v58 = vld [vmem:[#allocation71_spill] sm:$0xff]  ;;  %v4099_v10 = vld [vmem:[#allocation73_spill] sm:$0xff] }
 0x2e5   : > { %v1858_v37 = vadd.f32 %v1857_v60, %v4083_v52  ;;  %v2112_v43 = vadd.f32 %v2111_v55, %v1985_v0  ;;  %v2000_v52 = vmul.f32 %v4091_v46, %v4091_v46  ;;  %v2002_v0 = vmul.f32 %v4093_v34, %v4093_v34 }
 0x2e7   : > { %v1859_v4 = vadd.f32 %v1858_v37, %v4084_v44  ;;  %v2113_v14 = vadd.f32 %v2112_v43, %v1986_v48  ;;  %v2001_v44 = vmul.f32 %v4092_v38, %v4092_v38  ;;  %v2003_v48 = vmul.f32 %v4094_v26, %v4094_v26 }
 0x2e9   : > { %v1860_v39 = vadd.f32 %v1859_v4, %v4085_v40  ;;  %v2114_v51 = vadd.f32 %v2113_v14, %v1987_v59  ;;  %v4100_v40 = vld [vmem:[#allocation75_spill] sm:$0xff]  ;;  %v4101_v59 = vld [vmem:[#allocation77_spill] sm:$0xff] }
 0x2eb   : > { %v1861_v36 = vadd.f32 %v1860_v39, %v4086_v49  ;;  %v2115_v7 = vadd.f32 %v2114_v51, %v1988_v56  ;;  %v2004_v49 = vmul.f32 %v4095_v22, %v4095_v22  ;;  %v2006_v56 = vmul.f32 %v4097_v6, %v4097_v6 }
 0x2ec   : > { %v2008_v51 = vmul.f32 %v4099_v10, %v4099_v10 }
 0x2ed   : > { %v1862_v61 = vadd.f32 %v1861_v36, %v4087_v24  ;;  %v2116_v8 = vadd.f32 %v2115_v7, %v1989_v2  ;;  %v2005_v24 = vmul.f32 %v4096_v12, %v4096_v12 }
 0x2ef   : > { %v1863_v1 = vadd.f32 %v1862_v61, %v4088_v3  ;;  %v2117_v5 = vadd.f32 %v2116_v8, %v1990_v13  ;;  %v2009_v13 = vmul.f32 %v4100_v40, %v4100_v40 }
 0x2f1   : > { %v1864_v62 = vadd.f32 %v1863_v1, %v4089_v54  ;;  %v2118_v20 = vadd.f32 %v2117_v5, %v1991_v23  ;;  %v2007_v1 = vmul.f32 %v4098_v58, %v4098_v58 }
 0x2f3   : > { %v1865_v57 = vadd.f32 %v1864_v62, %v4090_v50  ;;  %v2119_v29 = vadd.f32 %v2118_v20, %v1992_v35  ;;  %v2010_v50 = vmul.f32 %v4101_v59, %v4101_v59 }
 0x2f5   : > { %v1866_v53 = vadd.f32 %v1865_v57, %v4091_v46  ;;  %v2120_v21 = vadd.f32 %v2119_v29, %v1993_v47 }
 0x2f7   : > { %v1867_v15 = vadd.f32 %v1866_v53, %v4092_v38  ;;  %v2121_v16 = vadd.f32 %v2120_v21, %v1994_v63  ;;  %v2144_v63 = vld [vmem:[%s3797_s3] sm:$0x3] }
 0x2f9   : > { %v1868_v11 = vadd.f32 %v1867_v15, %v4093_v34  ;;  %v2122_v27 = vadd.f32 %v2121_v16, %v1995_v17 }
 0x2fb   : > { %v1869_v19 = vadd.f32 %v1868_v11, %v4094_v26  ;;  %v2123_v33 = vadd.f32 %v2122_v27, %v1996_v41 }
 0x2fd   : > { %v1870_v28 = vadd.f32 %v1869_v19, %v4095_v22  ;;  %v2124_v31 = vadd.f32 %v2123_v33, %v1997_v9 }
 0x2ff   : > { %v1871_v25 = vadd.f32 %v1870_v28, %v4096_v12  ;;  %v2125_v37 = vadd.f32 %v2124_v31, %v1998_v18 }
 0x301   : > { %v1872_v30 = vadd.f32 %v1871_v25, %v4097_v6  ;;  %v2126_v4 = vadd.f32 %v2125_v37, %v1999_v42 }
 0x303   : > { %v1873_v60 = vadd.f32 %v1872_v30, %v4098_v58  ;;  %v2127_v45 = vadd.f32 %v2126_v4, %v2000_v52 }
 0x305   : > { %v1874_v32 = vadd.f32 %v1873_v60, %v4099_v10  ;;  %v2128_v55 = vadd.f32 %v2127_v45, %v2001_v44 }
 0x307   : > { %v1875_v39 = vadd.f32 %v1874_v32, %v4100_v40  ;;  %v2129_v36 = vadd.f32 %v2128_v55, %v2002_v0 }
 0x309   : > { %v1876_v43 = vadd.f32 %v1875_v39, %v4101_v59  ;;  %v2130_v61 = vadd.f32 %v2129_v36, %v2003_v48 }
 0x30b   : > { %v2131_v14 = vadd.f32 %v2130_v61, %v2004_v49  ;;  %v1877_v3 = vrot.slane %v1876_v43, 4 }
 0x30d   : > { %v2132_v2 = vadd.f32 %v2131_v14, %v2005_v24  ;;  %v1878_v62 = vadd.f32 %v1877_v3, %v1876_v43 }
 0x30f   : > { %v2133_v54 = vadd.f32 %v2132_v2, %v2006_v56  ;;  %v1879_v23 = vrot.slane %v1878_v62, 2 }
 0x311   : > { %v2134_v7 = vadd.f32 %v2133_v54, %v2007_v1  ;;  %v1880_v53 = vadd.f32 %v1879_v23, %v1878_v62 }
 0x313   : > { %v2135_v57 = vadd.f32 %v2134_v7, %v2008_v51  ;;  %v1881_v38 = vrot.slane %v1880_v53, 1 }
 0x315   : > { %v2136_v8 = vadd.f32 %v2135_v57, %v2009_v13  ;;  %v1882_v20 = vadd.f32 %v1881_v38, %v1880_v53 }
 0x317   : > { %v2137_v46 = vadd.f32 %v2136_v8, %v2010_v50 }
 0x319   : > { %v2138_v35 = vrot.slane %v2137_v46, 4 }
 0x31b   : > { %v2139_v5 = vadd.f32 %v2138_v35, %v2137_v46 }
 0x31d   : > { %v2140_v15 = vrot.slane %v2139_v5, 2 }
 0x31f   : > { %v2141_v47 = vadd.f32 %v2140_v15, %v2139_v5 }
 0x321   : > { %v2142_v34 = vrot.slane %v2141_v47, 1 }
 0x323   : > { %v2143_v11 = vadd.f32 %v2142_v34, %v2141_v47 }
 0x325   : > { %v2146_v29 = vsel %vm2145_vm0, %v1882_v20, %v2143_v11 }
 0x326   : > { %v2147_v26 = vadd.f32 %v2146_v29, %v2144_v63 }
 0x328   : > { %2148 = vst [vmem:[%s3797_s3] sm:$0x3] %v2147_v26 }
 0x329 PF: > { %s14_s12 = sadd.s32 1, %s2625_s12  }
 0x32a   : > { %p11_p5 = scmp.ge.s32.totalorder %s14_s12, 4  }
 0x32c   :  { %13 = sbr.rel (!%p11_p5) target bundleno = 1 (0x1), region = 70 }

// kernel: generator_forward.16
= control target key start
LH: loop header
LB: loop body
LE: loop exit
PB: predicated region body
PF: predicated region fallthrough
CT: control target
= control target key end

     0   :  { %s2050_s9 = smov 0   ;;  %s2543_s0 = inlined_call_operand.vmem [shape: f32[2048,128], index: 0, kind: input, shape index: {}]   ;;  %s2544_s1 = inlined_call_operand.vmem [shape: f32[2,128], index: 1, kind: input, shape index: {}]   ;;  %s2545_s2 = inlined_call_operand.vmem [shape: bf16[2048,128], index: 2, kind: output, shape index: {}]  }
   0x1 LB: > { %s1365_s10 = sadd.s32 4294967295, %s2033_s9   ;;  %p1369_p0 = scmp.ge.s32.totalorder %s2033_s9, 1  ;;  %s2033_s9 = sphi %s2050_s9, %s12_s9  }
   0x2   : > { %p113_p1 = scmp.lt.s32.totalorder %s2033_s9, 3 }
   0x4   : > { %p114_p2 = pnand %p1369_p0, %p113_p1 }
   0x5   : > { %s1370_s11 = sshll.u32 (!%p114_p2), %s1365_s10, 7 }
   0x6   : > { %117 = sbr.rel (%p114_p2) target bundleno = 133 (0x85), region = 28  ;;  %p136_p3 = scmp.lt.s32.totalorder (!%p114_p2), %s1370_s11, 255 }
   0xb   : > { %s2547_s11 = smov (!%p136_p3, %s1370_s11), 255  ;;  %v2064_v0 = vld [vmem:[%s2544_s1] ss:$0 sm:$0xff]  ;;  %v2074_v1 = vld [vmem:[%s2544_s1 + $0x1] ss:$0 sm:$0xff] }
   0xc   : > { %s1371_s12 = sshll.u32 %s2547_s11, 3  ;;  %s1373_s20 = sshll.u32 %s2547_s11, 2 }
   0xd   : > { %s2069_s17 = scalar_lea.vmem %s2543_s0, %s1371_s12  ;;  %s2106_s23 = scalar_lea.vmem %s2545_s2, %s1373_s20 }
   0xe   : > { %v149_v2 = vld [vmem:[%s2069_s17] sm:$0xff]  ;;  %v150_v3 = vld [vmem:[%s2069_s17 + $0x8] sm:$0xff]  ;;  %v151_v4 = vld [vmem:[%s2069_s17 + $0x10] sm:$0xff] }
   0xf   : > { %v281_v5 = vmul.f32 %v2064_v0, %v149_v2  ;;  %v282_v6 = vmul.f32 %v2064_v0, %v150_v3  ;;  %v152_v7 = vld [vmem:[%s2069_s17 + $0x18] sm:$0xff]  ;;  %v283_v8 = vmul.f32 %v2064_v0, %v151_v4  ;;  %v153_v9 = vld [vmem:[%s2069_s17 + $0x20] sm:$0xff]  ;;  %v154_v10 = vld [vmem:[%s2069_s17 + $0x28] sm:$0xff] }
  0x10   : > { %v284_v11 = vmul.f32 %v2064_v0, %v152_v7  ;;  %v285_v12 = vmul.f32 %v2064_v0, %v153_v9  ;;  %v286_v13 = vmul.f32 %v2064_v0, %v154_v10  ;;  %v155_v14 = vld [vmem:[%s2069_s17 + $0x30] sm:$0xff]  ;;  %v156_v15 = vld [vmem:[%s2069_s17 + $0x38] sm:$0xff]  ;;  %v157_v24 = vld [vmem:[%s2069_s17 + $0x40] sm:$0xff] }
  0x11   : > { %v413_v16 = vadd.f32 %v2074_v1, %v281_v5  ;;  %v414_v17 = vadd.f32 %v2074_v1, %v282_v6  ;;  %v415_v18 = vadd.f32 %v2074_v1, %v283_v8  ;;  %v287_v19 = vmul.f32 %v2064_v0, %v155_v14  ;;  %v158_v25 = vld [vmem:[%s2069_s17 + $0x48] sm:$0xff]  ;;  %v159_v30 = vld [vmem:[%s2069_s17 + $0x50] sm:$0xff]  ;;  %v160_v35 = vld [vmem:[%s2069_s17 + $0x58] sm:$0xff] }
  0x12   : > { %v416_v20 = vadd.f32 %v2074_v1, %v284_v11  ;;  %v417_v21 = vadd.f32 %v2074_v1, %v285_v12  ;;  %v418_v22 = vadd.f32 %v2074_v1, %v286_v13  ;;  %v288_v23 = vmul.f32 %v2064_v0, %v156_v15  ;;  %v161_v36 = vld [vmem:[%s2069_s17 + $0x60] sm:$0xff]  ;;  %v162_v41 = vld [vmem:[%s2069_s17 + $0x68] sm:$0xff]  ;;  %v163_v42 = vld [vmem:[%s2069_s17 + $0x70] sm:$0xff] }
  0x13   : > { %v541_v26 = vmax.f32 %v413_v16, 0.0  ;;  %v542_v27 = vmax.f32 %v414_v17, 0.0  ;;  %v543_v28 = vmax.f32 %v415_v18, 0.0  ;;  %v419_v29 = vadd.f32 %v2074_v1, %v287_v19  ;;  %v164_v51 = vld [vmem:[%s2069_s17 + $0x78] sm:$0xff]  ;;  %v165_v56 = vld [vmem:[%s2069_s17 + $0x80] sm:$0xff]  ;;  %v166_v61 = vld [vmem:[%s2069_s17 + $0x88] sm:$0xff] }
  0x14   : > { %v544_v31 = vmax.f32 %v416_v20, 0.0  ;;  %v545_v32 = vmax.f32 %v417_v21, 0.0  ;;  %v546_v33 = vmax.f32 %v418_v22, 0.0  ;;  %v420_v34 = vadd.f32 %v2074_v1, %v288_v23  ;;  %v167_v4 = vld [vmem:[%s2069_s17 + $0x90] sm:$0xff]  ;;  %v168_v5 = vld [vmem:[%s2069_s17 + $0x98] sm:$0xff]  ;;  %v169_v10 = vld [vmem:[%s2069_s17 + $0xa0] sm:$0xff] }
  0x15   : > { %v1637_v37 = vpack.c.bf16 %v542_v27, %v541_v26  ;;  %v547_v38 = vmax.f32 %v419_v29, 0.0  ;;  %v289_v39 = vmul.f32 %v2064_v0, %v157_v24  ;;  %v290_v40 = vmul.f32 %v2064_v0, %v158_v25  ;;  %v170_v15 = vld [vmem:[%s2069_s17 + $0xa8] sm:$0xff]  ;;  %v171_v20 = vld [vmem:[%s2069_s17 + $0xb0] sm:$0xff]  ;;  %v172_v25 = vld [vmem:[%s2069_s17 + $0xb8] sm:$0xff] }
  0x16   : > { %v1642_v43 = vpack.c.bf16 %v544_v31, %v543_v28  ;;  %v1647_v44 = vpack.c.bf16 %v546_v33, %v545_v32  ;;  %v548_v45 = vmax.f32 %v420_v34, 0.0  ;;  %v291_v46 = vmul.f32 %v2064_v0, %v159_v30  ;;  %v173_v30 = vld [vmem:[%s2069_s17 + $0xc0] sm:$0xff] }
  0x17   : > { %1638 = vst [vmem:[%s2106_s23] sm:$0xff] %v1637_v37   ;;  %v421_v47 = vadd.f32 %v2074_v1, %v289_v39  ;;  %v422_v48 = vadd.f32 %v2074_v1, %v290_v40  ;;  %v292_v49 = vmul.f32 %v2064_v0, %v160_v35  ;;  %v293_v50 = vmul.f32 %v2064_v0, %v161_v36  ;;  %v174_v35 = vld [vmem:[%s2069_s17 + $0xc8] sm:$0xff]  ;;  %v175_v40 = vld [vmem:[%s2069_s17 + $0xd0] sm:$0xff] }
  0x18   : > { %1954 = vst [vmem:[%s2106_s23 + $0x8] sm:$0xff] %v1642_v43   ;;  %1955 = vst [vmem:[%s2106_s23 + $0x10] sm:$0xff] %v1647_v44   ;;  %v1652_v52 = vpack.c.bf16 %v548_v45, %v547_v38  ;;  %v423_v53 = vadd.f32 %v2074_v1, %v291_v46  ;;  %v294_v54 = vmul.f32 %v2064_v0, %v162_v41  ;;  %v176_v41 = vld [vmem:[%s2069_s17 + $0xd8] sm:$0xff]  ;;  %v177_v46 = vld [vmem:[%s2069_s17 + $0xe0] sm:$0xff] }
  0x19   : > { %v295_v55 = vmul.f32 %v2064_v0, %v163_v42  ;;  %v549_v57 = vmax.f32 %v421_v47, 0.0  ;;  %v550_v58 = vmax.f32 %v422_v48, 0.0  ;;  %v424_v59 = vadd.f32 %v2074_v1, %v292_v49 }
  0x1a   : > { %v425_v60 = vadd.f32 %v2074_v1, %v293_v50  ;;  %1956 = vst [vmem:[%s2106_s23 + $0x18] sm:$0xff] %v1652_v52   ;;  %v551_v62 = vmax.f32 %v423_v53, 0.0  ;;  %v426_v63 = vadd.f32 %v2074_v1, %v294_v54  ;;  %v296_v2 = vmul.f32 %v2064_v0, %v164_v51  ;;  %v178_v51 = vld [vmem:[%s2069_s17 + $0xe8] sm:$0xff] }
  0x1b   : > { %v427_v3 = vadd.f32 %v2074_v1, %v295_v55  ;;  %v1657_v6 = vpack.c.bf16 %v550_v58, %v549_v57  ;;  %v552_v7 = vmax.f32 %v424_v59, 0.0  ;;  %v297_v9 = vmul.f32 %v2064_v0, %v165_v56  ;;  %v179_v56 = vld [vmem:[%s2069_s17 + $0xf0] sm:$0xff] }
  0x1c   : > { %v553_v8 = vmax.f32 %v425_v60, 0.0  ;;  %v554_v11 = vmax.f32 %v426_v63, 0.0  ;;  %v428_v12 = vadd.f32 %v2074_v1, %v296_v2  ;;  %v298_v14 = vmul.f32 %v2064_v0, %v166_v61  ;;  %v180_v61 = vld [vmem:[%s2069_s17 + $0xf8] sm:$0xff] }
  0x1d   : > { %v555_v13 = vmax.f32 %v427_v3, 0.0  ;;  %1957 = vst [vmem:[%s2106_s23 + $0x20] sm:$0xff] %v1657_v6   ;;  %v1662_v16 = vpack.c.bf16 %v552_v7, %v551_v62  ;;  %v429_v17 = vadd.f32 %v2074_v1, %v297_v9  ;;  %v299_v18 = vmul.f32 %v2064_v0, %v167_v4  ;;  %v181_v4 = vld [vmem:[%s2069_s17 + $0x100] sm:$0xff]  ;;  %v182_v9 = vld [vmem:[%s2069_s17 + $0x108] sm:$0xff] }
  0x1e   : > { %v300_v19 = vmul.f32 %v2064_v0, %v168_v5  ;;  %v1667_v21 = vpack.c.bf16 %v554_v11, %v553_v8  ;;  %v556_v22 = vmax.f32 %v428_v12, 0.0  ;;  %v430_v23 = vadd.f32 %v2074_v1, %v298_v14  ;;  %v183_v14 = vld [vmem:[%s2069_s17 + $0x110] sm:$0xff] }
  0x1f   : > { %v301_v24 = vmul.f32 %v2064_v0, %v169_v10  ;;  %1958 = vst [vmem:[%s2106_s23 + $0x28] sm:$0xff] %v1662_v16   ;;  %v557_v26 = vmax.f32 %v429_v17, 0.0  ;;  %v431_v27 = vadd.f32 %v2074_v1, %v299_v18  ;;  %v302_v29 = vmul.f32 %v2064_v0, %v170_v15  ;;  %v184_v15 = vld [vmem:[%s2069_s17 + $0x118] sm:$0xff] }
  0x20   : > { %v432_v28 = vadd.f32 %v2074_v1, %v300_v19  ;;  %1959 = vst [vmem:[%s2106_s23 + $0x30] sm:$0xff] %v1667_v21   ;;  %v1672_v31 = vpack.c.bf16 %v556_v22, %v555_v13  ;;  %v558_v32 = vmax.f32 %v430_v23, 0.0  ;;  %v303_v34 = vmul.f32 %v2064_v0, %v171_v20  ;;  %v185_v20 = vld [vmem:[%s2069_s17 + $0x120] sm:$0xff] }
  0x21   : > { %v433_v33 = vadd.f32 %v2074_v1, %v301_v24  ;;  %v559_v36 = vmax.f32 %v431_v27, 0.0  ;;  %v434_v38 = vadd.f32 %v2074_v1, %v302_v29  ;;  %v304_v39 = vmul.f32 %v2064_v0, %v172_v25  ;;  %v186_v25 = vld [vmem:[%s2069_s17 + $0x128] sm:$0xff] }
  0x22   : > { %v560_v37 = vmax.f32 %v432_v28, 0.0  ;;  %1960 = vst [vmem:[%s2106_s23 + $0x38] sm:$0xff] %v1672_v31   ;;  %v1677_v42 = vpack.c.bf16 %v558_v32, %v557_v26  ;;  %v435_v44 = vadd.f32 %v2074_v1, %v303_v34  ;;  %v305_v45 = vmul.f32 %v2064_v0, %v173_v30  ;;  %v187_v30 = vld [vmem:[%s2069_s17 + $0x130] sm:$0xff] }
  0x23   : > { %v561_v43 = vmax.f32 %v433_v33, 0.0  ;;  %v562_v48 = vmax.f32 %v434_v38, 0.0  ;;  %v436_v49 = vadd.f32 %v2074_v1, %v304_v39  ;;  %v306_v50 = vmul.f32 %v2064_v0, %v174_v35  ;;  %v188_v35 = vld [vmem:[%s2069_s17 + $0x138] sm:$0xff] }
  0x24   : > { %v1682_v47 = vpack.c.bf16 %v560_v37, %v559_v36  ;;  %1961 = vst [vmem:[%s2106_s23 + $0x40] sm:$0xff] %v1677_v42   ;;  %v563_v52 = vmax.f32 %v435_v44, 0.0  ;;  %v437_v53 = vadd.f32 %v2074_v1, %v305_v45  ;;  %v307_v54 = vmul.f32 %v2064_v0, %v175_v40  ;;  %v189_v40 = vld [vmem:[%s2069_s17 + $0x140] sm:$0xff]  ;;  %v190_v45 = vld [vmem:[%s2069_s17 + $0x148] sm:$0xff] }
  0x25   : > { %v308_v55 = vmul.f32 %v2064_v0, %v176_v41  ;;  %v1687_v57 = vpack.c.bf16 %v562_v48, %v561_v43  ;;  %v564_v58 = vmax.f32 %v436_v49, 0.0  ;;  %v438_v59 = vadd.f32 %v2074_v1, %v306_v50  ;;  %v191_v50 = vld [vmem:[%s2069_s17 + $0x150] sm:$0xff] }
  0x26   : > { %1962 = vst [vmem:[%s2106_s23 + $0x48] sm:$0xff] %v1682_v47   ;;  %v309_v60 = vmul.f32 %v2064_v0, %v177_v46  ;;  %v565_v62 = vmax.f32 %v437_v53, 0.0  ;;  %v439_v63 = vadd.f32 %v2074_v1, %v307_v54  ;;  %v310_v3 = vmul.f32 %v2064_v0, %v178_v51  ;;  %v192_v51 = vld [vmem:[%s2069_s17 + $0x158] sm:$0xff] }
  0x27   : > { %v440_v2 = vadd.f32 %v2074_v1, %v308_v55  ;;  %1963 = vst [vmem:[%s2106_s23 + $0x50] sm:$0xff] %v1687_v57   ;;  %v1692_v5 = vpack.c.bf16 %v564_v58, %v563_v52  ;;  %v566_v6 = vmax.f32 %v438_v59, 0.0  ;;  %v311_v8 = vmul.f32 %v2064_v0, %v179_v56  ;;  %v193_v56 = vld [vmem:[%s2069_s17 + $0x160] sm:$0xff] }
  0x28   : > { %v441_v7 = vadd.f32 %v2074_v1, %v309_v60  ;;  %v567_v10 = vmax.f32 %v439_v63, 0.0  ;;  %v442_v12 = vadd.f32 %v2074_v1, %v310_v3  ;;  %v312_v13 = vmul.f32 %v2064_v0, %v180_v61  ;;  %v194_v61 = vld [vmem:[%s2069_s17 + $0x168] sm:$0xff] }
  0x29   : > { %v568_v11 = vmax.f32 %v440_v2, 0.0  ;;  %1964 = vst [vmem:[%s2106_s23 + $0x58] sm:$0xff] %v1692_v5   ;;  %v1697_v16 = vpack.c.bf16 %v566_v6, %v565_v62  ;;  %v443_v18 = vadd.f32 %v2074_v1, %v311_v8  ;;  %v313_v19 = vmul.f32 %v2064_v0, %v181_v4  ;;  %v195_v4 = vld [vmem:[%s2069_s17 + $0x170] sm:$0xff] }
  0x2a   : > { %v569_v17 = vmax.f32 %v441_v7, 0.0  ;;  %v570_v22 = vmax.f32 %v442_v12, 0.0  ;;  %v444_v23 = vadd.f32 %v2074_v1, %v312_v13  ;;  %v314_v24 = vmul.f32 %v2064_v0, %v182_v9  ;;  %v196_v9 = vld [vmem:[%s2069_s17 + $0x178] sm:$0xff] }
  0x2b   : > { %v1702_v21 = vpack.c.bf16 %v568_v11, %v567_v10  ;;  %1965 = vst [vmem:[%s2106_s23 + $0x60] sm:$0xff] %v1697_v16   ;;  %v571_v26 = vmax.f32 %v443_v18, 0.0  ;;  %v445_v27 = vadd.f32 %v2074_v1, %v313_v19  ;;  %v315_v28 = vmul.f32 %v2064_v0, %v183_v14  ;;  %v197_v14 = vld [vmem:[%s2069_s17 + $0x180] sm:$0xff]  ;;  %v198_v19 = vld [vmem:[%s2069_s17 + $0x188] sm:$0xff] }
  0x2c   : > { %v316_v29 = vmul.f32 %v2064_v0, %v184_v15  ;;  %v1707_v31 = vpack.c.bf16 %v570_v22, %v569_v17  ;;  %v572_v32 = vmax.f32 %v444_v23, 0.0  ;;  %v446_v33 = vadd.f32 %v2074_v1, %v314_v24  ;;  %v199_v24 = vld [vmem:[%s2069_s17 + $0x190] sm:$0xff] }
  0x2d   : > { %1966 = vst [vmem:[%s2106_s23 + $0x68] sm:$0xff] %v1702_v21   ;;  %v317_v34 = vmul.f32 %v2064_v0, %v185_v20  ;;  %v573_v36 = vmax.f32 %v445_v27, 0.0  ;;  %v447_v37 = vadd.f32 %v2074_v1, %v315_v28  ;;  %v318_v39 = vmul.f32 %v2064_v0, %v186_v25  ;;  %v200_v25 = vld [vmem:[%s2069_s17 + $0x198] sm:$0xff] }
  0x2e   : > { %v448_v38 = vadd.f32 %v2074_v1, %v316_v29  ;;  %1967 = vst [vmem:[%s2106_s23 + $0x70] sm:$0xff] %v1707_v31   ;;  %v1712_v41 = vpack.c.bf16 %v572_v32, %v571_v26  ;;  %v574_v42 = vmax.f32 %v446_v33, 0.0  ;;  %v319_v44 = vmul.f32 %v2064_v0, %v187_v30  ;;  %v201_v30 = vld [vmem:[%s2069_s17 + $0x1a0] sm:$0xff] }
  0x2f   : > { %v449_v43 = vadd.f32 %v2074_v1, %v317_v34  ;;  %v575_v46 = vmax.f32 %v447_v37, 0.0  ;;  %v450_v48 = vadd.f32 %v2074_v1, %v318_v39  ;;  %v320_v49 = vmul.f32 %v2064_v0, %v188_v35  ;;  %v202_v35 = vld [vmem:[%s2069_s17 + $0x1a8] sm:$0xff] }
  0x30   : > { %v576_v47 = vmax.f32 %v448_v38, 0.0  ;;  %1968 = vst [vmem:[%s2106_s23 + $0x78] sm:$0xff] %v1712_v41   ;;  %v1717_v52 = vpack.c.bf16 %v574_v42, %v573_v36  ;;  %v451_v54 = vadd.f32 %v2074_v1, %v319_v44  ;;  %v321_v55 = vmul.f32 %v2064_v0, %v189_v40  ;;  %v203_v40 = vld [vmem:[%s2069_s17 + $0x1b0] sm:$0xff] }
  0x31   : > { %v577_v53 = vmax.f32 %v449_v43, 0.0  ;;  %v578_v58 = vmax.f32 %v450_v48, 0.0  ;;  %v452_v59 = vadd.f32 %v2074_v1, %v320_v49  ;;  %v322_v60 = vmul.f32 %v2064_v0, %v190_v45  ;;  %v204_v45 = vld [vmem:[%s2069_s17 + $0x1b8] sm:$0xff] }
  0x32   : > { %v1722_v57 = vpack.c.bf16 %v576_v47, %v575_v46  ;;  %1969 = vst [vmem:[%s2106_s23 + $0x80] sm:$0xff] %v1717_v52   ;;  %v579_v62 = vmax.f32 %v451_v54, 0.0  ;;  %v453_v63 = vadd.f32 %v2074_v1, %v321_v55  ;;  %v323_v2 = vmul.f32 %v2064_v0, %v191_v50  ;;  %v205_v50 = vld [vmem:[%s2069_s17 + $0x1c0] sm:$0xff]  ;;  %v206_v55 = vld [vmem:[%s2069_s17 + $0x1c8] sm:$0xff] }
  0x33   : > { %v324_v3 = vmul.f32 %v2064_v0, %v192_v51  ;;  %v1727_v5 = vpack.c.bf16 %v578_v58, %v577_v53  ;;  %v580_v6 = vmax.f32 %v452_v59, 0.0  ;;  %v454_v7 = vadd.f32 %v2074_v1, %v322_v60  ;;  %v207_v60 = vld [vmem:[%s2069_s17 + $0x1d0] sm:$0xff] }
  0x34   : > { %1970 = vst [vmem:[%s2106_s23 + $0x88] sm:$0xff] %v1722_v57   ;;  %v325_v8 = vmul.f32 %v2064_v0, %v193_v56  ;;  %v581_v10 = vmax.f32 %v453_v63, 0.0  ;;  %v455_v11 = vadd.f32 %v2074_v1, %v323_v2  ;;  %v326_v13 = vmul.f32 %v2064_v0, %v194_v61  ;;  %v208_v61 = vld [vmem:[%s2069_s17 + $0x1d8] sm:$0xff] }
  0x35   : > { %v456_v12 = vadd.f32 %v2074_v1, %v324_v3  ;;  %1971 = vst [vmem:[%s2106_s23 + $0x90] sm:$0xff] %v1727_v5   ;;  %v1732_v15 = vpack.c.bf16 %v580_v6, %v579_v62  ;;  %v582_v16 = vmax.f32 %v454_v7, 0.0  ;;  %v327_v18 = vmul.f32 %v2064_v0, %v195_v4  ;;  %v209_v4 = vld [vmem:[%s2069_s17 + $0x1e0] sm:$0xff] }
  0x36   : > { %v457_v17 = vadd.f32 %v2074_v1, %v325_v8  ;;  %v583_v20 = vmax.f32 %v455_v11, 0.0  ;;  %v458_v22 = vadd.f32 %v2074_v1, %v326_v13  ;;  %v328_v23 = vmul.f32 %v2064_v0, %v196_v9  ;;  %v210_v9 = vld [vmem:[%s2069_s17 + $0x1e8] sm:$0xff] }
  0x37   : > { %v584_v21 = vmax.f32 %v456_v12, 0.0  ;;  %1972 = vst [vmem:[%s2106_s23 + $0x98] sm:$0xff] %v1732_v15   ;;  %v1737_v26 = vpack.c.bf16 %v582_v16, %v581_v10  ;;  %v459_v28 = vadd.f32 %v2074_v1, %v327_v18  ;;  %v329_v29 = vmul.f32 %v2064_v0, %v197_v14  ;;  %v211_v14 = vld [vmem:[%s2069_s17 + $0x1f0] sm:$0xff] }
  0x38   : > { %v585_v27 = vmax.f32 %v457_v17, 0.0  ;;  %v586_v32 = vmax.f32 %v458_v22, 0.0  ;;  %v460_v33 = vadd.f32 %v2074_v1, %v328_v23  ;;  %v330_v34 = vmul.f32 %v2064_v0, %v198_v19  ;;  %v212_v19 = vld [vmem:[%s2069_s17 + $0x1f8] sm:$0xff] }
  0x39   : > { %v1742_v31 = vpack.c.bf16 %v584_v21, %v583_v20  ;;  %1973 = vst [vmem:[%s2106_s23 + $0xa0] sm:$0xff] %v1737_v26   ;;  %v587_v36 = vmax.f32 %v459_v28, 0.0  ;;  %v461_v37 = vadd.f32 %v2074_v1, %v329_v29  ;;  %v331_v38 = vmul.f32 %v2064_v0, %v199_v24  ;;  %v213_v24 = vld [vmem:[%s2069_s17 + $0x200] sm:$0xff]  ;;  %v214_v29 = vld [vmem:[%s2069_s17 + $0x208] sm:$0xff] }
  0x3a   : > { %v332_v39 = vmul.f32 %v2064_v0, %v200_v25  ;;  %v1747_v41 = vpack.c.bf16 %v586_v32, %v585_v27  ;;  %v588_v42 = vmax.f32 %v460_v33, 0.0  ;;  %v462_v43 = vadd.f32 %v2074_v1, %v330_v34  ;;  %v215_v34 = vld [vmem:[%s2069_s17 + $0x210] sm:$0xff] }
  0x3b   : > { %1974 = vst [vmem:[%s2106_s23 + $0xa8] sm:$0xff] %v1742_v31   ;;  %v333_v44 = vmul.f32 %v2064_v0, %v201_v30  ;;  %v589_v46 = vmax.f32 %v461_v37, 0.0  ;;  %v463_v47 = vadd.f32 %v2074_v1, %v331_v38  ;;  %v334_v49 = vmul.f32 %v2064_v0, %v202_v35  ;;  %v216_v35 = vld [vmem:[%s2069_s17 + $0x218] sm:$0xff] }
  0x3c   : > { %v464_v48 = vadd.f32 %v2074_v1, %v332_v39  ;;  %1975 = vst [vmem:[%s2106_s23 + $0xb0] sm:$0xff] %v1747_v41   ;;  %v1752_v51 = vpack.c.bf16 %v588_v42, %v587_v36  ;;  %v590_v52 = vmax.f32 %v462_v43, 0.0  ;;  %v335_v54 = vmul.f32 %v2064_v0, %v203_v40  ;;  %v217_v40 = vld [vmem:[%s2069_s17 + $0x220] sm:$0xff] }
  0x3d   : > { %v465_v53 = vadd.f32 %v2074_v1, %v333_v44  ;;  %v591_v56 = vmax.f32 %v463_v47, 0.0  ;;  %v466_v58 = vadd.f32 %v2074_v1, %v334_v49  ;;  %v336_v59 = vmul.f32 %v2064_v0, %v204_v45  ;;  %v218_v45 = vld [vmem:[%s2069_s17 + $0x228] sm:$0xff] }
  0x3e   : > { %v592_v57 = vmax.f32 %v464_v48, 0.0  ;;  %1976 = vst [vmem:[%s2106_s23 + $0xb8] sm:$0xff] %v1752_v51   ;;  %v1757_v62 = vpack.c.bf16 %v590_v52, %v589_v46  ;;  %v467_v2 = vadd.f32 %v2074_v1, %v335_v54  ;;  %v337_v3 = vmul.f32 %v2064_v0, %v205_v50  ;;  %v219_v50 = vld [vmem:[%s2069_s17 + $0x230] sm:$0xff] }
  0x3f   : > { %v593_v63 = vmax.f32 %v465_v53, 0.0  ;;  %v594_v6 = vmax.f32 %v466_v58, 0.0  ;;  %v468_v7 = vadd.f32 %v2074_v1, %v336_v59  ;;  %v338_v8 = vmul.f32 %v2064_v0, %v206_v55  ;;  %v220_v55 = vld [vmem:[%s2069_s17 + $0x238] sm:$0xff] }
  0x40   : > { %v1762_v5 = vpack.c.bf16 %v592_v57, %v591_v56  ;;  %1977 = vst [vmem:[%s2106_s23 + $0xc0] sm:$0xff] %v1757_v62   ;;  %v595_v10 = vmax.f32 %v467_v2, 0.0  ;;  %v469_v11 = vadd.f32 %v2074_v1, %v337_v3  ;;  %v339_v12 = vmul.f32 %v2064_v0, %v207_v60  ;;  %v221_v60 = vld [vmem:[%s2069_s17 + $0x240] sm:$0xff]  ;;  %v222_v3 = vld [vmem:[%s2069_s17 + $0x248] sm:$0xff] }
  0x41   : > { %v340_v13 = vmul.f32 %v2064_v0, %v208_v61  ;;  %v1767_v15 = vpack.c.bf16 %v594_v6, %v593_v63  ;;  %v596_v16 = vmax.f32 %v468_v7, 0.0  ;;  %v470_v17 = vadd.f32 %v2074_v1, %v338_v8  ;;  %v223_v8 = vld [vmem:[%s2069_s17 + $0x250] sm:$0xff] }
  0x42   : > { %1978 = vst [vmem:[%s2106_s23 + $0xc8] sm:$0xff] %v1762_v5   ;;  %v341_v18 = vmul.f32 %v2064_v0, %v209_v4  ;;  %v597_v20 = vmax.f32 %v469_v11, 0.0  ;;  %v471_v21 = vadd.f32 %v2074_v1, %v339_v12  ;;  %v342_v23 = vmul.f32 %v2064_v0, %v210_v9  ;;  %v224_v9 = vld [vmem:[%s2069_s17 + $0x258] sm:$0xff] }
  0x43   : > { %v472_v22 = vadd.f32 %v2074_v1, %v340_v13  ;;  %1979 = vst [vmem:[%s2106_s23 + $0xd0] sm:$0xff] %v1767_v15   ;;  %v1772_v25 = vpack.c.bf16 %v596_v16, %v595_v10  ;;  %v598_v26 = vmax.f32 %v470_v17, 0.0  ;;  %v343_v28 = vmul.f32 %v2064_v0, %v211_v14  ;;  %v225_v14 = vld [vmem:[%s2069_s17 + $0x260] sm:$0xff] }
  0x44   : > { %v473_v27 = vadd.f32 %v2074_v1, %v341_v18  ;;  %v599_v30 = vmax.f32 %v471_v21, 0.0  ;;  %v474_v32 = vadd.f32 %v2074_v1, %v342_v23  ;;  %v344_v33 = vmul.f32 %v2064_v0, %v212_v19  ;;  %v226_v19 = vld [vmem:[%s2069_s17 + $0x268] sm:$0xff] }
  0x45   : > { %v600_v31 = vmax.f32 %v472_v22, 0.0  ;;  %1980 = vst [vmem:[%s2106_s23 + $0xd8] sm:$0xff] %v1772_v25   ;;  %v1777_v36 = vpack.c.bf16 %v598_v26, %v597_v20  ;;  %v475_v38 = vadd.f32 %v2074_v1, %v343_v28  ;;  %v345_v39 = vmul.f32 %v2064_v0, %v213_v24  ;;  %v227_v24 = vld [vmem:[%s2069_s17 + $0x270] sm:$0xff] }
  0x46   : > { %v601_v37 = vmax.f32 %v473_v27, 0.0  ;;  %v602_v42 = vmax.f32 %v474_v32, 0.0  ;;  %v476_v43 = vadd.f32 %v2074_v1, %v344_v33  ;;  %v346_v44 = vmul.f32 %v2064_v0, %v214_v29  ;;  %v228_v29 = vld [vmem:[%s2069_s17 + $0x278] sm:$0xff] }
  0x47   : > { %v1782_v41 = vpack.c.bf16 %v600_v31, %v599_v30  ;;  %1981 = vst [vmem:[%s2106_s23 + $0xe0] sm:$0xff] %v1777_v36   ;;  %v603_v46 = vmax.f32 %v475_v38, 0.0  ;;  %v477_v47 = vadd.f32 %v2074_v1, %v345_v39  ;;  %v347_v48 = vmul.f32 %v2064_v0, %v215_v34  ;;  %v229_v34 = vld [vmem:[%s2069_s17 + $0x280] sm:$0xff]  ;;  %v230_v39 = vld [vmem:[%s2069_s17 + $0x288] sm:$0xff] }
  0x48   : > { %v348_v49 = vmul.f32 %v2064_v0, %v216_v35  ;;  %v1787_v51 = vpack.c.bf16 %v602_v42, %v601_v37  ;;  %v604_v52 = vmax.f32 %v476_v43, 0.0  ;;  %v478_v53 = vadd.f32 %v2074_v1, %v346_v44  ;;  %v231_v44 = vld [vmem:[%s2069_s17 + $0x290] sm:$0xff] }
  0x49   : > { %1982 = vst [vmem:[%s2106_s23 + $0xe8] sm:$0xff] %v1782_v41   ;;  %v349_v54 = vmul.f32 %v2064_v0, %v217_v40  ;;  %v605_v56 = vmax.f32 %v477_v47, 0.0  ;;  %v479_v57 = vadd.f32 %v2074_v1, %v347_v48  ;;  %v350_v59 = vmul.f32 %v2064_v0, %v218_v45  ;;  %v232_v45 = vld [vmem:[%s2069_s17 + $0x298] sm:$0xff] }
  0x4a   : > { %v480_v58 = vadd.f32 %v2074_v1, %v348_v49  ;;  %1983 = vst [vmem:[%s2106_s23 + $0xf0] sm:$0xff] %v1787_v51   ;;  %v1792_v61 = vpack.c.bf16 %v604_v52, %v603_v46  ;;  %v606_v62 = vmax.f32 %v478_v53, 0.0  ;;  %v351_v2 = vmul.f32 %v2064_v0, %v219_v50  ;;  %v233_v50 = vld [vmem:[%s2069_s17 + $0x2a0] sm:$0xff] }
  0x4b   : > { %v481_v63 = vadd.f32 %v2074_v1, %v349_v54  ;;  %v607_v4 = vmax.f32 %v479_v57, 0.0  ;;  %v482_v6 = vadd.f32 %v2074_v1, %v350_v59  ;;  %v352_v7 = vmul.f32 %v2064_v0, %v220_v55  ;;  %v234_v55 = vld [vmem:[%s2069_s17 + $0x2a8] sm:$0xff] }
  0x4c   : > { %v608_v5 = vmax.f32 %v480_v58, 0.0  ;;  %1984 = vst [vmem:[%s2106_s23 + $0xf8] sm:$0xff] %v1792_v61   ;;  %v1797_v10 = vpack.c.bf16 %v606_v62, %v605_v56  ;;  %v483_v12 = vadd.f32 %v2074_v1, %v351_v2  ;;  %v353_v13 = vmul.f32 %v2064_v0, %v221_v60  ;;  %v235_v60 = vld [vmem:[%s2069_s17 + $0x2b0] sm:$0xff] }
  0x4d   : > { %v609_v11 = vmax.f32 %v481_v63, 0.0  ;;  %v610_v16 = vmax.f32 %v482_v6, 0.0  ;;  %v484_v17 = vadd.f32 %v2074_v1, %v352_v7  ;;  %v354_v18 = vmul.f32 %v2064_v0, %v222_v3  ;;  %v236_v3 = vld [vmem:[%s2069_s17 + $0x2b8] sm:$0xff] }
  0x4e   : > { %v1802_v15 = vpack.c.bf16 %v608_v5, %v607_v4  ;;  %1985 = vst [vmem:[%s2106_s23 + $0x100] sm:$0xff] %v1797_v10   ;;  %v611_v20 = vmax.f32 %v483_v12, 0.0  ;;  %v485_v21 = vadd.f32 %v2074_v1, %v353_v13  ;;  %v355_v22 = vmul.f32 %v2064_v0, %v223_v8  ;;  %v237_v8 = vld [vmem:[%s2069_s17 + $0x2c0] sm:$0xff]  ;;  %v238_v13 = vld [vmem:[%s2069_s17 + $0x2c8] sm:$0xff] }
  0x4f   : > { %v356_v23 = vmul.f32 %v2064_v0, %v224_v9  ;;  %v1807_v25 = vpack.c.bf16 %v610_v16, %v609_v11  ;;  %v612_v26 = vmax.f32 %v484_v17, 0.0  ;;  %v486_v27 = vadd.f32 %v2074_v1, %v354_v18  ;;  %v239_v18 = vld [vmem:[%s2069_s17 + $0x2d0] sm:$0xff] }
  0x50   : > { %1986 = vst [vmem:[%s2106_s23 + $0x108] sm:$0xff] %v1802_v15   ;;  %v357_v28 = vmul.f32 %v2064_v0, %v225_v14  ;;  %v613_v30 = vmax.f32 %v485_v21, 0.0  ;;  %v487_v31 = vadd.f32 %v2074_v1, %v355_v22  ;;  %v358_v33 = vmul.f32 %v2064_v0, %v226_v19  ;;  %v240_v19 = vld [vmem:[%s2069_s17 + $0x2d8] sm:$0xff] }
  0x51   : > { %v488_v32 = vadd.f32 %v2074_v1, %v356_v23  ;;  %1987 = vst [vmem:[%s2106_s23 + $0x110] sm:$0xff] %v1807_v25   ;;  %v1812_v35 = vpack.c.bf16 %v612_v26, %v611_v20  ;;  %v614_v36 = vmax.f32 %v486_v27, 0.0  ;;  %v359_v38 = vmul.f32 %v2064_v0, %v227_v24  ;;  %v241_v24 = vld [vmem:[%s2069_s17 + $0x2e0] sm:$0xff] }
  0x52   : > { %v489_v37 = vadd.f32 %v2074_v1, %v357_v28  ;;  %v615_v40 = vmax.f32 %v487_v31, 0.0  ;;  %v490_v42 = vadd.f32 %v2074_v1, %v358_v33  ;;  %v360_v43 = vmul.f32 %v2064_v0, %v228_v29  ;;  %v242_v29 = vld [vmem:[%s2069_s17 + $0x2e8] sm:$0xff] }
  0x53   : > { %v616_v41 = vmax.f32 %v488_v32, 0.0  ;;  %1988 = vst [vmem:[%s2106_s23 + $0x118] sm:$0xff] %v1812_v35   ;;  %v1817_v46 = vpack.c.bf16 %v614_v36, %v613_v30  ;;  %v491_v48 = vadd.f32 %v2074_v1, %v359_v38  ;;  %v361_v49 = vmul.f32 %v2064_v0, %v229_v34  ;;  %v243_v34 = vld [vmem:[%s2069_s17 + $0x2f0] sm:$0xff] }
  0x54   : > { %v617_v47 = vmax.f32 %v489_v37, 0.0  ;;  %v618_v52 = vmax.f32 %v490_v42, 0.0  ;;  %v492_v53 = vadd.f32 %v2074_v1, %v360_v43  ;;  %v362_v54 = vmul.f32 %v2064_v0, %v230_v39  ;;  %v244_v39 = vld [vmem:[%s2069_s17 + $0x2f8] sm:$0xff] }
  0x55   : > { %v1822_v51 = vpack.c.bf16 %v616_v41, %v615_v40  ;;  %1989 = vst [vmem:[%s2106_s23 + $0x120] sm:$0xff] %v1817_v46   ;;  %v619_v56 = vmax.f32 %v491_v48, 0.0  ;;  %v493_v57 = vadd.f32 %v2074_v1, %v361_v49  ;;  %v363_v58 = vmul.f32 %v2064_v0, %v231_v44  ;;  %v245_v44 = vld [vmem:[%s2069_s17 + $0x300] sm:$0xff]  ;;  %v246_v49 = vld [vmem:[%s2069_s17 + $0x308] sm:$0xff] }
  0x56   : > { %v364_v59 = vmul.f32 %v2064_v0, %v232_v45  ;;  %v1827_v61 = vpack.c.bf16 %v618_v52, %v617_v47  ;;  %v620_v62 = vmax.f32 %v492_v53, 0.0  ;;  %v494_v63 = vadd.f32 %v2074_v1, %v362_v54  ;;  %v247_v54 = vld [vmem:[%s2069_s17 + $0x310] sm:$0xff] }
  0x57   : > { %1990 = vst [vmem:[%s2106_s23 + $0x128] sm:$0xff] %v1822_v51   ;;  %v365_v2 = vmul.f32 %v2064_v0, %v233_v50  ;;  %v621_v4 = vmax.f32 %v493_v57, 0.0  ;;  %v495_v5 = vadd.f32 %v2074_v1, %v363_v58  ;;  %v366_v7 = vmul.f32 %v2064_v0, %v234_v55  ;;  %v248_v55 = vld [vmem:[%s2069_s17 + $0x318] sm:$0xff] }
  0x58   : > { %v496_v6 = vadd.f32 %v2074_v1, %v364_v59  ;;  %1991 = vst [vmem:[%s2106_s23 + $0x130] sm:$0xff] %v1827_v61   ;;  %v1832_v9 = vpack.c.bf16 %v620_v62, %v619_v56  ;;  %v622_v10 = vmax.f32 %v494_v63, 0.0  ;;  %v367_v12 = vmul.f32 %v2064_v0, %v235_v60  ;;  %v249_v60 = vld [vmem:[%s2069_s17 + $0x320] sm:$0xff] }
  0x59   : > { %v497_v11 = vadd.f32 %v2074_v1, %v365_v2  ;;  %v623_v14 = vmax.f32 %v495_v5, 0.0  ;;  %v498_v16 = vadd.f32 %v2074_v1, %v366_v7  ;;  %v368_v17 = vmul.f32 %v2064_v0, %v236_v3  ;;  %v250_v3 = vld [vmem:[%s2069_s17 + $0x328] sm:$0xff] }
  0x5a   : > { %v624_v15 = vmax.f32 %v496_v6, 0.0  ;;  %1992 = vst [vmem:[%s2106_s23 + $0x138] sm:$0xff] %v1832_v9   ;;  %v1837_v20 = vpack.c.bf16 %v622_v10, %v621_v4  ;;  %v499_v22 = vadd.f32 %v2074_v1, %v367_v12  ;;  %v369_v23 = vmul.f32 %v2064_v0, %v237_v8  ;;  %v251_v8 = vld [vmem:[%s2069_s17 + $0x330] sm:$0xff] }
  0x5b   : > { %v625_v21 = vmax.f32 %v497_v11, 0.0  ;;  %v626_v26 = vmax.f32 %v498_v16, 0.0  ;;  %v500_v27 = vadd.f32 %v2074_v1, %v368_v17  ;;  %v370_v28 = vmul.f32 %v2064_v0, %v238_v13  ;;  %v252_v13 = vld [vmem:[%s2069_s17 + $0x338] sm:$0xff] }
  0x5c   : > { %v1842_v25 = vpack.c.bf16 %v624_v15, %v623_v14  ;;  %1993 = vst [vmem:[%s2106_s23 + $0x140] sm:$0xff] %v1837_v20   ;;  %v627_v30 = vmax.f32 %v499_v22, 0.0  ;;  %v501_v31 = vadd.f32 %v2074_v1, %v369_v23  ;;  %v371_v32 = vmul.f32 %v2064_v0, %v239_v18  ;;  %v253_v18 = vld [vmem:[%s2069_s17 + $0x340] sm:$0xff]  ;;  %v254_v23 = vld [vmem:[%s2069_s17 + $0x348] sm:$0xff] }
  0x5d   : > { %v372_v33 = vmul.f32 %v2064_v0, %v240_v19  ;;  %v1847_v35 = vpack.c.bf16 %v626_v26, %v625_v21  ;;  %v628_v36 = vmax.f32 %v500_v27, 0.0  ;;  %v502_v37 = vadd.f32 %v2074_v1, %v370_v28  ;;  %v255_v28 = vld [vmem:[%s2069_s17 + $0x350] sm:$0xff] }
  0x5e   : > { %1994 = vst [vmem:[%s2106_s23 + $0x148] sm:$0xff] %v1842_v25   ;;  %v373_v38 = vmul.f32 %v2064_v0, %v241_v24  ;;  %v629_v40 = vmax.f32 %v501_v31, 0.0  ;;  %v503_v41 = vadd.f32 %v2074_v1, %v371_v32  ;;  %v374_v43 = vmul.f32 %v2064_v0, %v242_v29  ;;  %v256_v29 = vld [vmem:[%s2069_s17 + $0x358] sm:$0xff]  ;;  %v2447_v32 = vld [vmem:[%s2544_s1 + $0x1] ss:$0 sm:$0xff] }
  0x5f   : > { %v504_v42 = vadd.f32 %v2074_v1, %v372_v33  ;;  %1995 = vst [vmem:[%s2106_s23 + $0x150] sm:$0xff] %v1847_v35   ;;  %v1852_v45 = vpack.c.bf16 %v628_v36, %v627_v30  ;;  %v630_v46 = vmax.f32 %v502_v37, 0.0  ;;  %v375_v48 = vmul.f32 %v2064_v0, %v243_v34  ;;  %v257_v34 = vld [vmem:[%s2069_s17 + $0x360] sm:$0xff] }
  0x60   : > { %v505_v47 = vadd.f32 %v2074_v1, %v373_v38  ;;  %v631_v50 = vmax.f32 %v503_v41, 0.0  ;;  %v506_v52 = vadd.f32 %v2074_v1, %v374_v43  ;;  %v376_v53 = vmul.f32 %v2064_v0, %v244_v39  ;;  %v258_v39 = vld [vmem:[%s2069_s17 + $0x368] sm:$0xff] }
  0x61   : > { %v632_v51 = vmax.f32 %v504_v42, 0.0  ;;  %1996 = vst [vmem:[%s2106_s23 + $0x158] sm:$0xff] %v1852_v45   ;;  %v1857_v56 = vpack.c.bf16 %v630_v46, %v629_v40  ;;  %v507_v58 = vadd.f32 %v2074_v1, %v375_v48  ;;  %v377_v59 = vmul.f32 %v2064_v0, %v245_v44  ;;  %v259_v44 = vld [vmem:[%s2069_s17 + $0x370] sm:$0xff] }
  0x62   : > { %v633_v57 = vmax.f32 %v505_v47, 0.0  ;;  %v634_v62 = vmax.f32 %v506_v52, 0.0  ;;  %v508_v63 = vadd.f32 %v2074_v1, %v376_v53  ;;  %v378_v2 = vmul.f32 %v2064_v0, %v246_v49  ;;  %v260_v49 = vld [vmem:[%s2069_s17 + $0x378] sm:$0xff] }
  0x63   : > { %v1862_v61 = vpack.c.bf16 %v632_v51, %v631_v50  ;;  %1997 = vst [vmem:[%s2106_s23 + $0x160] sm:$0xff] %v1857_v56   ;;  %v635_v4 = vmax.f32 %v507_v58, 0.0  ;;  %v509_v5 = vadd.f32 %v2074_v1, %v377_v59  ;;  %v379_v6 = vmul.f32 %v2064_v0, %v247_v54  ;;  %v261_v54 = vld [vmem:[%s2069_s17 + $0x380] sm:$0xff]  ;;  %v262_v59 = vld [vmem:[%s2069_s17 + $0x388] sm:$0xff] }
  0x64   : > { %v380_v7 = vmul.f32 %v2064_v0, %v248_v55  ;;  %v1867_v9 = vpack.c.bf16 %v634_v62, %v633_v57  ;;  %v636_v10 = vmax.f32 %v508_v63, 0.0  ;;  %v510_v11 = vadd.f32 %v2074_v1, %v378_v2  ;;  %v263_v2 = vld [vmem:[%s2069_s17 + $0x390] sm:$0xff] }
  0x65   : > { %1998 = vst [vmem:[%s2106_s23 + $0x168] sm:$0xff] %v1862_v61   ;;  %v381_v12 = vmul.f32 %v2064_v0, %v249_v60  ;;  %v637_v14 = vmax.f32 %v509_v5, 0.0  ;;  %v511_v15 = vadd.f32 %v2074_v1, %v379_v6  ;;  %v382_v17 = vmul.f32 %v2064_v0, %v250_v3  ;;  %v264_v3 = vld [vmem:[%s2069_s17 + $0x398] sm:$0xff] }
  0x66   : > { %v512_v16 = vadd.f32 %v2074_v1, %v380_v7  ;;  %1999 = vst [vmem:[%s2106_s23 + $0x170] sm:$0xff] %v1867_v9   ;;  %v1872_v19 = vpack.c.bf16 %v636_v10, %v635_v4  ;;  %v638_v20 = vmax.f32 %v510_v11, 0.0  ;;  %v383_v22 = vmul.f32 %v2064_v0, %v251_v8  ;;  %v265_v8 = vld [vmem:[%s2069_s17 + $0x3a0] sm:$0xff] }
  0x67   : > { %v513_v21 = vadd.f32 %v2074_v1, %v381_v12  ;;  %v639_v24 = vmax.f32 %v511_v15, 0.0  ;;  %v514_v26 = vadd.f32 %v2074_v1, %v382_v17  ;;  %v384_v27 = vmul.f32 %v2064_v0, %v252_v13  ;;  %v2453_v1 = vld [vmem:[%s2544_s1] ss:$0 sm:$0xff]  ;;  %v266_v13 = vld [vmem:[%s2069_s17 + $0x3a8] sm:$0xff] }
  0x68   : > { %v640_v25 = vmax.f32 %v512_v16, 0.0  ;;  %2000 = vst [vmem:[%s2106_s23 + $0x178] sm:$0xff] %v1872_v19   ;;  %v1877_v30 = vpack.c.bf16 %v638_v20, %v637_v14  ;;  %v515_v33 = vadd.f32 %v2447_v32, %v383_v22  ;;  %v385_v0 = vmul.f32 %v2453_v1, %v253_v18  ;;  %v267_v18 = vld [vmem:[%s2069_s17 + $0x3b0] sm:$0xff] }
  0x69   : > { %v641_v31 = vmax.f32 %v513_v21, 0.0  ;;  %v642_v36 = vmax.f32 %v514_v26, 0.0  ;;  %v516_v37 = vadd.f32 %v2447_v32, %v384_v27  ;;  %v386_v38 = vmul.f32 %v2453_v1, %v254_v23  ;;  %v268_v23 = vld [vmem:[%s2069_s17 + $0x3b8] sm:$0xff] }
  0x6a   : > { %v1882_v35 = vpack.c.bf16 %v640_v25, %v639_v24  ;;  %2001 = vst [vmem:[%s2106_s23 + $0x180] sm:$0xff] %v1877_v30   ;;  %v643_v40 = vmax.f32 %v515_v33, 0.0  ;;  %v517_v41 = vadd.f32 %v2447_v32, %v385_v0  ;;  %v387_v42 = vmul.f32 %v2453_v1, %v255_v28  ;;  %v269_v28 = vld [vmem:[%s2069_s17 + $0x3c0] sm:$0xff]  ;;  %v270_v0 = vld [vmem:[%s2069_s17 + $0x3c8] sm:$0xff] }
  0x6b   : > { %v388_v43 = vmul.f32 %v2453_v1, %v256_v29  ;;  %v1887_v45 = vpack.c.bf16 %v642_v36, %v641_v31  ;;  %v644_v46 = vmax.f32 %v516_v37, 0.0  ;;  %v518_v47 = vadd.f32 %v2447_v32, %v386_v38  ;;  %v271_v38 = vld [vmem:[%s2069_s17 + $0x3d0] sm:$0xff] }
  0x6c   : > { %2002 = vst [vmem:[%s2106_s23 + $0x188] sm:$0xff] %v1882_v35   ;;  %v389_v48 = vmul.f32 %v2453_v1, %v257_v34  ;;  %v645_v50 = vmax.f32 %v517_v41, 0.0  ;;  %v519_v51 = vadd.f32 %v2447_v32, %v387_v42  ;;  %v390_v53 = vmul.f32 %v2453_v1, %v258_v39  ;;  %v272_v39 = vld [vmem:[%s2069_s17 + $0x3d8] sm:$0xff] }
  0x6d   : > { %v520_v52 = vadd.f32 %v2447_v32, %v388_v43  ;;  %2003 = vst [vmem:[%s2106_s23 + $0x190] sm:$0xff] %v1887_v45   ;;  %v1892_v55 = vpack.c.bf16 %v644_v46, %v643_v40  ;;  %v646_v56 = vmax.f32 %v518_v47, 0.0  ;;  %v391_v58 = vmul.f32 %v2453_v1, %v259_v44  ;;  %v273_v44 = vld [vmem:[%s2069_s17 + $0x3e0] sm:$0xff] }
  0x6e   : > { %v521_v57 = vadd.f32 %v2447_v32, %v389_v48  ;;  %v647_v60 = vmax.f32 %v519_v51, 0.0  ;;  %v522_v62 = vadd.f32 %v2447_v32, %v390_v53  ;;  %v392_v63 = vmul.f32 %v2453_v1, %v260_v49  ;;  %v274_v49 = vld [vmem:[%s2069_s17 + $0x3e8] sm:$0xff] }
  0x6f   : > { %v648_v61 = vmax.f32 %v520_v52, 0.0  ;;  %2004 = vst [vmem:[%s2106_s23 + $0x198] sm:$0xff] %v1892_v55   ;;  %v1897_v4 = vpack.c.bf16 %v646_v56, %v645_v50  ;;  %v523_v6 = vadd.f32 %v2447_v32, %v391_v58  ;;  %v393_v7 = vmul.f32 %v2453_v1, %v261_v54  ;;  %v275_v54 = vld [vmem:[%s2069_s17 + $0x3f0] sm:$0xff] }
  0x70   : > { %v649_v5 = vmax.f32 %v521_v57, 0.0  ;;  %v650_v10 = vmax.f32 %v522_v62, 0.0  ;;  %v524_v11 = vadd.f32 %v2447_v32, %v392_v63  ;;  %v394_v12 = vmul.f32 %v2453_v1, %v262_v59  ;;  %v276_v59 = vld [vmem:[%s2069_s17 + $0x3f8] sm:$0xff] }
  0x71   : > { %v1902_v9 = vpack.c.bf16 %v648_v61, %v647_v60  ;;  %2005 = vst [vmem:[%s2106_s23 + $0x1a0] sm:$0xff] %v1897_v4   ;;  %v651_v14 = vmax.f32 %v523_v6, 0.0  ;;  %v525_v15 = vadd.f32 %v2447_v32, %v393_v7  ;;  %v395_v16 = vmul.f32 %v2453_v1, %v263_v2 }
  0x72   : > { %v396_v17 = vmul.f32 %v2453_v1, %v264_v3  ;;  %v1907_v19 = vpack.c.bf16 %v650_v10, %v649_v5  ;;  %v652_v20 = vmax.f32 %v524_v11, 0.0  ;;  %v526_v21 = vadd.f32 %v2447_v32, %v394_v12 }
  0x73   : > { %2006 = vst [vmem:[%s2106_s23 + $0x1a8] sm:$0xff] %v1902_v9   ;;  %v397_v22 = vmul.f32 %v2453_v1, %v265_v8  ;;  %v653_v24 = vmax.f32 %v525_v15, 0.0  ;;  %v527_v25 = vadd.f32 %v2447_v32, %v395_v16  ;;  %v398_v27 = vmul.f32 %v2453_v1, %v266_v13 }
  0x74   : > { %v528_v26 = vadd.f32 %v2447_v32, %v396_v17  ;;  %2007 = vst [vmem:[%s2106_s23 + $0x1b0] sm:$0xff] %v1907_v19   ;;  %v1912_v29 = vpack.c.bf16 %v652_v20, %v651_v14  ;;  %v654_v30 = vmax.f32 %v526_v21, 0.0  ;;  %v399_v33 = vmul.f32 %v2453_v1, %v267_v18 }
  0x75   : > { %v529_v31 = vadd.f32 %v2447_v32, %v397_v22  ;;  %v655_v34 = vmax.f32 %v527_v25, 0.0  ;;  %v530_v36 = vadd.f32 %v2447_v32, %v398_v27  ;;  %v400_v37 = vmul.f32 %v2453_v1, %v268_v23 }
  0x76   : > { %v656_v35 = vmax.f32 %v528_v26, 0.0  ;;  %2008 = vst [vmem:[%s2106_s23 + $0x1b8] sm:$0xff] %v1912_v29   ;;  %v1917_v40 = vpack.c.bf16 %v654_v30, %v653_v24  ;;  %v531_v42 = vadd.f32 %v2447_v32, %v399_v33  ;;  %v401_v43 = vmul.f32 %v2453_v1, %v269_v28 }
  0x77   : > { %v657_v41 = vmax.f32 %v529_v31, 0.0  ;;  %v658_v46 = vmax.f32 %v530_v36, 0.0  ;;  %v532_v47 = vadd.f32 %v2447_v32, %v400_v37  ;;  %v402_v48 = vmul.f32 %v2453_v1, %v270_v0 }
  0x78   : > { %v1922_v45 = vpack.c.bf16 %v656_v35, %v655_v34  ;;  %2009 = vst [vmem:[%s2106_s23 + $0x1c0] sm:$0xff] %v1917_v40   ;;  %v659_v50 = vmax.f32 %v531_v42, 0.0  ;;  %v533_v51 = vadd.f32 %v2447_v32, %v401_v43  ;;  %v403_v52 = vmul.f32 %v2453_v1, %v271_v38 }
  0x79   : > { %v404_v53 = vmul.f32 %v2453_v1, %v272_v39  ;;  %v1927_v55 = vpack.c.bf16 %v658_v46, %v657_v41  ;;  %v660_v56 = vmax.f32 %v532_v47, 0.0  ;;  %v534_v57 = vadd.f32 %v2447_v32, %v402_v48 }
  0x7a   : > { %2010 = vst [vmem:[%s2106_s23 + $0x1c8] sm:$0xff] %v1922_v45   ;;  %v405_v58 = vmul.f32 %v2453_v1, %v273_v44  ;;  %v661_v60 = vmax.f32 %v533_v51, 0.0  ;;  %v535_v61 = vadd.f32 %v2447_v32, %v403_v52  ;;  %v406_v63 = vmul.f32 %v2453_v1, %v274_v49 }
  0x7b   : > { %v536_v62 = vadd.f32 %v2447_v32, %v404_v53  ;;  %2011 = vst [vmem:[%s2106_s23 + $0x1d0] sm:$0xff] %v1927_v55   ;;  %v1932_v2 = vpack.c.bf16 %v660_v56, %v659_v50  ;;  %v662_v3 = vmax.f32 %v534_v57, 0.0  ;;  %v407_v5 = vmul.f32 %v2453_v1, %v275_v54 }
  0x7c   : > { %v537_v4 = vadd.f32 %v2447_v32, %v405_v58  ;;  %v663_v6 = vmax.f32 %v535_v61, 0.0  ;;  %v538_v8 = vadd.f32 %v2447_v32, %v406_v63  ;;  %v408_v9 = vmul.f32 %v2453_v1, %v276_v59 }
  0x7d   : > { %v664_v7 = vmax.f32 %v536_v62, 0.0  ;;  %2012 = vst [vmem:[%s2106_s23 + $0x1d8] sm:$0xff] %v1932_v2   ;;  %v1937_v10 = vpack.c.bf16 %v662_v3, %v661_v60  ;;  %v539_v12 = vadd.f32 %v2447_v32, %v407_v5 }
  0x7e   : > { %v665_v11 = vmax.f32 %v537_v4, 0.0  ;;  %v666_v14 = vmax.f32 %v538_v8, 0.0  ;;  %v540_v15 = vadd.f32 %v2447_v32, %v408_v9 }
  0x7f   : > { %v1942_v13 = vpack.c.bf16 %v664_v7, %v663_v6  ;;  %2013 = vst [vmem:[%s2106_s23 + $0x1e0] sm:$0xff] %v1937_v10   ;;  %v667_v16 = vmax.f32 %v539_v12, 0.0 }
  0x80   : > { %v1947_v17 = vpack.c.bf16 %v666_v14, %v665_v11  ;;  %v668_v18 = vmax.f32 %v540_v15, 0.0 }
  0x81   : > { %2014 = vst [vmem:[%s2106_s23 + $0x1e8] sm:$0xff] %v1942_v13  }
  0x82   : > { %2015 = vst [vmem:[%s2106_s23 + $0x1f0] sm:$0xff] %v1947_v17   ;;  %v1952_v19 = vpack.c.bf16 %v668_v18, %v667_v16 }
  0x84   : > { %2016 = vst [vmem:[%s2106_s23 + $0x1f8] sm:$0xff] %v1952_v19  }
  0x85 PF: > { %s12_s9 = sadd.s32 1, %s2033_s9  }
  0x86   : > { %p9_p4 = scmp.ge.s32.totalorder %s12_s9, 4  }
  0x88   :  { %11 = sbr.rel (!%p9_p4) target bundleno = 1 (0x1), region = 58 }

// kernel: generator_forward.17
= control target key start
LH: loop header
LB: loop body
LE: loop exit
PB: predicated region body
PF: predicated region fallthrough
CT: control target
= control target key end

     0   :  { %s2255_s9 = smov 0   ;;  %s2496_s0 = inlined_call_operand.vmem [shape: bf16[8192,128], index: 0, kind: input, shape index: {}]   ;;  %s2497_s1 = inlined_call_operand.vmem [shape: bf16[128,128], index: 1, kind: input, shape index: {}]   ;;  %s2498_s2 = inlined_call_operand.vmem [shape: f32[8192,128], index: 2, kind: output, shape index: {}]  }
   0x1 LB: > { %s1581_s10 = sadd.s32 4294967295, %s2238_s9   ;;  %p1585_p0 = scmp.ge.s32.totalorder %s2238_s9, 1  ;;  %s2238_s9 = sphi %s2255_s9, %s12_s9  }
   0x2   : > { %p113_p1 = scmp.lt.s32.totalorder %s2238_s9, 9 }
   0x4   : > { %p114_p2 = pnand %p1585_p0, %p113_p1 }
   0x5   : > { %s1586_s13 = sshll.u32 (!%p114_p2), %s1581_s10, 7 }
   0x6   : > { %117 = sbr.rel (%p114_p2) target bundleno = 379 (0x17b), region = 28  ;;  %p136_p3 = scmp.lt.s32.totalorder (!%p114_p2), %s1586_s13, 1023 }
   0xb   : > { %v1904_v0 = vld [vmem:[%s2497_s1 + $0x38] sm:$0xff]   ;;  %v1905_v1 = vld [vmem:[%s2497_s1 + $0x30] sm:$0xff]   ;;  %s2500_s13 = smov (!%p136_p3, %s1586_s13), 1023  ;;  %v1906_v2 = vld [vmem:[%s2497_s1 + $0x28] sm:$0xff]  }
   0xc   : > { %1736 = vmatprep.subr.bf16.mxu0 %v1904_v0  ;;  %1880 = vmatprep.subr.bf16.mxu1 %v1904_v0  ;;  %s1587_s18 = sshll.u32 %s2500_s13, 2  ;;  %v1907_v3 = vld [vmem:[%s2497_s1 + $0x20] sm:$0xff]   ;;  %v1908_v6 = vld [vmem:[%s2497_s1 + $0x18] sm:$0xff]   ;;  %v1909_v7 = vld [vmem:[%s2497_s1 + $0x10] sm:$0xff]   ;;  %s1589_s4 = sshll.u32 %s2500_s13, 3 }
   0xd   : > { %1737 = vmatpush3.bf16.msra.mxu0 %v1904_v0  ;;  %1888 = vmatpush3.bf16.msra.mxu1 %v1904_v0  ;;  %s2278_s21 = scalar_lea.vmem %s2496_s0, %s1587_s18  ;;  %v1910_v8 = vld [vmem:[%s2497_s1 + $0x8] sm:$0xff]   ;;  %v1911_v9 = vld [vmem:[%s2497_s1] sm:$0xff]   ;;  %s2363_s7 = scalar_lea.vmem %s2498_s2, %s1589_s4 }
   0xe   : > { %1738 = vmatprep.subr.bf16.mxu0 %v1905_v1  ;;  %1881 = vmatprep.subr.bf16.mxu1 %v1905_v1  ;;  %v1912_v4 = vld [vmem:[%s2278_s21] sm:$0xff]   ;;  %v1914_v10 = vld [vmem:[%s2278_s21 + $0x8] sm:$0xff]   ;;  %v1916_v12 = vld [vmem:[%s2278_s21 + $0x10] sm:$0xff]  }
   0xf   : > { %v1913_v5 = vld [vmem:[%s2278_s21 + $0x100] sm:$0xff]   ;;  %1752 = vmatprep.mubr.bf16.mxu0 %v1912_v4  ;;  %v1915_v11 = vld [vmem:[%s2278_s21 + $0x108] sm:$0xff]   ;;  %v1917_v13 = vld [vmem:[%s2278_s21 + $0x110] sm:$0xff]  }
  0x10   : > { %1816 = vmatprep.mubr.bf16.mxu1 %v1913_v5  ;;  %v1918_v14 = vld [vmem:[%s2278_s21 + $0x18] sm:$0xff]   ;;  %v1920_v16 = vld [vmem:[%s2278_s21 + $0x20] sm:$0xff]   ;;  %v1922_v18 = vld [vmem:[%s2278_s21 + $0x28] sm:$0xff]  }
  0x11   : > { %1739 = vmatpush3.bf16.msra.mxu0 %v1905_v1  ;;  %1889 = vmatpush3.bf16.msra.mxu1 %v1905_v1  ;;  %v1919_v15 = vld [vmem:[%s2278_s21 + $0x118] sm:$0xff]   ;;  %v1921_v17 = vld [vmem:[%s2278_s21 + $0x120] sm:$0xff]   ;;  %v1923_v19 = vld [vmem:[%s2278_s21 + $0x128] sm:$0xff]  }
  0x12   : > { %1740 = vmatprep.subr.bf16.mxu0 %v1906_v2  ;;  %1882 = vmatprep.subr.bf16.mxu1 %v1906_v2  ;;  %v1924_v20 = vld [vmem:[%s2278_s21 + $0x30] sm:$0xff]   ;;  %v1926_v22 = vld [vmem:[%s2278_s21 + $0x38] sm:$0xff]   ;;  %v1928_v24 = vld [vmem:[%s2278_s21 + $0x40] sm:$0xff]  }
  0x13   : > { %v1925_v21 = vld [vmem:[%s2278_s21 + $0x130] sm:$0xff]   ;;  %v1927_v23 = vld [vmem:[%s2278_s21 + $0x138] sm:$0xff]   ;;  %v1929_v25 = vld [vmem:[%s2278_s21 + $0x140] sm:$0xff]  }
  0x14   : > { %v1930_v26 = vld [vmem:[%s2278_s21 + $0x48] sm:$0xff]   ;;  %v1932_v28 = vld [vmem:[%s2278_s21 + $0x50] sm:$0xff]   ;;  %v1934_v30 = vld [vmem:[%s2278_s21 + $0x58] sm:$0xff]  }
  0x15   : > { %1741 = vmatpush3.bf16.msra.mxu0 %v1906_v2  ;;  %1890 = vmatpush3.bf16.msra.mxu1 %v1906_v2  ;;  %v1931_v27 = vld [vmem:[%s2278_s21 + $0x148] sm:$0xff]   ;;  %v1933_v29 = vld [vmem:[%s2278_s21 + $0x150] sm:$0xff]   ;;  %v1935_v31 = vld [vmem:[%s2278_s21 + $0x158] sm:$0xff]  }
  0x16   : > { %1742 = vmatprep.subr.bf16.mxu0 %v1907_v3  ;;  %1883 = vmatprep.subr.bf16.mxu1 %v1907_v3  ;;  %v1936_v32 = vld [vmem:[%s2278_s21 + $0x60] sm:$0xff]   ;;  %v1938_v34 = vld [vmem:[%s2278_s21 + $0x68] sm:$0xff]   ;;  %v1940_v36 = vld [vmem:[%s2278_s21 + $0x70] sm:$0xff]  }
  0x17   : > { %v1937_v33 = vld [vmem:[%s2278_s21 + $0x160] sm:$0xff]   ;;  %v1939_v35 = vld [vmem:[%s2278_s21 + $0x168] sm:$0xff]   ;;  %v1941_v37 = vld [vmem:[%s2278_s21 + $0x170] sm:$0xff]  }
  0x18   : > { %v1942_v38 = vld [vmem:[%s2278_s21 + $0x78] sm:$0xff]   ;;  %v1944_v40 = vld [vmem:[%s2278_s21 + $0x80] sm:$0xff]   ;;  %v1946_v42 = vld [vmem:[%s2278_s21 + $0x88] sm:$0xff]  }
  0x19   : > { %1743 = vmatpush3.bf16.msra.mxu0 %v1907_v3  ;;  %1891 = vmatpush3.bf16.msra.mxu1 %v1907_v3  ;;  %v1943_v39 = vld [vmem:[%s2278_s21 + $0x178] sm:$0xff]   ;;  %v1945_v41 = vld [vmem:[%s2278_s21 + $0x180] sm:$0xff]   ;;  %v1947_v43 = vld [vmem:[%s2278_s21 + $0x188] sm:$0xff]  }
  0x1a   : > { %1744 = vmatprep.subr.bf16.mxu0 %v1908_v6  ;;  %1884 = vmatprep.subr.bf16.mxu1 %v1908_v6  ;;  %v1948_v44 = vld [vmem:[%s2278_s21 + $0x90] sm:$0xff]   ;;  %v1950_v46 = vld [vmem:[%s2278_s21 + $0x98] sm:$0xff]   ;;  %v1952_v48 = vld [vmem:[%s2278_s21 + $0xa0] sm:$0xff]  }
  0x1b   : > { %v1949_v45 = vld [vmem:[%s2278_s21 + $0x190] sm:$0xff]   ;;  %v1951_v47 = vld [vmem:[%s2278_s21 + $0x198] sm:$0xff]   ;;  %v1953_v49 = vld [vmem:[%s2278_s21 + $0x1a0] sm:$0xff]  }
  0x1c   : > { %v1954_v50 = vld [vmem:[%s2278_s21 + $0xa8] sm:$0xff]   ;;  %v1956_v52 = vld [vmem:[%s2278_s21 + $0xb0] sm:$0xff]   ;;  %v1958_v54 = vld [vmem:[%s2278_s21 + $0xb8] sm:$0xff]  }
  0x1d   : > { %1745 = vmatpush3.bf16.msra.mxu0 %v1908_v6  ;;  %1892 = vmatpush3.bf16.msra.mxu1 %v1908_v6  ;;  %v1955_v51 = vld [vmem:[%s2278_s21 + $0x1a8] sm:$0xff]   ;;  %v1957_v53 = vld [vmem:[%s2278_s21 + $0x1b0] sm:$0xff]   ;;  %v1959_v55 = vld [vmem:[%s2278_s21 + $0x1b8] sm:$0xff]  }
  0x1e   : > { %1746 = vmatprep.subr.bf16.mxu0 %v1909_v7  ;;  %1885 = vmatprep.subr.bf16.mxu1 %v1909_v7  ;;  %v1960_v56 = vld [vmem:[%s2278_s21 + $0xc0] sm:$0xff]   ;;  %v1962_v58 = vld [vmem:[%s2278_s21 + $0xc8] sm:$0xff]   ;;  %v1964_v60 = vld [vmem:[%s2278_s21 + $0xd0] sm:$0xff]  }
  0x1f   : > { %v1961_v57 = vld [vmem:[%s2278_s21 + $0x1c0] sm:$0xff]   ;;  %v1963_v59 = vld [vmem:[%s2278_s21 + $0x1c8] sm:$0xff]   ;;  %v1965_v61 = vld [vmem:[%s2278_s21 + $0x1d0] sm:$0xff]  }
  0x20   : > { %v1966_v62 = vld [vmem:[%s2278_s21 + $0xd8] sm:$0xff]   ;;  %v1968_v0 = vld [vmem:[%s2278_s21 + $0xe0] sm:$0xff]   ;;  %v1970_v2 = vld [vmem:[%s2278_s21 + $0xe8] sm:$0xff]  }
  0x21   : > { %1747 = vmatpush3.bf16.msra.mxu0 %v1909_v7  ;;  %1893 = vmatpush3.bf16.msra.mxu1 %v1909_v7  ;;  %v1967_v63 = vld [vmem:[%s2278_s21 + $0x1d8] sm:$0xff]   ;;  %v1969_v1 = vld [vmem:[%s2278_s21 + $0x1e0] sm:$0xff]   ;;  %v1971_v3 = vld [vmem:[%s2278_s21 + $0x1e8] sm:$0xff]  }
  0x22   : > { %1748 = vmatprep.subr.bf16.mxu0 %v1910_v8  ;;  %1886 = vmatprep.subr.bf16.mxu1 %v1910_v8  ;;  %v1972_v4 = vld [vmem:[%s2278_s21 + $0xf0] sm:$0xff]   ;;  %v1974_v6 = vld [vmem:[%s2278_s21 + $0xf8] sm:$0xff]  }
  0x23   : > { %v1973_v5 = vld [vmem:[%s2278_s21 + $0x1f0] sm:$0xff]   ;;  %v1975_v7 = vld [vmem:[%s2278_s21 + $0x1f8] sm:$0xff]  }
  0x25   : > { %1749 = vmatpush3.bf16.msra.mxu0 %v1910_v8  ;;  %1894 = vmatpush3.bf16.msra.mxu1 %v1910_v8 }
  0x26   : > { %1750 = vmatprep.subr.bf16.mxu0 %v1911_v9  ;;  %1887 = vmatprep.subr.bf16.mxu1 %v1911_v9 }
  0x29   : > { %1751 = vmatpush3.bf16.msra.mxu0 %v1911_v9  ;;  %1895 = vmatpush3.bf16.msra.mxu1 %v1911_v9 }
  0x2c   : > { %1753 = vmatmul.mubr.bf16.vlgmr.msra.gmra.mxu0 %v1914_v10  ;;  %1817 = vmatmul.mubr.bf16.vlgmr.msra.gmra.mxu1 %v1915_v11 }
  0x2d   : > { %1756 = vmatprep.mubr.bf16.mxu0 %v1916_v12  ;;  %1820 = vmatprep.mubr.bf16.mxu1 %v1917_v13 }
  0x34   : > { %1757 = vmatmul.mubr.bf16.gmra.mxu0 %v1918_v14  ;;  %1821 = vmatmul.mubr.bf16.gmra.mxu1 %v1919_v15 }
  0x35   : > { %1760 = vmatprep.mubr.bf16.mxu0 %v1920_v16  ;;  %1824 = vmatprep.mubr.bf16.mxu1 %v1921_v17 }
  0x3c   : > { %1761 = vmatmul.mubr.bf16.gmra.mxu0 %v1922_v18  ;;  %1825 = vmatmul.mubr.bf16.gmra.mxu1 %v1923_v19 }
  0x3d   : > { %1764 = vmatprep.mubr.bf16.mxu0 %v1924_v20  ;;  %1828 = vmatprep.mubr.bf16.mxu1 %v1925_v21 }
  0x44   : > { %1765 = vmatmul.mubr.bf16.gmra.mxu0 %v1926_v22  ;;  %1829 = vmatmul.mubr.bf16.gmra.mxu1 %v1927_v23 }
  0x45   : > { %1768 = vmatprep.mubr.bf16.mxu0 %v1928_v24  ;;  %1832 = vmatprep.mubr.bf16.mxu1 %v1929_v25 }
  0x4c   : > { %1769 = vmatmul.mubr.bf16.gmra.mxu0 %v1930_v26  ;;  %1833 = vmatmul.mubr.bf16.gmra.mxu1 %v1931_v27 }
  0x4d   : > { %1772 = vmatprep.mubr.bf16.mxu0 %v1932_v28  ;;  %1836 = vmatprep.mubr.bf16.mxu1 %v1933_v29 }
  0x54   : > { %1773 = vmatmul.mubr.bf16.gmra.mxu0 %v1934_v30  ;;  %1837 = vmatmul.mubr.bf16.gmra.mxu1 %v1935_v31 }
  0x55   : > { %1776 = vmatprep.mubr.bf16.mxu0 %v1936_v32  ;;  %1840 = vmatprep.mubr.bf16.mxu1 %v1937_v33 }
  0x5c   : > { %1777 = vmatmul.mubr.bf16.gmra.mxu0 %v1938_v34  ;;  %1841 = vmatmul.mubr.bf16.gmra.mxu1 %v1939_v35 }
  0x5d   : > { %1780 = vmatprep.mubr.bf16.mxu0 %v1940_v36  ;;  %1844 = vmatprep.mubr.bf16.mxu1 %v1941_v37 }
  0x64   : > { %1781 = vmatmul.mubr.bf16.gmra.mxu0 %v1942_v38  ;;  %1845 = vmatmul.mubr.bf16.gmra.mxu1 %v1943_v39 }
  0x65   : > { %1784 = vmatprep.mubr.bf16.mxu0 %v1944_v40  ;;  %1848 = vmatprep.mubr.bf16.mxu1 %v1945_v41 }
  0x6c   : > { %1785 = vmatmul.mubr.bf16.gmra.mxu0 %v1946_v42  ;;  %1849 = vmatmul.mubr.bf16.gmra.mxu1 %v1947_v43 }
  0x6d   : > { %1788 = vmatprep.mubr.bf16.mxu0 %v1948_v44  ;;  %1852 = vmatprep.mubr.bf16.mxu1 %v1949_v45 }
  0x74   : > { %1789 = vmatmul.mubr.bf16.gmra.mxu0 %v1950_v46  ;;  %1853 = vmatmul.mubr.bf16.gmra.mxu1 %v1951_v47 }
  0x75   : > { %1792 = vmatprep.mubr.bf16.mxu0 %v1952_v48  ;;  %1856 = vmatprep.mubr.bf16.mxu1 %v1953_v49 }
  0x7c   : > { %1793 = vmatmul.mubr.bf16.gmra.mxu0 %v1954_v50  ;;  %1857 = vmatmul.mubr.bf16.gmra.mxu1 %v1955_v51 }
  0x7d   : > { %1796 = vmatprep.mubr.bf16.mxu0 %v1956_v52  ;;  %1860 = vmatprep.mubr.bf16.mxu1 %v1957_v53 }
  0x84   : > { %1797 = vmatmul.mubr.bf16.gmra.mxu0 %v1958_v54  ;;  %1861 = vmatmul.mubr.bf16.gmra.mxu1 %v1959_v55 }
  0x85   : > { %1800 = vmatprep.mubr.bf16.mxu0 %v1960_v56  ;;  %1864 = vmatprep.mubr.bf16.mxu1 %v1961_v57 }
  0x8c   : > { %1801 = vmatmul.mubr.bf16.gmra.mxu0 %v1962_v58  ;;  %1865 = vmatmul.mubr.bf16.gmra.mxu1 %v1963_v59 }
  0x8d   : > { %1804 = vmatprep.mubr.bf16.mxu0 %v1964_v60  ;;  %1868 = vmatprep.mubr.bf16.mxu1 %v1965_v61 }
  0x94   : > { %1805 = vmatmul.mubr.bf16.gmra.mxu0 %v1966_v62  ;;  %1869 = vmatmul.mubr.bf16.gmra.mxu1 %v1967_v63 }
  0x95   : > { %1808 = vmatprep.mubr.bf16.mxu0 %v1968_v0  ;;  %1872 = vmatprep.mubr.bf16.mxu1 %v1969_v1 }
  0x9c   : > { %1809 = vmatmul.mubr.bf16.gmra.mxu0 %v1970_v2  ;;  %1873 = vmatmul.mubr.bf16.gmra.mxu1 %v1971_v3 }
  0x9d   : > { %1812 = vmatprep.mubr.bf16.mxu0 %v1972_v4  ;;  %1876 = vmatprep.mubr.bf16.mxu1 %v1973_v5 }
  0xa4   : > { %1813 = vmatmul.mubr.bf16.gmra.mxu0 %v1974_v6  ;;  %1877 = vmatmul.mubr.bf16.gmra.mxu1 %v1975_v7 }
  0xec   : > { %v1754_v8 = vpop.f32.mrf.mxu0  ;;  %v1818_v9 = vpop.f32.mrf.mxu1 }
  0xed   : > { %1976 = vtanh.f32 %v1754_v8 }
  0xee   : > { %1978 = vtanh.f32 %v1818_v9  ;;  %v758_v10 = vpop.f32.mrf.mxu0  ;;  %v1014_v11 = vpop.f32.mrf.mxu1 }
  0xef   : > { %1980 = vtanh.f32 %v758_v10 }
  0xf0   : > { %1982 = vtanh.f32 %v1014_v11  ;;  %v1755_v12 = vpop.f32.mrf.mxu0  ;;  %v1819_v13 = vpop.f32.mrf.mxu1 }
  0xf1   : > { %1984 = vtanh.f32 %v1755_v12 }
  0xf2   : > { %1986 = vtanh.f32 %v1819_v13  ;;  %v761_v14 = vpop.f32.mrf.mxu0  ;;  %v1017_v15 = vpop.f32.mrf.mxu1 }
  0xf3   : > { %1988 = vtanh.f32 %v761_v14 }
  0xf4   : > { %1990 = vtanh.f32 %v1017_v15  ;;  %v1758_v16 = vpop.f32.mrf.mxu0  ;;  %v1822_v17 = vpop.f32.mrf.mxu1 }
  0xf5   : > { %1992 = vtanh.f32 %v1758_v16 }
  0xf6   : > { %1994 = vtanh.f32 %v1822_v17  ;;  %v774_v18 = vpop.f32.mrf.mxu0  ;;  %v1030_v19 = vpop.f32.mrf.mxu1 }
  0xf7   : > { %1996 = vtanh.f32 %v774_v18 }
  0xf8   : > { %1998 = vtanh.f32 %v1030_v19  ;;  %v1759_v20 = vpop.f32.mrf.mxu0  ;;  %v1823_v21 = vpop.f32.mrf.mxu1 }
  0xf9   : > { %2000 = vtanh.f32 %v1759_v20 }
  0xfa   : > { %v1977_v22 = vpop.eup %1976  ;;  %2002 = vtanh.f32 %v1823_v21  ;;  %v777_v23 = vpop.f32.mrf.mxu0 }
  0xfb   : > { %v1033_v24 = vpop.f32.mrf.mxu1  ;;  %v1979_v25 = vpop.eup %1978  ;;  %1399 = vst [vmem:[%s2363_s7 + $0x10] sm:$0xff] %v1977_v22  ;;  %2004 = vtanh.f32 %v777_v23 }
  0xfc   : > { %v1981_v26 = vpop.eup %1980  ;;  %1463 = vst [vmem:[%s2363_s7 + $0x210] sm:$0xff] %v1979_v25  ;;  %2006 = vtanh.f32 %v1033_v24  ;;  %v1762_v27 = vpop.f32.mrf.mxu0 }
  0xfd   : > { %v1826_v28 = vpop.f32.mrf.mxu1  ;;  %v1983_v29 = vpop.eup %1982  ;;  %1397 = vst [vmem:[%s2363_s7] sm:$0xff] %v1981_v26  ;;  %2008 = vtanh.f32 %v1762_v27 }
  0xfe   : > { %v1985_v30 = vpop.eup %1984  ;;  %1461 = vst [vmem:[%s2363_s7 + $0x200] sm:$0xff] %v1983_v29  ;;  %2010 = vtanh.f32 %v1826_v28  ;;  %v790_v31 = vpop.f32.mrf.mxu0 }
  0xff   : > { %v1046_v32 = vpop.f32.mrf.mxu1  ;;  %v1987_v33 = vpop.eup %1986  ;;  %1400 = vst [vmem:[%s2363_s7 + $0x18] sm:$0xff] %v1985_v30  ;;  %2012 = vtanh.f32 %v790_v31 }
 0x100   : > { %v1989_v34 = vpop.eup %1988  ;;  %1464 = vst [vmem:[%s2363_s7 + $0x218] sm:$0xff] %v1987_v33  ;;  %2014 = vtanh.f32 %v1046_v32  ;;  %v1763_v35 = vpop.f32.mrf.mxu0 }
 0x101   : > { %v1827_v36 = vpop.f32.mrf.mxu1  ;;  %v1991_v37 = vpop.eup %1990  ;;  %1398 = vst [vmem:[%s2363_s7 + $0x8] sm:$0xff] %v1989_v34  ;;  %2016 = vtanh.f32 %v1763_v35 }
 0x102   : > { %v1993_v38 = vpop.eup %1992  ;;  %1462 = vst [vmem:[%s2363_s7 + $0x208] sm:$0xff] %v1991_v37  ;;  %2018 = vtanh.f32 %v1827_v36  ;;  %v793_v39 = vpop.f32.mrf.mxu0 }
 0x103   : > { %v1049_v40 = vpop.f32.mrf.mxu1  ;;  %v1995_v41 = vpop.eup %1994  ;;  %1403 = vst [vmem:[%s2363_s7 + $0x30] sm:$0xff] %v1993_v38  ;;  %2020 = vtanh.f32 %v793_v39 }
 0x104   : > { %v1997_v42 = vpop.eup %1996  ;;  %1467 = vst [vmem:[%s2363_s7 + $0x230] sm:$0xff] %v1995_v41  ;;  %2022 = vtanh.f32 %v1049_v40  ;;  %v1766_v43 = vpop.f32.mrf.mxu0 }
 0x105   : > { %v1830_v44 = vpop.f32.mrf.mxu1  ;;  %v1999_v45 = vpop.eup %1998  ;;  %1401 = vst [vmem:[%s2363_s7 + $0x20] sm:$0xff] %v1997_v42  ;;  %2024 = vtanh.f32 %v1766_v43 }
 0x106   : > { %v2001_v46 = vpop.eup %2000  ;;  %1465 = vst [vmem:[%s2363_s7 + $0x220] sm:$0xff] %v1999_v45  ;;  %2026 = vtanh.f32 %v1830_v44  ;;  %v806_v47 = vpop.f32.mrf.mxu0 }
 0x107   : > { %v1062_v48 = vpop.f32.mrf.mxu1  ;;  %v2003_v49 = vpop.eup %2002  ;;  %1404 = vst [vmem:[%s2363_s7 + $0x38] sm:$0xff] %v2001_v46  ;;  %2028 = vtanh.f32 %v806_v47 }
 0x108   : > { %v2005_v50 = vpop.eup %2004  ;;  %1468 = vst [vmem:[%s2363_s7 + $0x238] sm:$0xff] %v2003_v49  ;;  %2030 = vtanh.f32 %v1062_v48  ;;  %v1767_v51 = vpop.f32.mrf.mxu0 }
 0x109   : > { %v1831_v52 = vpop.f32.mrf.mxu1  ;;  %v2007_v53 = vpop.eup %2006  ;;  %1402 = vst [vmem:[%s2363_s7 + $0x28] sm:$0xff] %v2005_v50  ;;  %2032 = vtanh.f32 %v1767_v51 }
 0x10a   : > { %v2009_v54 = vpop.eup %2008  ;;  %1466 = vst [vmem:[%s2363_s7 + $0x228] sm:$0xff] %v2007_v53  ;;  %2034 = vtanh.f32 %v1831_v52  ;;  %v809_v55 = vpop.f32.mrf.mxu0 }
 0x10b   : > { %v1065_v56 = vpop.f32.mrf.mxu1  ;;  %v2011_v57 = vpop.eup %2010  ;;  %1407 = vst [vmem:[%s2363_s7 + $0x50] sm:$0xff] %v2009_v54  ;;  %2036 = vtanh.f32 %v809_v55 }
 0x10c   : > { %v2013_v58 = vpop.eup %2012  ;;  %1471 = vst [vmem:[%s2363_s7 + $0x250] sm:$0xff] %v2011_v57  ;;  %2038 = vtanh.f32 %v1065_v56  ;;  %v1770_v59 = vpop.f32.mrf.mxu0 }
 0x10d   : > { %v1834_v60 = vpop.f32.mrf.mxu1  ;;  %v2015_v61 = vpop.eup %2014  ;;  %1405 = vst [vmem:[%s2363_s7 + $0x40] sm:$0xff] %v2013_v58  ;;  %2040 = vtanh.f32 %v1770_v59 }
 0x10e   : > { %v2017_v62 = vpop.eup %2016  ;;  %1469 = vst [vmem:[%s2363_s7 + $0x240] sm:$0xff] %v2015_v61  ;;  %2042 = vtanh.f32 %v1834_v60  ;;  %v822_v63 = vpop.f32.mrf.mxu0 }
 0x10f   : > { %v1078_v0 = vpop.f32.mrf.mxu1  ;;  %v2019_v1 = vpop.eup %2018  ;;  %1408 = vst [vmem:[%s2363_s7 + $0x58] sm:$0xff] %v2017_v62  ;;  %2044 = vtanh.f32 %v822_v63 }
 0x110   : > { %v2021_v2 = vpop.eup %2020  ;;  %1472 = vst [vmem:[%s2363_s7 + $0x258] sm:$0xff] %v2019_v1  ;;  %2046 = vtanh.f32 %v1078_v0  ;;  %v1771_v3 = vpop.f32.mrf.mxu0 }
 0x111   : > { %v1835_v4 = vpop.f32.mrf.mxu1  ;;  %v2023_v5 = vpop.eup %2022  ;;  %1406 = vst [vmem:[%s2363_s7 + $0x48] sm:$0xff] %v2021_v2  ;;  %2048 = vtanh.f32 %v1771_v3 }
 0x112   : > { %v2025_v6 = vpop.eup %2024  ;;  %1470 = vst [vmem:[%s2363_s7 + $0x248] sm:$0xff] %v2023_v5  ;;  %2050 = vtanh.f32 %v1835_v4  ;;  %v825_v7 = vpop.f32.mrf.mxu0 }
 0x113   : > { %v1081_v8 = vpop.f32.mrf.mxu1  ;;  %v2027_v9 = vpop.eup %2026  ;;  %1411 = vst [vmem:[%s2363_s7 + $0x70] sm:$0xff] %v2025_v6  ;;  %2052 = vtanh.f32 %v825_v7 }
 0x114   : > { %v2029_v10 = vpop.eup %2028  ;;  %1475 = vst [vmem:[%s2363_s7 + $0x270] sm:$0xff] %v2027_v9  ;;  %2054 = vtanh.f32 %v1081_v8  ;;  %v1774_v11 = vpop.f32.mrf.mxu0 }
 0x115   : > { %v1838_v12 = vpop.f32.mrf.mxu1  ;;  %v2031_v13 = vpop.eup %2030  ;;  %1409 = vst [vmem:[%s2363_s7 + $0x60] sm:$0xff] %v2029_v10  ;;  %2056 = vtanh.f32 %v1774_v11 }
 0x116   : > { %v2033_v14 = vpop.eup %2032  ;;  %1473 = vst [vmem:[%s2363_s7 + $0x260] sm:$0xff] %v2031_v13  ;;  %2058 = vtanh.f32 %v1838_v12  ;;  %v838_v15 = vpop.f32.mrf.mxu0 }
 0x117   : > { %v1094_v16 = vpop.f32.mrf.mxu1  ;;  %v2035_v17 = vpop.eup %2034  ;;  %1412 = vst [vmem:[%s2363_s7 + $0x78] sm:$0xff] %v2033_v14  ;;  %2060 = vtanh.f32 %v838_v15 }
 0x118   : > { %v2037_v18 = vpop.eup %2036  ;;  %1476 = vst [vmem:[%s2363_s7 + $0x278] sm:$0xff] %v2035_v17  ;;  %2062 = vtanh.f32 %v1094_v16  ;;  %v1775_v19 = vpop.f32.mrf.mxu0 }
 0x119   : > { %v1839_v20 = vpop.f32.mrf.mxu1  ;;  %v2039_v21 = vpop.eup %2038  ;;  %1410 = vst [vmem:[%s2363_s7 + $0x68] sm:$0xff] %v2037_v18  ;;  %2064 = vtanh.f32 %v1775_v19 }
 0x11a   : > { %v2041_v22 = vpop.eup %2040  ;;  %1474 = vst [vmem:[%s2363_s7 + $0x268] sm:$0xff] %v2039_v21  ;;  %2066 = vtanh.f32 %v1839_v20  ;;  %v841_v23 = vpop.f32.mrf.mxu0 }
 0x11b   : > { %v1097_v24 = vpop.f32.mrf.mxu1  ;;  %v2043_v25 = vpop.eup %2042  ;;  %1415 = vst [vmem:[%s2363_s7 + $0x90] sm:$0xff] %v2041_v22  ;;  %2068 = vtanh.f32 %v841_v23 }
 0x11c   : > { %v2045_v26 = vpop.eup %2044  ;;  %1479 = vst [vmem:[%s2363_s7 + $0x290] sm:$0xff] %v2043_v25  ;;  %2070 = vtanh.f32 %v1097_v24  ;;  %v1778_v27 = vpop.f32.mrf.mxu0 }
 0x11d   : > { %v1842_v28 = vpop.f32.mrf.mxu1  ;;  %v2047_v29 = vpop.eup %2046  ;;  %1413 = vst [vmem:[%s2363_s7 + $0x80] sm:$0xff] %v2045_v26  ;;  %2072 = vtanh.f32 %v1778_v27 }
 0x11e   : > { %v2049_v30 = vpop.eup %2048  ;;  %1477 = vst [vmem:[%s2363_s7 + $0x280] sm:$0xff] %v2047_v29  ;;  %2074 = vtanh.f32 %v1842_v28  ;;  %v854_v31 = vpop.f32.mrf.mxu0 }
 0x11f   : > { %v1110_v32 = vpop.f32.mrf.mxu1  ;;  %v2051_v33 = vpop.eup %2050  ;;  %1416 = vst [vmem:[%s2363_s7 + $0x98] sm:$0xff] %v2049_v30  ;;  %2076 = vtanh.f32 %v854_v31 }
 0x120   : > { %v2053_v34 = vpop.eup %2052  ;;  %1480 = vst [vmem:[%s2363_s7 + $0x298] sm:$0xff] %v2051_v33  ;;  %2078 = vtanh.f32 %v1110_v32  ;;  %v1779_v35 = vpop.f32.mrf.mxu0 }
 0x121   : > { %v1843_v36 = vpop.f32.mrf.mxu1  ;;  %v2055_v37 = vpop.eup %2054  ;;  %1414 = vst [vmem:[%s2363_s7 + $0x88] sm:$0xff] %v2053_v34  ;;  %2080 = vtanh.f32 %v1779_v35 }
 0x122   : > { %v2057_v38 = vpop.eup %2056  ;;  %1478 = vst [vmem:[%s2363_s7 + $0x288] sm:$0xff] %v2055_v37  ;;  %2082 = vtanh.f32 %v1843_v36  ;;  %v857_v39 = vpop.f32.mrf.mxu0 }
 0x123   : > { %v1113_v40 = vpop.f32.mrf.mxu1  ;;  %v2059_v41 = vpop.eup %2058  ;;  %1419 = vst [vmem:[%s2363_s7 + $0xb0] sm:$0xff] %v2057_v38  ;;  %2084 = vtanh.f32 %v857_v39 }
 0x124   : > { %v2061_v42 = vpop.eup %2060  ;;  %1483 = vst [vmem:[%s2363_s7 + $0x2b0] sm:$0xff] %v2059_v41  ;;  %2086 = vtanh.f32 %v1113_v40  ;;  %v1782_v43 = vpop.f32.mrf.mxu0 }
 0x125   : > { %v1846_v44 = vpop.f32.mrf.mxu1  ;;  %v2063_v45 = vpop.eup %2062  ;;  %1417 = vst [vmem:[%s2363_s7 + $0xa0] sm:$0xff] %v2061_v42  ;;  %2088 = vtanh.f32 %v1782_v43 }
 0x126   : > { %v2065_v46 = vpop.eup %2064  ;;  %1481 = vst [vmem:[%s2363_s7 + $0x2a0] sm:$0xff] %v2063_v45  ;;  %2090 = vtanh.f32 %v1846_v44  ;;  %v870_v47 = vpop.f32.mrf.mxu0 }
 0x127   : > { %v1126_v48 = vpop.f32.mrf.mxu1  ;;  %v2067_v49 = vpop.eup %2066  ;;  %1420 = vst [vmem:[%s2363_s7 + $0xb8] sm:$0xff] %v2065_v46  ;;  %2092 = vtanh.f32 %v870_v47 }
 0x128   : > { %v2069_v50 = vpop.eup %2068  ;;  %1484 = vst [vmem:[%s2363_s7 + $0x2b8] sm:$0xff] %v2067_v49  ;;  %2094 = vtanh.f32 %v1126_v48  ;;  %v1783_v51 = vpop.f32.mrf.mxu0 }
 0x129   : > { %v1847_v52 = vpop.f32.mrf.mxu1  ;;  %v2071_v53 = vpop.eup %2070  ;;  %1418 = vst [vmem:[%s2363_s7 + $0xa8] sm:$0xff] %v2069_v50  ;;  %2096 = vtanh.f32 %v1783_v51 }
 0x12a   : > { %v2073_v54 = vpop.eup %2072  ;;  %1482 = vst [vmem:[%s2363_s7 + $0x2a8] sm:$0xff] %v2071_v53  ;;  %2098 = vtanh.f32 %v1847_v52  ;;  %v873_v55 = vpop.f32.mrf.mxu0 }
 0x12b   : > { %v1129_v56 = vpop.f32.mrf.mxu1  ;;  %v2075_v57 = vpop.eup %2074  ;;  %1423 = vst [vmem:[%s2363_s7 + $0xd0] sm:$0xff] %v2073_v54  ;;  %2100 = vtanh.f32 %v873_v55 }
 0x12c   : > { %v2077_v58 = vpop.eup %2076  ;;  %1487 = vst [vmem:[%s2363_s7 + $0x2d0] sm:$0xff] %v2075_v57  ;;  %2102 = vtanh.f32 %v1129_v56  ;;  %v1786_v59 = vpop.f32.mrf.mxu0 }
 0x12d   : > { %v1850_v60 = vpop.f32.mrf.mxu1  ;;  %v2079_v61 = vpop.eup %2078  ;;  %1421 = vst [vmem:[%s2363_s7 + $0xc0] sm:$0xff] %v2077_v58  ;;  %2104 = vtanh.f32 %v1786_v59 }
 0x12e   : > { %v2081_v62 = vpop.eup %2080  ;;  %1485 = vst [vmem:[%s2363_s7 + $0x2c0] sm:$0xff] %v2079_v61  ;;  %2106 = vtanh.f32 %v1850_v60  ;;  %v886_v63 = vpop.f32.mrf.mxu0 }
 0x12f   : > { %v1142_v0 = vpop.f32.mrf.mxu1  ;;  %v2083_v1 = vpop.eup %2082  ;;  %1424 = vst [vmem:[%s2363_s7 + $0xd8] sm:$0xff] %v2081_v62  ;;  %2108 = vtanh.f32 %v886_v63 }
 0x130   : > { %v2085_v2 = vpop.eup %2084  ;;  %1488 = vst [vmem:[%s2363_s7 + $0x2d8] sm:$0xff] %v2083_v1  ;;  %2110 = vtanh.f32 %v1142_v0  ;;  %v1787_v3 = vpop.f32.mrf.mxu0 }
 0x131   : > { %v1851_v4 = vpop.f32.mrf.mxu1  ;;  %v2087_v5 = vpop.eup %2086  ;;  %1422 = vst [vmem:[%s2363_s7 + $0xc8] sm:$0xff] %v2085_v2  ;;  %2112 = vtanh.f32 %v1787_v3 }
 0x132   : > { %v2089_v6 = vpop.eup %2088  ;;  %1486 = vst [vmem:[%s2363_s7 + $0x2c8] sm:$0xff] %v2087_v5  ;;  %2114 = vtanh.f32 %v1851_v4  ;;  %v889_v7 = vpop.f32.mrf.mxu0 }
 0x133   : > { %v1145_v8 = vpop.f32.mrf.mxu1  ;;  %v2091_v9 = vpop.eup %2090  ;;  %1427 = vst [vmem:[%s2363_s7 + $0xf0] sm:$0xff] %v2089_v6  ;;  %2116 = vtanh.f32 %v889_v7 }
 0x134   : > { %v2093_v10 = vpop.eup %2092  ;;  %1491 = vst [vmem:[%s2363_s7 + $0x2f0] sm:$0xff] %v2091_v9  ;;  %2118 = vtanh.f32 %v1145_v8  ;;  %v1790_v11 = vpop.f32.mrf.mxu0 }
 0x135   : > { %v1854_v12 = vpop.f32.mrf.mxu1  ;;  %v2095_v13 = vpop.eup %2094  ;;  %1425 = vst [vmem:[%s2363_s7 + $0xe0] sm:$0xff] %v2093_v10  ;;  %2120 = vtanh.f32 %v1790_v11 }
 0x136   : > { %v2097_v14 = vpop.eup %2096  ;;  %1489 = vst [vmem:[%s2363_s7 + $0x2e0] sm:$0xff] %v2095_v13  ;;  %2122 = vtanh.f32 %v1854_v12  ;;  %v902_v15 = vpop.f32.mrf.mxu0 }
 0x137   : > { %v1158_v16 = vpop.f32.mrf.mxu1  ;;  %v2099_v17 = vpop.eup %2098  ;;  %1428 = vst [vmem:[%s2363_s7 + $0xf8] sm:$0xff] %v2097_v14  ;;  %2124 = vtanh.f32 %v902_v15 }
 0x138   : > { %v2101_v18 = vpop.eup %2100  ;;  %1492 = vst [vmem:[%s2363_s7 + $0x2f8] sm:$0xff] %v2099_v17  ;;  %2126 = vtanh.f32 %v1158_v16  ;;  %v1791_v19 = vpop.f32.mrf.mxu0 }
 0x139   : > { %v1855_v20 = vpop.f32.mrf.mxu1  ;;  %v2103_v21 = vpop.eup %2102  ;;  %1426 = vst [vmem:[%s2363_s7 + $0xe8] sm:$0xff] %v2101_v18  ;;  %2128 = vtanh.f32 %v1791_v19 }
 0x13a   : > { %v2105_v22 = vpop.eup %2104  ;;  %1490 = vst [vmem:[%s2363_s7 + $0x2e8] sm:$0xff] %v2103_v21  ;;  %2130 = vtanh.f32 %v1855_v20  ;;  %v905_v23 = vpop.f32.mrf.mxu0 }
 0x13b   : > { %v1161_v24 = vpop.f32.mrf.mxu1  ;;  %v2107_v25 = vpop.eup %2106  ;;  %1431 = vst [vmem:[%s2363_s7 + $0x110] sm:$0xff] %v2105_v22  ;;  %2132 = vtanh.f32 %v905_v23 }
 0x13c   : > { %v2109_v26 = vpop.eup %2108  ;;  %1495 = vst [vmem:[%s2363_s7 + $0x310] sm:$0xff] %v2107_v25  ;;  %2134 = vtanh.f32 %v1161_v24  ;;  %v1794_v27 = vpop.f32.mrf.mxu0 }
 0x13d   : > { %v1858_v28 = vpop.f32.mrf.mxu1  ;;  %v2111_v29 = vpop.eup %2110  ;;  %1429 = vst [vmem:[%s2363_s7 + $0x100] sm:$0xff] %v2109_v26  ;;  %2136 = vtanh.f32 %v1794_v27 }
 0x13e   : > { %v2113_v30 = vpop.eup %2112  ;;  %1493 = vst [vmem:[%s2363_s7 + $0x300] sm:$0xff] %v2111_v29  ;;  %2138 = vtanh.f32 %v1858_v28  ;;  %v918_v31 = vpop.f32.mrf.mxu0 }
 0x13f   : > { %v1174_v32 = vpop.f32.mrf.mxu1  ;;  %v2115_v33 = vpop.eup %2114  ;;  %1432 = vst [vmem:[%s2363_s7 + $0x118] sm:$0xff] %v2113_v30  ;;  %2140 = vtanh.f32 %v918_v31 }
 0x140   : > { %v2117_v34 = vpop.eup %2116  ;;  %1496 = vst [vmem:[%s2363_s7 + $0x318] sm:$0xff] %v2115_v33  ;;  %2142 = vtanh.f32 %v1174_v32  ;;  %v1795_v35 = vpop.f32.mrf.mxu0 }
 0x141   : > { %v1859_v36 = vpop.f32.mrf.mxu1  ;;  %v2119_v37 = vpop.eup %2118  ;;  %1430 = vst [vmem:[%s2363_s7 + $0x108] sm:$0xff] %v2117_v34  ;;  %2144 = vtanh.f32 %v1795_v35 }
 0x142   : > { %v2121_v38 = vpop.eup %2120  ;;  %1494 = vst [vmem:[%s2363_s7 + $0x308] sm:$0xff] %v2119_v37  ;;  %2146 = vtanh.f32 %v1859_v36  ;;  %v921_v39 = vpop.f32.mrf.mxu0 }
 0x143   : > { %v1177_v40 = vpop.f32.mrf.mxu1  ;;  %v2123_v41 = vpop.eup %2122  ;;  %1435 = vst [vmem:[%s2363_s7 + $0x130] sm:$0xff] %v2121_v38  ;;  %2148 = vtanh.f32 %v921_v39 }
 0x144   : > { %v2125_v42 = vpop.eup %2124  ;;  %1499 = vst [vmem:[%s2363_s7 + $0x330] sm:$0xff] %v2123_v41  ;;  %2150 = vtanh.f32 %v1177_v40  ;;  %v1798_v43 = vpop.f32.mrf.mxu0 }
 0x145   : > { %v1862_v44 = vpop.f32.mrf.mxu1  ;;  %v2127_v45 = vpop.eup %2126  ;;  %1433 = vst [vmem:[%s2363_s7 + $0x120] sm:$0xff] %v2125_v42  ;;  %2152 = vtanh.f32 %v1798_v43 }
 0x146   : > { %v2129_v46 = vpop.eup %2128  ;;  %1497 = vst [vmem:[%s2363_s7 + $0x320] sm:$0xff] %v2127_v45  ;;  %2154 = vtanh.f32 %v1862_v44  ;;  %v934_v47 = vpop.f32.mrf.mxu0 }
 0x147   : > { %v1190_v48 = vpop.f32.mrf.mxu1  ;;  %v2131_v49 = vpop.eup %2130  ;;  %1436 = vst [vmem:[%s2363_s7 + $0x138] sm:$0xff] %v2129_v46  ;;  %2156 = vtanh.f32 %v934_v47 }
 0x148   : > { %v2133_v50 = vpop.eup %2132  ;;  %1500 = vst [vmem:[%s2363_s7 + $0x338] sm:$0xff] %v2131_v49  ;;  %2158 = vtanh.f32 %v1190_v48  ;;  %v1799_v51 = vpop.f32.mrf.mxu0 }
 0x149   : > { %v1863_v52 = vpop.f32.mrf.mxu1  ;;  %v2135_v53 = vpop.eup %2134  ;;  %1434 = vst [vmem:[%s2363_s7 + $0x128] sm:$0xff] %v2133_v50  ;;  %2160 = vtanh.f32 %v1799_v51 }
 0x14a   : > { %v2137_v54 = vpop.eup %2136  ;;  %1498 = vst [vmem:[%s2363_s7 + $0x328] sm:$0xff] %v2135_v53  ;;  %2162 = vtanh.f32 %v1863_v52  ;;  %v937_v55 = vpop.f32.mrf.mxu0 }
 0x14b   : > { %v1193_v56 = vpop.f32.mrf.mxu1  ;;  %v2139_v57 = vpop.eup %2138  ;;  %1439 = vst [vmem:[%s2363_s7 + $0x150] sm:$0xff] %v2137_v54  ;;  %2164 = vtanh.f32 %v937_v55 }
 0x14c   : > { %v2141_v58 = vpop.eup %2140  ;;  %1503 = vst [vmem:[%s2363_s7 + $0x350] sm:$0xff] %v2139_v57  ;;  %2166 = vtanh.f32 %v1193_v56  ;;  %v1802_v59 = vpop.f32.mrf.mxu0 }
 0x14d   : > { %v1866_v60 = vpop.f32.mrf.mxu1  ;;  %v2143_v61 = vpop.eup %2142  ;;  %1437 = vst [vmem:[%s2363_s7 + $0x140] sm:$0xff] %v2141_v58  ;;  %2168 = vtanh.f32 %v1802_v59 }
 0x14e   : > { %v2145_v62 = vpop.eup %2144  ;;  %1501 = vst [vmem:[%s2363_s7 + $0x340] sm:$0xff] %v2143_v61  ;;  %2170 = vtanh.f32 %v1866_v60  ;;  %v950_v63 = vpop.f32.mrf.mxu0 }
 0x14f   : > { %v1206_v0 = vpop.f32.mrf.mxu1  ;;  %v2147_v1 = vpop.eup %2146  ;;  %1440 = vst [vmem:[%s2363_s7 + $0x158] sm:$0xff] %v2145_v62  ;;  %2172 = vtanh.f32 %v950_v63 }
 0x150   : > { %v2149_v2 = vpop.eup %2148  ;;  %1504 = vst [vmem:[%s2363_s7 + $0x358] sm:$0xff] %v2147_v1  ;;  %2174 = vtanh.f32 %v1206_v0  ;;  %v1803_v3 = vpop.f32.mrf.mxu0 }
 0x151   : > { %v1867_v4 = vpop.f32.mrf.mxu1  ;;  %v2151_v5 = vpop.eup %2150  ;;  %1438 = vst [vmem:[%s2363_s7 + $0x148] sm:$0xff] %v2149_v2  ;;  %2176 = vtanh.f32 %v1803_v3 }
 0x152   : > { %v2153_v6 = vpop.eup %2152  ;;  %1502 = vst [vmem:[%s2363_s7 + $0x348] sm:$0xff] %v2151_v5  ;;  %2178 = vtanh.f32 %v1867_v4  ;;  %v953_v7 = vpop.f32.mrf.mxu0 }
 0x153   : > { %v1209_v8 = vpop.f32.mrf.mxu1  ;;  %v2155_v9 = vpop.eup %2154  ;;  %1443 = vst [vmem:[%s2363_s7 + $0x170] sm:$0xff] %v2153_v6  ;;  %2180 = vtanh.f32 %v953_v7 }
 0x154   : > { %v2157_v10 = vpop.eup %2156  ;;  %1507 = vst [vmem:[%s2363_s7 + $0x370] sm:$0xff] %v2155_v9  ;;  %2182 = vtanh.f32 %v1209_v8  ;;  %v1806_v11 = vpop.f32.mrf.mxu0 }
 0x155   : > { %v1870_v12 = vpop.f32.mrf.mxu1  ;;  %v2159_v13 = vpop.eup %2158  ;;  %1441 = vst [vmem:[%s2363_s7 + $0x160] sm:$0xff] %v2157_v10  ;;  %2184 = vtanh.f32 %v1806_v11 }
 0x156   : > { %v2161_v14 = vpop.eup %2160  ;;  %1505 = vst [vmem:[%s2363_s7 + $0x360] sm:$0xff] %v2159_v13  ;;  %2186 = vtanh.f32 %v1870_v12  ;;  %v966_v15 = vpop.f32.mrf.mxu0 }
 0x157   : > { %v1222_v16 = vpop.f32.mrf.mxu1  ;;  %v2163_v17 = vpop.eup %2162  ;;  %1444 = vst [vmem:[%s2363_s7 + $0x178] sm:$0xff] %v2161_v14  ;;  %2188 = vtanh.f32 %v966_v15 }
 0x158   : > { %v2165_v18 = vpop.eup %2164  ;;  %1508 = vst [vmem:[%s2363_s7 + $0x378] sm:$0xff] %v2163_v17  ;;  %2190 = vtanh.f32 %v1222_v16  ;;  %v1807_v19 = vpop.f32.mrf.mxu0 }
 0x159   : > { %v1871_v20 = vpop.f32.mrf.mxu1  ;;  %v2167_v21 = vpop.eup %2166  ;;  %1442 = vst [vmem:[%s2363_s7 + $0x168] sm:$0xff] %v2165_v18  ;;  %2192 = vtanh.f32 %v1807_v19 }
 0x15a   : > { %v2169_v22 = vpop.eup %2168  ;;  %1506 = vst [vmem:[%s2363_s7 + $0x368] sm:$0xff] %v2167_v21  ;;  %2194 = vtanh.f32 %v1871_v20  ;;  %v969_v23 = vpop.f32.mrf.mxu0 }
 0x15b   : > { %v1225_v24 = vpop.f32.mrf.mxu1  ;;  %v2171_v25 = vpop.eup %2170  ;;  %1447 = vst [vmem:[%s2363_s7 + $0x190] sm:$0xff] %v2169_v22  ;;  %2196 = vtanh.f32 %v969_v23 }
 0x15c   : > { %v2173_v26 = vpop.eup %2172  ;;  %1511 = vst [vmem:[%s2363_s7 + $0x390] sm:$0xff] %v2171_v25  ;;  %2198 = vtanh.f32 %v1225_v24  ;;  %v1810_v27 = vpop.f32.mrf.mxu0 }
 0x15d   : > { %v1874_v28 = vpop.f32.mrf.mxu1  ;;  %v2175_v29 = vpop.eup %2174  ;;  %1445 = vst [vmem:[%s2363_s7 + $0x180] sm:$0xff] %v2173_v26  ;;  %2200 = vtanh.f32 %v1810_v27 }
 0x15e   : > { %v2177_v30 = vpop.eup %2176  ;;  %1509 = vst [vmem:[%s2363_s7 + $0x380] sm:$0xff] %v2175_v29  ;;  %2202 = vtanh.f32 %v1874_v28  ;;  %v982_v31 = vpop.f32.mrf.mxu0 }
 0x15f   : > { %v1238_v32 = vpop.f32.mrf.mxu1  ;;  %v2179_v33 = vpop.eup %2178  ;;  %1448 = vst [vmem:[%s2363_s7 + $0x198] sm:$0xff] %v2177_v30  ;;  %2204 = vtanh.f32 %v982_v31 }
 0x160   : > { %v2181_v34 = vpop.eup %2180  ;;  %1512 = vst [vmem:[%s2363_s7 + $0x398] sm:$0xff] %v2179_v33  ;;  %2206 = vtanh.f32 %v1238_v32  ;;  %v1811_v35 = vpop.f32.mrf.mxu0 }
 0x161   : > { %v1875_v36 = vpop.f32.mrf.mxu1  ;;  %v2183_v37 = vpop.eup %2182  ;;  %1446 = vst [vmem:[%s2363_s7 + $0x188] sm:$0xff] %v2181_v34  ;;  %2208 = vtanh.f32 %v1811_v35 }
 0x162   : > { %v2185_v38 = vpop.eup %2184  ;;  %1510 = vst [vmem:[%s2363_s7 + $0x388] sm:$0xff] %v2183_v37  ;;  %2210 = vtanh.f32 %v1875_v36  ;;  %v985_v39 = vpop.f32.mrf.mxu0 }
 0x163   : > { %v1241_v40 = vpop.f32.mrf.mxu1  ;;  %v2187_v41 = vpop.eup %2186  ;;  %1451 = vst [vmem:[%s2363_s7 + $0x1b0] sm:$0xff] %v2185_v38  ;;  %2212 = vtanh.f32 %v985_v39 }
 0x164   : > { %v2189_v42 = vpop.eup %2188  ;;  %1515 = vst [vmem:[%s2363_s7 + $0x3b0] sm:$0xff] %v2187_v41  ;;  %2214 = vtanh.f32 %v1241_v40  ;;  %v1814_v43 = vpop.f32.mrf.mxu0 }
 0x165   : > { %v1878_v44 = vpop.f32.mrf.mxu1  ;;  %v2191_v45 = vpop.eup %2190  ;;  %1449 = vst [vmem:[%s2363_s7 + $0x1a0] sm:$0xff] %v2189_v42  ;;  %2216 = vtanh.f32 %v1814_v43 }
 0x166   : > { %v2193_v46 = vpop.eup %2192  ;;  %1513 = vst [vmem:[%s2363_s7 + $0x3a0] sm:$0xff] %v2191_v45  ;;  %2218 = vtanh.f32 %v1878_v44  ;;  %v998_v47 = vpop.f32.mrf.mxu0 }
 0x167   : > { %v1254_v48 = vpop.f32.mrf.mxu1  ;;  %v2195_v49 = vpop.eup %2194  ;;  %1452 = vst [vmem:[%s2363_s7 + $0x1b8] sm:$0xff] %v2193_v46  ;;  %2220 = vtanh.f32 %v998_v47 }
 0x168   : > { %v2197_v50 = vpop.eup %2196  ;;  %1516 = vst [vmem:[%s2363_s7 + $0x3b8] sm:$0xff] %v2195_v49  ;;  %2222 = vtanh.f32 %v1254_v48  ;;  %v1815_v51 = vpop.f32.mrf.mxu0 }
 0x169   : > { %v1879_v52 = vpop.f32.mrf.mxu1  ;;  %v2199_v53 = vpop.eup %2198  ;;  %1450 = vst [vmem:[%s2363_s7 + $0x1a8] sm:$0xff] %v2197_v50  ;;  %2224 = vtanh.f32 %v1815_v51 }
 0x16a   : > { %v2201_v54 = vpop.eup %2200  ;;  %1514 = vst [vmem:[%s2363_s7 + $0x3a8] sm:$0xff] %v2199_v53  ;;  %2226 = vtanh.f32 %v1879_v52  ;;  %v1001_v55 = vpop.f32.mrf.mxu0 }
 0x16b   : > { %v1257_v56 = vpop.f32.mrf.mxu1  ;;  %v2203_v57 = vpop.eup %2202  ;;  %1455 = vst [vmem:[%s2363_s7 + $0x1d0] sm:$0xff] %v2201_v54  ;;  %2228 = vtanh.f32 %v1001_v55 }
 0x16c   : > { %v2205_v58 = vpop.eup %2204  ;;  %1519 = vst [vmem:[%s2363_s7 + $0x3d0] sm:$0xff] %v2203_v57  ;;  %2230 = vtanh.f32 %v1257_v56 }
 0x16d   : > { %v2207_v59 = vpop.eup %2206  ;;  %1453 = vst [vmem:[%s2363_s7 + $0x1c0] sm:$0xff] %v2205_v58 }
 0x16e   : > { %v2209_v60 = vpop.eup %2208  ;;  %1517 = vst [vmem:[%s2363_s7 + $0x3c0] sm:$0xff] %v2207_v59 }
 0x16f   : > { %v2211_v61 = vpop.eup %2210  ;;  %1456 = vst [vmem:[%s2363_s7 + $0x1d8] sm:$0xff] %v2209_v60 }
 0x170   : > { %v2213_v62 = vpop.eup %2212  ;;  %1520 = vst [vmem:[%s2363_s7 + $0x3d8] sm:$0xff] %v2211_v61 }
 0x171   : > { %v2215_v63 = vpop.eup %2214  ;;  %1454 = vst [vmem:[%s2363_s7 + $0x1c8] sm:$0xff] %v2213_v62 }
 0x172   : > { %v2217_v0 = vpop.eup %2216  ;;  %1518 = vst [vmem:[%s2363_s7 + $0x3c8] sm:$0xff] %v2215_v63 }
 0x173   : > { %v2219_v1 = vpop.eup %2218  ;;  %1459 = vst [vmem:[%s2363_s7 + $0x1f0] sm:$0xff] %v2217_v0 }
 0x174   : > { %v2221_v2 = vpop.eup %2220  ;;  %1523 = vst [vmem:[%s2363_s7 + $0x3f0] sm:$0xff] %v2219_v1 }
 0x175   : > { %v2223_v3 = vpop.eup %2222  ;;  %1457 = vst [vmem:[%s2363_s7 + $0x1e0] sm:$0xff] %v2221_v2 }
 0x176   : > { %v2225_v4 = vpop.eup %2224  ;;  %1521 = vst [vmem:[%s2363_s7 + $0x3e0] sm:$0xff] %v2223_v3 }
 0x177   : > { %v2227_v5 = vpop.eup %2226  ;;  %1460 = vst [vmem:[%s2363_s7 + $0x1f8] sm:$0xff] %v2225_v4 }
 0x178   : > { %v2229_v6 = vpop.eup %2228  ;;  %1524 = vst [vmem:[%s2363_s7 + $0x3f8] sm:$0xff] %v2227_v5 }
 0x179   : > { %v2231_v7 = vpop.eup %2230  ;;  %1458 = vst [vmem:[%s2363_s7 + $0x1e8] sm:$0xff] %v2229_v6 }
 0x17a   : > { %1522 = vst [vmem:[%s2363_s7 + $0x3e8] sm:$0xff] %v2231_v7 }
 0x17b PF: > { %s12_s9 = sadd.s32 1, %s2238_s9  }
 0x17c   : > { %p9_p4 = scmp.ge.s32.totalorder %s12_s9, 10  }
 0x17e   :  { %11 = sbr.rel (!%p9_p4) target bundleno = 1 (0x1), region = 58 }

</bundles_post_ra>
